<compile_context>
chip_gen: v5e
topology: v5e:2x2
jax: 0.10.0
libtpu: 0.0.40
codegen_flags: <defaults>
</compile_context>

<pallas_src>
import functools

import jax
import jax.numpy as jnp
from jax import lax
from jax.experimental import pallas as pl
from jax.experimental.pallas import tpu as pltpu


# ---------------------------------------------------------------------------
# Fused Pallas kernel (NB samples per grid step)
# ---------------------------------------------------------------------------
def _fused_kernel(x_ref, t1_ref, v1_ref, t2_ref, v2_ref, fg_ref, eg_ref, o_ref,
                  xr_ref, yp_ref,
                  *, NB, H, W, Cin, C, G, eps, kh1, kh2, pad1, pad2):
    WC = W * C
    WCin = W * Cin
    inv_cnt = 1.0 / float(H * W * (C // G))

    fg = fg_ref[...]          # (W*C, G)  f32 group-fold matrix (0/1)
    eg = eg_ref[...]          # (G, W*C)  f32 group-expand matrix (0/1)
    v1 = v1_ref[...]          # (3, W*C)  [bias; gamma; beta], pre-tiled over W
    v2 = v2_ref[...]

    def group_norm_relu(a, vec):
        # a: (NB, H, W*C) f32.  One-pass GN: fold [sum; sum-of-squares] per group with a
        # single matmul, derive mean / inv_std in f32, expand back with a single matmul.
        s1 = jnp.sum(a, axis=1)                                        # (NB, W*C)
        s2 = jnp.sum(a * a, axis=1)                                    # (NB, W*C)
        g = jnp.dot(jnp.concatenate([s1, s2], axis=0), fg,
                    preferred_element_type=jnp.float32)                # (2*NB, G)
        mean_g = g[:NB] * inv_cnt                                      # (NB, G)
        var_g = jnp.maximum(g[NB:] * inv_cnt - mean_g * mean_g, 0.0)   # (NB, G), f32
        inv_g = lax.rsqrt(var_g + eps)
        cols = jnp.dot(jnp.concatenate([mean_g, inv_g], axis=0), eg,
                       preferred_element_type=jnp.float32)             # (2*NB, W*C)
        mean_c = cols[:NB][:, None, :]                                 # (NB, 1, W*C)
        inv_c = cols[NB:][:, None, :]
        return jnp.maximum((a - mean_c) * inv_c * vec[1:2, :] + vec[2:3, :], 0.0)

    # ---- stage 1: reflected rows staged once in bf16 VMEM scratch, 7x7 conv = ONE matmul
    x = x_ref[...]                                                     # (NB, H, W*Cin) bf16
    top = [x[:, pad1 - r:pad1 - r + 1, :] for r in range(pad1)]        # rows 3, 2, 1
    bot = [x[:, H - 2 - r:H - 1 - r, :] for r in range(pad1)]          # rows H-2, H-3, H-4
    xr_ref[...] = jnp.concatenate(top + [x] + bot, axis=1)             # (NB, H+2*pad1, W*Cin)

    # Tap windows are Ref-backed offset loads, concatenated along the contraction axis.
    lhs1 = jnp.concatenate([xr_ref[:, kh:kh + H, :] for kh in range(kh1)], axis=2)
    acc = jnp.dot(lhs1.reshape(NB * H, kh1 * WCin), t1_ref[...],
                  preferred_element_type=jnp.float32).reshape(NB, H, WC)
    y = group_norm_relu(acc + v1[0:1, :], v1)                          # (NB, H, W*C) f32

    # ---- stage 2: zero rows staged once in bf16 VMEM scratch, 3x3 conv = ONE matmul ----
    zrow = jnp.zeros((NB, pad2, WC), jnp.bfloat16)
    yp_ref[...] = jnp.concatenate([zrow, y.astype(jnp.bfloat16), zrow], axis=1)

    lhs2 = jnp.concatenate([yp_ref[:, kh:kh + H, :] for kh in range(kh2)], axis=2)
    acc2 = jnp.dot(lhs2.reshape(NB * H, kh2 * WC), t2_ref[...],
                   preferred_element_type=jnp.float32).reshape(NB, H, WC)
    z = group_norm_relu(acc2 + v2[0:1, :], v2)

    o_ref[...] = z.astype(o_ref.dtype)                                 # lane-dense store


# ---------------------------------------------------------------------------
# Wrapper: weight preparation + pallas_call plumbing
# ---------------------------------------------------------------------------
def _width_toeplitz(w_hwio, W, pad, reflect):
    """Fold the conv's width dimension (and its padding) into the weights.

    Returns T of shape (KH*W*Cin, W*Cout) with
      T[kh*W*Cin + p*Cin + ci, w*Cout + co] = sum_kw w[kh,kw,ci,co] * [p == map(w + kw - pad)]
    where `map` is reflection (PyTorch ReflectionPad) or identity-with-drop (zero pad).
    """
    KH, KW, Cin, Cout = w_hwio.shape
    pos = jnp.arange(W)[None, :] + jnp.arange(KW)[:, None] - pad           # (KW, W_out)
    if reflect:
        pos = jnp.where(pos < 0, -pos, pos)
        pos = jnp.where(pos > W - 1, 2 * (W - 1) - pos, pos)
    # sel[kw, p, w] = 1 if input position p feeds output w through tap kw
    sel = (pos[:, None, :] == jnp.arange(W)[None, :, None]).astype(w_hwio.dtype)
    t = jnp.einsum('kpw,hkic->hpiwc', sel, w_hwio)                          # (KH,W,Cin,W,Cout)
    return t.reshape(KH * W * Cin, W * Cout)


def _tensorcores_per_chip():
    """Best effort: 2 for chips exposing 2 TensorCores per JAX device (v4/v5p megacore, v7x)."""
    try:
        kind = jax.devices()[0].device_kind.lower()
    except Exception:
        return 1
    return 2 if any(tag in kind for tag in ("v4", "v5p", "v7", "tpu7")) else 1


def inconv_forward(x_nchw, params, num_groups):
    N, Cin, H, W = x_nchw.shape
    Cout = params["w1"].shape[-1]
    G = num_groups
    assert Cout % G == 0, "out_ch must be divisible by num_groups"
    assert H >= 4 and W >= 4, "ReflectionPad2d(3) requires spatial dims >= 4"

    kh1, kh2 = params["w1"].shape[0], params["w2"].shape[0]
    pad1, pad2 = (kh1 - 1) // 2, (kh2 - 1) // 2

    # Batch folding: 1 block (whole batch) on single-TC chips, 2 "parallel" blocks otherwise.
    tc = _tensorcores_per_chip()
    num_blocks = tc if (tc > 1 and N % tc == 0) else 1
    NB = N // num_blocks

    # NCHW -> lane-flat NHWC (N, H, W*Cin), cast to bf16 ONCE in the wrapper.
    x = jnp.transpose(x_nchw, (0, 2, 3, 1)).reshape(N, H, W * Cin).astype(jnp.bfloat16)

    # Width-folded Toeplitz weights (reflection for conv1, zero pad for conv2), bf16,
    # reshaped to a single (KH*W*Cin, W*Cout) contraction matrix per conv.
    t1 = _width_toeplitz(params["w1"], W, pad=pad1, reflect=True).astype(jnp.bfloat16)
    t2 = _width_toeplitz(params["w2"], W, pad=pad2, reflect=False).astype(jnp.bfloat16)

    # Hoisted per-column (lane-tiled) bias / gamma / beta vectors: (3, W*Cout) per stage.
    def tile_cols(v):
        return jnp.tile(v.reshape(1, Cout), (1, W))
    v1 = jnp.concatenate([tile_cols(params["b1"]), tile_cols(params["g1"]),
                          tile_cols(params["be1"])], axis=0).astype(jnp.float32)
    v2 = jnp.concatenate([tile_cols(params["b2"]), tile_cols(params["g2"]),
                          tile_cols(params["be2"])], axis=0).astype(jnp.float32)

    # Group fold / expand matrices for GN stats in the (W*C) lane layout.
    grp = (jnp.arange(W * Cout) % Cout) // (Cout // G)
    fg = (grp[:, None] == jnp.arange(G)[None, :]).astype(jnp.float32)       # (W*C, G)
    eg = fg.T                                                               # (G, W*C)

    kernel = functools.partial(
        _fused_kernel, NB=NB, H=H, W=W, Cin=Cin, C=Cout, G=G, eps=1e-5,
        kh1=kh1, kh2=kh2, pad1=pad1, pad2=pad2)

    out = pl.pallas_call(
        kernel,
        out_shape=jax.ShapeDtypeStruct((N, H, W * Cout), jnp.float32),
        grid_spec=pltpu.PrefetchScalarGridSpec(
            num_scalar_prefetch=0,
            grid=(num_blocks,),
            in_specs=[
                pl.BlockSpec((NB, H, W * Cin), lambda n: (n, 0, 0)),
                pl.BlockSpec(t1.shape, lambda n: (0, 0)),
                pl.BlockSpec(v1.shape, lambda n: (0, 0)),
                pl.BlockSpec(t2.shape, lambda n: (0, 0)),
                pl.BlockSpec(v2.shape, lambda n: (0, 0)),
                pl.BlockSpec(fg.shape, lambda n: (0, 0)),
                pl.BlockSpec(eg.shape, lambda n: (0, 0)),
            ],
            out_specs=pl.BlockSpec((NB, H, W * Cout), lambda n: (n, 0, 0)),
            scratch_shapes=[
                pltpu.VMEM((NB, H + 2 * pad1, W * Cin), jnp.bfloat16),   # reflected rows
                pltpu.VMEM((NB, H + 2 * pad2, W * Cout), jnp.bfloat16),  # zero-padded rows
            ],
        ),
        compiler_params=pltpu.CompilerParams(dimension_semantics=("parallel",)),
    )(x, t1, v1, t2, v2, fg, eg)

    out = out.reshape(N, H, W, Cout)
    return jnp.transpose(out, (0, 3, 1, 2))                                 # NHWC -> NCHW


# ---------------------------------------------------------------------------
# Pure-JAX references for validation
# ---------------------------------------------------------------------------
def _gn_ref(x_nhwc, gamma, beta, G, eps=1e-5):
    N, H, W, C = x_nhwc.shape
    xg = x_nhwc.reshape(N, H, W, G, C // G)
    mean = xg.mean(axis=(1, 2, 4), keepdims=True)
    var = ((xg - mean) ** 2).mean(axis=(1, 2, 4), keepdims=True)
    xn = (xg - mean) * lax.rsqrt(var + eps)
    return xn.reshape(N, H, W, C) * gamma.reshape(1, 1, 1, C) + beta.reshape(1, 1, 1, C)


def _conv_ref(xp, w, b, conv_dtype=None):
    if conv_dtype is not None:
        xp, w = xp.astype(conv_dtype), w.astype(conv_dtype)
    y = lax.conv_general_dilated(
        xp, w, window_strides=(1, 1), padding="VALID",
        dimension_numbers=("NHWC", "HWIO", "NHWC"),
        preferred_element_type=jnp.float32,
        precision=lax.Precision.HIGHEST)
    return y + b.reshape(1, 1, 1, -1)


def inconv_ref(x_nchw, params, num_groups, conv_dtype=None):
    x = jnp.transpose(x_nchw, (0, 2, 3, 1))
    xp = jnp.pad(x, ((0, 0), (3, 3), (3, 3), (0, 0)), mode="reflect")
    y = jnp.maximum(_gn_ref(_conv_ref(xp, params["w1"], params["b1"], conv_dtype),
                            params["g1"], params["be1"], num_groups), 0.0)
    yp = jnp.pad(y, ((0, 0), (1, 1), (1, 1), (0, 0)))
    z = jnp.maximum(_gn_ref(_conv_ref(yp, params["w2"], params["b2"], conv_dtype),
                            params["g2"], params["be2"], num_groups), 0.0)
    return jnp.transpose(z, (0, 3, 1, 2))


# ---------------------------------------------------------------------------
def init_params(key, in_ch, out_ch):
    k1, k2, k3, k4 = jax.random.split(key, 4)
    fan1 = in_ch * 7 * 7
    fan2 = out_ch * 3 * 3
    w1 = jax.random.normal(k1, (7, 7, in_ch, out_ch), jnp.float32) / jnp.sqrt(fan1)
    b1 = jax.random.normal(k2, (out_ch,), jnp.float32) / jnp.sqrt(fan1)
    w2 = jax.random.normal(k3, (3, 3, out_ch, out_ch), jnp.float32) / jnp.sqrt(fan2)
    b2 = jax.random.normal(k4, (out_ch,), jnp.float32) / jnp.sqrt(fan2)
    g1 = jnp.ones((out_ch,), jnp.float32)
    be1 = jnp.zeros((out_ch,), jnp.float32)
    g2 = jnp.ones((out_ch,), jnp.float32)
    be2 = jnp.zeros((out_ch,), jnp.float32)
    return dict(w1=w1, b1=b1, g1=g1, be1=be1, w2=w2, b2=b2, g2=g2, be2=be2)


if __name__ == "__main__":
    N, in_ch, H, W = 2, 4, 16, 16
    out_ch, num_groups = 32, 32        # out_ch must be divisible by num_groups

    key = jax.random.PRNGKey(0)
    kx, kp = jax.random.split(key)
    x = jax.random.normal(kx, (N, in_ch, H, W), jnp.float32)   # NCHW, like PyTorch
    params = init_params(kp, in_ch, out_ch)

    fwd = jax.jit(lambda a: inconv_forward(a, params, num_groups))
    out = jax.block_until_ready(fwd(x))
    assert out.shape == (N, out_ch, H, W)

    # Matched-precision reference (bf16 conv operands, f32 accumulation) -> tight check.
    ref_bf16 = inconv_ref(x, params, num_groups, conv_dtype=jnp.bfloat16)
    assert jnp.allclose(out, ref_bf16, rtol=2e-2, atol=2e-2), \
        "Pallas output mismatch vs matched-precision (bf16-matmul) reference"

    # Full f32 reference -> looser check accounting for bf16 matmul rounding in the kernel.
    ref_f32 = inconv_ref(x, params, num_groups)
    assert jnp.allclose(out, ref_f32, rtol=6e-2, atol=6e-2), \
        "Pallas output mismatch vs f32 reference"

    print("KERNEL_OK")
</pallas_src>

<mosaic_0001>
module attributes {stable_mosaic.version = 11 : i64} {
  func.func @_fused_kernel(%arg0: i32, %arg1: memref<2x16x64xbf16, #tpu.memory_space<vmem>>, %arg2: memref<448x512xbf16, #tpu.memory_space<vmem>>, %arg3: memref<3x512xf32, #tpu.memory_space<vmem>>, %arg4: memref<1536x512xbf16, #tpu.memory_space<vmem>>, %arg5: memref<3x512xf32, #tpu.memory_space<vmem>>, %arg6: memref<512x32xf32, #tpu.memory_space<vmem>>, %arg7: memref<32x512xf32, #tpu.memory_space<vmem>>, %arg8: memref<2x16x512xf32, #tpu.memory_space<vmem>>, %arg9: memref<2x22x64xbf16, #tpu.memory_space<vmem>>, %arg10: memref<2x18x512xbf16, #tpu.memory_space<vmem>>) attributes {dimension_semantics = [#tpu.dimension_semantics<parallel>], iteration_bounds = array<i64: 1>, scalar_prefetch = 0 : i64, scratch_operands = 2 : i64, tpu.core_type = #tpu.core_type<tc>, window_params = [{transform_indices = @transform_0, window_bounds = array<i64: 2, 16, 64>}, {pipeline_mode = #tpu.pipeline_mode<synchronous>, transform_indices = @transform_1, window_bounds = array<i64: 448, 512>}, {pipeline_mode = #tpu.pipeline_mode<synchronous>, transform_indices = @transform_2, window_bounds = array<i64: 3, 512>}, {pipeline_mode = #tpu.pipeline_mode<synchronous>, transform_indices = @transform_3, window_bounds = array<i64: 1536, 512>}, {pipeline_mode = #tpu.pipeline_mode<synchronous>, transform_indices = @transform_4, window_bounds = array<i64: 3, 512>}, {pipeline_mode = #tpu.pipeline_mode<synchronous>, transform_indices = @transform_5, window_bounds = array<i64: 512, 32>}, {pipeline_mode = #tpu.pipeline_mode<synchronous>, transform_indices = @transform_6, window_bounds = array<i64: 32, 512>}, {transform_indices = @transform_7, window_bounds = array<i64: 2, 16, 512>}]} {
    %c0 = arith.constant 0 : index
    %c0_0 = arith.constant 0 : index
    %0 = vector.load %arg6[%c0, %c0_0] : memref<512x32xf32, #tpu.memory_space<vmem>>, vector<512x32xf32>
    %c0_1 = arith.constant 0 : index
    %c0_2 = arith.constant 0 : index
    %1 = vector.load %arg7[%c0_1, %c0_2] : memref<32x512xf32, #tpu.memory_space<vmem>>, vector<32x512xf32>
    %c0_3 = arith.constant 0 : index
    %c0_4 = arith.constant 0 : index
    %2 = vector.load %arg3[%c0_3, %c0_4] : memref<3x512xf32, #tpu.memory_space<vmem>>, vector<3x512xf32>
    %c0_5 = arith.constant 0 : index
    %c0_6 = arith.constant 0 : index
    %3 = vector.load %arg5[%c0_5, %c0_6] : memref<3x512xf32, #tpu.memory_space<vmem>>, vector<3x512xf32>
    %c0_7 = arith.constant 0 : index
    %c0_8 = arith.constant 0 : index
    %c0_9 = arith.constant 0 : index
    %4 = vector.load %arg1[%c0_7, %c0_8, %c0_9] : memref<2x16x64xbf16, #tpu.memory_space<vmem>>, vector<2x16x64xbf16>
    %5 = vector.extract_strided_slice %4 {offsets = [0, 3, 0], sizes = [2, 1, 64], strides = [1, 1, 1]} : vector<2x16x64xbf16> to vector<2x1x64xbf16>
    %6 = vector.extract_strided_slice %4 {offsets = [0, 2, 0], sizes = [2, 1, 64], strides = [1, 1, 1]} : vector<2x16x64xbf16> to vector<2x1x64xbf16>
    %7 = vector.extract_strided_slice %4 {offsets = [0, 1, 0], sizes = [2, 1, 64], strides = [1, 1, 1]} : vector<2x16x64xbf16> to vector<2x1x64xbf16>
    %8 = vector.extract_strided_slice %4 {offsets = [0, 14, 0], sizes = [2, 1, 64], strides = [1, 1, 1]} : vector<2x16x64xbf16> to vector<2x1x64xbf16>
    %9 = vector.extract_strided_slice %4 {offsets = [0, 13, 0], sizes = [2, 1, 64], strides = [1, 1, 1]} : vector<2x16x64xbf16> to vector<2x1x64xbf16>
    %10 = vector.extract_strided_slice %4 {offsets = [0, 12, 0], sizes = [2, 1, 64], strides = [1, 1, 1]} : vector<2x16x64xbf16> to vector<2x1x64xbf16>
    %11 = tpu.concatenate %5, %6, %7, %4, %8, %9, %10 in 1 : vector<2x1x64xbf16>, vector<2x1x64xbf16>, vector<2x1x64xbf16>, vector<2x16x64xbf16>, vector<2x1x64xbf16>, vector<2x1x64xbf16>, vector<2x1x64xbf16> -> vector<2x22x64xbf16>
    %c0_10 = arith.constant 0 : index
    %c0_11 = arith.constant 0 : index
    %c0_12 = arith.constant 0 : index
    %12 = vector.load %arg9[%c0_10, %c0_11, %c0_12] : memref<2x22x64xbf16, #tpu.memory_space<vmem>>, vector<2x22x64xbf16>
    tpu.vector_store %arg9[%c0_10, %c0_11, %c0_12], %11 {strides = array<i32>} : memref<2x22x64xbf16, #tpu.memory_space<vmem>>, vector<2x22x64xbf16>,
    %c0_13 = arith.constant 0 : index
    %c0_14 = arith.constant 0 : index
    %c0_15 = arith.constant 0 : index
    %13 = vector.load %arg9[%c0_13, %c0_14, %c0_15] : memref<2x22x64xbf16, #tpu.memory_space<vmem>>, vector<2x16x64xbf16>
    %c0_16 = arith.constant 0 : index
    %c1 = arith.constant 1 : index
    %c0_17 = arith.constant 0 : index
    %14 = vector.load %arg9[%c0_16, %c1, %c0_17] : memref<2x22x64xbf16, #tpu.memory_space<vmem>>, vector<2x16x64xbf16>
    %c0_18 = arith.constant 0 : index
    %c2 = arith.constant 2 : index
    %c0_19 = arith.constant 0 : index
    %15 = vector.load %arg9[%c0_18, %c2, %c0_19] : memref<2x22x64xbf16, #tpu.memory_space<vmem>>, vector<2x16x64xbf16>
    %c0_20 = arith.constant 0 : index
    %c3 = arith.constant 3 : index
    %c0_21 = arith.constant 0 : index
    %16 = vector.load %arg9[%c0_20, %c3, %c0_21] : memref<2x22x64xbf16, #tpu.memory_space<vmem>>, vector<2x16x64xbf16>
    %c0_22 = arith.constant 0 : index
    %c4 = arith.constant 4 : index
    %c0_23 = arith.constant 0 : index
    %17 = vector.load %arg9[%c0_22, %c4, %c0_23] : memref<2x22x64xbf16, #tpu.memory_space<vmem>>, vector<2x16x64xbf16>
    %c0_24 = arith.constant 0 : index
    %c5 = arith.constant 5 : index
    %c0_25 = arith.constant 0 : index
    %18 = vector.load %arg9[%c0_24, %c5, %c0_25] : memref<2x22x64xbf16, #tpu.memory_space<vmem>>, vector<2x16x64xbf16>
    %c0_26 = arith.constant 0 : index
    %c6 = arith.constant 6 : index
    %c0_27 = arith.constant 0 : index
    %19 = vector.load %arg9[%c0_26, %c6, %c0_27] : memref<2x22x64xbf16, #tpu.memory_space<vmem>>, vector<2x16x64xbf16>
    %20 = tpu.concatenate %13, %14, %15, %16, %17, %18, %19 in 2 : vector<2x16x64xbf16>, vector<2x16x64xbf16>, vector<2x16x64xbf16>, vector<2x16x64xbf16>, vector<2x16x64xbf16>, vector<2x16x64xbf16>, vector<2x16x64xbf16> -> vector<2x16x448xbf16>
    %21 = vector.shape_cast %20 : vector<2x16x448xbf16> to vector<32x448xbf16>
    %c0_28 = arith.constant 0 : index
    %c0_29 = arith.constant 0 : index
    %22 = vector.load %arg2[%c0_28, %c0_29] : memref<448x512xbf16, #tpu.memory_space<vmem>>, vector<448x512xbf16>
    %cst = arith.constant dense<0.000000e+00> : vector<32x512xf32>
    %23 = tpu.matmul %21, %22, %cst {dimension_numbers = #tpu.dot_dimension_numbers<[1], [0], [0], [1], [0, 0, 1, 1], [], []>} : vector<32x448xbf16>, vector<448x512xbf16>, vector<32x512xf32> -> vector<32x512xf32>
    %24 = vector.shape_cast %23 : vector<32x512xf32> to vector<2x16x512xf32>
    %25 = vector.extract_strided_slice %2 {offsets = [0, 0], sizes = [1, 512], strides = [1, 1]} : vector<3x512xf32> to vector<1x512xf32>
    %26 = vector.shape_cast %25 : vector<1x512xf32> to vector<1x1x512xf32>
    %27 = vector.broadcast %26 : vector<1x1x512xf32> to vector<2x16x512xf32>
    %28 = arith.addf %24, %27 : vector<2x16x512xf32>
    %cst_30 = arith.constant dense<0.000000e+00> : vector<2x512xf32>
    %29 = vector.multi_reduction <add>, %28, %cst_30 [1] : vector<2x16x512xf32> to vector<2x512xf32>
    %30 = arith.mulf %28, %28 : vector<2x16x512xf32>
    %cst_31 = arith.constant dense<0.000000e+00> : vector<2x512xf32>
    %31 = vector.multi_reduction <add>, %30, %cst_31 [1] : vector<2x16x512xf32> to vector<2x512xf32>
    %32 = tpu.concatenate %29, %31 in 0 : vector<2x512xf32>, vector<2x512xf32> -> vector<4x512xf32>
    %cst_32 = arith.constant dense<0.000000e+00> : vector<4x32xf32>
    %33 = tpu.matmul %32, %0, %cst_32 {dimension_numbers = #tpu.dot_dimension_numbers<[1], [0], [0], [1], [0, 0, 1, 1], [], []>} : vector<4x512xf32>, vector<512x32xf32>, vector<4x32xf32> -> vector<4x32xf32>
    %34 = vector.extract_strided_slice %33 {offsets = [0, 0], sizes = [2, 32], strides = [1, 1]} : vector<4x32xf32> to vector<2x32xf32>
    %cst_33 = arith.constant 3.906250e-03 : f32
    %35 = vector.broadcast %cst_33 : f32 to vector<2x32xf32>
    %36 = arith.mulf %34, %35 : vector<2x32xf32>
    %37 = vector.extract_strided_slice %33 {offsets = [2, 0], sizes = [2, 32], strides = [1, 1]} : vector<4x32xf32> to vector<2x32xf32>
    %cst_34 = arith.constant 3.906250e-03 : f32
    %38 = vector.broadcast %cst_34 : f32 to vector<2x32xf32>
    %39 = arith.mulf %37, %38 : vector<2x32xf32>
    %40 = arith.mulf %36, %36 : vector<2x32xf32>
    %41 = arith.subf %39, %40 : vector<2x32xf32>
    %cst_35 = arith.constant 0.000000e+00 : f32
    %42 = vector.broadcast %cst_35 : f32 to vector<2x32xf32>
    %43 = arith.maximumf %41, %42 : vector<2x32xf32>
    %cst_36 = arith.constant 9.99999974E-6 : f32
    %44 = vector.broadcast %cst_36 : f32 to vector<2x32xf32>
    %45 = arith.addf %43, %44 : vector<2x32xf32>
    %46 = math.rsqrt %45 : vector<2x32xf32>
    %47 = tpu.concatenate %36, %46 in 0 : vector<2x32xf32>, vector<2x32xf32> -> vector<4x32xf32>
    %cst_37 = arith.constant dense<0.000000e+00> : vector<4x512xf32>
    %48 = tpu.matmul %47, %1, %cst_37 {dimension_numbers = #tpu.dot_dimension_numbers<[1], [0], [0], [1], [0, 0, 1, 1], [], []>} : vector<4x32xf32>, vector<32x512xf32>, vector<4x512xf32> -> vector<4x512xf32>
    %49 = vector.extract_strided_slice %48 {offsets = [0, 0], sizes = [2, 512], strides = [1, 1]} : vector<4x512xf32> to vector<2x512xf32>
    %50 = vector.shape_cast %49 : vector<2x512xf32> to vector<2x1x512xf32>
    %51 = vector.extract_strided_slice %48 {offsets = [2, 0], sizes = [2, 512], strides = [1, 1]} : vector<4x512xf32> to vector<2x512xf32>
    %52 = vector.shape_cast %51 : vector<2x512xf32> to vector<2x1x512xf32>
    %53 = vector.broadcast %50 : vector<2x1x512xf32> to vector<2x16x512xf32>
    %54 = arith.subf %28, %53 : vector<2x16x512xf32>
    %55 = vector.broadcast %52 : vector<2x1x512xf32> to vector<2x16x512xf32>
    %56 = arith.mulf %54, %55 : vector<2x16x512xf32>
    %57 = vector.extract_strided_slice %2 {offsets = [1, 0], sizes = [1, 512], strides = [1, 1]} : vector<3x512xf32> to vector<1x512xf32>
    %58 = vector.shape_cast %57 : vector<1x512xf32> to vector<1x1x512xf32>
    %59 = vector.broadcast %58 : vector<1x1x512xf32> to vector<2x16x512xf32>
    %60 = arith.mulf %56, %59 : vector<2x16x512xf32>
    %61 = vector.extract_strided_slice %2 {offsets = [2, 0], sizes = [1, 512], strides = [1, 1]} : vector<3x512xf32> to vector<1x512xf32>
    %62 = vector.shape_cast %61 : vector<1x512xf32> to vector<1x1x512xf32>
    %63 = vector.broadcast %62 : vector<1x1x512xf32> to vector<2x16x512xf32>
    %64 = arith.addf %60, %63 : vector<2x16x512xf32>
    %cst_38 = arith.constant 0.000000e+00 : f32
    %65 = vector.broadcast %cst_38 : f32 to vector<2x16x512xf32>
    %66 = arith.maximumf %64, %65 : vector<2x16x512xf32>
    %cst_39 = arith.constant 0.000000e+00 : bf16
    %67 = vector.broadcast %cst_39 : bf16 to vector<2x1x512xbf16>
    %68 = arith.truncf %66 : vector<2x16x512xf32> to vector<2x16x512xbf16>
    %69 = tpu.concatenate %67, %68, %67 in 1 : vector<2x1x512xbf16>, vector<2x16x512xbf16>, vector<2x1x512xbf16> -> vector<2x18x512xbf16>
    %c0_40 = arith.constant 0 : index
    %c0_41 = arith.constant 0 : index
    %c0_42 = arith.constant 0 : index
    %70 = vector.load %arg10[%c0_40, %c0_41, %c0_42] : memref<2x18x512xbf16, #tpu.memory_space<vmem>>, vector<2x18x512xbf16>
    tpu.vector_store %arg10[%c0_40, %c0_41, %c0_42], %69 {strides = array<i32>} : memref<2x18x512xbf16, #tpu.memory_space<vmem>>, vector<2x18x512xbf16>,
    %c0_43 = arith.constant 0 : index
    %c0_44 = arith.constant 0 : index
    %c0_45 = arith.constant 0 : index
    %71 = vector.load %arg10[%c0_43, %c0_44, %c0_45] : memref<2x18x512xbf16, #tpu.memory_space<vmem>>, vector<2x16x512xbf16>
    %c0_46 = arith.constant 0 : index
    %c1_47 = arith.constant 1 : index
    %c0_48 = arith.constant 0 : index
    %72 = vector.load %arg10[%c0_46, %c1_47, %c0_48] : memref<2x18x512xbf16, #tpu.memory_space<vmem>>, vector<2x16x512xbf16>
    %c0_49 = arith.constant 0 : index
    %c2_50 = arith.constant 2 : index
    %c0_51 = arith.constant 0 : index
    %73 = vector.load %arg10[%c0_49, %c2_50, %c0_51] : memref<2x18x512xbf16, #tpu.memory_space<vmem>>, vector<2x16x512xbf16>
    %74 = tpu.concatenate %71, %72, %73 in 2 : vector<2x16x512xbf16>, vector<2x16x512xbf16>, vector<2x16x512xbf16> -> vector<2x16x1536xbf16>
    %75 = vector.shape_cast %74 : vector<2x16x1536xbf16> to vector<32x1536xbf16>
    %c0_52 = arith.constant 0 : index
    %c0_53 = arith.constant 0 : index
    %76 = vector.load %arg4[%c0_52, %c0_53] : memref<1536x512xbf16, #tpu.memory_space<vmem>>, vector<1536x512xbf16>
    %cst_54 = arith.constant dense<0.000000e+00> : vector<32x512xf32>
    %77 = tpu.matmul %75, %76, %cst_54 {dimension_numbers = #tpu.dot_dimension_numbers<[1], [0], [0], [1], [0, 0, 1, 1], [], []>} : vector<32x1536xbf16>, vector<1536x512xbf16>, vector<32x512xf32> -> vector<32x512xf32>
    %78 = vector.shape_cast %77 : vector<32x512xf32> to vector<2x16x512xf32>
    %79 = vector.extract_strided_slice %3 {offsets = [0, 0], sizes = [1, 512], strides = [1, 1]} : vector<3x512xf32> to vector<1x512xf32>
    %80 = vector.shape_cast %79 : vector<1x512xf32> to vector<1x1x512xf32>
    %81 = vector.broadcast %80 : vector<1x1x512xf32> to vector<2x16x512xf32>
    %82 = arith.addf %78, %81 : vector<2x16x512xf32>
    %cst_55 = arith.constant dense<0.000000e+00> : vector<2x512xf32>
    %83 = vector.multi_reduction <add>, %82, %cst_55 [1] : vector<2x16x512xf32> to vector<2x512xf32>
    %84 = arith.mulf %82, %82 : vector<2x16x512xf32>
    %cst_56 = arith.constant dense<0.000000e+00> : vector<2x512xf32>
    %85 = vector.multi_reduction <add>, %84, %cst_56 [1] : vector<2x16x512xf32> to vector<2x512xf32>
    %86 = tpu.concatenate %83, %85 in 0 : vector<2x512xf32>, vector<2x512xf32> -> vector<4x512xf32>
    %cst_57 = arith.constant dense<0.000000e+00> : vector<4x32xf32>
    %87 = tpu.matmul %86, %0, %cst_57 {dimension_numbers = #tpu.dot_dimension_numbers<[1], [0], [0], [1], [0, 0, 1, 1], [], []>} : vector<4x512xf32>, vector<512x32xf32>, vector<4x32xf32> -> vector<4x32xf32>
    %88 = vector.extract_strided_slice %87 {offsets = [0, 0], sizes = [2, 32], strides = [1, 1]} : vector<4x32xf32> to vector<2x32xf32>
    %cst_58 = arith.constant 3.906250e-03 : f32
    %89 = vector.broadcast %cst_58 : f32 to vector<2x32xf32>
    %90 = arith.mulf %88, %89 : vector<2x32xf32>
    %91 = vector.extract_strided_slice %87 {offsets = [2, 0], sizes = [2, 32], strides = [1, 1]} : vector<4x32xf32> to vector<2x32xf32>
    %cst_59 = arith.constant 3.906250e-03 : f32
    %92 = vector.broadcast %cst_59 : f32 to vector<2x32xf32>
    %93 = arith.mulf %91, %92 : vector<2x32xf32>
    %94 = arith.mulf %90, %90 : vector<2x32xf32>
    %95 = arith.subf %93, %94 : vector<2x32xf32>
    %cst_60 = arith.constant 0.000000e+00 : f32
    %96 = vector.broadcast %cst_60 : f32 to vector<2x32xf32>
    %97 = arith.maximumf %95, %96 : vector<2x32xf32>
    %cst_61 = arith.constant 9.99999974E-6 : f32
    %98 = vector.broadcast %cst_61 : f32 to vector<2x32xf32>
    %99 = arith.addf %97, %98 : vector<2x32xf32>
    %100 = math.rsqrt %99 : vector<2x32xf32>
    %101 = tpu.concatenate %90, %100 in 0 : vector<2x32xf32>, vector<2x32xf32> -> vector<4x32xf32>
    %cst_62 = arith.constant dense<0.000000e+00> : vector<4x512xf32>
    %102 = tpu.matmul %101, %1, %cst_62 {dimension_numbers = #tpu.dot_dimension_numbers<[1], [0], [0], [1], [0, 0, 1, 1], [], []>} : vector<4x32xf32>, vector<32x512xf32>, vector<4x512xf32> -> vector<4x512xf32>
    %103 = vector.extract_strided_slice %102 {offsets = [0, 0], sizes = [2, 512], strides = [1, 1]} : vector<4x512xf32> to vector<2x512xf32>
    %104 = vector.shape_cast %103 : vector<2x512xf32> to vector<2x1x512xf32>
    %105 = vector.extract_strided_slice %102 {offsets = [2, 0], sizes = [2, 512], strides = [1, 1]} : vector<4x512xf32> to vector<2x512xf32>
    %106 = vector.shape_cast %105 : vector<2x512xf32> to vector<2x1x512xf32>
    %107 = vector.broadcast %104 : vector<2x1x512xf32> to vector<2x16x512xf32>
    %108 = arith.subf %82, %107 : vector<2x16x512xf32>
    %109 = vector.broadcast %106 : vector<2x1x512xf32> to vector<2x16x512xf32>
    %110 = arith.mulf %108, %109 : vector<2x16x512xf32>
    %111 = vector.extract_strided_slice %3 {offsets = [1, 0], sizes = [1, 512], strides = [1, 1]} : vector<3x512xf32> to vector<1x512xf32>
    %112 = vector.shape_cast %111 : vector<1x512xf32> to vector<1x1x512xf32>
    %113 = vector.broadcast %112 : vector<1x1x512xf32> to vector<2x16x512xf32>
    %114 = arith.mulf %110, %113 : vector<2x16x512xf32>
    %115 = vector.extract_strided_slice %3 {offsets = [2, 0], sizes = [1, 512], strides = [1, 1]} : vector<3x512xf32> to vector<1x512xf32>
    %116 = vector.shape_cast %115 : vector<1x512xf32> to vector<1x1x512xf32>
    %117 = vector.broadcast %116 : vector<1x1x512xf32> to vector<2x16x512xf32>
    %118 = arith.addf %114, %117 : vector<2x16x512xf32>
    %cst_63 = arith.constant 0.000000e+00 : f32
    %119 = vector.broadcast %cst_63 : f32 to vector<2x16x512xf32>
    %120 = arith.maximumf %118, %119 : vector<2x16x512xf32>
    %c0_64 = arith.constant 0 : index
    %c0_65 = arith.constant 0 : index
    %c0_66 = arith.constant 0 : index
    %121 = vector.load %arg8[%c0_64, %c0_65, %c0_66] : memref<2x16x512xf32, #tpu.memory_space<vmem>>, vector<2x16x512xf32>
    tpu.vector_store %arg8[%c0_64, %c0_65, %c0_66], %120 {strides = array<i32>} : memref<2x16x512xf32, #tpu.memory_space<vmem>>, vector<2x16x512xf32>,
    return
  }
  func.func @transform_0(%arg0: i32) -> (i32, i32, i32) {
    %c0_i32 = arith.constant 0 : i32
    %c0_i32_0 = arith.constant 0 : i32
    %c0_i32_1 = arith.constant 0 : i32
    return %arg0, %c0_i32, %c0_i32_0 : i32, i32, i32
  }
  func.func @transform_1(%arg0: i32) -> (i32, i32) {
    %c0_i32 = arith.constant 0 : i32
    %c0_i32_0 = arith.constant 0 : i32
    %c0_i32_1 = arith.constant 0 : i32
    return %c0_i32, %c0_i32_0 : i32, i32
  }
  func.func @transform_2(%arg0: i32) -> (i32, i32) {
    %c0_i32 = arith.constant 0 : i32
    %c0_i32_0 = arith.constant 0 : i32
    %c0_i32_1 = arith.constant 0 : i32
    return %c0_i32, %c0_i32_0 : i32, i32
  }
  func.func @transform_3(%arg0: i32) -> (i32, i32) {
    %c0_i32 = arith.constant 0 : i32
    %c0_i32_0 = arith.constant 0 : i32
    %c0_i32_1 = arith.constant 0 : i32
    return %c0_i32, %c0_i32_0 : i32, i32
  }
  func.func @transform_4(%arg0: i32) -> (i32, i32) {
    %c0_i32 = arith.constant 0 : i32
    %c0_i32_0 = arith.constant 0 : i32
    %c0_i32_1 = arith.constant 0 : i32
    return %c0_i32, %c0_i32_0 : i32, i32
  }
  func.func @transform_5(%arg0: i32) -> (i32, i32) {
    %c0_i32 = arith.constant 0 : i32
    %c0_i32_0 = arith.constant 0 : i32
    %c0_i32_1 = arith.constant 0 : i32
    return %c0_i32, %c0_i32_0 : i32, i32
  }
  func.func @transform_6(%arg0: i32) -> (i32, i32) {
    %c0_i32 = arith.constant 0 : i32
    %c0_i32_0 = arith.constant 0 : i32
    %c0_i32_1 = arith.constant 0 : i32
    return %c0_i32, %c0_i32_0 : i32, i32
  }
  func.func @transform_7(%arg0: i32) -> (i32, i32, i32) {
    %c0_i32 = arith.constant 0 : i32
    %c0_i32_0 = arith.constant 0 : i32
    %c0_i32_1 = arith.constant 0 : i32
    return %arg0, %c0_i32, %c0_i32_0 : i32, i32, i32
  }
}

</mosaic_0001>

<bundles_post_ra>
// kernel: _lambda_.1
= control target key start
LH: loop header
LB: loop body
LE: loop exit
PB: predicated region body
PF: predicated region fallthrough
CT: control target
= control target key end

     0   :  { %vm183_vm0 = vcmask 1040384   ;;  %vm184_vm1 = vsmask.f32 256  ;;  %vm197_vm2 = vcmask 1041408   ;;  %vm198_vm3 = vsmask.f32 1280  ;;  %s13489_s0 = inlined_call_operand.vmem [shape: bf16[2,16,64], index: 0, kind: input, shape index: {}]   ;;  %s13490_s1 = inlined_call_operand.vmem [shape: bf16[448,512], index: 1, kind: input, shape index: {}]   ;;  %s13491_s5 = inlined_call_operand.vmem [shape: f32[512,32], index: 5, kind: input, shape index: {}]   ;;  %s13492_s2 = inlined_call_operand.vmem [shape: f32[3,512], index: 2, kind: input, shape index: {}]   ;;  %s13493_s6 = inlined_call_operand.vmem [shape: f32[32,512], index: 6, kind: input, shape index: {}]   ;;  %s13494_s3 = inlined_call_operand.vmem [shape: bf16[1536,512], index: 3, kind: input, shape index: {}]   ;;  %s13495_s4 = inlined_call_operand.vmem [shape: f32[3,512], index: 4, kind: input, shape index: {}]   ;;  %s13496_s7 = inlined_call_operand.vmem [shape: f32[2,16,512], index: 7, kind: output, shape index: {}]  }
   0x1   :  { %v8685_v0 = vld [vmem:[%s13489_s0] sm:$0xff]   ;;  %v8696_v5 = vld [vmem:[%s13489_s0 + $0x8] sm:$0xff]   ;;  %vm213_vm4 = vcmask 1042432   ;;  %vm214_vm5 = vsmask.f32 2304  ;;  %vm8864_vm6 = vmand %vm183_vm0, %vm184_vm1  ;;  %vm240_vm9 = vcmask 519168  }
   0x2   :  { %v8686_v1 = vunpack.c.l.b16 %v8685_v0  ;;  %v8687_v2 = vunpack.c.h.b16 %v8685_v0  ;;  %v148_v3 = vshrl.u32 %v8685_v0, 16  ;;  %v151_v4 = vshll.u32 %v8685_v0, 16  ;;  %vm8870_vm7 = vmand %vm197_vm2, %vm198_vm3  ;;  %v6622_v63 = vld [vmem:[%s13490_s1 + $0x360] sm:$0xf]  ;;  %v8298_v0 = vld [vmem:[%s13490_s1 + $0x36c] sm:$0xf0] }
   0x3   :  { %v8690_v6 = vunpack.c.l.b16 %v8696_v5  ;;  %v156_v7 = vshrl.u32 %v8696_v5, 16  ;;  %v8691_v12 = vunpack.c.h.b16 %v8696_v5  ;;  %v159_v14 = vshll.u32 %v8696_v5, 16  ;;  %vm8876_vm8 = vmand %vm213_vm4, %vm214_vm5  ;;  %s8815_s14 = smov 64   ;;  %v7146_v19 = vld [vmem:[%s13494_s3 + $0x3e0] sm:$0xf] }
   0x4   :  { %v119_v8 = vpack.c.b16 %v8686_v1, %v8686_v1  ;;  %v150_v9 = vrot.slane %v148_v3, 6  ;;  %v153_v10 = vrot.slane %v151_v4, 7  ;;  %v165_v11 = vpack.c.b16 %v8687_v2, %v8687_v2  ;;  %v6606_v4 = vld [vmem:[%s13490_s1 + $0x340] sm:$0xf] }
   0x5   :  { %v120_v13 = vpack.c.b16 %v8690_v6, %v8690_v6  ;;  %v158_v24 = vrot.slane %v156_v7, 6  ;;  %v161_v33 = vrot.slane %v159_v14, 7  ;;  %v166_v36 = vpack.c.b16 %v8691_v12, %v8691_v12 }
   0x6   :  { %v122_v15 = vshrl.u32 %v119_v8, 16  ;;  %v131_v16 = vshll.u32 %v119_v8, 16  ;;  %v154_v17 = vor.u32 %v153_v10, %v150_v9  ;;  %v168_v18 = vshll.u32 %v165_v11, 16  ;;  %v8294_v8 = vld [vmem:[%s13490_s1 + $0x34c] sm:$0xf0] }
   0x7   :  { %v177_v20 = vshrl.u32 %v165_v11, 16  ;;  %v126_v22 = vshrl.u32 %v120_v13, 16  ;;  %v134_v23 = vshll.u32 %v120_v13, 16  ;;  %v162_v39 = vor.u32 %v161_v33, %v158_v24 }
   0x8   :  { %v124_v25 = vrot.slane %v122_v15, 1  ;;  %v133_v26 = vrot.slane %v131_v16, 1  ;;  %v139_v27 = vrot.slane %v122_v15, 7  ;;  %v170_v28 = vrot.slane %v168_v18, 2 }
   0x9   :  { %v128_v30 = vrot.slane %v126_v22, 1  ;;  %v136_v31 = vrot.slane %v134_v23, 1  ;;  %v140_v32 = vrot.slane %v126_v22, 7  ;;  %v172_v43 = vshll.u32 %v166_v36, 16 }
   0xa   :  { %v186_v34 = vsel %vm8864_vm6, %v124_v25, %v133_v26  ;;  %v202_v35 = vsel %vm8870_vm7, %v154_v17, %v170_v28  ;;  %v179_v44 = vshrl.u32 %v166_v36, 16  ;;  %vm243_vm10 = vcmask 518144  }
   0xb   :  { %v191_v37 = vsel %vm183_vm0, %v186_v34, %v139_v27  ;;  %v207_v38 = vsel %vm197_vm2, %v202_v35, %v177_v20  ;;  %v187_v40 = vsel %vm8864_vm6, %v128_v30, %v136_v31  ;;  %v174_v49 = vrot.slane %v172_v43, 2 }
   0xc   :  { %v200_v41 = vsel %vm8870_vm7, %v191_v37, %v154_v17  ;;  %v216_v42 = vsel %vm8876_vm8, %v207_v38, %v168_v18  ;;  %v195_v48 = vsel %vm183_vm0, %v187_v40, %v140_v32  ;;  %v6623_v3 = vor.u32 %v8298_v0, %v6622_v63  ;;  %v6430_v63 = vld [vmem:[%s13490_s1 + $0x1e0] sm:$0xf] }
   0xd   :  { %v222_v45 = vunpack.c.l.b16 %v200_v41  ;;  %v223_v46 = vunpack.c.h.b16 %v200_v41  ;;  %v224_v47 = vunpack.c.l.b16 %v216_v42  ;;  %v201_v50 = vsel %vm8870_vm7, %v195_v48, %v162_v39 }
   0xe   :  { %v225_v54 = vunpack.c.l.b16 %v201_v50  ;;  %v203_v55 = vsel %vm8870_vm7, %v162_v39, %v174_v49  ;;  %v226_v56 = vunpack.c.h.b16 %v201_v50  ;;  %vm386_vm11 = vsmask.f32 5376  ;;  %1200 = vmatpush.bf16.msra.mxu3 %v6623_v3 }
   0xf   :  { %v228_v51 = vpack.c.b16 %v222_v45, %v222_v45  ;;  %v229_v52 = vpack.c.b16 %v223_v46, %v223_v46  ;;  %v230_v53 = vpack.c.b16 %v224_v47, %v224_v47  ;;  %v211_v57 = vsel %vm197_vm2, %v203_v55, %v179_v44 }
  0x10   :  { %v231_v58 = vpack.c.b16 %v225_v54, %v225_v54  ;;  %v217_v59 = vsel %vm8876_vm8, %v211_v57, %v172_v43  ;;  %v232_v60 = vpack.c.b16 %v226_v56, %v226_v56  ;;  %vm328_vm12 = vsmask.f32 6400 }
  0x11   :  { %241 = vst.msk [vmem:[#allocation2] sm:$0xf] %vm240_vm9, %v228_v51  ;;  %v227_v61 = vunpack.c.l.b16 %v217_v59  ;;  %v6607_v13 = vor.u32 %v8294_v8, %v6606_v4  ;;  %vm280_vm13 = vsmask.f32 7424  ;;  %v8250_v4 = vld [vmem:[%s13490_s1 + $0x1ec] sm:$0xf0] }
  0x12   :  { %242 = vst.msk [vmem:[#allocation2 + $0x4] sm:$0xf] %vm240_vm9, %v229_v52  ;;  %vm431_vm14 = vcmask 1044480   ;;  %vm438_vm15 = vcmask 523264   ;;  %vm373_vm1 = vcmask 1045504   ;;  %vm315_vm3 = vcmask 1046528  }
  0x13   :  { %244 = vst.msk [vmem:[#allocation2 + $0x8] sm:$0x7] %vm243_vm10, %v230_v53  ;;  %v233_v62 = vpack.c.b16 %v227_v61, %v227_v61  ;;  %1201 = vmatpush.bf16.msra.mxu3 %v6607_v13  ;;  %v6590_v13 = vld [vmem:[%s13490_s1 + $0x320] sm:$0xf]  ;;  %vm1609_vm4 = vcmask 1041409   ;;  %vm1626_vm5 = vcmask 1043459  }
  0x14   :  { %245 = vst.msk [vmem:[#allocation2 + $0xc] sm:$0xf] %vm240_vm9, %v231_v58 }
  0x15   :  { %246 = vst.msk [vmem:[#allocation2 + $0x10] sm:$0xf] %vm240_vm9, %v232_v60 }
  0x16   :  { %247 = vst.msk [vmem:[#allocation2 + $0x14] sm:$0x7] %vm243_vm10, %v233_v62  ;;  %vm1738_vm10 = vcmask 261120  }
  0x18   :  { %v258_v1 = vld [vmem:[#allocation2] sm:$0xc] }
  0x19   :  { %v254_v2 = vld [vmem:[#allocation2] sm:$0xe]  ;;  %v369_v6 = vunpack.c.l.b16 %v258_v1 }
  0x1a   :  { %v8913_v5 = vld [vmem:[#allocation2] sm:$0xff]   ;;  %v311_v7 = vunpack.c.l.b16 %v254_v2  ;;  %v260_v10 = vld [vmem:[#allocation2 + $0x8] sm:$0x7] }
  0x1b   :  { %v8919_v9 = vunpack.c.h.b16 %v8913_v5  ;;  %v256_v11 = vld [vmem:[#allocation2 + $0x8] sm:$0x3]  ;;  %v382_v14 = vunpack.c.l.b16 %v260_v10  ;;  %v282_v17 = vshrl.u32 %v8913_v5, 16  ;;  %v259_v18 = vld [vmem:[#allocation2 + $0xc] sm:$0xc]  ;;  %v284_v22 = vshll.u32 %v8913_v5, 16 }
  0x1c   :  { %v252_v12 = vld [vmem:[#allocation2 + $0x8] sm:$0x1]  ;;  %v324_v15 = vunpack.c.l.b16 %v256_v11  ;;  %v8929_v23 = vld [vmem:[#allocation2 + $0xc] sm:$0xff]   ;;  %v370_v24 = vunpack.c.l.b16 %v259_v18  ;;  %v6558_v11 = vld [vmem:[%s13490_s1 + $0x2e0] sm:$0xf] }
  0x1d   :  { %v276_v16 = vunpack.c.l.b16 %v252_v12  ;;  %v8923_v20 = vpack.c.b16 %v8919_v9, %v369_v6  ;;  %v8926_v21 = vpack.c.b16 %v8919_v9, %v311_v7  ;;  %v8931_v25 = vpack.c.b16 %v382_v14, %v382_v14  ;;  %v261_v41 = vld [vmem:[#allocation2 + $0x14] sm:$0x7]  ;;  %v255_v58 = vld [vmem:[#allocation2 + $0xc] sm:$0xe]  ;;  %v8282_v12 = vld [vmem:[%s13490_s1 + $0x2ec] sm:$0xf0] }
  0x1e   :  { %v8933_v26 = vpack.c.b16 %v324_v15, %v324_v15  ;;  %v8938_v28 = vunpack.c.h.b16 %v8929_v23  ;;  %v253_v46 = vld [vmem:[#allocation2 + $0x14] sm:$0x1]  ;;  %v286_v49 = vrot.slane %v284_v22, 1  ;;  %v383_v54 = vunpack.c.l.b16 %v261_v41  ;;  %v8290_v18 = vld [vmem:[%s13490_s1 + $0x32c] sm:$0xf0] }
  0x1f   :  { %v8935_v27 = vpack.c.b16 %v276_v16, %v276_v16  ;;  %v388_v29 = vshrl.u32 %v8923_v20, 16  ;;  %v391_v30 = vshll.u32 %v8923_v20, 16  ;;  %v330_v31 = vshrl.u32 %v8926_v21, 16  ;;  %v257_v3 = vld [vmem:[#allocation2 + $0x14] sm:$0x3] }
  0x20   :  { %v333_v32 = vshll.u32 %v8926_v21, 16  ;;  %v396_v33 = vshrl.u32 %v8931_v25, 16  ;;  %v399_v34 = vshll.u32 %v8931_v25, 16  ;;  %v338_v35 = vshrl.u32 %v8933_v26, 16 }
  0x21   :  { %v341_v36 = vshll.u32 %v8933_v26, 16  ;;  %v390_v37 = vrot.slane %v388_v29, 2  ;;  %v393_v38 = vrot.slane %v391_v30, 3  ;;  %v332_v39 = vrot.slane %v330_v31, 1  ;;  %v6414_v31 = vld [vmem:[%s13490_s1 + $0x1c0] sm:$0xf] }
  0x22   :  { %v335_v40 = vrot.slane %v333_v32, 2  ;;  %v398_v42 = vrot.slane %v396_v33, 2  ;;  %v401_v43 = vrot.slane %v399_v34, 3  ;;  %v340_v44 = vrot.slane %v338_v35, 1  ;;  %v8246_v32 = vld [vmem:[%s13490_s1 + $0x1cc] sm:$0xf0] }
  0x23   :  { %v343_v45 = vrot.slane %v341_v36, 2  ;;  %v394_v47 = vor.u32 %v393_v38, %v390_v37  ;;  %v289_v50 = vshll.u32 %v8935_v27, 16  ;;  %v8950_v53 = vpack.c.b16 %v8938_v28, %v370_v24  ;;  %v6542_v37 = vld [vmem:[%s13490_s1 + $0x2c0] sm:$0xf]  ;;  %v8278_v38 = vld [vmem:[%s13490_s1 + $0x2cc] sm:$0xf0] }
  0x24   :  { %v336_v48 = vor.u32 %v335_v40, %v332_v39  ;;  %v402_v51 = vor.u32 %v401_v43, %v398_v42  ;;  %v287_v55 = vor.u32 %v286_v49, %v282_v17  ;;  %v277_v57 = vunpack.c.l.b16 %v253_v46  ;;  %v6574_v39 = vld [vmem:[%s13490_s1 + $0x300] sm:$0xf] }
  0x25   :  { %v344_v52 = vor.u32 %v343_v45, %v340_v44  ;;  %v291_v56 = vrot.slane %v289_v50, 1  ;;  %v8954_v61 = vpack.c.b16 %v383_v54, %v383_v54  ;;  %v405_v62 = vshrl.u32 %v8950_v53, 16  ;;  %v8286_v44 = vld [vmem:[%s13490_s1 + $0x30c] sm:$0xf0]  ;;  %v262_v45 = vld [vmem:[#allocation2] sm:$0x8] }
  0x26   :  { %v403_v59 = vsel %vm386_vm11, %v394_v47, %v402_v51  ;;  %v408_v1 = vshll.u32 %v8950_v53, 16  ;;  %v8964_v2 = vpack.c.b16 %v277_v57, %v277_v57  ;;  %v312_v10 = vunpack.c.l.b16 %v255_v58  ;;  %v6302_v50 = vld [vmem:[%s13490_s1 + $0xe0] sm:$0xf]  ;;  %v8218_v51 = vld [vmem:[%s13490_s1 + $0xec] sm:$0xf0] }
  0x27   :  { %v345_v60 = vsel %vm328_vm12, %v336_v48, %v344_v52  ;;  %421 = vrot.lane.b32.xlu0 %v403_v59, %s8815_s14  ;;  %v292_v0 = vsel %vm280_vm13, %v287_v55, %v291_v56  ;;  %v407_v6 = vrot.slane %v405_v62, 2  ;;  %v413_v7 = vshrl.u32 %v8954_v61, 16  ;;  %v6398_v52 = vld [vmem:[%s13490_s1 + $0x1a0] sm:$0xf]  ;;  %v8242_v58 = vld [vmem:[%s13490_s1 + $0x1ac] sm:$0xf0] }
  0x28   :  { %363 = vrot.lane.b32.xlu1 %v345_v60, %s8815_s14  ;;  %v416_v8 = vshll.u32 %v8954_v61, 16  ;;  %v410_v14 = vrot.slane %v408_v1, 3  ;;  %v294_v15 = vshrl.u32 %v8929_v23, 16  ;;  %v296_v16 = vshll.u32 %v8929_v23, 16  ;;  %v8216_v62 = vld [vmem:[%s13490_s1 + $0xe4] sm:$0xf] }
  0x29   :  { %v301_v17 = vshll.u32 %v8964_v2, 16  ;;  %v415_v22 = vrot.slane %v413_v7, 2  ;;  %v8987_v29 = vpack.c.b16 %v8938_v28, %v312_v10  ;;  %v325_v30 = vunpack.c.l.b16 %v257_v3  ;;  %v8214_v7 = vld [vmem:[%s13490_s1 + $0xcc] sm:$0xf0] }
  0x2a   :  { %v418_v24 = vrot.slane %v416_v8, 3  ;;  %v411_v33 = vor.u32 %v410_v14, %v407_v6  ;;  %v298_v34 = vrot.slane %v296_v16, 1  ;;  %v6431_v36 = vor.u32 %v8250_v4, %v6430_v63  ;;  %v6304_v63 = vld [vmem:[%s13490_s1 + $0xf0] sm:$0xf0]  ;;  %v6286_v6 = vld [vmem:[%s13490_s1 + $0xc0] sm:$0xf] }
  0x2b   :  { %v303_v35 = vrot.slane %v301_v17, 1  ;;  %v9004_v41 = vpack.c.b16 %v325_v30, %v325_v30  ;;  %v347_v42 = vshrl.u32 %v8987_v29, 16  ;;  %v350_v43 = vshll.u32 %v8987_v29, 16  ;;  %v8274_v14 = vld [vmem:[%s13490_s1 + $0x2ac] sm:$0xf0] }
  0x2c   :  { %v419_v40 = vor.u32 %v418_v24, %v415_v22  ;;  %v299_v46 = vor.u32 %v298_v34, %v294_v15  ;;  %1158 = vmatpush.bf16.msra.mxu1 %v6431_v36  ;;  %v6559_v47 = vor.u32 %v8282_v12, %v6558_v11  ;;  %v6591_v48 = vor.u32 %v8290_v18, %v6590_v13  ;;  %v6526_v13 = vld [vmem:[%s13490_s1 + $0x2a0] sm:$0xf]  ;;  %v8238_v22 = vld [vmem:[%s13490_s1 + $0x18c] sm:$0xf0] }
  0x2d   :  { %v6415_v49 = vor.u32 %v8246_v32, %v6414_v31  ;;  %v349_v55 = vrot.slane %v347_v42, 1  ;;  %v352_v56 = vrot.slane %v350_v43, 2  ;;  %v355_v57 = vshrl.u32 %v9004_v41, 16  ;;  %v6382_v18 = vld [vmem:[%s13490_s1 + $0x180] sm:$0xf] }
  0x2e   :  { %v420_v54 = vsel %vm386_vm11, %v411_v33, %v419_v40  ;;  %v304_v59 = vsel %vm280_vm13, %v299_v46, %v303_v35  ;;  %v358_v60 = vshll.u32 %v9004_v41, 16  ;;  %1177 = vmatpush.bf16.msra.mxu2 %v6559_v47  ;;  %v6543_v3 = vor.u32 %v8278_v38, %v6542_v37  ;;  %1202 = vmatpush.bf16.msra.mxu3 %v6591_v48  ;;  %v8212_v31 = vld [vmem:[%s13490_s1 + $0xc4] sm:$0xf]  ;;  %v6270_v32 = vld [vmem:[%s13490_s1 + $0xa0] sm:$0xf] }
  0x2f   :  { %305 = vrot.lane.b32.xlu0 %v292_v0, %s8815_s14  ;;  %307 = vrot.lane.b32.xlu2 %v304_v59, %s8815_s14  ;;  %v357_v1 = vrot.slane %v355_v57, 1  ;;  %v6575_v0 = vor.u32 %v8286_v44, %v6574_v39  ;;  %v427_v4 = vunpack.c.l.b16 %v262_v45  ;;  %v353_v8 = vor.u32 %v352_v56, %v349_v55  ;;  %v8210_v33 = vld [vmem:[%s13490_s1 + $0xac] sm:$0xf0]  ;;  %v6510_v37 = vld [vmem:[%s13490_s1 + $0x280] sm:$0xf] }
  0x30   :  { %423 = vrot.lane.b32.xlu1 %v420_v54, %s8815_s14  ;;  %v360_v10 = vrot.slane %v358_v60, 2  ;;  %1159 = vmatpush.bf16.msra.mxu1 %v6415_v49  ;;  %v6303_v11 = vor.u32 %v8218_v51, %v6302_v50  ;;  %v6399_v12 = vor.u32 %v8242_v58, %v6398_v52  ;;  %v433_v16 = vrot.slane %v8931_v25, 3  ;;  %v8270_v38 = vld [vmem:[%s13490_s1 + $0x28c] sm:$0xf0]  ;;  %v6366_v42 = vld [vmem:[%s13490_s1 + $0x160] sm:$0xf] }
  0x31   :  { %v429_v15 = vpack.c.b16 %v8919_v9, %v427_v4  ;;  %v6307_v17 = vor.u32 %v8216_v62, %v6304_v63  ;;  %v6287_v30 = vor.u32 %v8214_v7, %v6286_v6  ;;  %v6288_v9 = vld [vmem:[%s13490_s1 + $0xd0] sm:$0xf0]  ;;  %v6527_v35 = vor.u32 %v8274_v14, %v6526_v13  ;;  %v8234_v43 = vld [vmem:[%s13490_s1 + $0x16c] sm:$0xf0]  ;;  %v8208_v46 = vld [vmem:[%s13490_s1 + $0xa4] sm:$0xf] }
  0x32   :  { %v361_v24 = vor.u32 %v360_v10, %v357_v1  ;;  %1139 = vmatpush.bf16.msra.mxu0 %v6303_v11  ;;  %1178 = vmatpush.bf16.msra.mxu2 %v6543_v3  ;;  %v6383_v36 = vor.u32 %v8238_v22, %v6382_v18  ;;  %v6291_v40 = vor.u32 %v8212_v31, %v6288_v9  ;;  %v263_v44 = vld [vmem:[#allocation2 + $0xc] sm:$0x8]  ;;  %v6254_v48 = vld [vmem:[%s13490_s1 + $0x80] sm:$0xf]  ;;  %v8206_v49 = vld [vmem:[%s13490_s1 + $0x8c] sm:$0xf0] }
  0x33   :  { %v432_v25 = vrot.slane %v429_v15, 3  ;;  %1203 = vmatpush.bf16.msra.mxu3 %v6575_v0  ;;  %v6271_v45 = vor.u32 %v8210_v33, %v6270_v32  ;;  %v6272_v47 = vld [vmem:[%s13490_s1 + $0xb0] sm:$0xf0]  ;;  %v6511_v50 = vor.u32 %v8270_v38, %v6510_v37  ;;  %v6367_v51 = vor.u32 %v8234_v43, %v6366_v42  ;;  %v6494_v52 = vld [vmem:[%s13490_s1 + $0x260] sm:$0xf] }
  0x34   :  { %v362_v34 = vsel %vm328_vm12, %v353_v8, %v361_v24  ;;  %1160 = vmatpush.bf16.msra.mxu1 %v6399_v12  ;;  %v428_v54 = vunpack.c.l.b16 %v263_v44  ;;  %v8266_v55 = vld [vmem:[%s13490_s1 + $0x26c] sm:$0xf0]  ;;  %v6275_v56 = vor.u32 %v8208_v46, %v6272_v47  ;;  %v6350_v57 = vld [vmem:[%s13490_s1 + $0x140] sm:$0xf]  ;;  %v6255_v59 = vor.u32 %v8206_v49, %v6254_v48  ;;  %v8204_v60 = vld [vmem:[%s13490_s1 + $0x84] sm:$0xf] }
  0x35   :  { %v9076_v39 = vsel %vm431_vm14, %v432_v25, %v433_v16  ;;  %v8230_v58 = vld [vmem:[%s13490_s1 + $0x14c] sm:$0xf0]  ;;  %v6256_v62 = vld [vmem:[%s13490_s1 + $0x90] sm:$0xf0]  ;;  %v6238_v63 = vld [vmem:[%s13490_s1 + $0x60] sm:$0xf]  ;;  %v6495_v3 = vor.u32 %v8266_v55, %v6494_v52 }
  0x36   :  { %1140 = vmatpush.bf16.msra.mxu0 %v6287_v30  ;;  %6636 = vmatmul.msk.bf16.vlgmr.msra.gmra.mxu3 %vm438_vm15, %v9076_v39  ;;  %v8202_v1 = vld [vmem:[%s13490_s1 + $0x6c] sm:$0xf0]  ;;  %v6351_v0 = vor.u32 %v8230_v58, %v6350_v57  ;;  %v6478_v4 = vld [vmem:[%s13490_s1 + $0x240] sm:$0xf]  ;;  %v430_v6 = vpack.c.b16 %v8938_v28, %v428_v54  ;;  %v6259_v8 = vor.u32 %v8204_v60, %v6256_v62  ;;  %v8200_v28 = vld [vmem:[%s13490_s1 + $0x64] sm:$0xf] }
  0x37   :  { %1215 = vmatpush.bf16.msrb.mxu3 %v6307_v17  ;;  %365 = vrot.lane.b32.xlu2 %v362_v34, %s8815_s14  ;;  %v8262_v7 = vld [vmem:[%s13490_s1 + $0x24c] sm:$0xf0]  ;;  %v6334_v10 = vld [vmem:[%s13490_s1 + $0x120] sm:$0xf]  ;;  %v6239_v12 = vor.u32 %v8202_v1, %v6238_v63  ;;  %v6240_v13 = vld [vmem:[%s13490_s1 + $0x70] sm:$0xf0] }
  0x38   :  { %1179 = vmatpush.bf16.msra.mxu2 %v6527_v35  ;;  %1161 = vmatpush.bf16.msra.mxu1 %v6383_v36  ;;  %v8226_v11 = vld [vmem:[%s13490_s1 + $0x12c] sm:$0xf0]  ;;  %v6222_v14 = vld [vmem:[%s13490_s1 + $0x40] sm:$0xf]  ;;  %v6479_v16 = vor.u32 %v8262_v7, %v6478_v4  ;;  %v435_v17 = vrot.slane %v430_v6, 3  ;;  %v436_v18 = vrot.slane %v8954_v61, 3  ;;  %v6243_v31 = vor.u32 %v8200_v28, %v6240_v13 }
  0x39   :  { %v8198_v15 = vld [vmem:[%s13490_s1 + $0x4c] sm:$0xf0]  ;;  %v6335_v22 = vor.u32 %v8226_v11, %v6334_v10  ;;  %v6462_v24 = vld [vmem:[%s13490_s1 + $0x220] sm:$0xf]  ;;  %v8196_v32 = vld [vmem:[%s13490_s1 + $0x44] sm:$0xf] }
  0x3a   :  { %1141 = vmatpush.bf16.msra.mxu0 %v6271_v45  ;;  %v8258_v30 = vld [vmem:[%s13490_s1 + $0x22c] sm:$0xf0]  ;;  %v6318_v9 = vld [vmem:[%s13490_s1 + $0x100] sm:$0xf]  ;;  %v6223_v61 = vor.u32 %v8198_v15, %v6222_v14  ;;  %v6224_v33 = vld [vmem:[%s13490_s1 + $0x50] sm:$0xf0]  ;;  %v9168_v34 = vsel %vm431_vm14, %v435_v17, %v436_v18 }
  0x3b   :  { %1216 = vmatpush.bf16.msrb.mxu3 %v6291_v40  ;;  %v8222_v25 = vld [vmem:[%s13490_s1 + $0x10c] sm:$0xf0]  ;;  %v6463_v35 = vor.u32 %v8258_v30, %v6462_v24  ;;  %v6446_v37 = vld [vmem:[%s13490_s1 + $0x200] sm:$0xf]  ;;  %v6227_v40 = vor.u32 %v8196_v32, %v6224_v33  ;;  %v8192_v45 = vld [vmem:[%s13490_s1 + $0x24] sm:$0xf] }
  0x3c   :  { %1180 = vmatpush.bf16.msra.mxu2 %v6511_v50  ;;  %1162 = vmatpush.bf16.msra.mxu1 %v6367_v51  ;;  %v6319_v36 = vor.u32 %v8222_v25, %v6318_v9  ;;  %v8254_v38 = vld [vmem:[%s13490_s1 + $0x20c] sm:$0xf0]  ;;  %v6206_v43 = vld [vmem:[%s13490_s1 + $0x20] sm:$0xf]  ;;  %v6208_v47 = vld [vmem:[%s13490_s1 + $0x30] sm:$0xf0] }
  0x3d   :  { %v6447_v42 = vor.u32 %v8254_v38, %v6446_v37  ;;  %v8194_v44 = vld [vmem:[%s13490_s1 + $0x2c] sm:$0xf0]  ;;  %v8280_v48 = vld [vmem:[%s13490_s1 + $0x2e4] sm:$0xf]  ;;  %v6560_v49 = vld [vmem:[%s13490_s1 + $0x2f0] sm:$0xf0]  ;;  %v6211_v50 = vor.u32 %v8192_v45, %v6208_v47 }
  0x3e   :  { %1142 = vmatpush.bf16.msra.mxu0 %v6255_v59  ;;  %v6207_v46 = vor.u32 %v8194_v44, %v6206_v43  ;;  %v6563_v51 = vor.u32 %v8280_v48, %v6560_v49  ;;  %v6190_v52 = vld [vmem:[%s13490_s1] sm:$0xf]  ;;  %v8190_v54 = vld [vmem:[%s13490_s1 + $0xc] sm:$0xf0]  ;;  %v8188_v55 = vld [vmem:[%s13490_s1 + $0x4] sm:$0xf] }
  0x3f   :  { %1217 = vmatpush.bf16.msrb.mxu3 %v6275_v56  ;;  %v6191_v56 = vor.u32 %v8190_v54, %v6190_v52  ;;  %v6192_v57 = vld [vmem:[%s13490_s1 + $0x10] sm:$0xf0]  ;;  %v8276_v58 = vld [vmem:[%s13490_s1 + $0x2c4] sm:$0xf]  ;;  %v6310_v10 = vld [vmem:[%s13490_s1 + $0xe8] sm:$0xf] }
  0x40   :  { %1181 = vmatpush.bf16.msra.mxu2 %v6495_v3  ;;  %1163 = vmatpush.bf16.msra.mxu1 %v6351_v0  ;;  %v6544_v59 = vld [vmem:[%s13490_s1 + $0x2d0] sm:$0xf0]  ;;  %v6195_v60 = vor.u32 %v8188_v55, %v6192_v57  ;;  %v8296_v63 = vld [vmem:[%s13490_s1 + $0x364] sm:$0xf]  ;;  %v8219_v11 = vld [vmem:[%s13490_s1 + $0xf4] sm:$0xf0] }
  0x41   :  { %v6547_v62 = vor.u32 %v8276_v58, %v6544_v59  ;;  %v6624_v1 = vld [vmem:[%s13490_s1 + $0x370] sm:$0xf0]  ;;  %v8248_v0 = vld [vmem:[%s13490_s1 + $0x1e4] sm:$0xf]  ;;  %v6311_v28 = vor.u32 %v8219_v11, %v6310_v10  ;;  %v6294_v18 = vld [vmem:[%s13490_s1 + $0xc8] sm:$0xf] }
  0x42   :  { %1143 = vmatpush.bf16.msra.mxu0 %v6239_v12  ;;  %v6627_v3 = vor.u32 %v8296_v63, %v6624_v1  ;;  %v6432_v4 = vld [vmem:[%s13490_s1 + $0x1f0] sm:$0xf0]  ;;  %v8272_v6 = vld [vmem:[%s13490_s1 + $0x2a4] sm:$0xf]  ;;  %v6278_v37 = vld [vmem:[%s13490_s1 + $0xa8] sm:$0xf] }
  0x43   :  { %1218 = vmatpush.bf16.msrb.mxu3 %v6259_v8  ;;  %v6435_v7 = vor.u32 %v8248_v0, %v6432_v4  ;;  %v6528_v8 = vld [vmem:[%s13490_s1 + $0x2b0] sm:$0xf0]  ;;  %v8244_v13 = vld [vmem:[%s13490_s1 + $0x1c4] sm:$0xf]  ;;  %v8211_v38 = vld [vmem:[%s13490_s1 + $0xb4] sm:$0xf0] }
  0x44   :  { %1182 = vmatpush.bf16.msra.mxu2 %v6479_v16  ;;  %1164 = vmatpush.bf16.msra.mxu1 %v6335_v22  ;;  %v6531_v12 = vor.u32 %v8272_v6, %v6528_v8  ;;  %v6416_v14 = vld [vmem:[%s13490_s1 + $0x1d0] sm:$0xf0]  ;;  %v8268_v15 = vld [vmem:[%s13490_s1 + $0x284] sm:$0xf]  ;;  %v8215_v22 = vld [vmem:[%s13490_s1 + $0xd4] sm:$0xf0] }
  0x45   :  { %v6419_v16 = vor.u32 %v8244_v13, %v6416_v14  ;;  %v6512_v17 = vld [vmem:[%s13490_s1 + $0x290] sm:$0xf0]  ;;  %v6295_v30 = vor.u32 %v8215_v22, %v6294_v18  ;;  %v8264_v33 = vld [vmem:[%s13490_s1 + $0x264] sm:$0xf]  ;;  %v6262_v48 = vld [vmem:[%s13490_s1 + $0x88] sm:$0xf] }
  0x46   :  { %1144 = vmatpush.bf16.msra.mxu0 %v6223_v61  ;;  %6637 = vmatmul.msk.bf16.gmra.mxu3 %vm438_vm15, %v9168_v34  ;;  %v6515_v24 = vor.u32 %v8268_v15, %v6512_v17  ;;  %v6608_v9 = vld [vmem:[%s13490_s1 + $0x350] sm:$0xf0]  ;;  %v8240_v61 = vld [vmem:[%s13490_s1 + $0x1a4] sm:$0xf]  ;;  %v8207_v49 = vld [vmem:[%s13490_s1 + $0x94] sm:$0xf0] }
  0x47   :  { %1219 = vmatpush.bf16.msrb.mxu3 %v6243_v31  ;;  %v8292_v31 = vld [vmem:[%s13490_s1 + $0x344] sm:$0xf]  ;;  %v6400_v32 = vld [vmem:[%s13490_s1 + $0x1b0] sm:$0xf0]  ;;  %v374_v57 = vrot.slane %v8923_v20, 2  ;;  %v317_v58 = vrot.slane %v8935_v27, 1 }
  0x48   :  { %1183 = vmatpush.bf16.msra.mxu2 %v6463_v35  ;;  %1165 = vmatpush.bf16.msra.mxu1 %v6319_v36  ;;  %v6611_v25 = vor.u32 %v8292_v31, %v6608_v9  ;;  %v6403_v35 = vor.u32 %v8240_v61, %v6400_v32  ;;  %v6496_v36 = vld [vmem:[%s13490_s1 + $0x270] sm:$0xf0]  ;;  %v8236_v43 = vld [vmem:[%s13490_s1 + $0x184] sm:$0xf]  ;;  %v316_v59 = vrot.slane %v8926_v21, 1  ;;  %vm1830_vm11 = vcmask 1042434  }
  0x49   :  { %v6384_v44 = vld [vmem:[%s13490_s1 + $0x190] sm:$0xf0]  ;;  %v8260_v45 = vld [vmem:[%s13490_s1 + $0x244] sm:$0xf]  ;;  %v6246_v27 = vld [vmem:[%s13490_s1 + $0x68] sm:$0xf] }
  0x4a   :  { %1145 = vmatpush.bf16.msra.mxu0 %v6207_v46  ;;  %v6387_v46 = vor.u32 %v8236_v43, %v6384_v44  ;;  %v6480_v47 = vld [vmem:[%s13490_s1 + $0x250] sm:$0xf0]  ;;  %v8288_v52 = vld [vmem:[%s13490_s1 + $0x324] sm:$0xf]  ;;  %v8203_v63 = vld [vmem:[%s13490_s1 + $0x74] sm:$0xf0]  ;;  %v318_v22 = vsel %vm315_vm3, %v316_v59, %v317_v58 }
  0x4b   :  { %1220 = vmatpush.bf16.msrb.mxu3 %v6227_v40  ;;  %v6499_v40 = vor.u32 %v8264_v33, %v6496_v36  ;;  %v6592_v54 = vld [vmem:[%s13490_s1 + $0x330] sm:$0xf0]  ;;  %v8256_v20 = vld [vmem:[%s13490_s1 + $0x224] sm:$0xf]  ;;  %v6230_v13 = vld [vmem:[%s13490_s1 + $0x48] sm:$0xf] }
  0x4c   :  { %1184 = vmatpush.bf16.msra.mxu2 %v6447_v42  ;;  %1253 = vmatpush.bf16.msrb.mxu1 %v6563_v51  ;;  %v6279_v42 = vor.u32 %v8211_v38, %v6278_v37  ;;  %v6263_v51 = vor.u32 %v8207_v49, %v6262_v48  ;;  %v6595_v55 = vor.u32 %v8288_v52, %v6592_v54  ;;  %v6464_v21 = vld [vmem:[%s13490_s1 + $0x230] sm:$0xf0]  ;;  %v8228_v0 = vld [vmem:[%s13490_s1 + $0x144] sm:$0xf]  ;;  %v8199_v14 = vld [vmem:[%s13490_s1 + $0x54] sm:$0xf0] }
  0x4d   :  { %v6467_v1 = vor.u32 %v8256_v20, %v6464_v21  ;;  %v6352_v4 = vld [vmem:[%s13490_s1 + $0x150] sm:$0xf0]  ;;  %v8252_v6 = vld [vmem:[%s13490_s1 + $0x204] sm:$0xf]  ;;  %v6214_v9 = vld [vmem:[%s13490_s1 + $0x28] sm:$0xf] }
  0x4e   :  { %1146 = vmatpush.bf16.msra.mxu0 %v6191_v56  ;;  %v375_v56 = vrot.slane %v8933_v26, 2  ;;  %v6448_v8 = vld [vmem:[%s13490_s1 + $0x210] sm:$0xf0]  ;;  %v8284_v10 = vld [vmem:[%s13490_s1 + $0x304] sm:$0xf]  ;;  %v319_v54 = vrot.slane %v8987_v29, 1 }
  0x4f   :  { %1221 = vmatpush.bf16.msrb.mxu3 %v6211_v50  ;;  %v6483_v50 = vor.u32 %v8260_v45, %v6480_v47  ;;  %v6576_v11 = vld [vmem:[%s13490_s1 + $0x310] sm:$0xf0]  ;;  %v8224_v15 = vld [vmem:[%s13490_s1 + $0x124] sm:$0xf]  ;;  %v6566_v61 = vld [vmem:[%s13490_s1 + $0x2e8] sm:$0xf] }
  0x50   :  { %1276 = vmatpush.bf16.msrb.mxu2 %v6627_v3  ;;  %1254 = vmatpush.bf16.msrb.mxu1 %v6547_v62  ;;  %v6368_v62 = vld [vmem:[%s13490_s1 + $0x170] sm:$0xf0]  ;;  %v6247_v3 = vor.u32 %v8203_v63, %v6246_v27  ;;  %v376_v18 = vsel %vm373_vm1, %v374_v57, %v375_v56  ;;  %v8283_v36 = vld [vmem:[%s13490_s1 + $0x2f4] sm:$0xf0]  ;;  %v6198_v43 = vld [vmem:[%s13490_s1 + $0x8] sm:$0xf] }
  0x51   :  { %v6336_v17 = vld [vmem:[%s13490_s1 + $0x130] sm:$0xf0]  ;;  %v6567_v38 = vor.u32 %v8283_v36, %v6566_v61  ;;  %v8191_v45 = vld [vmem:[%s13490_s1 + $0x14] sm:$0xf0]  ;;  %v377_v56 = vrot.slane %v8950_v53, 2  ;;  %v378_v57 = vrot.slane %v9004_v41, 2 }
  0x52   :  { %1234 = vmatpush.bf16.msrb.mxu0 %v6435_v7  ;;  %v6355_v7 = vor.u32 %v8228_v0, %v6352_v4  ;;  %v8279_v47 = vld [vmem:[%s13490_s1 + $0x2d4] sm:$0xf0]  ;;  %v6199_v48 = vor.u32 %v8191_v45, %v6198_v43  ;;  %v6438_v59 = vld [vmem:[%s13490_s1 + $0x1e8] sm:$0xf]  ;;  %v6312_v20 = vld [vmem:[%s13490_s1 + $0xf8] sm:$0xf0] }
  0x53   :  { %1222 = vmatpush.bf16.msrb.mxu3 %v6195_v60  ;;  %v8232_v60 = vld [vmem:[%s13490_s1 + $0x164] sm:$0xf]  ;;  %v8275_v41 = vld [vmem:[%s13490_s1 + $0x2b4] sm:$0xf0]  ;;  %v6422_v21 = vld [vmem:[%s13490_s1 + $0x1c8] sm:$0xf] }
  0x54   :  { %1255 = vmatpush.bf16.msrb.mxu1 %v6531_v12  ;;  %1277 = vmatpush.bf16.msrb.mxu2 %v6611_v25  ;;  %v6371_v26 = vor.u32 %v8232_v60, %v6368_v62  ;;  %v6451_v12 = vor.u32 %v8252_v6, %v6448_v8  ;;  %v8195_v25 = vld [vmem:[%s13490_s1 + $0x34] sm:$0xf0]  ;;  %v8217_v62 = vld [vmem:[%s13490_s1 + $0xec] sm:$0xf]  ;;  %v6518_v63 = vld [vmem:[%s13490_s1 + $0x288] sm:$0xf]  ;;  %v379_v8 = vsel %vm373_vm1, %v377_v56, %v378_v57 }
  0x55   :  { %v8251_v60 = vld [vmem:[%s13490_s1 + $0x1f4] sm:$0xf0]  ;;  %v8213_v4 = vld [vmem:[%s13490_s1 + $0xcc] sm:$0xf]  ;;  %v6296_v6 = vld [vmem:[%s13490_s1 + $0xd8] sm:$0xf0] }
  0x56   :  { %1235 = vmatpush.bf16.msrb.mxu0 %v6419_v16  ;;  %v6231_v16 = vor.u32 %v8199_v14, %v6230_v13  ;;  %v6439_v29 = vor.u32 %v8251_v60, %v6438_v59  ;;  %v8247_v27 = vld [vmem:[%s13490_s1 + $0x1d4] sm:$0xf0]  ;;  %v8205_v43 = vld [vmem:[%s13490_s1 + $0x8c] sm:$0xf]  ;;  %vm1835_vm12 = vcmask 1042433  }
  0x57   :  { %1291 = vmatpush.bf16.msra.mxu3 %v6311_v28  ;;  %v6579_v28 = vor.u32 %v8284_v10, %v6576_v11  ;;  %v8271_v0 = vld [vmem:[%s13490_s1 + $0x294] sm:$0xf0]  ;;  %v8201_v57 = vld [vmem:[%s13490_s1 + $0x6c] sm:$0xf] }
  0x58   :  { %1256 = vmatpush.bf16.msrb.mxu1 %v6515_v24  ;;  %1278 = vmatpush.bf16.msrb.mxu2 %v6595_v55  ;;  %v6339_v24 = vor.u32 %v8224_v15, %v6336_v17  ;;  %v320_v55 = vrot.slane %v8964_v2, 1  ;;  %v6534_v2 = vld [vmem:[%s13490_s1 + $0x2a8] sm:$0xf]  ;;  %v6519_v11 = vor.u32 %v8271_v0, %v6518_v63  ;;  %v8295_v13 = vld [vmem:[%s13490_s1 + $0x354] sm:$0xf0] }
  0x59   :  { %v6406_v17 = vld [vmem:[%s13490_s1 + $0x1a8] sm:$0xf]  ;;  %v8239_v36 = vld [vmem:[%s13490_s1 + $0x194] sm:$0xf0] }
  0x5a   :  { %1236 = vmatpush.bf16.msrb.mxu0 %v6403_v35  ;;  %v6215_v35 = vor.u32 %v8195_v25, %v6214_v9  ;;  %v6280_v9 = vld [vmem:[%s13490_s1 + $0xb8] sm:$0xf0]  ;;  %v8259_v56 = vld [vmem:[%s13490_s1 + $0x234] sm:$0xf0]  ;;  %v6342_v63 = vld [vmem:[%s13490_s1 + $0x128] sm:$0xf] }
  0x5b   :  { %1292 = vmatpush.bf16.msra.mxu3 %v6295_v30  ;;  %v8231_v60 = vld [vmem:[%s13490_s1 + $0x154] sm:$0xf0] }
  0x5c   :  { %1257 = vmatpush.bf16.msrb.mxu1 %v6499_v40  ;;  %1279 = vmatpush.bf16.msrb.mxu2 %v6579_v28  ;;  %v8220_v40 = vld [vmem:[%s13490_s1 + $0x104] sm:$0xf]  ;;  %v6614_v28 = vld [vmem:[%s13490_s1 + $0x348] sm:$0xf] }
  0x5d   :  { %v6615_v14 = vor.u32 %v8295_v13, %v6614_v28  ;;  %v8223_v28 = vld [vmem:[%s13490_s1 + $0x114] sm:$0xf0]  ;;  %v8189_v13 = vld [vmem:[%s13490_s1 + $0xc] sm:$0xf] }
  0x5e   :  { %1237 = vmatpush.bf16.msrb.mxu0 %v6387_v46  ;;  %v6550_v46 = vld [vmem:[%s13490_s1 + $0x2c8] sm:$0xf] }
  0x5f   :  { %1293 = vmatpush.bf16.msra.mxu3 %v6279_v42  ;;  %v6320_v42 = vld [vmem:[%s13490_s1 + $0x110] sm:$0xf0]  ;;  %v6551_v49 = vor.u32 %v8279_v47, %v6550_v46  ;;  %v6598_v47 = vld [vmem:[%s13490_s1 + $0x328] sm:$0xf] }
  0x60   :  { %1258 = vmatpush.bf16.msrb.mxu1 %v6483_v50  ;;  %v6323_v44 = vor.u32 %v8220_v40, %v6320_v42  ;;  %v6630_v50 = vld [vmem:[%s13490_s1 + $0x368] sm:$0xf]  ;;  %v8263_v42 = vld [vmem:[%s13490_s1 + $0x254] sm:$0xf0] }
  0x62   :  { %1238 = vmatpush.bf16.msrb.mxu0 %v6371_v26  ;;  %v6535_v26 = vor.u32 %v8275_v41, %v6534_v2  ;;  %v6454_v2 = vld [vmem:[%s13490_s1 + $0x208] sm:$0xf]  ;;  %v8255_v41 = vld [vmem:[%s13490_s1 + $0x214] sm:$0xf0] }
  0x63   :  { %1294 = vmatpush.bf16.msra.mxu3 %v6263_v51  ;;  %v8299_v51 = vld [vmem:[%s13490_s1 + $0x374] sm:$0xf0] }
  0x64   :  { %1259 = vmatpush.bf16.msrb.mxu1 %v6467_v1  ;;  %v6631_v52 = vor.u32 %v8299_v51, %v6630_v50  ;;  %v321_v1 = vsel %vm315_vm3, %v319_v54, %v320_v55  ;;  %v6374_v50 = vld [vmem:[%s13490_s1 + $0x168] sm:$0xf]  ;;  %v8235_v51 = vld [vmem:[%s13490_s1 + $0x174] sm:$0xf0] }
  0x65   :  { %v6375_v55 = vor.u32 %v8235_v51, %v6374_v50 }
  0x66   :  { %1239 = vmatpush.bf16.msrb.mxu0 %v6355_v7 }
  0x67   :  { %1295 = vmatpush.bf16.msra.mxu3 %v6247_v3  ;;  %v6423_v3 = vor.u32 %v8247_v27, %v6422_v21  ;;  %v8197_v21 = vld [vmem:[%s13490_s1 + $0x4c] sm:$0xf]  ;;  %v6232_v27 = vld [vmem:[%s13490_s1 + $0x58] sm:$0xf0] }
  0x68   :  { %1260 = vmatpush.bf16.msrb.mxu1 %v6451_v12  ;;  %v6299_v12 = vor.u32 %v8213_v4, %v6296_v6  ;;  %v8193_v4 = vld [vmem:[%s13490_s1 + $0x2c] sm:$0xf]  ;;  %v6216_v6 = vld [vmem:[%s13490_s1 + $0x38] sm:$0xf0] }
  0x6a   :  { %1240 = vmatpush.bf16.msrb.mxu0 %v6339_v24 }
  0x6b   :  { %1296 = vmatpush.bf16.msra.mxu3 %v6231_v16 }
  0x6e   :  { %1241 = vmatpush.bf16.msrb.mxu0 %v6323_v44  ;;  %v6264_v44 = vld [vmem:[%s13490_s1 + $0x98] sm:$0xf0] }
  0x6f   :  { %1297 = vmatpush.bf16.msra.mxu3 %v6215_v35  ;;  %v6390_v35 = vld [vmem:[%s13490_s1 + $0x188] sm:$0xf]  ;;  %v6267_v46 = vor.u32 %v8205_v43, %v6264_v44  ;;  %v8245_v43 = vld [vmem:[%s13490_s1 + $0x1cc] sm:$0xf]  ;;  %v6424_v44 = vld [vmem:[%s13490_s1 + $0x1d8] sm:$0xf0] }
  0x70   :  { %v6391_v40 = vor.u32 %v8239_v36, %v6390_v35  ;;  %v6440_v35 = vld [vmem:[%s13490_s1 + $0x1f8] sm:$0xf0]  ;;  %v8273_v36 = vld [vmem:[%s13490_s1 + $0x2ac] sm:$0xf] }
  0x73   :  { %1298 = vmatpush.bf16.msra.mxu3 %v6199_v48  ;;  %v8291_v48 = vld [vmem:[%s13490_s1 + $0x334] sm:$0xf0] }
  0x89   :  { %v9378_v37 = vpop.permute.xlu2 %307 }
  0x8a   :  { %v9520_v54 = vsel %vm438_vm15, %v8929_v23, %v9378_v37  ;;  %v6358_v37 = vld [vmem:[%s13490_s1 + $0x148] sm:$0xf] }
  0x91   :  { %v366_v7 = vpop.permute.xlu2 %365 }
  0x92   :  { %v9459_v15 = vsel %vm438_vm15, %v321_v1, %v366_v7  ;;  %v6235_v1 = vor.u32 %v8197_v21, %v6232_v27  ;;  %v8281_v7 = vld [vmem:[%s13490_s1 + $0x2ec] sm:$0xf]  ;;  %v6376_v21 = vld [vmem:[%s13490_s1 + $0x178] sm:$0xf0] }
  0x93   :  { %v8257_v27 = vld [vmem:[%s13490_s1 + $0x22c] sm:$0xf] }
  0x99   :  { %v422_v30 = vpop.permute.xlu0 %421 }
  0x9a   :  { %v364_v31 = vpop.permute.xlu1 %363  ;;  %v9368_v32 = vsel %vm438_vm15, %v376_v18, %v422_v30  ;;  %v8243_v18 = vld [vmem:[%s13490_s1 + $0x1b4] sm:$0xf0] }
  0x9b   :  { %v9371_v33 = vsel %vm438_vm15, %v318_v22, %v364_v31  ;;  %1185 = vmatmul.bf16.vlgmr.msra.gmra.mxu2 %v9368_v32  ;;  %v6502_v22 = vld [vmem:[%s13490_s1 + $0x268] sm:$0xf]  ;;  %v6407_v24 = vor.u32 %v8243_v18, %v6406_v17  ;;  %v8267_v30 = vld [vmem:[%s13490_s1 + $0x274] sm:$0xf0]  ;;  %v8209_v31 = vld [vmem:[%s13490_s1 + $0xac] sm:$0xf] }
  0x9c   :  { %1166 = vmatmul.bf16.vlgmr.msra.gmra.mxu1 %v9371_v33  ;;  %1352 = vmatpush.bf16.msra.mxu2 %v6631_v52  ;;  %v6503_v25 = vor.u32 %v8267_v30, %v6502_v22  ;;  %v6283_v61 = vor.u32 %v8209_v31, %v6280_v9  ;;  %v6470_v52 = vld [vmem:[%s13490_s1 + $0x228] sm:$0xf]  ;;  %v6200_v17 = vld [vmem:[%s13490_s1 + $0x18] sm:$0xf0]  ;;  %v8277_v18 = vld [vmem:[%s13490_s1 + $0x2cc] sm:$0xf] }
  0x9d   :  { %1329 = vmatpush.bf16.msra.mxu1 %v6567_v38  ;;  %v6486_v38 = vld [vmem:[%s13490_s1 + $0x248] sm:$0xf]  ;;  %v6471_v59 = vor.u32 %v8259_v56, %v6470_v52  ;;  %v6552_v22 = vld [vmem:[%s13490_s1 + $0x2d8] sm:$0xf0]  ;;  %v8297_v31 = vld [vmem:[%s13490_s1 + $0x36c] sm:$0xf] }
  0x9e   :  { %v6487_v45 = vor.u32 %v8263_v42, %v6486_v38  ;;  %v6555_v30 = vor.u32 %v8277_v18, %v6552_v22  ;;  %v6632_v9 = vld [vmem:[%s13490_s1 + $0x378] sm:$0xf0]  ;;  %v8241_v52 = vld [vmem:[%s13490_s1 + $0x1ac] sm:$0xf] }
  0x9f   :  { %v8265_v56 = vld [vmem:[%s13490_s1 + $0x26c] sm:$0xf]  ;;  %v6328_v22 = vld [vmem:[%s13490_s1 + $0x118] sm:$0xf0] }
  0xa0   :  { %1353 = vmatpush.bf16.msra.mxu2 %v6615_v14  ;;  %v8221_v18 = vld [vmem:[%s13490_s1 + $0x10c] sm:$0xf] }
  0xa1   :  { %v306_v58 = vpop.permute.xlu0 %305  ;;  %1330 = vmatpush.bf16.msra.mxu1 %v6551_v49  ;;  %v6599_v49 = vor.u32 %v8291_v48, %v6598_v47  ;;  %v6520_v47 = vld [vmem:[%s13490_s1 + $0x298] sm:$0xf0]  ;;  %v8293_v48 = vld [vmem:[%s13490_s1 + $0x34c] sm:$0xf] }
  0xa2   :  { %v9419_v53 = vsel %vm438_vm15, %v8913_v5, %v306_v58  ;;  %v6315_v5 = vor.u32 %v8217_v62, %v6312_v20  ;;  %v424_v10 = vpop.permute.xlu1 %423  ;;  %v6248_v58 = vld [vmem:[%s13490_s1 + $0x78] sm:$0xf0]  ;;  %v6582_v62 = vld [vmem:[%s13490_s1 + $0x308] sm:$0xf]  ;;  %v8287_v20 = vld [vmem:[%s13490_s1 + $0x314] sm:$0xf0] }
  0xa3   :  { %1147 = vmatmul.bf16.vlgmr.msra.gmra.mxu0 %v9419_v53  ;;  %1223 = vmatmul.bf16.vlgmr.msrb.gmra.mxu3 %v9419_v53  ;;  %v9462_v16 = vsel %vm438_vm15, %v379_v8, %v424_v10  ;;  %v6251_v23 = vor.u32 %v8201_v57, %v6248_v58  ;;  %v6219_v8 = vor.u32 %v8193_v4, %v6216_v6  ;;  %v6568_v10 = vld [vmem:[%s13490_s1 + $0x2f8] sm:$0xf0]  ;;  %v8253_v6 = vld [vmem:[%s13490_s1 + $0x20c] sm:$0xf] }
  0xa4   :  { %1310 = vmatpush.bf16.msra.mxu0 %v6439_v29  ;;  %1367 = vmatpush.bf16.msrb.mxu3 %v6315_v5  ;;  %v6359_v29 = vor.u32 %v8231_v60, %v6358_v37  ;;  %v6583_v5 = vor.u32 %v8287_v20, %v6582_v62  ;;  %v6504_v58 = vld [vmem:[%s13490_s1 + $0x278] sm:$0xf0]  ;;  %v8261_v60 = vld [vmem:[%s13490_s1 + $0x24c] sm:$0xf] }
  0xa5   :  { %1331 = vmatpush.bf16.msra.mxu1 %v6535_v26  ;;  %1354 = vmatpush.bf16.msra.mxu2 %v6599_v49  ;;  %v6455_v26 = vor.u32 %v8255_v41, %v6454_v2  ;;  %v6616_v49 = vld [vmem:[%s13490_s1 + $0x358] sm:$0xf0]  ;;  %v8289_v41 = vld [vmem:[%s13490_s1 + $0x32c] sm:$0xf] }
  0xa6   :  { %v6619_v51 = vor.u32 %v8293_v48, %v6616_v49  ;;  %v6392_v37 = vld [vmem:[%s13490_s1 + $0x198] sm:$0xf0] }
  0xa7   :  { %v6600_v62 = vld [vmem:[%s13490_s1 + $0x338] sm:$0xf0] }
  0xa8   :  { %1311 = vmatpush.bf16.msra.mxu0 %v6423_v3  ;;  %1368 = vmatpush.bf16.msrb.mxu3 %v6299_v12  ;;  %v8227_v3 = vld [vmem:[%s13490_s1 + $0x134] sm:$0xf0]  ;;  %v6326_v12 = vld [vmem:[%s13490_s1 + $0x108] sm:$0xf]  ;;  %v6360_v4 = vld [vmem:[%s13490_s1 + $0x158] sm:$0xf0] }
  0xa9   :  { %1332 = vmatpush.bf16.msra.mxu1 %v6519_v11  ;;  %1355 = vmatpush.bf16.msra.mxu2 %v6583_v5  ;;  %v6343_v0 = vor.u32 %v8227_v3, %v6342_v63  ;;  %v6571_v11 = vor.u32 %v8281_v7, %v6568_v10  ;;  %v6327_v14 = vor.u32 %v8223_v28, %v6326_v12  ;;  %v8233_v5 = vld [vmem:[%s13490_s1 + $0x16c] sm:$0xf] }
  0xaa   :  { %v6379_v63 = vor.u32 %v8233_v5, %v6376_v21  ;;  %v8285_v10 = vld [vmem:[%s13490_s1 + $0x30c] sm:$0xf]  ;;  %v27_v5 = vld [vmem:[%s13491_s5] sm:$0xff] }
  0xab   :  { %1190 = vmatmul.bf16.gmra.mxu2 %v9462_v16 }
  0xac   :  { %1171 = vmatmul.bf16.gmra.mxu1 %v9459_v15  ;;  %1312 = vmatpush.bf16.msra.mxu0 %v6407_v24  ;;  %v6203_v24 = vor.u32 %v8189_v13, %v6200_v17  ;;  %v8225_v13 = vld [vmem:[%s13490_s1 + $0x12c] sm:$0xf] }
  0xad   :  { %1333 = vmatpush.bf16.msra.mxu1 %v6503_v25  ;;  %1369 = vmatpush.bf16.msrb.mxu3 %v6283_v61  ;;  %v6635_v25 = vor.u32 %v8297_v31, %v6632_v9  ;;  %v8249_v61 = vld [vmem:[%s13490_s1 + $0x1ec] sm:$0xf]  ;;  %v37_v31 = vld [vmem:[%s13491_s5 + $0x50] sm:$0xff] }
  0xae   :  { %v6443_v38 = vor.u32 %v8249_v61, %v6440_v35  ;;  %v36_v61 = vld [vmem:[%s13491_s5 + $0x48] sm:$0xff] }
  0xb0   :  { %1313 = vmatpush.bf16.msra.mxu0 %v6391_v40  ;;  %v6536_v40 = vld [vmem:[%s13490_s1 + $0x2b8] sm:$0xf0] }
  0xb1   :  { %1334 = vmatpush.bf16.msra.mxu1 %v6487_v45  ;;  %1370 = vmatpush.bf16.msrb.mxu3 %v6267_v46  ;;  %v6539_v42 = vor.u32 %v8273_v36, %v6536_v40  ;;  %v8269_v45 = vld [vmem:[%s13490_s1 + $0x28c] sm:$0xf]  ;;  %v6427_v46 = vor.u32 %v8245_v43, %v6424_v44  ;;  %v34_v40 = vld [vmem:[%s13491_s5 + $0x38] sm:$0xff]  ;;  %v33_v43 = vld [vmem:[%s13491_s5 + $0x30] sm:$0xff] }
  0xb2   :  { %v6523_v50 = vor.u32 %v8269_v45, %v6520_v47  ;;  %v9766_v44 = vld [vmem:[%s13492_s2] sm:$0x77] }
  0xb3   :  { %1152 = vmatmul.bf16.gmra.mxu0 %v9520_v54  ;;  %1228 = vmatmul.bf16.gmra.mxu3 %v9520_v54 }
  0xb4   :  { %1314 = vmatpush.bf16.msra.mxu0 %v6375_v55  ;;  %v6408_v55 = vld [vmem:[%s13490_s1 + $0x1b8] sm:$0xf0] }
  0xb5   :  { %1335 = vmatpush.bf16.msra.mxu1 %v6471_v59  ;;  %1371 = vmatpush.bf16.msrb.mxu3 %v6251_v23  ;;  %v6411_v57 = vor.u32 %v8241_v52, %v6408_v55  ;;  %v6507_v59 = vor.u32 %v8265_v56, %v6504_v58  ;;  %v8237_v23 = vld [vmem:[%s13490_s1 + $0x18c] sm:$0xf]  ;;  %v31_v55 = vld [vmem:[%s13491_s5 + $0x20] sm:$0xff] }
  0xb6   :  { %v6395_v2 = vor.u32 %v8237_v23, %v6392_v37  ;;  %v29_v37 = vld [vmem:[%s13491_s5 + $0x10] sm:$0xff] }
  0xb8   :  { %1315 = vmatpush.bf16.msra.mxu0 %v6359_v29  ;;  %v6488_v29 = vld [vmem:[%s13490_s1 + $0x258] sm:$0xf0] }
  0xb9   :  { %1336 = vmatpush.bf16.msra.mxu1 %v6455_v26  ;;  %1372 = vmatpush.bf16.msrb.mxu3 %v6235_v1  ;;  %v6491_v20 = vor.u32 %v8261_v60, %v6488_v29  ;;  %v6603_v26 = vor.u32 %v8289_v41, %v6600_v62  ;;  %v6472_v1 = vld [vmem:[%s13490_s1 + $0x238] sm:$0xf0]  ;;  %v28_v29 = vld [vmem:[%s13491_s5 + $0x8] sm:$0xff] }
  0xba   :  { %v6475_v3 = vor.u32 %v8257_v27, %v6472_v1 }
  0xbb   :  { %6638 = vmatmul.msk.bf16.vlgmr.msrb.gmra.mxu2 %vm438_vm15, %v9076_v39 }
  0xbc   :  { %1261 = vmatmul.bf16.vlgmr.msrb.gmra.mxu1 %v9368_v32  ;;  %1316 = vmatpush.bf16.msra.mxu0 %v6343_v0  ;;  %v8229_v0 = vld [vmem:[%s13490_s1 + $0x14c] sm:$0xf] }
  0xbd   :  { %1373 = vmatpush.bf16.msrb.mxu3 %v6219_v8  ;;  %1405 = vmatpush.bf16.msrb.mxu1 %v6571_v11  ;;  %v6363_v7 = vor.u32 %v8229_v0, %v6360_v4  ;;  %v6456_v8 = vld [vmem:[%s13490_s1 + $0x218] sm:$0xf0]  ;;  %v57_v0 = vld [vmem:[%s13491_s5 + $0xf0] sm:$0xff] }
  0xbe   :  { %1428 = vmatpush.bf16.msrb.mxu2 %v6635_v25  ;;  %v6584_v11 = vld [vmem:[%s13490_s1 + $0x318] sm:$0xf0]  ;;  %v6459_v12 = vor.u32 %v8253_v6, %v6456_v8  ;;  %v56_v8 = vld [vmem:[%s13491_s5 + $0xe8] sm:$0xff] }
  0xbf   :  { %v6587_v28 = vor.u32 %v8285_v10, %v6584_v11 }
  0xc0   :  { %1317 = vmatpush.bf16.msra.mxu0 %v6327_v14  ;;  %v6344_v14 = vld [vmem:[%s13490_s1 + $0x138] sm:$0xf0] }
  0xc1   :  { %1374 = vmatpush.bf16.msrb.mxu3 %v6203_v24  ;;  %1406 = vmatpush.bf16.msrb.mxu1 %v6555_v30  ;;  %v6347_v17 = vor.u32 %v8225_v13, %v6344_v14  ;;  %v6331_v24 = vor.u32 %v8221_v18, %v6328_v22  ;;  %v1205_v30 = vpop.f32.mrf.mxu3  ;;  %v55_v13 = vld [vmem:[%s13491_s5 + $0xe0] sm:$0xff]  ;;  %v54_v22 = vld [vmem:[%s13491_s5 + $0xd8] sm:$0xff] }
  0xc2   :  { %1429 = vmatpush.bf16.msrb.mxu2 %v6619_v51 }
  0xc3   :  { %1242 = vmatmul.bf16.vlgmr.msrb.gmra.mxu0 %v9371_v33  ;;  %1299 = vmatmul.bf16.vlgmr.msra.gmra.mxu3 %v9419_v53 }
  0xc4   :  { %1386 = vmatpush.bf16.msrb.mxu0 %v6443_v38  ;;  %v35_v38 = vld [vmem:[%s13491_s5 + $0x40] sm:$0xff] }
  0xc5   :  { %1407 = vmatpush.bf16.msrb.mxu1 %v6539_v42 }
  0xc6   :  { %1430 = vmatpush.bf16.msrb.mxu2 %v6603_v26 }
  0xc8   :  { %1387 = vmatpush.bf16.msrb.mxu0 %v6427_v46  ;;  %v32_v46 = vld [vmem:[%s13491_s5 + $0x28] sm:$0xff] }
  0xc9   :  { %1408 = vmatpush.bf16.msrb.mxu1 %v6523_v50  ;;  %v1445_v50 = vperm.slane %v9766_v44, 0 }
  0xca   :  { %1431 = vmatpush.bf16.msrb.mxu2 %v6587_v28 }
  0xcb   :  { %6639 = vmatmul.msk.bf16.gmra.mxu2 %vm438_vm15, %v9168_v34 }
  0xcc   :  { %1266 = vmatmul.bf16.gmra.mxu1 %v9462_v16  ;;  %1388 = vmatpush.bf16.msrb.mxu0 %v6411_v57  ;;  %v30_v57 = vld [vmem:[%s13491_s5 + $0x18] sm:$0xff] }
  0xcd   :  { %1409 = vmatpush.bf16.msrb.mxu1 %v6507_v59  ;;  %v1453_v59 = vperm.slane %v1445_v50, 0 }
  0xd0   :  { %1389 = vmatpush.bf16.msrb.mxu0 %v6395_v2 }
  0xd1   :  { %1410 = vmatpush.bf16.msrb.mxu1 %v6491_v20 }
  0xd3   :  { %1247 = vmatmul.bf16.gmra.mxu0 %v9459_v15  ;;  %1304 = vmatmul.bf16.gmra.mxu3 %v9520_v54 }
  0xd4   :  { %1390 = vmatpush.bf16.msrb.mxu0 %v6379_v63  ;;  %v58_v63 = vld [vmem:[%s13491_s5 + $0xf8] sm:$0xff] }
  0xd5   :  { %1411 = vmatpush.bf16.msrb.mxu1 %v6475_v3 }
  0xd8   :  { %1391 = vmatpush.bf16.msrb.mxu0 %v6363_v7 }
  0xd9   :  { %1412 = vmatpush.bf16.msrb.mxu1 %v6459_v12 }
  0xdb   :  { %6640 = vmatmul.msk.bf16.vlgmr.msra.gmra.mxu2 %vm438_vm15, %v9076_v39 }
  0xdc   :  { %1337 = vmatmul.bf16.vlgmr.msra.gmra.mxu1 %v9368_v32  ;;  %1392 = vmatpush.bf16.msrb.mxu0 %v6347_v17 }
  0xe0   :  { %1393 = vmatpush.bf16.msrb.mxu0 %v6331_v24 }
  0xe3   :  { %1318 = vmatmul.bf16.vlgmr.msra.gmra.mxu0 %v9371_v33  ;;  %1375 = vmatmul.bf16.vlgmr.msrb.gmra.mxu3 %v9419_v53  ;;  %v1207_v53 = vpop.f32.mrf.mxu3 }
  0xe4   :  { %1659 = vmatpush.msra.mxu0 %v58_v63 }
  0xe6   :  { %1660 = vmatpush.msra.mxu0 %v57_v0 }
  0xe8   :  { %1661 = vmatpush.msra.mxu0 %v56_v8  ;;  %v45_v8 = vld [vmem:[%s13491_s5 + $0x90] sm:$0xff] }
  0xea   :  { %1662 = vmatpush.msra.mxu0 %v55_v13 }
  0xeb   :  { %6641 = vmatmul.msk.bf16.gmra.mxu2 %vm438_vm15, %v9168_v34 }
  0xec   :  { %1342 = vmatmul.bf16.gmra.mxu1 %v9462_v16  ;;  %1663 = vmatpush.msra.mxu0 %v54_v22 }
  0xf3   :  { %1323 = vmatmul.bf16.gmra.mxu0 %v9459_v15  ;;  %1380 = vmatmul.bf16.gmra.mxu3 %v9520_v54  ;;  %v42_v54 = vld [vmem:[%s13491_s5 + $0x78] sm:$0xff] }
  0xf4   :  { %1639 = vmatpush.msra.mxu3 %v42_v54  ;;  %v53_v54 = vld [vmem:[%s13491_s5 + $0xd0] sm:$0xff] }
  0xf5   :  { %1664 = vmatpush.msra.mxu0 %v53_v54 }
  0xfb   :  { %6642 = vmatmul.msk.bf16.vlgmr.msrb.gmra.mxu2 %vm438_vm15, %v9076_v39  ;;  %v41_v39 = vld [vmem:[%s13491_s5 + $0x70] sm:$0xff] }
  0xfc   :  { %1413 = vmatmul.bf16.vlgmr.msrb.gmra.mxu1 %v9368_v32  ;;  %v9732_v32 = vpop.f32.mrf.mxu3  ;;  %1640 = vmatpush.msra.mxu3 %v41_v39 }
 0x103   :  { %1394 = vmatmul.bf16.vlgmr.msrb.gmra.mxu0 %v9371_v33  ;;  %v40_v33 = vld [vmem:[%s13491_s5 + $0x68] sm:$0xff] }
 0x104   :  { %1641 = vmatpush.msra.mxu3 %v40_v33  ;;  %v9749_v25 = vpop.f32.mrf.mxu3 }
 0x10b   :  { %6643 = vmatmul.msk.bf16.gmra.mxu2 %vm438_vm15, %v9168_v34 }
 0x10c   :  { %1418 = vmatmul.bf16.gmra.mxu1 %v9462_v16  ;;  %v38_v16 = vld [vmem:[%s13491_s5 + $0x58] sm:$0xff] }
 0x113   :  { %1399 = vmatmul.bf16.gmra.mxu0 %v9459_v15  ;;  %v39_v15 = vld [vmem:[%s13491_s5 + $0x60] sm:$0xff] }
 0x114   :  { %1642 = vmatpush.msra.mxu3 %v39_v15  ;;  %v52_v15 = vld [vmem:[%s13491_s5 + $0xc8] sm:$0xff] }
 0x115   :  { %1665 = vmatpush.msra.mxu0 %v52_v15 }
 0x116   :  { %1643 = vmatpush.msra.mxu3 %v38_v16 }
 0x118   :  { %1644 = vmatpush.msra.mxu3 %v37_v31 }
 0x119   :  { %v1167_v34 = vpop.f32.mrf.mxu1 }
 0x11a   :  { %1645 = vmatpush.msra.mxu3 %v36_v61 }
 0x11c   :  { %1646 = vmatpush.msra.mxu3 %v35_v38 }
 0x11e   :  { %v1186_v9 = vpop.f32.mrf.mxu2  ;;  %1647 = vmatpush.msra.mxu3 %v34_v40 }
 0x120   :  { %v1148_v35 = vpop.f32.mrf.mxu0  ;;  %1648 = vmatpush.msra.mxu3 %v33_v43  ;;  %v50_v43 = vld [vmem:[%s13491_s5 + $0xb8] sm:$0xff] }
 0x121   :  { %v1169_v36 = vpop.f32.mrf.mxu1  ;;  %v1168_v42 = vadd.f32 %v1167_v34, %v1148_v35  ;;  %v51_v35 = vld [vmem:[%s13491_s5 + $0xc0] sm:$0xff] }
 0x122   :  { %1649 = vmatpush.msra.mxu3 %v32_v46  ;;  %1666 = vmatpush.msra.mxu0 %v51_v35 }
 0x123   :  { %v1187_v49 = vadd.f32 %v1186_v9, %v1168_v42 }
 0x124   :  { %1650 = vmatpush.msra.mxu3 %v31_v55  ;;  %1667 = vmatpush.msra.mxu0 %v50_v43 }
 0x125   :  { %v1206_v58 = vadd.f32 %v1205_v30, %v1187_v49 }
 0x126   :  { %v1188_v45 = vpop.f32.mrf.mxu2  ;;  %v9772_v51 = vpop.f32.mrf.mxu3  ;;  %1651 = vmatpush.msra.mxu3 %v30_v57 }
 0x127   :  { %v9788_v20 = vadd.f32 %v1453_v59, %v1206_v58  ;;  %v48_v58 = vld [vmem:[%s13491_s5 + $0xa8] sm:$0xff] }
 0x128   :  { %v1150_v47 = vpop.f32.mrf.mxu0  ;;  %1652 = vmatpush.msra.mxu3 %v29_v37 }
 0x129   :  { %v1172_v48 = vpop.f32.mrf.mxu1  ;;  %v1170_v52 = vadd.f32 %v1169_v36, %v1150_v47  ;;  %v1529_v1 = vmul.f32 %v9788_v20, %v9788_v20 }
 0x12a   :  { %1653 = vmatpush.msra.mxu3 %v28_v29 }
 0x12b   :  { %v1189_v56 = vadd.f32 %v1188_v45, %v1170_v52 }
 0x12c   :  { %1654 = vmatpush.msra.mxu3 %v27_v5 }
 0x12d   :  { %v1208_v23 = vadd.f32 %v1207_v53, %v1189_v56 }
 0x12e   :  { %v1191_v60 = vpop.f32.mrf.mxu2  ;;  %v9795_v27 = vpop.f32.mrf.mxu3 }
 0x12f   :  { %v9783_v2 = vadd.f32 %v1453_v59, %v1208_v23 }
 0x130   :  { %v1153_v41 = vpop.f32.mrf.mxu0 }
 0x131   :  { %v1174_v62 = vpop.f32.mrf.mxu1  ;;  %v1173_v26 = vadd.f32 %v1172_v48, %v1153_v41  ;;  %v1533_v21 = vmul.f32 %v9783_v2, %v9783_v2  ;;  %v1473_v4 = vadd.f32 %v9783_v2, %v9788_v20  ;;  %v49_v48 = vld [vmem:[%s13491_s5 + $0xb0] sm:$0xff] }
 0x132   :  { %1668 = vmatpush.msra.mxu0 %v49_v48 }
 0x133   :  { %v1192_v3 = vadd.f32 %v1191_v60, %v1173_v26  ;;  %v1545_v7 = vadd.f32 %v1533_v21, %v1529_v1  ;;  %v1474_v14 = vrot.slane %v1473_v4, 4 }
 0x134   :  { %1669 = vmatpush.msra.mxu0 %v48_v58 }
 0x135   :  { %v1211_v12 = vadd.f32 %v9732_v32, %v1192_v3  ;;  %v1546_v18 = vrot.slane %v1545_v7, 4  ;;  %v1475_v39 = vadd.f32 %v1474_v14, %v1473_v4  ;;  %v46_v3 = vld [vmem:[%s13491_s5 + $0x98] sm:$0xff]  ;;  %v44_v14 = vld [vmem:[%s13491_s5 + $0x88] sm:$0xff] }
 0x136   :  { %v1193_v6 = vpop.f32.mrf.mxu2  ;;  %v9819_v30 = vpop.f32.mrf.mxu3 }
 0x137   :  { %v9817_v24 = vadd.f32 %v1453_v59, %v1211_v12  ;;  %v1547_v34 = vadd.f32 %v1546_v18, %v1545_v7  ;;  %v1476_v36 = vrot.slane %v1475_v39, 2 }
 0x138   :  { %v1155_v10 = vpop.f32.mrf.mxu0 }
 0x139   :  { %v1262_v11 = vpop.f32.mrf.mxu1  ;;  %v1175_v28 = vadd.f32 %v1174_v62, %v1155_v10  ;;  %v1537_v9 = vmul.f32 %v9817_v24, %v9817_v24  ;;  %v1548_v42 = vrot.slane %v1547_v34, 2  ;;  %v1477_v50 = vadd.f32 %v1476_v36, %v1475_v39  ;;  %v47_v62 = vld [vmem:[%s13491_s5 + $0xa0] sm:$0xff] }
 0x13a   :  { %1670 = vmatpush.msra.mxu0 %v47_v62  ;;  %v43_v39 = vld [vmem:[%s13491_s5 + $0x80] sm:$0xff] }
 0x13b   :  { %v1194_v17 = vadd.f32 %v1193_v6, %v1175_v28  ;;  %v1549_v56 = vadd.f32 %v1548_v42, %v1547_v34  ;;  %v1478_v26 = vrot.slane %v1477_v50, 1 }
 0x13c   :  { %1671 = vmatpush.msra.mxu0 %v46_v3 }
 0x13d   :  { %v1213_v53 = vadd.f32 %v9749_v25, %v1194_v17  ;;  %v1550_v63 = vrot.slane %v1549_v56, 1  ;;  %v1479_v12 = vadd.f32 %v1478_v26, %v1477_v50  ;;  %v70_v50 = vld [vmem:[%s13491_s5 + $0x158] sm:$0xff] }
 0x13e   :  { %v1281_v32 = vpop.f32.mrf.mxu2  ;;  %v9846_v52 = vpop.f32.mrf.mxu3  ;;  %1672 = vmatpush.msra.mxu0 %v45_v8  ;;  %v65_v8 = vld [vmem:[%s13491_s5 + $0x130] sm:$0xff] }
 0x13f   :  { %v9825_v33 = vadd.f32 %v1453_v59, %v1213_v53  ;;  %v1551_v28 = vadd.f32 %v1550_v63, %v1549_v56 }
 0x140   :  { %v1243_v16 = vpop.f32.mrf.mxu0  ;;  %1673 = vmatpush.msra.mxu0 %v44_v14 }
 0x141   :  { %v1264_v31 = vpop.f32.mrf.mxu1  ;;  %v1501_v25 = vadd.f32 %v9825_v33, %v9817_v24  ;;  %v1541_v61 = vmul.f32 %v9825_v33, %v9825_v33  ;;  %v1244_v45 = vadd.f32 %v1243_v16, %v9772_v51  ;;  %v1446_v51 = vperm.slane %v9766_v44, 4 }
 0x142   :  { %1674 = vmatpush.msra.mxu0 %v43_v39 }
 0x143   :  { %v1502_v38 = vrot.slane %v1501_v25, 4  ;;  %v1573_v40 = vadd.f32 %v1541_v61, %v1537_v9  ;;  %v1263_v37 = vadd.f32 %v1262_v11, %v1244_v45  ;;  %v1454_v0 = vperm.slane %v1446_v51, 0 }
 0x145   :  { %v1503_v46 = vadd.f32 %v1502_v38, %v1501_v25  ;;  %v1574_v47 = vrot.slane %v1573_v40, 4  ;;  %v1282_v4 = vadd.f32 %v1281_v32, %v1263_v37  ;;  %v73_v25 = vld [vmem:[%s13491_s5 + $0x170] sm:$0xff]  ;;  %v72_v38 = vld [vmem:[%s13491_s5 + $0x168] sm:$0xff] }
 0x146   :  { %v1283_v49 = vpop.f32.mrf.mxu2  ;;  %v1300_v34 = vpop.f32.mrf.mxu3  ;;  %v68_v37 = vld [vmem:[%s13491_s5 + $0x148] sm:$0xff] }
 0x147   :  { %v1504_v55 = vrot.slane %v1503_v46, 2  ;;  %v1575_v57 = vadd.f32 %v1574_v47, %v1573_v40  ;;  %v9867_v22 = vadd.f32 %v1454_v0, %v1282_v4  ;;  %v9923_v4 = vld [vmem:[%s13492_s2 + $0x8] sm:$0x77] }
 0x148   :  { %v1245_v59 = vpop.f32.mrf.mxu0 }
 0x149   :  { %v1267_v23 = vpop.f32.mrf.mxu1  ;;  %v1246_v60 = vadd.f32 %v1245_v59, %v9795_v27  ;;  %v1505_v29 = vadd.f32 %v1504_v55, %v1503_v46  ;;  %v1576_v41 = vrot.slane %v1575_v57, 2  ;;  %v71_v46 = vld [vmem:[%s13491_s5 + $0x160] sm:$0xff] }
 0x14b   :  { %v1265_v5 = vadd.f32 %v1264_v31, %v1246_v60  ;;  %v1506_v21 = vrot.slane %v1505_v29, 1  ;;  %v1577_v1 = vadd.f32 %v1576_v41, %v1575_v57  ;;  %v1530_v31 = vmul.f32 %v9867_v22, %v9867_v22 }
 0x14d   :  { %v1284_v27 = vadd.f32 %v1283_v49, %v1265_v5  ;;  %v1507_v6 = vadd.f32 %v1506_v21, %v1505_v29  ;;  %v1578_v7 = vrot.slane %v1577_v1, 1  ;;  %v67_v5 = vld [vmem:[%s13491_s5 + $0x140] sm:$0xff] }
 0x14e   :  { %v1286_v10 = vpop.f32.mrf.mxu2  ;;  %v1302_v55 = vpop.f32.mrf.mxu3 }
 0x14f   :  { %v9862_v11 = vadd.f32 %v1454_v0, %v1284_v27  ;;  %v1579_v13 = vadd.f32 %v1578_v7, %v1577_v1  ;;  %v1610_v54 = vsel %vm1609_vm4, %v1507_v6, %v1479_v12 }
 0x150   :  { %v1248_v17 = vpop.f32.mrf.mxu0 }
 0x151   :  { %v1269_v18 = vpop.f32.mrf.mxu1  ;;  %v1249_v53 = vadd.f32 %v1248_v17, %v9819_v30  ;;  %v1627_v32 = vsel %vm1626_vm5, %v1579_v13, %v1551_v28  ;;  %v1534_v16 = vmul.f32 %v9862_v11, %v9862_v11  ;;  %v74_v30 = vld [vmem:[%s13491_s5 + $0x178] sm:$0xff]  ;;  %v1480_v61 = vadd.f32 %v9862_v11, %v9867_v22 }
 0x152   :  { %v1635_v15 = vsel %vm197_vm2, %v1610_v54, %v1627_v32  ;;  %1679 = vmatpush.msra.mxu1 %v74_v30  ;;  %v63_v30 = vld [vmem:[%s13491_s5 + $0x120] sm:$0xff] }
 0x153   :  { %1655 = vmatmul.f32.vlgmr.msra.gmra.mxu3 %v1635_v15  ;;  %v1268_v9 = vadd.f32 %v1267_v23, %v1249_v53  ;;  %v1552_v36 = vadd.f32 %v1534_v16, %v1530_v31  ;;  %v1481_v47 = vrot.slane %v1480_v61, 4  ;;  %v1447_v53 = vperm.slane %v9923_v4, 0 }
 0x154   :  { %1680 = vmatpush.msra.mxu1 %v73_v25 }
 0x155   :  { %v1287_v43 = vadd.f32 %v1286_v10, %v1268_v9  ;;  %v1553_v49 = vrot.slane %v1552_v36, 4  ;;  %v1482_v51 = vadd.f32 %v1481_v47, %v1480_v61 }
 0x156   :  { %v1288_v35 = vpop.f32.mrf.mxu2  ;;  %1681 = vmatpush.msra.mxu1 %v72_v38  ;;  %v1305_v10 = vpop.f32.mrf.mxu3  ;;  %v1455_v38 = vperm.slane %v1447_v53, 0 }
 0x157   :  { %v9898_v56 = vadd.f32 %v1454_v0, %v1287_v43  ;;  %v1554_v23 = vadd.f32 %v1553_v49, %v1552_v36  ;;  %v1483_v21 = vrot.slane %v1482_v51, 2  ;;  %v62_v36 = vld [vmem:[%s13491_s5 + $0x118] sm:$0xff] }
 0x158   :  { %v1250_v40 = vpop.f32.mrf.mxu0  ;;  %1682 = vmatpush.msra.mxu1 %v71_v46  ;;  %v61_v46 = vld [vmem:[%s13491_s5 + $0x110] sm:$0xff] }
 0x159   :  { %v1338_v42 = vpop.f32.mrf.mxu1  ;;  %v1251_v45 = vadd.f32 %v1250_v40, %v9846_v52  ;;  %v69_v52 = vld [vmem:[%s13491_s5 + $0x150] sm:$0xff]  ;;  %v1538_v41 = vmul.f32 %v9898_v56, %v9898_v56  ;;  %v1555_v3 = vrot.slane %v1554_v23, 2  ;;  %v1484_v28 = vadd.f32 %v1483_v21, %v1482_v51 }
 0x15a   :  { %1683 = vmatpush.msra.mxu1 %v70_v50 }
 0x15b   :  { %v1270_v48 = vadd.f32 %v1269_v18, %v1251_v45  ;;  %v1556_v14 = vadd.f32 %v1555_v3, %v1554_v23  ;;  %v64_v18 = vld [vmem:[%s13491_s5 + $0x128] sm:$0xff]  ;;  %v1485_v31 = vrot.slane %v1484_v28, 1 }
 0x15c   :  { %1684 = vmatpush.msra.mxu1 %v69_v52 }
 0x15d   :  { %v1289_v57 = vadd.f32 %v1288_v35, %v1270_v48  ;;  %v1557_v61 = vrot.slane %v1556_v14, 1  ;;  %v1486_v49 = vadd.f32 %v1485_v31, %v1484_v28  ;;  %v84_v31 = vld [vmem:[%s13491_s5 + $0x1c8] sm:$0xff] }
 0x15e   :  { %v1357_v58 = vpop.f32.mrf.mxu2  ;;  %1685 = vmatpush.msra.mxu1 %v68_v37  ;;  %v1307_v52 = vpop.f32.mrf.mxu3 }
 0x15f   :  { %v9903_v59 = vadd.f32 %v1454_v0, %v1289_v57  ;;  %v66_v0 = vld [vmem:[%s13491_s5 + $0x138] sm:$0xff]  ;;  %v1558_v50 = vadd.f32 %v1557_v61, %v1556_v14  ;;  %v60_v57 = vld [vmem:[%s13491_s5 + $0x108] sm:$0xff] }
 0x160   :  { %v1319_v60 = vpop.f32.mrf.mxu0  ;;  %1686 = vmatpush.msra.mxu1 %v67_v5  ;;  %v90_v5 = vld [vmem:[%s13491_s5 + $0x1f8] sm:$0xff] }
 0x161   :  { %v1340_v29 = vpop.f32.mrf.mxu1  ;;  %v1508_v62 = vadd.f32 %v9903_v59, %v9898_v56  ;;  %v1542_v26 = vmul.f32 %v9903_v59, %v9903_v59  ;;  %v1320_v27 = vadd.f32 %v1319_v60, %v1300_v34  ;;  %1699 = vmatpush.msra.mxu2 %v90_v5 }
 0x162   :  { %1687 = vmatpush.msra.mxu1 %v66_v0 }
 0x163   :  { %v1509_v63 = vrot.slane %v1508_v62, 4  ;;  %v1580_v1 = vadd.f32 %v1542_v26, %v1538_v41  ;;  %v1339_v39 = vadd.f32 %v1338_v42, %v1320_v27 }
 0x164   :  { %1688 = vmatpush.msra.mxu1 %v65_v8 }
 0x165   :  { %v1510_v6 = vadd.f32 %v1509_v63, %v1508_v62  ;;  %v1581_v7 = vrot.slane %v1580_v1, 4  ;;  %v1358_v40 = vadd.f32 %v1357_v58, %v1339_v39  ;;  %v85_v39 = vld [vmem:[%s13491_s5 + $0x1d0] sm:$0xff] }
 0x166   :  { %v1359_v12 = vpop.f32.mrf.mxu2  ;;  %1689 = vmatpush.msra.mxu1 %v64_v18  ;;  %v1376_v28 = vpop.f32.mrf.mxu3  ;;  %v86_v18 = vld [vmem:[%s13491_s5 + $0x1d8] sm:$0xff] }
 0x167   :  { %v1511_v13 = vrot.slane %v1510_v6, 2  ;;  %v1582_v17 = vadd.f32 %v1581_v7, %v1580_v1  ;;  %v9946_v51 = vadd.f32 %v1455_v38, %v1358_v40  ;;  %v89_v1 = vld [vmem:[%s13491_s5 + $0x1f0] sm:$0xff] }
 0x168   :  { %v1321_v54 = vpop.f32.mrf.mxu0  ;;  %1690 = vmatpush.msra.mxu1 %v63_v30  ;;  %1700 = vmatpush.msra.mxu2 %v89_v1 }
 0x169   :  { %v1343_v32 = vpop.f32.mrf.mxu1  ;;  %v1322_v34 = vadd.f32 %v1321_v54, %v1302_v55  ;;  %v1512_v15 = vadd.f32 %v1511_v13, %v1510_v6  ;;  %v1583_v16 = vrot.slane %v1582_v17, 2  ;;  %v1531_v21 = vmul.f32 %v9946_v51, %v9946_v51  ;;  %v88_v6 = vld [vmem:[%s13491_s5 + $0x1e8] sm:$0xff] }
 0x16a   :  { %1691 = vmatpush.msra.mxu1 %v62_v36  ;;  %1701 = vmatpush.msra.mxu2 %v88_v6  ;;  %v83_v36 = vld [vmem:[%s13491_s5 + $0x1c0] sm:$0xff] }
 0x16b   :  { %v1341_v9 = vadd.f32 %v1340_v29, %v1322_v34  ;;  %v1513_v25 = vrot.slane %v1512_v15, 1  ;;  %v1584_v35 = vadd.f32 %v1583_v16, %v1582_v17  ;;  %v59_v29 = vld [vmem:[%s13491_s5 + $0x100] sm:$0xff] }
 0x16c   :  { %1692 = vmatpush.msra.mxu1 %v61_v46  ;;  %v81_v46 = vld [vmem:[%s13491_s5 + $0x1b0] sm:$0xff] }
 0x16d   :  { %v1360_v42 = vadd.f32 %v1359_v12, %v1341_v9  ;;  %v1514_v43 = vadd.f32 %v1513_v25, %v1512_v15  ;;  %v1585_v45 = vrot.slane %v1584_v35, 1  ;;  %v87_v12 = vld [vmem:[%s13491_s5 + $0x1e0] sm:$0xff] }
 0x16e   :  { %v1362_v47 = vpop.f32.mrf.mxu2  ;;  %1693 = vmatpush.msra.mxu1 %v60_v57  ;;  %1702 = vmatpush.msra.mxu2 %v87_v12  ;;  %v80_v57 = vld [vmem:[%s13491_s5 + $0x1a8] sm:$0xff] }
 0x16f   :  { %v9941_v48 = vadd.f32 %v1455_v38, %v1360_v42  ;;  %v1586_v55 = vadd.f32 %v1585_v45, %v1584_v35  ;;  %v1611_v37 = vsel %vm1609_vm4, %v1514_v43, %v1486_v49  ;;  %v82_v45 = vld [vmem:[%s13491_s5 + $0x1b8] sm:$0xff] }
 0x170   :  { %v1324_v58 = vpop.f32.mrf.mxu0  ;;  %1694 = vmatpush.msra.mxu1 %v59_v29  ;;  %1703 = vmatpush.msra.mxu2 %v86_v18  ;;  %v79_v29 = vld [vmem:[%s13491_s5 + $0x1a0] sm:$0xff]  ;;  %v76_v18 = vld [vmem:[%s13491_s5 + $0x188] sm:$0xff] }
 0x171   :  { %v1325_v23 = vadd.f32 %v1324_v58, %v1305_v10  ;;  %v1628_v60 = vsel %vm1626_vm5, %v1586_v55, %v1558_v50  ;;  %v1345_v41 = vpop.f32.mrf.mxu1  ;;  %v1535_v26 = vmul.f32 %v9941_v48, %v9941_v48  ;;  %v1487_v3 = vadd.f32 %v9941_v48, %v9946_v51 }
 0x172   :  { %v1636_v62 = vsel %vm197_vm2, %v1611_v37, %v1628_v60  ;;  %1704 = vmatpush.msra.mxu2 %v85_v39 }
 0x173   :  { %1675 = vmatmul.f32.vlgmr.msra.gmra.mxu0 %v1636_v62  ;;  %v1344_v63 = vadd.f32 %v1343_v32, %v1325_v23  ;;  %v1559_v27 = vadd.f32 %v1535_v26, %v1531_v21  ;;  %v1488_v13 = vrot.slane %v1487_v3, 4 }
 0x174   :  { %1705 = vmatpush.msra.mxu2 %v84_v31  ;;  %v75_v31 = vld [vmem:[%s13491_s5 + $0x180] sm:$0xff] }
 0x175   :  { %v1363_v8 = vadd.f32 %v1362_v47, %v1344_v63  ;;  %v1560_v17 = vrot.slane %v1559_v27, 4  ;;  %v1489_v15 = vadd.f32 %v1488_v13, %v1487_v3  ;;  %v1378_v47 = vpop.f32.mrf.mxu3  ;;  %v78_v3 = vld [vmem:[%s13491_s5 + $0x198] sm:$0xff] }
 0x176   :  { %v1364_v0 = vpop.f32.mrf.mxu2  ;;  %1706 = vmatpush.msra.mxu2 %v83_v36 }
 0x177   :  { %v9975_v54 = vadd.f32 %v1455_v38, %v1363_v8  ;;  %v1561_v30 = vadd.f32 %v1560_v17, %v1559_v27 }
 0x178   :  { %v1326_v7 = vpop.f32.mrf.mxu0  ;;  %1707 = vmatpush.msra.mxu2 %v82_v45 }
 0x179   :  { %v1327_v10 = vadd.f32 %v1326_v7, %v1307_v52  ;;  %v1414_v53 = vpop.f32.mrf.mxu1  ;;  %v1539_v25 = vmul.f32 %v9975_v54, %v9975_v54  ;;  %v1562_v43 = vrot.slane %v1561_v30, 2 }
 0x17a   :  { %1708 = vmatpush.msra.mxu2 %v81_v46 }
 0x17b   :  { %v1346_v14 = vadd.f32 %v1345_v41, %v1327_v10  ;;  %v1563_v37 = vadd.f32 %v1562_v43, %v1561_v30  ;;  %v1448_v41 = vperm.slane %v9923_v4, 4  ;;  %v77_v10 = vld [vmem:[%s13491_s5 + $0x190] sm:$0xff] }
 0x17c   :  { %1709 = vmatpush.msra.mxu2 %v80_v57 }
 0x17d   :  { %v1365_v32 = vadd.f32 %v1364_v0, %v1346_v14  ;;  %v1564_v7 = vrot.slane %v1563_v37, 1  ;;  %v1456_v12 = vperm.slane %v1448_v41, 0 }
 0x17e   :  { %v1433_v34 = vpop.f32.mrf.mxu2  ;;  %1710 = vmatpush.msra.mxu2 %v79_v29 }
 0x17f   :  { %v9980_v16 = vadd.f32 %v1455_v38, %v1365_v32  ;;  %v1490_v38 = vrot.slane %v1489_v15, 2 }
 0x180   :  { %v1395_v9 = vpop.f32.mrf.mxu0  ;;  %1711 = vmatpush.msra.mxu2 %v78_v3 }
 0x181   :  { %v1515_v61 = vadd.f32 %v9980_v16, %v9975_v54  ;;  %v1543_v35 = vmul.f32 %v9980_v16, %v9980_v16  ;;  %v1396_v49 = vadd.f32 %v1395_v9, %v1376_v28  ;;  %v1416_v52 = vpop.f32.mrf.mxu1  ;;  %v1491_v58 = vadd.f32 %v1490_v38, %v1489_v15 }
 0x182   :  { %1712 = vmatpush.msra.mxu2 %v77_v10  ;;  %v1565_v15 = vadd.f32 %v1564_v7, %v1563_v37 }
 0x183   :  { %v1516_v40 = vrot.slane %v1515_v61, 4  ;;  %v1587_v42 = vadd.f32 %v1543_v35, %v1539_v25  ;;  %v1415_v5 = vadd.f32 %v1414_v53, %v1396_v49  ;;  %v1492_v0 = vrot.slane %v1491_v58, 1  ;;  %v1381_v53 = vpop.f32.mrf.mxu3 }
 0x184   :  { %1713 = vmatpush.msra.mxu2 %v76_v18 }
 0x185   :  { %v1517_v50 = vadd.f32 %v1516_v40, %v1515_v61  ;;  %v1588_v55 = vrot.slane %v1587_v42, 4  ;;  %v1434_v28 = vadd.f32 %v1433_v34, %v1415_v5  ;;  %v1493_v39 = vadd.f32 %v1492_v0, %v1491_v58 }
 0x186   :  { %v1435_v62 = vpop.f32.mrf.mxu2  ;;  %1714 = vmatpush.msra.mxu2 %v75_v31 }
 0x187   :  { %v1518_v23 = vrot.slane %v1517_v50, 2  ;;  %v1589_v60 = vadd.f32 %v1588_v55, %v1587_v42  ;;  %v10021_v25 = vadd.f32 %v1456_v12, %v1434_v28 }
 0x188   :  { %v1397_v26 = vpop.f32.mrf.mxu0 }
 0x189   :  { %v1398_v21 = vadd.f32 %v1397_v26, %v1378_v47  ;;  %v1519_v63 = vadd.f32 %v1518_v23, %v1517_v50  ;;  %v1590_v1 = vrot.slane %v1589_v60, 2  ;;  %v1419_v9 = vpop.f32.mrf.mxu1  ;;  %v1532_v43 = vmul.f32 %v10021_v25, %v10021_v25 }
 0x18b   :  { %v1417_v27 = vadd.f32 %v1416_v52, %v1398_v21  ;;  %v1520_v6 = vrot.slane %v1519_v63, 1  ;;  %v1591_v8 = vadd.f32 %v1590_v1, %v1589_v60  ;;  %v1383_v49 = vpop.f32.mrf.mxu3 }
 0x18d   :  { %v1436_v13 = vadd.f32 %v1435_v62, %v1417_v27  ;;  %v1521_v14 = vadd.f32 %v1520_v6, %v1519_v63  ;;  %v1592_v17 = vrot.slane %v1591_v8, 1 }
 0x18e   :  { %v1438_v38 = vpop.f32.mrf.mxu2 }
 0x18f   :  { %v10016_v32 = vadd.f32 %v1456_v12, %v1436_v13  ;;  %v1593_v30 = vadd.f32 %v1592_v17, %v1591_v8  ;;  %v1612_v35 = vsel %vm1609_vm4, %v1521_v14, %v1493_v39 }
 0x190   :  { %v1400_v34 = vpop.f32.mrf.mxu0 }
 0x191   :  { %v1401_v61 = vadd.f32 %v1400_v34, %v1381_v53  ;;  %v1629_v36 = vsel %vm1626_vm5, %v1593_v30, %v1565_v15  ;;  %v1536_v42 = vmul.f32 %v10016_v32, %v10016_v32  ;;  %v1494_v46 = vadd.f32 %v10016_v32, %v10021_v25  ;;  %v1421_v52 = vpop.f32.mrf.mxu1 }
 0x192   :  { %v1637_v40 = vsel %vm197_vm2, %v1612_v35, %v1629_v36 }
 0x193   :  { %1695 = vmatmul.f32.vlgmr.msra.gmra.mxu1 %v1637_v40  ;;  %v1420_v45 = vadd.f32 %v1419_v9, %v1401_v61  ;;  %v1566_v47 = vadd.f32 %v1536_v42, %v1532_v43  ;;  %v1495_v58 = vrot.slane %v1494_v46, 4  ;;  %v103_v42 = vld [vmem:[%s13493_s6 + $0x60] sm:$0xff]  ;;  %v105_v43 = vld [vmem:[%s13493_s6 + $0x70] sm:$0xff] }
 0x194   :  { %1754 = vmatpush.msrb.mxu3 %v103_v42  ;;  %1794 = vmatpush.msrb.mxu0 %v105_v43  ;;  %v1913_v42 = vperm.slane %v9923_v4, 5  ;;  %v1938_v43 = vperm.slane %v9766_v44, 2 }
 0x195   :  { %v1439_v55 = vadd.f32 %v1438_v38, %v1420_v45  ;;  %v1567_v37 = vrot.slane %v1566_v47, 4  ;;  %v1496_v26 = vadd.f32 %v1495_v58, %v1494_v46  ;;  %v106_v45 = vld [vmem:[%s13493_s6 + $0x78] sm:$0xff]  ;;  %v99_v46 = vld [vmem:[%s13493_s6 + $0x40] sm:$0xff] }
 0x196   :  { %v1440_v60 = vpop.f32.mrf.mxu2  ;;  %1814 = vmatpush.msrb.mxu1 %v106_v45  ;;  %1755 = vmatpush.msrb.mxu3 %v99_v46 }
 0x197   :  { %v10032_v29 = vadd.f32 %v1456_v12, %v1439_v55  ;;  %v1568_v5 = vadd.f32 %v1567_v37, %v1566_v47  ;;  %v1497_v27 = vrot.slane %v1496_v26, 2  ;;  %v101_v47 = vld [vmem:[%s13493_s6 + $0x50] sm:$0xff]  ;;  %v91_v37 = vld [vmem:[%s13493_s6] sm:$0xff] }
 0x198   :  { %v1402_v50 = vpop.f32.mrf.mxu0  ;;  %1795 = vmatpush.msrb.mxu0 %v101_v47 }
 0x199   :  { %v1403_v57 = vadd.f32 %v1402_v50, %v1383_v49  ;;  %v1540_v21 = vmul.f32 %v10032_v29, %v10032_v29  ;;  %v1569_v6 = vrot.slane %v1568_v5, 2  ;;  %v1498_v10 = vadd.f32 %v1497_v27, %v1496_v26  ;;  %v102_v49 = vld [vmem:[%s13493_s6 + $0x58] sm:$0xff] }
 0x19a   :  { %1815 = vmatpush.msrb.mxu1 %v102_v49  ;;  %v94_v26 = vld [vmem:[%s13493_s6 + $0x18] sm:$0xff] }
 0x19b   :  { %v1422_v23 = vadd.f32 %v1421_v52, %v1403_v57  ;;  %v1570_v28 = vadd.f32 %v1569_v6, %v1568_v5  ;;  %v1499_v18 = vrot.slane %v1498_v10, 1  ;;  %v95_v57 = vld [vmem:[%s13493_s6 + $0x20] sm:$0xff]  ;;  %v97_v52 = vld [vmem:[%s13493_s6 + $0x30] sm:$0xff]  ;;  %v92_v6 = vld [vmem:[%s13493_s6 + $0x8] sm:$0xff] }
 0x19c   :  { %1756 = vmatpush.msrb.mxu3 %v95_v57  ;;  %1796 = vmatpush.msrb.mxu0 %v97_v52  ;;  %v1941_v57 = vperm.slane %v9923_v4, 6 }
 0x19d   :  { %v1441_v41 = vadd.f32 %v1440_v60, %v1422_v23  ;;  %v1571_v39 = vrot.slane %v1570_v28, 1  ;;  %v1500_v9 = vadd.f32 %v1499_v18, %v1498_v10  ;;  %v98_v23 = vld [vmem:[%s13493_s6 + $0x38] sm:$0xff]  ;;  %v93_v60 = vld [vmem:[%s13493_s6 + $0x10] sm:$0xff] }
 0x19e   :  { %1816 = vmatpush.msrb.mxu1 %v98_v23  ;;  %1757 = vmatpush.msrb.mxu3 %v91_v37 }
 0x19f   :  { %v10034_v62 = vadd.f32 %v1456_v12, %v1441_v41  ;;  %v1572_v34 = vadd.f32 %v1571_v39, %v1570_v28  ;;  %1797 = vmatpush.msrb.mxu0 %v93_v60 }
 0x1a0   :  { %1817 = vmatpush.msrb.mxu1 %v94_v26  ;;  %v10118_v26 = vperm.slane %v1913_v42, 1 }
 0x1a1   :  { %v1522_v63 = vadd.f32 %v10034_v62, %v10032_v29  ;;  %v1544_v1 = vmul.f32 %v10034_v62, %v10034_v62 }
 0x1a3   :  { %v1523_v3 = vrot.slane %v1522_v63, 4  ;;  %v1594_v0 = vadd.f32 %v1544_v1, %v1540_v21 }
 0x1a5   :  { %v1524_v7 = vadd.f32 %v1523_v3, %v1522_v63  ;;  %v1595_v8 = vrot.slane %v1594_v0, 4  ;;  %v104_v63 = vld [vmem:[%s13493_s6 + $0x68] sm:$0xff] }
 0x1a6   :  { %1774 = vmatpush.msra.mxu3 %v104_v63  ;;  %v100_v3 = vld [vmem:[%s13493_s6 + $0x48] sm:$0xff] }
 0x1a7   :  { %v1525_v12 = vrot.slane %v1524_v7, 2  ;;  %v1596_v13 = vadd.f32 %v1595_v8, %v1594_v0  ;;  %v96_v0 = vld [vmem:[%s13493_s6 + $0x28] sm:$0xff] }
 0x1a8   :  { %1775 = vmatpush.msra.mxu3 %v100_v3 }
 0x1a9   :  { %v1526_v14 = vadd.f32 %v1525_v12, %v1524_v7  ;;  %v1597_v17 = vrot.slane %v1596_v13, 2 }
 0x1aa   :  { %1776 = vmatpush.msra.mxu3 %v96_v0 }
 0x1ab   :  { %v1527_v53 = vrot.slane %v1526_v14, 1  ;;  %v1598_v15 = vadd.f32 %v1597_v17, %v1596_v13 }
 0x1ac   :  { %1777 = vmatpush.msra.mxu3 %v92_v6 }
 0x1ad   :  { %v1528_v30 = vadd.f32 %v1527_v53, %v1526_v14  ;;  %v1599_v31 = vrot.slane %v1598_v15, 1 }
 0x1af   :  { %v1600_v61 = vadd.f32 %v1599_v31, %v1598_v15  ;;  %v1613_v35 = vsel %vm1609_vm4, %v1528_v30, %v1500_v9 }
 0x1b1   :  { %v1630_v36 = vsel %vm1626_vm5, %v1600_v61, %v1572_v34  ;;  %v1910_v34 = vperm.slane %v9766_v44, 1  ;;  %v1911_v61 = vperm.slane %v9766_v44, 5 }
 0x1b2   :  { %v1638_v38 = vsel %vm197_vm2, %v1613_v35, %v1630_v36  ;;  %v1912_v35 = vperm.slane %v9923_v4, 1 }
 0x1b3   :  { %1715 = vmatmul.f32.vlgmr.msra.gmra.mxu2 %v1638_v38  ;;  %v10103_v46 = vperm.slane %v1910_v34, 1  ;;  %v10105_v47 = vperm.slane %v1911_v61, 1 }
 0x1b4   :  { %v10107_v49 = vperm.slane %v1912_v35, 1 }
 0x1d6   :  { %v1656_v50 = vpop.f32.mrf.mxu3 }
 0x1f0   :  { %v1676_v40 = vpop.f32.mrf.mxu0 }
 0x1f1   :  { %v1677_v58 = vadd.f32 %v1676_v40, %v1656_v50  ;;  %v1939_v50 = vperm.slane %v9766_v44, 6 }
 0x1f3   :  { %v10122_v3 = vperm.slane %v1939_v50, 2 }
 0x210   :  { %v1696_v55 = vpop.f32.mrf.mxu1 }
 0x211   :  { %v1697_v41 = vadd.f32 %v1696_v55, %v1677_v58  ;;  %v1940_v55 = vperm.slane %v9923_v4, 2 }
 0x213   :  { %v10124_v0 = vperm.slane %v1940_v55, 2 }
 0x236   :  { %v1716_v5 = vpop.f32.mrf.mxu2 }
 0x237   :  { %v1717_v21 = vadd.f32 %v1716_v5, %v1697_v41  ;;  %v10120_v5 = vperm.slane %v1938_v43, 2 }
 0x239   :  { %v1719_v1 = vmul.f32 0.00390625, %v1717_v21 }
 0x23b   :  { %v1720_v27 = vmul.f32 %v1719_v1, %v1719_v1 }
 0x23d   :  { %v1722_v7 = vrot.slane %v1720_v27, 6  ;;  %v10126_v27 = vperm.slane %v1941_v57, 2 }
 0x23f   :  { %v1724_v8 = vsub.f32 %v1719_v1, %v1722_v7 }
 0x241   :  { %v1725_v10 = vmax.f32 %v1724_v8, 0.0 }
 0x243   :  { %v1726_v12 = vadd.f32 1e-05, %v1725_v10 }
 0x245   :  { %8698 = vrsqrt.f32 %v1726_v12  ;;  %vm1733_vm8 = vweird.f32 %v1726_v12 }
 0x24b   :  { %v8699_v28 = vpop.eup %8698 }
 0x24c   :  { %v1728_v13 = vmul.f32 %v8699_v28, %v1726_v12  ;;  %vm1734_vm7 = vweird.f32 %v8699_v28 }
 0x24d   :  { %vm1735_vm9 = vmor %vm1733_vm8, %vm1734_vm7 }
 0x24e   :  { %v1729_v14 = vmul.f32 %v8699_v28, %v1728_v13 }
 0x250   :  { %v1730_v17 = vmul.f32 0.5, %v1729_v14 }
 0x252   :  { %v1731_v18 = vsub.f32 1.5, %v1730_v17 }
 0x254   :  { %v1732_v53 = vmul.f32 %v8699_v28, %v1731_v18 }
 0x256   :  { %v1736_v39 = vsel %vm1735_vm9, %v8699_v28, %v1732_v53 }
 0x257   :  { %v1737_v15 = vsel %vm197_vm2, %v1719_v1, %v1736_v39 }
 0x258   :  { %6644 = vmatmul.msk.f32.vlgmr.msrb.gmra.mxu3 %vm1738_vm10, %v1737_v15  ;;  %6646 = vmatmul.msk.f32.vlgmr.msrb.gmra.mxu0 %vm1738_vm10, %v1737_v15 }
 0x259   :  { %6647 = vmatmul.msk.f32.vlgmr.msrb.gmra.mxu1 %vm1738_vm10, %v1737_v15 }
 0x260   :  { %6645 = vmatmul.msk.f32.vlgmr.msra.gmra.mxu3 %vm1738_vm10, %v1737_v15 }
 0x2d5   :  { %v1799_v30 = vpop.f32.mrf.mxu0 }
 0x2d6   :  { %1840 = vst [vmem:[#allocation1 + $0x12] sm:$0xff] %v1799_v30  ;;  %v1819_v31 = vpop.f32.mrf.mxu1  ;;  %v1827_v36 = vrot.slane %v1799_v30, 6 }
 0x2d7   :  { %1841 = vst [vmem:[#allocation1 + $0x1b] sm:$0xff] %v1819_v31  ;;  %v1828_v38 = vrot.slane %v1819_v31, 5 }
 0x2d9   :  { %v1831_v52 = vsel %vm1830_vm11, %v1827_v36, %v1828_v38  ;;  %v1834_v58 = vsel %vm1626_vm5, %v1827_v36, %v1828_v38 }
 0x2db   :  { %v1759_v9 = vpop.f32.mrf.mxu3 }
 0x2dc   :  { %1838 = vst [vmem:[#allocation1] sm:$0xff] %v1759_v9 }
 0x2e3   :  { %v1779_v40 = vpop.f32.mrf.mxu3 }
 0x2e4   :  { %v1826_v45 = vrot.slane %v1779_v40, 7  ;;  %1839 = vst [vmem:[#allocation1 + $0x9] sm:$0xff] %v1779_v40 }
 0x2e6   :  { %v1829_v23 = vsel %vm183_vm0, %v1759_v9, %v1826_v45  ;;  %v1833_v37 = vsel %vm1609_vm4, %v1759_v9, %v1826_v45 }
 0x2e7   :  { %v1832_v60 = vsel %vm197_vm2, %v1829_v23, %v1831_v52  ;;  %v1836_v41 = vsel %vm1835_vm12, %v1833_v37, %v1834_v58 }
 0x2e8   :  { %v1837_v44 = vrot.slane %v1836_v41, 1  ;;  %v1846_v21 = vperm.slane %v1832_v60, 0  ;;  %v1847_v63 = vperm.slane %v1832_v60, 1  ;;  %v1848_v4 = vperm.slane %v1832_v60, 2 }
 0x2e9   :  { %v1849_v1 = vperm.slane %v1832_v60, 3 }
 0x2ea   :  { %v1850_v6 = vperm.slane %v1837_v44, 0  ;;  %v1851_v7 = vperm.slane %v1837_v44, 1  ;;  %v1852_v8 = vperm.slane %v1837_v44, 2  ;;  %v1853_v10 = vperm.slane %v1837_v44, 3 }
 0x2eb   :  { %v1862_v12 = vsub.f32 %v9788_v20, %v1846_v21  ;;  %v1863_v28 = vsub.f32 %v9867_v22, %v1847_v63  ;;  %v1864_v13 = vsub.f32 %v9946_v51, %v1848_v4  ;;  %v1865_v14 = vsub.f32 %v10021_v25, %v1849_v1  ;;  %v1843_v17 = vld [vmem:[#allocation1 + $0x2] ss:$9 sm:$0xff] }
 0x2ec   :  { %v1866_v18 = vsub.f32 %v9783_v2, %v1846_v21  ;;  %v1867_v53 = vsub.f32 %v9862_v11, %v1847_v63  ;;  %v1868_v39 = vsub.f32 %v9941_v48, %v1848_v4  ;;  %v1869_v15 = vsub.f32 %v10016_v32, %v1849_v1  ;;  %v1845_v30 = vld [vmem:[#allocation1 + $0x3] ss:$9 sm:$0xff] }
 0x2ed   :  { %v1870_v31 = vsub.f32 %v9817_v24, %v1850_v6  ;;  %v1871_v20 = vsub.f32 %v9898_v56, %v1851_v7  ;;  %v1872_v22 = vsub.f32 %v9975_v54, %v1852_v8  ;;  %v1873_v51 = vsub.f32 %v10032_v29, %v1853_v10 }
 0x2ee   :  { %v1874_v25 = vsub.f32 %v9825_v33, %v1850_v6  ;;  %v1875_v9 = vsub.f32 %v9903_v59, %v1851_v7  ;;  %v1876_v2 = vsub.f32 %v9980_v16, %v1852_v8  ;;  %v1877_v11 = vsub.f32 %v10034_v62, %v1853_v10 }
 0x2ef   :  { %v1878_v48 = vperm.slane %v1843_v17, 0  ;;  %v1879_v34 = vperm.slane %v1843_v17, 1  ;;  %v1880_v32 = vperm.slane %v1843_v17, 2  ;;  %v1881_v61 = vperm.slane %v1843_v17, 3 }
 0x2f0   :  { %v1882_v35 = vperm.slane %v1845_v30, 0  ;;  %v1883_v24 = vperm.slane %v1845_v30, 1  ;;  %v1884_v36 = vperm.slane %v1845_v30, 2  ;;  %v1885_v56 = vperm.slane %v1845_v30, 3 }
 0x2f1   :  { %v1894_v38 = vmul.f32 %v1878_v48, %v1862_v12  ;;  %v1895_v54 = vmul.f32 %v1879_v34, %v1863_v28  ;;  %v1896_v40 = vmul.f32 %v1880_v32, %v1864_v13  ;;  %v1897_v29 = vmul.f32 %v1881_v61, %v1865_v14 }
 0x2f2   :  { %v1898_v42 = vmul.f32 %v1878_v48, %v1866_v18  ;;  %v1899_v33 = vmul.f32 %v1879_v34, %v1867_v53  ;;  %v1900_v43 = vmul.f32 %v1880_v32, %v1868_v39  ;;  %v1901_v59 = vmul.f32 %v1881_v61, %v1869_v15 }
 0x2f3   :  { %v1902_v45 = vmul.f32 %v1882_v35, %v1870_v31  ;;  %v1903_v16 = vmul.f32 %v1883_v24, %v1871_v20  ;;  %v1904_v50 = vmul.f32 %v1884_v36, %v1872_v22  ;;  %v1905_v62 = vmul.f32 %v1885_v56, %v1873_v51 }
 0x2f4   :  { %v1906_v55 = vmul.f32 %v1882_v35, %v1874_v25  ;;  %v1907_v57 = vmul.f32 %v1883_v24, %v1875_v9  ;;  %v1908_v52 = vmul.f32 %v1884_v36, %v1876_v2  ;;  %v1909_v58 = vmul.f32 %v1885_v56, %v1877_v11 }
 0x2f5   :  { %v1922_v23 = vmul.f32 %v10103_v46, %v1894_v38  ;;  %v1923_v37 = vmul.f32 %v10105_v47, %v1895_v54  ;;  %v1924_v60 = vmul.f32 %v10107_v49, %v1896_v40  ;;  %v1925_v41 = vmul.f32 %v10118_v26, %v1897_v29 }
 0x2f6   :  { %v1926_v44 = vmul.f32 %v10103_v46, %v1898_v42  ;;  %v1927_v21 = vmul.f32 %v10105_v47, %v1899_v33  ;;  %v1928_v63 = vmul.f32 %v10107_v49, %v1900_v43  ;;  %v1929_v4 = vmul.f32 %v10118_v26, %v1901_v59 }
 0x2f7   :  { %v1930_v1 = vmul.f32 %v10103_v46, %v1902_v45  ;;  %v1931_v6 = vmul.f32 %v10105_v47, %v1903_v16  ;;  %v1932_v7 = vmul.f32 %v10107_v49, %v1904_v50  ;;  %v1933_v8 = vmul.f32 %v10118_v26, %v1905_v62 }
 0x2f8   :  { %v1934_v10 = vmul.f32 %v10103_v46, %v1906_v55  ;;  %v1935_v12 = vmul.f32 %v10105_v47, %v1907_v57  ;;  %v1936_v28 = vmul.f32 %v10107_v49, %v1908_v52  ;;  %v1937_v13 = vmul.f32 %v10118_v26, %v1909_v58 }
 0x2f9   :  { %v1950_v14 = vadd.f32 %v10120_v5, %v1922_v23  ;;  %v1951_v17 = vadd.f32 %v10122_v3, %v1923_v37  ;;  %v1952_v18 = vadd.f32 %v10124_v0, %v1924_v60  ;;  %v1953_v53 = vadd.f32 %v10126_v27, %v1925_v41 }
 0x2fa   :  { %v1954_v39 = vadd.f32 %v10120_v5, %v1926_v44  ;;  %v1955_v15 = vadd.f32 %v10122_v3, %v1927_v21  ;;  %v1956_v46 = vadd.f32 %v10124_v0, %v1928_v63  ;;  %v1957_v47 = vadd.f32 %v10126_v27, %v1929_v4 }
 0x2fb   :  { %v1958_v49 = vadd.f32 %v10120_v5, %v1930_v1  ;;  %v1959_v26 = vadd.f32 %v10122_v3, %v1931_v6  ;;  %v1960_v30 = vadd.f32 %v10124_v0, %v1932_v7  ;;  %v1961_v31 = vadd.f32 %v10126_v27, %v1933_v8 }
 0x2fc   :  { %v1962_v20 = vadd.f32 %v10120_v5, %v1934_v10  ;;  %v1963_v22 = vadd.f32 %v10122_v3, %v1935_v12  ;;  %v1964_v51 = vadd.f32 %v10124_v0, %v1936_v28  ;;  %v1965_v25 = vadd.f32 %v10126_v27, %v1937_v13 }
 0x2fd   :  { %v1966_v9 = vmax.f32 %v1950_v14, 0.0  ;;  %v1967_v2 = vmax.f32 %v1951_v17, 0.0  ;;  %v1968_v11 = vmax.f32 %v1952_v18, 0.0  ;;  %v1969_v48 = vmax.f32 %v1953_v53, 0.0 }
 0x2fe   :  { %v1970_v34 = vmax.f32 %v1954_v39, 0.0  ;;  %v1971_v32 = vmax.f32 %v1955_v15, 0.0  ;;  %v1972_v61 = vmax.f32 %v1956_v46, 0.0  ;;  %v1973_v35 = vmax.f32 %v1957_v47, 0.0 }
 0x2ff   :  { %v1974_v24 = vmax.f32 %v1958_v49, 0.0  ;;  %v1975_v36 = vmax.f32 %v1959_v26, 0.0  ;;  %v1976_v56 = vmax.f32 %v1960_v30, 0.0  ;;  %v1977_v38 = vmax.f32 %v1961_v31, 0.0 }
 0x300   :  { %v1978_v54 = vmax.f32 %v1962_v20, 0.0  ;;  %v1979_v5 = vmax.f32 %v1963_v22, 0.0  ;;  %v1980_v40 = vmax.f32 %v1964_v51, 0.0  ;;  %v1981_v3 = vmax.f32 %v1965_v25, 0.0 }
 0x301   :  { %v1982_v29 = vpack.c.bf16 %v1967_v2, %v1966_v9  ;;  %v1983_v0 = vpack.c.bf16 %v1969_v48, %v1968_v11  ;;  %v1984_v42 = vpack.c.bf16 %v1971_v32, %v1970_v34  ;;  %v1985_v27 = vpack.c.bf16 %v1973_v35, %v1972_v61 }
 0x302   :  { %v1986_v33 = vpack.c.bf16 %v1975_v36, %v1974_v24  ;;  %v1987_v43 = vpack.c.bf16 %v1977_v38, %v1976_v56  ;;  %v1988_v59 = vpack.c.bf16 %v1979_v5, %v1978_v54  ;;  %v1989_v45 = vpack.c.bf16 %v1981_v3, %v1980_v40 }
 0x303   :  { %v1998_v16 = vunpack.c.l.b16 %v1982_v29  ;;  %v1999_v50 = vunpack.c.h.b16 %v1982_v29  ;;  %v2000_v62 = vunpack.c.l.b16 %v1983_v0  ;;  %v2001_v55 = vunpack.c.h.b16 %v1983_v0 }
 0x304   :  { %v2002_v57 = vunpack.c.l.b16 %v1984_v42  ;;  %v2003_v52 = vunpack.c.h.b16 %v1984_v42  ;;  %v2004_v58 = vunpack.c.l.b16 %v1985_v27  ;;  %v2005_v23 = vunpack.c.h.b16 %v1985_v27 }
 0x305   :  { %v2006_v37 = vunpack.c.l.b16 %v1986_v33  ;;  %v2007_v60 = vunpack.c.h.b16 %v1986_v33  ;;  %v2008_v41 = vunpack.c.l.b16 %v1987_v43  ;;  %v2009_v44 = vunpack.c.h.b16 %v1987_v43 }
 0x306   :  { %v2010_v21 = vunpack.c.l.b16 %v1988_v59  ;;  %v2011_v63 = vunpack.c.h.b16 %v1988_v59  ;;  %v2012_v4 = vunpack.c.l.b16 %v1989_v45  ;;  %v2013_v1 = vunpack.c.h.b16 %v1989_v45 }
 0x307   :  { %v2014_v6 = vpack.c.b16 %v2002_v57, %v1998_v16  ;;  %v2015_v7 = vpack.c.b16 %v2003_v52, %v1999_v50  ;;  %v2016_v8 = vpack.c.b16 %v2004_v58, %v2000_v62  ;;  %v2017_v10 = vpack.c.b16 %v2005_v23, %v2001_v55 }
 0x308   :  { %v2018_v12 = vpack.c.b16 %v2010_v21, %v2006_v37  ;;  %v2019_v28 = vpack.c.b16 %v2011_v63, %v2007_v60  ;;  %v2020_v13 = vpack.c.b16 %v2012_v4, %v2008_v41  ;;  %v2021_v14 = vpack.c.b16 %v2013_v1, %v2009_v44 }
 0x309   :  { %v2023_v17 = vshrl.u32 %v2014_v6, 16  ;;  %v2030_v18 = vshrl.u32 %v2015_v7, 16  ;;  %v2026_v53 = vshll.u32 %v2014_v6, 16  ;;  %v2033_v39 = vshll.u32 %v2015_v7, 16 }
 0x30a   :  { %v2037_v15 = vshrl.u32 %v2016_v8, 16  ;;  %v2044_v46 = vshrl.u32 %v2017_v10, 16  ;;  %v2040_v26 = vshll.u32 %v2016_v8, 16  ;;  %v2051_v30 = vshrl.u32 %v2018_v12, 16 }
 0x30b   :  { %v2025_v47 = vrot.slane %v2023_v17, 7  ;;  %v2032_v49 = vrot.slane %v2030_v18, 7  ;;  %v2047_v22 = vshll.u32 %v2017_v10, 16  ;;  %v2058_v51 = vshrl.u32 %v2019_v28, 16 }
 0x30c   :  { %v2039_v31 = vrot.slane %v2037_v15, 7  ;;  %v2046_v20 = vrot.slane %v2044_v46, 7  ;;  %v10176_v25 = vrot.slane %v2051_v30, 7  ;;  %v2054_v9 = vshll.u32 %v2018_v12, 16  ;;  %v6762_v12 = vld [vmem:[%s13494_s3 + $0xe0] sm:$0xf] }
 0x30d   :  { %v2061_v2 = vshll.u32 %v2019_v28, 16  ;;  %v2065_v11 = vshrl.u32 %v2020_v13, 16  ;;  %v2028_v48 = vor.u32 %v2026_v53, %v2025_v47  ;;  %v2035_v34 = vor.u32 %v2033_v39, %v2032_v49  ;;  %v8330_v28 = vld [vmem:[%s13494_s3 + $0xec] sm:$0xf0]  ;;  %v7018_v15 = vld [vmem:[%s13494_s3 + $0x2e0] sm:$0xf] }
 0x30e   :  { %v2042_v32 = vor.u32 %v2040_v26, %v2039_v31  ;;  %v10178_v61 = vrot.slane %v2058_v51, 7  ;;  %v2049_v35 = vor.u32 %v2047_v22, %v2046_v20  ;;  %v2068_v36 = vshll.u32 %v2020_v13, 16  ;;  %v6890_v13 = vld [vmem:[%s13494_s3 + $0x1e0] sm:$0xf]  ;;  %v8394_v46 = vld [vmem:[%s13494_s3 + $0x2ec] sm:$0xf0] }
 0x30f   :  { %v10180_v24 = vrot.slane %v2065_v11, 7  ;;  %v2072_v56 = vshrl.u32 %v2021_v14, 16  ;;  %v2056_v38 = vor.u32 %v2054_v9, %v10176_v25  ;;  %v2075_v3 = vshll.u32 %v2021_v14, 16  ;;  %v8362_v14 = vld [vmem:[%s13494_s3 + $0x1ec] sm:$0xf0] }
 0x310   :  { %v2063_v54 = vor.u32 %v2061_v2, %v10178_v61  ;;  %v10189_v29 = vsel %vm8864_vm6, 0, %v2028_v48  ;;  %v10193_v0 = vsel %vm8864_vm6, 0, %v2035_v34  ;;  %v10197_v42 = vsel %vm8864_vm6, 0, %v2042_v32  ;;  %v8426_v30 = vld [vmem:[%s13494_s3 + $0x3ec] sm:$0xf0] }
 0x311   :  { %v2070_v5 = vor.u32 %v2068_v36, %v10180_v24  ;;  %v10185_v40 = vrot.slane %v2072_v56, 7  ;;  %v10201_v27 = vsel %vm8864_vm6, 0, %v2049_v35  ;;  %v10206_v43 = vsel %vm8864_vm6, 0, %v2056_v38  ;;  %v6874_v9 = vld [vmem:[%s13494_s3 + $0x1c0] sm:$0xf] }
 0x312   :  { %v10210_v59 = vsel %vm8864_vm6, 0, %v2063_v54  ;;  %v2102_v45 = vsel %vm8864_vm6, %v2025_v47, 0  ;;  %v2103_v50 = vsel %vm8864_vm6, %v2032_v49, 0  ;;  %v2104_v62 = vsel %vm8864_vm6, %v2039_v31, 0  ;;  %v6746_v31 = vld [vmem:[%s13494_s3 + $0xc0] sm:$0xf] }
 0x313   :  { %v2077_v33 = vor.u32 %v2075_v3, %v10185_v40  ;;  %v10216_v16 = vsel %vm8864_vm6, 0, %v2070_v5  ;;  %v2105_v55 = vsel %vm8864_vm6, %v2046_v20, 0  ;;  %v2106_v57 = vsel %vm8864_vm6, %v10176_v25, 0  ;;  %v8326_v25 = vld [vmem:[%s13494_s3 + $0xcc] sm:$0xf0] }
 0x314   :  { %v2107_v52 = vsel %vm8864_vm6, %v10178_v61, 0  ;;  %v2126_v58 = vunpack.c.l.b16 %v10189_v29  ;;  %v2127_v23 = vunpack.c.l.b16 %v10193_v0  ;;  %v2128_v37 = vunpack.c.l.b16 %v10197_v42  ;;  %v8358_v2 = vld [vmem:[%s13494_s3 + $0x1cc] sm:$0xf0]  ;;  %v7002_v61 = vld [vmem:[%s13494_s3 + $0x2c0] sm:$0xf] }
 0x315   :  { %v2129_v60 = vunpack.c.l.b16 %v10201_v27  ;;  %v2130_v41 = vunpack.c.h.b16 %v10189_v29  ;;  %v2131_v44 = vunpack.c.h.b16 %v10193_v0  ;;  %v10238_v21 = vsel %vm8864_vm6, 0, %v2077_v33  ;;  %v8390_v35 = vld [vmem:[%s13494_s3 + $0x2cc] sm:$0xf0]  ;;  %v7130_v54 = vld [vmem:[%s13494_s3 + $0x3c0] sm:$0xf] }
 0x316   :  { %v2108_v63 = vsel %vm8864_vm6, %v10180_v24, 0  ;;  %v2132_v4 = vunpack.c.h.b16 %v10197_v42  ;;  %v2133_v1 = vunpack.c.h.b16 %v10201_v27  ;;  %v2134_v6 = vunpack.c.l.b16 %v2102_v45  ;;  %v8422_v5 = vld [vmem:[%s13494_s3 + $0x3cc] sm:$0xf0] }
 0x317   :  { %v2135_v7 = vunpack.c.l.b16 %v2103_v50  ;;  %v2136_v8 = vunpack.c.l.b16 %v2104_v62  ;;  %v2137_v10 = vunpack.c.l.b16 %v2105_v55  ;;  %v2109_v17 = vsel %vm8864_vm6, %v10185_v40, 0  ;;  %v6730_v50 = vld [vmem:[%s13494_s3 + $0xa0] sm:$0xf]  ;;  %v8322_v62 = vld [vmem:[%s13494_s3 + $0xac] sm:$0xf0] }
 0x318   :  { %v2138_v18 = vunpack.c.l.b16 %v10206_v43  ;;  %v2139_v53 = vunpack.c.l.b16 %v10210_v59  ;;  %v2140_v39 = vunpack.c.l.b16 %v10216_v16  ;;  %v2141_v47 = vunpack.c.l.b16 %v10238_v21 }
 0x319   :  { %v2150_v49 = vpack.c.b16 %v2127_v23, %v2126_v58  ;;  %v2151_v26 = vpack.c.b16 %v2129_v60, %v2128_v37  ;;  %v2142_v20 = vunpack.c.h.b16 %v10206_v43  ;;  %v2143_v22 = vunpack.c.h.b16 %v10210_v59  ;;  %v8354_v23 = vld [vmem:[%s13494_s3 + $0x1ac] sm:$0xf0] }
 0x31a   :  { %v2144_v51 = vunpack.c.h.b16 %v10216_v16  ;;  %v2145_v11 = vunpack.c.h.b16 %v10238_v21  ;;  %v2146_v48 = vunpack.c.l.b16 %v2106_v57  ;;  %v2154_v34 = vpack.c.b16 %v2135_v7, %v2134_v6  ;;  %v8386_v6 = vld [vmem:[%s13494_s3 + $0x2ac] sm:$0xf0]  ;;  %v7114_v7 = vld [vmem:[%s13494_s3 + $0x3a0] sm:$0xf] }
 0x31b   :  { %v2155_v32 = vpack.c.b16 %v2137_v10, %v2136_v8  ;;  %2174 = vst [vmem:[#allocation3 + $0x30] sm:$0xff] %v2150_v49  ;;  %v6763_v24 = vor.u32 %v8330_v28, %v6762_v12  ;;  %v6891_v36 = vor.u32 %v8362_v14, %v6890_v13  ;;  %v7019_v56 = vor.u32 %v8394_v46, %v7018_v15  ;;  %v8418_v8 = vld [vmem:[%s13494_s3 + $0x3ac] sm:$0xf0]  ;;  %v6714_v12 = vld [vmem:[%s13494_s3 + $0x80] sm:$0xf] }
 0x31c   :  { %2175 = vst [vmem:[#allocation3] sm:$0xff] %v2151_v26  ;;  %v7147_v38 = vor.u32 %v8426_v30, %v7146_v19  ;;  %v2147_v40 = vunpack.c.l.b16 %v2107_v52  ;;  %v2148_v3 = vunpack.c.l.b16 %v2108_v63  ;;  %v2149_v33 = vunpack.c.l.b16 %v2109_v17  ;;  %v6858_v52 = vld [vmem:[%s13494_s3 + $0x1a0] sm:$0xf]  ;;  %v8318_v28 = vld [vmem:[%s13494_s3 + $0x8c] sm:$0xf0] }
 0x31d   :  { %v2156_v45 = vpack.c.b16 %v2139_v53, %v2138_v18  ;;  %v2157_v55 = vpack.c.b16 %v2141_v47, %v2140_v39  ;;  %4722 = vmatpush.bf16.msrb.mxu2 %v6763_v24  ;;  %4741 = vmatpush.bf16.msrb.mxu3 %v6891_v36  ;;  %v6747_v57 = vor.u32 %v8326_v25, %v6746_v31  ;;  %v6986_v63 = vld [vmem:[%s13494_s3 + $0x2a0] sm:$0xf]  ;;  %v8350_v53 = vld [vmem:[%s13494_s3 + $0x18c] sm:$0xf0] }
 0x31e   :  { %v6875_v58 = vor.u32 %v8358_v2, %v6874_v9  ;;  %2178 = vst [vmem:[#allocation3 + $0x50] sm:$0x11] %v2154_v34  ;;  %4760 = vmatpush.bf16.msra.mxu0 %v7019_v56  ;;  %4779 = vmatpush.bf16.msra.mxu1 %v7147_v38  ;;  %v7003_v37 = vor.u32 %v8390_v35, %v7002_v61  ;;  %v6842_v18 = vld [vmem:[%s13494_s3 + $0x180] sm:$0xf]  ;;  %v8382_v47 = vld [vmem:[%s13494_s3 + $0x28c] sm:$0xf0] }
 0x31f   :  { %v7131_v60 = vor.u32 %v8422_v5, %v7130_v54  ;;  %2179 = vst [vmem:[#allocation3 + $0x20] sm:$0x11] %v2155_v32  ;;  %v2160_v10 = vpack.c.b16 %v2147_v40, %v2146_v48  ;;  %v2161_v13 = vpack.c.b16 %v2149_v33, %v2148_v3  ;;  %v6731_v14 = vor.u32 %v8322_v62, %v6730_v50  ;;  %v6970_v46 = vld [vmem:[%s13494_s3 + $0x280] sm:$0xf]  ;;  %v8414_v26 = vld [vmem:[%s13494_s3 + $0x38c] sm:$0xf0] }
 0x320   :  { %2180 = vst [vmem:[#allocation3 + $0x8] sm:$0xff] %v2156_v45  ;;  %v6859_v17 = vor.u32 %v8354_v23, %v6858_v52  ;;  %v6987_v39 = vor.u32 %v8386_v6, %v6986_v63  ;;  %v7115_v15 = vor.u32 %v8418_v8, %v7114_v7  ;;  %v7098_v49 = vld [vmem:[%s13494_s3 + $0x380] sm:$0xf]  ;;  %v6715_v19 = vor.u32 %v8318_v28, %v6714_v12  ;;  %v8314_v25 = vld [vmem:[%s13494_s3 + $0x6c] sm:$0xf0] }
 0x321   :  { %2181 = vst [vmem:[#allocation3 + $0x38] sm:$0xff] %v2157_v55  ;;  %4723 = vmatpush.bf16.msrb.mxu2 %v6747_v57  ;;  %4742 = vmatpush.bf16.msrb.mxu3 %v6875_v58  ;;  %v6843_v30 = vor.u32 %v8350_v53, %v6842_v18  ;;  %v6698_v31 = vld [vmem:[%s13494_s3 + $0x60] sm:$0xf]  ;;  %v6971_v9 = vor.u32 %v8382_v47, %v6970_v46  ;;  %v8346_v34 = vld [vmem:[%s13494_s3 + $0x16c] sm:$0xf0] }
 0x322   :  { %4761 = vmatpush.bf16.msra.mxu0 %v7003_v37  ;;  %4780 = vmatpush.bf16.msra.mxu1 %v7131_v60  ;;  %2184 = vst [vmem:[#allocation3 + $0x10] sm:$0x11] %v2160_v10  ;;  %v7099_v2 = vor.u32 %v8414_v26, %v7098_v49  ;;  %v6826_v48 = vld [vmem:[%s13494_s3 + $0x160] sm:$0xf]  ;;  %v8378_v61 = vld [vmem:[%s13494_s3 + $0x26c] sm:$0xf0]  ;;  %v6699_v36 = vor.u32 %v8314_v25, %v6698_v31 }
 0x323   :  { %2185 = vst [vmem:[#allocation3 + $0x40] sm:$0x11] %v2161_v13  ;;  %v6954_v32 = vld [vmem:[%s13494_s3 + $0x260] sm:$0xf]  ;;  %v8410_v24 = vld [vmem:[%s13494_s3 + $0x36c] sm:$0xf0]  ;;  %v6827_v56 = vor.u32 %v8346_v34, %v6826_v48 }
 0x324   :  { %v7082_v35 = vld [vmem:[%s13494_s3 + $0x360] sm:$0xf]  ;;  %v8310_v54 = vld [vmem:[%s13494_s3 + $0x4c] sm:$0xf0]  ;;  %v6955_v5 = vor.u32 %v8378_v61, %v6954_v32 }
 0x325   :  { %4724 = vmatpush.bf16.msrb.mxu2 %v6731_v14  ;;  %4743 = vmatpush.bf16.msrb.mxu3 %v6859_v17  ;;  %v6682_v38 = vld [vmem:[%s13494_s3 + $0x40] sm:$0xf]  ;;  %v7083_v40 = vor.u32 %v8410_v24, %v7082_v35  ;;  %v8342_v33 = vld [vmem:[%s13494_s3 + $0x14c] sm:$0xf0] }
 0x326   :  { %4762 = vmatpush.bf16.msra.mxu0 %v6987_v39  ;;  %4781 = vmatpush.bf16.msra.mxu1 %v7115_v15  ;;  %v6810_v3 = vld [vmem:[%s13494_s3 + $0x140] sm:$0xf]  ;;  %v8374_v50 = vld [vmem:[%s13494_s3 + $0x24c] sm:$0xf0]  ;;  %v6683_v57 = vor.u32 %v8310_v54, %v6682_v38 }
 0x327   :  { %v6938_v45 = vld [vmem:[%s13494_s3 + $0x240] sm:$0xf]  ;;  %v8406_v55 = vld [vmem:[%s13494_s3 + $0x34c] sm:$0xf0]  ;;  %v6811_v58 = vor.u32 %v8342_v33, %v6810_v3 }
 0x328   :  { %v7066_v62 = vld [vmem:[%s13494_s3 + $0x340] sm:$0xf]  ;;  %v8306_v23 = vld [vmem:[%s13494_s3 + $0x2c] sm:$0xf0]  ;;  %v6939_v60 = vor.u32 %v8374_v50, %v6938_v45 }
 0x329   :  { %4725 = vmatpush.bf16.msrb.mxu2 %v6715_v19  ;;  %4744 = vmatpush.bf16.msrb.mxu3 %v6843_v30  ;;  %v6666_v52 = vld [vmem:[%s13494_s3 + $0x20] sm:$0xf]  ;;  %v7067_v63 = vor.u32 %v8406_v55, %v7066_v62  ;;  %v8338_v6 = vld [vmem:[%s13494_s3 + $0x12c] sm:$0xf0] }
 0x32a   :  { %4763 = vmatpush.bf16.msra.mxu0 %v6971_v9  ;;  %4782 = vmatpush.bf16.msra.mxu1 %v7099_v2  ;;  %v6794_v37 = vld [vmem:[%s13494_s3 + $0x120] sm:$0xf]  ;;  %v8370_v8 = vld [vmem:[%s13494_s3 + $0x22c] sm:$0xf0]  ;;  %v6667_v18 = vor.u32 %v8306_v23, %v6666_v52 }
 0x32b   :  { %v6922_v7 = vld [vmem:[%s13494_s3 + $0x220] sm:$0xf]  ;;  %v8402_v12 = vld [vmem:[%s13494_s3 + $0x32c] sm:$0xf0]  ;;  %v6795_v53 = vor.u32 %v8338_v6, %v6794_v37 }
 0x32c   :  { %v7050_v10 = vld [vmem:[%s13494_s3 + $0x320] sm:$0xf]  ;;  %v8302_v13 = vld [vmem:[%s13494_s3 + $0xc] sm:$0xf0]  ;;  %v6923_v39 = vor.u32 %v8370_v8, %v6922_v7 }
 0x32d   :  { %4726 = vmatpush.bf16.msrb.mxu2 %v6699_v36  ;;  %4745 = vmatpush.bf16.msrb.mxu3 %v6827_v56  ;;  %v6650_v28 = vld [vmem:[%s13494_s3] sm:$0xf]  ;;  %v8334_v17 = vld [vmem:[%s13494_s3 + $0x10c] sm:$0xf0]  ;;  %v7051_v15 = vor.u32 %v8402_v12, %v7050_v10 }
 0x32e   :  { %4764 = vmatpush.bf16.msra.mxu0 %v6955_v5  ;;  %4783 = vmatpush.bf16.msra.mxu1 %v7083_v40  ;;  %v6778_v14 = vld [vmem:[%s13494_s3 + $0x100] sm:$0xf]  ;;  %v8366_v47 = vld [vmem:[%s13494_s3 + $0x20c] sm:$0xf0]  ;;  %v6651_v49 = vor.u32 %v8302_v13, %v6650_v28 }
 0x32f   :  { %v6906_v46 = vld [vmem:[%s13494_s3 + $0x200] sm:$0xf]  ;;  %v6779_v26 = vor.u32 %v8334_v17, %v6778_v14  ;;  %v8398_v30 = vld [vmem:[%s13494_s3 + $0x30c] sm:$0xf0] }
 0x330   :  { %v7034_v19 = vld [vmem:[%s13494_s3 + $0x300] sm:$0xf]  ;;  %v8458_v25 = vld [vmem:[%s13494_s3 + $0x4ec] sm:$0xf0]  ;;  %v6907_v48 = vor.u32 %v8366_v47, %v6906_v46 }
 0x331   :  { %4727 = vmatpush.bf16.msrb.mxu2 %v6683_v57  ;;  %4746 = vmatpush.bf16.msrb.mxu3 %v6811_v58  ;;  %v7274_v31 = vld [vmem:[%s13494_s3 + $0x4e0] sm:$0xf]  ;;  %v8490_v2 = vld [vmem:[%s13494_s3 + $0x5ec] sm:$0xf0]  ;;  %v7035_v34 = vor.u32 %v8398_v30, %v7034_v19 }
 0x332   :  { %4765 = vmatpush.bf16.msra.mxu0 %v6939_v60  ;;  %4784 = vmatpush.bf16.msra.mxu1 %v7067_v63  ;;  %v7402_v9 = vld [vmem:[%s13494_s3 + $0x5e0] sm:$0xf]  ;;  %v8522_v61 = vld [vmem:[%s13494_s3 + $0x6ec] sm:$0xf0]  ;;  %v7275_v35 = vor.u32 %v8458_v25, %v7274_v31 }
 0x333   :  { %v7530_v32 = vld [vmem:[%s13494_s3 + $0x6e0] sm:$0xf]  ;;  %v7403_v24 = vor.u32 %v8490_v2, %v7402_v9  ;;  %v8554_v56 = vld [vmem:[%s13494_s3 + $0x7ec] sm:$0xf0] }
 0x334   :  { %v7658_v36 = vld [vmem:[%s13494_s3 + $0x7e0] sm:$0xf]  ;;  %v8454_v54 = vld [vmem:[%s13494_s3 + $0x4cc] sm:$0xf0]  ;;  %v7531_v3 = vor.u32 %v8522_v61, %v7530_v32 }
 0x335   :  { %4728 = vmatpush.bf16.msrb.mxu2 %v6667_v18  ;;  %4747 = vmatpush.bf16.msrb.mxu3 %v6795_v53  ;;  %v7258_v38 = vld [vmem:[%s13494_s3 + $0x4c0] sm:$0xf]  ;;  %v8486_v40 = vld [vmem:[%s13494_s3 + $0x5cc] sm:$0xf0]  ;;  %v7659_v33 = vor.u32 %v8554_v56, %v7658_v36 }
 0x336   :  { %4766 = vmatpush.bf16.msra.mxu0 %v6923_v39  ;;  %4785 = vmatpush.bf16.msra.mxu1 %v7051_v15  ;;  %v7386_v5 = vld [vmem:[%s13494_s3 + $0x5c0] sm:$0xf]  ;;  %v8518_v50 = vld [vmem:[%s13494_s3 + $0x6cc] sm:$0xf0]  ;;  %v7259_v62 = vor.u32 %v8454_v54, %v7258_v38 }
 0x337   :  { %v7514_v45 = vld [vmem:[%s13494_s3 + $0x6c0] sm:$0xf]  ;;  %v7387_v55 = vor.u32 %v8486_v40, %v7386_v5  ;;  %v8550_v58 = vld [vmem:[%s13494_s3 + $0x7cc] sm:$0xf0] }
 0x338   :  { %v7642_v57 = vld [vmem:[%s13494_s3 + $0x7c0] sm:$0xf]  ;;  %v8450_v23 = vld [vmem:[%s13494_s3 + $0x4ac] sm:$0xf0]  ;;  %v7515_v63 = vor.u32 %v8518_v50, %v7514_v45 }
 0x339   :  { %4729 = vmatpush.bf16.msrb.mxu2 %v6651_v49  ;;  %4748 = vmatpush.bf16.msrb.mxu3 %v6779_v26  ;;  %v7242_v52 = vld [vmem:[%s13494_s3 + $0x4a0] sm:$0xf]  ;;  %v8482_v60 = vld [vmem:[%s13494_s3 + $0x5ac] sm:$0xf0]  ;;  %v7643_v6 = vor.u32 %v8550_v58, %v7642_v57 }
 0x33a   :  { %4767 = vmatpush.bf16.msra.mxu0 %v6907_v48  ;;  %4786 = vmatpush.bf16.msra.mxu1 %v7035_v34  ;;  %v7370_v37 = vld [vmem:[%s13494_s3 + $0x5a0] sm:$0xf]  ;;  %v8514_v8 = vld [vmem:[%s13494_s3 + $0x6ac] sm:$0xf0]  ;;  %v7243_v12 = vor.u32 %v8450_v23, %v7242_v52 }
 0x33b   :  { %v7498_v7 = vld [vmem:[%s13494_s3 + $0x6a0] sm:$0xf]  ;;  %v7371_v28 = vor.u32 %v8482_v60, %v7370_v37  ;;  %v8546_v13 = vld [vmem:[%s13494_s3 + $0x7ac] sm:$0xf0]  ;;  %v2265_v60 = vshll.u32 %v10189_v29, 16 }
 0x33c   :  { %4730 = vmatmul.bf16.vlgmr.msrb.gmra.mxu2 %v10189_v29  ;;  %4749 = vmatmul.bf16.vlgmr.msrb.gmra.mxu3 %v10193_v0  ;;  %v7626_v10 = vld [vmem:[%s13494_s3 + $0x7a0] sm:$0xf]  ;;  %v2194_v17 = vld [vmem:[#allocation3 + $0x50] sm:$0x11]  ;;  %v7499_v15 = vor.u32 %v8514_v8, %v7498_v7 }
 0x33d   :  { %4798 = vmatpush.bf16.msra.mxu2 %v7275_v35  ;;  %4817 = vmatpush.bf16.msra.mxu3 %v7403_v24  ;;  %v7226_v14 = vld [vmem:[%s13494_s3 + $0x480] sm:$0xf]  ;;  %v8446_v18 = vld [vmem:[%s13494_s3 + $0x48c] sm:$0xf0]  ;;  %v7627_v46 = vor.u32 %v8546_v13, %v7626_v10  ;;  %v2246_v26 = vunpack.c.l.b16 %v2194_v17 }
 0x33e   :  { %4768 = vmatmul.bf16.vlgmr.msra.gmra.mxu0 %v10197_v42  ;;  %4787 = vmatmul.bf16.vlgmr.msra.gmra.mxu1 %v10201_v27  ;;  %v7354_v53 = vld [vmem:[%s13494_s3 + $0x580] sm:$0xf]  ;;  %v8478_v39 = vld [vmem:[%s13494_s3 + $0x58c] sm:$0xf0]  ;;  %v7227_v19 = vor.u32 %v8446_v18, %v7226_v14  ;;  %v2263_v18 = vshrl.u32 %v10189_v29, 16 }
 0x33f   :  { %4836 = vmatpush.bf16.msrb.mxu0 %v7531_v3  ;;  %4855 = vmatpush.bf16.msrb.mxu1 %v7659_v33  ;;  %v7482_v47 = vld [vmem:[%s13494_s3 + $0x680] sm:$0xf]  ;;  %v8510_v49 = vld [vmem:[%s13494_s3 + $0x68c] sm:$0xf0]  ;;  %v7355_v30 = vor.u32 %v8478_v39, %v7354_v53  ;;  %v10572_v54 = vpack.c.b16 %v2246_v26, %v2246_v26  ;;  %v2247_v33 = vunpack.c.h.b16 %v2194_v17  ;;  %v2275_v53 = vshrl.u32 %v10193_v0, 16 }
 0x340   :  { %v7610_v31 = vld [vmem:[%s13494_s3 + $0x780] sm:$0xf]  ;;  %v8542_v25 = vld [vmem:[%s13494_s3 + $0x78c] sm:$0xf0]  ;;  %v7483_v32 = vor.u32 %v8510_v49, %v7482_v47 }
 0x341   :  { %4799 = vmatpush.bf16.msra.mxu2 %v7259_v62  ;;  %4818 = vmatpush.bf16.msra.mxu3 %v7387_v55  ;;  %v7210_v9 = vld [vmem:[%s13494_s3 + $0x460] sm:$0xf]  ;;  %v8442_v2 = vld [vmem:[%s13494_s3 + $0x46c] sm:$0xf0]  ;;  %v7611_v24 = vor.u32 %v8542_v25, %v7610_v31  ;;  %v10606_v13 = vpack.c.b16 %v2247_v33, %v2247_v33  ;;  %v2267_v31 = vrot.slane %v2265_v60, 1 }
 0x342   :  { %v7338_v48 = vld [vmem:[%s13494_s3 + $0x560] sm:$0xf]  ;;  %v8474_v34 = vld [vmem:[%s13494_s3 + $0x56c] sm:$0xf0]  ;;  %v7211_v5 = vor.u32 %v8442_v2, %v7210_v9 }
 0x343   :  { %4837 = vmatpush.bf16.msrb.mxu0 %v7515_v63  ;;  %4856 = vmatpush.bf16.msrb.mxu1 %v7643_v6  ;;  %v7466_v61 = vld [vmem:[%s13494_s3 + $0x660] sm:$0xf]  ;;  %v8506_v36 = vld [vmem:[%s13494_s3 + $0x66c] sm:$0xf0]  ;;  %v7339_v40 = vor.u32 %v8474_v34, %v7338_v48  ;;  %v2270_v63 = vshll.u32 %v10572_v54, 16 }
 0x344   :  { %v2195_v35 = vld [vmem:[#allocation3 + $0x20] sm:$0x11]  ;;  %v8538_v38 = vld [vmem:[%s13494_s3 + $0x76c] sm:$0xf0]  ;;  %v7467_v57 = vor.u32 %v8506_v36, %v7466_v61  ;;  %v2277_v61 = vshll.u32 %v10193_v0, 16 }
 0x345   :  { %4800 = vmatpush.bf16.msra.mxu2 %v7243_v12  ;;  %4819 = vmatpush.bf16.msra.mxu3 %v7371_v28  ;;  %v7594_v56 = vld [vmem:[%s13494_s3 + $0x760] sm:$0xf]  ;;  %v8438_v45 = vld [vmem:[%s13494_s3 + $0x44c] sm:$0xf0]  ;;  %v2248_v55 = vunpack.c.l.b16 %v2195_v35  ;;  %v2249_v6 = vunpack.c.h.b16 %v2195_v35  ;;  %v10637_v25 = vrot.slane %v2270_v63, 1  ;;  %v2282_v35 = vshll.u32 %v10606_v13, 16 }
 0x346   :  { %v7194_v3 = vld [vmem:[%s13494_s3 + $0x440] sm:$0xf]  ;;  %v8470_v62 = vld [vmem:[%s13494_s3 + $0x54c] sm:$0xf0]  ;;  %v7595_v58 = vor.u32 %v8538_v38, %v7594_v56  ;;  %v2289_v56 = vshll.u32 %v10197_v42, 16  ;;  %v2279_v63 = vrot.slane %v2277_v61, 1  ;;  %v2268_v61 = vor.u32 %v2267_v31, %v2263_v18 }
 0x347   :  { %4838 = vmatpush.bf16.msrb.mxu0 %v7499_v15  ;;  %4857 = vmatpush.bf16.msrb.mxu1 %v7627_v46  ;;  %v7322_v50 = vld [vmem:[%s13494_s3 + $0x540] sm:$0xf]  ;;  %v8502_v23 = vld [vmem:[%s13494_s3 + $0x64c] sm:$0xf0]  ;;  %v7195_v7 = vor.u32 %v8438_v45, %v7194_v3  ;;  %v10618_v39 = vpack.c.b16 %v2248_v55, %v2248_v55  ;;  %v10639_v9 = vpack.c.b16 %v2249_v6, %v2249_v6  ;;  %v2284_v6 = vrot.slane %v2282_v35, 1 }
 0x348   :  { %v7450_v52 = vld [vmem:[%s13494_s3 + $0x640] sm:$0xf]  ;;  %v7323_v8 = vor.u32 %v8470_v62, %v7322_v50  ;;  %v8534_v10 = vld [vmem:[%s13494_s3 + $0x74c] sm:$0xf0] }
 0x349   :  { %4801 = vmatpush.bf16.msra.mxu2 %v7227_v19  ;;  %4820 = vmatpush.bf16.msra.mxu3 %v7355_v30  ;;  %v7578_v37 = vld [vmem:[%s13494_s3 + $0x740] sm:$0xf]  ;;  %v8434_v28 = vld [vmem:[%s13494_s3 + $0x42c] sm:$0xf0]  ;;  %v7451_v15 = vor.u32 %v8502_v23, %v7450_v52  ;;  %v2294_v38 = vshll.u32 %v10618_v39, 16  ;;  %v2306_v52 = vshll.u32 %v10639_v9, 16 }
 0x34a   :  { %v7178_v12 = vld [vmem:[%s13494_s3 + $0x420] sm:$0xf]  ;;  %v8466_v17 = vld [vmem:[%s13494_s3 + $0x52c] sm:$0xf0]  ;;  %v7579_v26 = vor.u32 %v8534_v10, %v7578_v37 }
 0x34b   :  { %4839 = vmatpush.bf16.msrb.mxu0 %v7483_v32  ;;  %4858 = vmatpush.bf16.msrb.mxu1 %v7611_v24  ;;  %v7306_v14 = vld [vmem:[%s13494_s3 + $0x520] sm:$0xf]  ;;  %v8498_v47 = vld [vmem:[%s13494_s3 + $0x62c] sm:$0xf0]  ;;  %v7179_v2 = vor.u32 %v8434_v28, %v7178_v12 }
 0x34c   :  { %4735 = vmatmul.bf16.gmra.mxu2 %v10206_v43  ;;  %4754 = vmatmul.bf16.gmra.mxu3 %v10210_v59  ;;  %v7434_v46 = vld [vmem:[%s13494_s3 + $0x620] sm:$0xf]  ;;  %v8530_v19 = vld [vmem:[%s13494_s3 + $0x72c] sm:$0xf0]  ;;  %v7307_v48 = vor.u32 %v8466_v17, %v7306_v14 }
 0x34d   :  { %4802 = vmatpush.bf16.msra.mxu2 %v7211_v5  ;;  %4821 = vmatpush.bf16.msra.mxu3 %v7339_v40  ;;  %v7562_v49 = vld [vmem:[%s13494_s3 + $0x720] sm:$0xf]  ;;  %v8430_v34 = vld [vmem:[%s13494_s3 + $0x40c] sm:$0xf0]  ;;  %v7435_v50 = vor.u32 %v8498_v47, %v7434_v46  ;;  %v2291_v46 = vrot.slane %v2289_v56, 1  ;;  %v2296_v47 = vrot.slane %v2294_v38, 1 }
 0x34e   :  { %4773 = vmatmul.bf16.gmra.mxu0 %v10216_v16  ;;  %4792 = vmatmul.bf16.gmra.mxu1 %v10238_v21  ;;  %v7162_v30 = vld [vmem:[%s13494_s3 + $0x400] sm:$0xf]  ;;  %v10649_v24 = vld [vmem:[#allocation3 + $0x10] sm:$0x11]  ;;  %v7563_v62 = vor.u32 %v8530_v19, %v7562_v49  ;;  %v2299_v49 = vshrl.u32 %v10201_v27, 16 }
 0x34f   :  { %4840 = vmatpush.bf16.msrb.mxu0 %v7467_v57  ;;  %4859 = vmatpush.bf16.msrb.mxu1 %v7595_v58  ;;  %v7290_v32 = vld [vmem:[%s13494_s3 + $0x500] sm:$0xf]  ;;  %v8462_v36 = vld [vmem:[%s13494_s3 + $0x50c] sm:$0xf0]  ;;  %v2301_v58 = vshll.u32 %v10201_v27, 16  ;;  %v7163_v23 = vor.u32 %v8430_v34, %v7162_v30  ;;  %v2250_v17 = vunpack.c.l.b16 %v10649_v24 }
 0x350   :  { %v7786_v5 = vld [vmem:[%s13494_s3 + $0x8e0] sm:$0xf]  ;;  %v8586_v3 = vld [vmem:[%s13494_s3 + $0x8ec] sm:$0xf0]  ;;  %v7291_v37 = vor.u32 %v8462_v36, %v7290_v32 }
 0x351   :  { %4803 = vmatpush.bf16.msra.mxu2 %v7195_v7  ;;  %4822 = vmatpush.bf16.msra.mxu3 %v7323_v8  ;;  %v7418_v40 = vld [vmem:[%s13494_s3 + $0x600] sm:$0xf]  ;;  %v8618_v45 = vld [vmem:[%s13494_s3 + $0x9ec] sm:$0xf0]  ;;  %v7787_v8 = vor.u32 %v8586_v3, %v7786_v5  ;;  %v10725_v3 = vpack.c.b16 %v2250_v17, %v2250_v17  ;;  %v2313_v17 = vshll.u32 %v10206_v43, 16 }
 0x352   :  { %v7914_v33 = vld [vmem:[%s13494_s3 + $0x9e0] sm:$0xf]  ;;  %v8494_v55 = vld [vmem:[%s13494_s3 + $0x60c] sm:$0xf0] }
 0x353   :  { %4841 = vmatpush.bf16.msrb.mxu0 %v7451_v15  ;;  %4860 = vmatpush.bf16.msrb.mxu1 %v7579_v26  ;;  %v7546_v57 = vld [vmem:[%s13494_s3 + $0x700] sm:$0xf]  ;;  %v8526_v60 = vld [vmem:[%s13494_s3 + $0x70c] sm:$0xf0]  ;;  %v7915_v10 = vor.u32 %v8618_v45, %v7914_v33  ;;  %v2287_v15 = vshrl.u32 %v10197_v42, 16  ;;  %v7419_v19 = vor.u32 %v8494_v55, %v7418_v40  ;;  %v2251_v33 = vunpack.c.h.b16 %v10649_v24 }
 0x354   :  { %v8042_v7 = vld [vmem:[%s13494_s3 + $0xae0] sm:$0xf]  ;;  %v8650_v12 = vld [vmem:[%s13494_s3 + $0xaec] sm:$0xf0]  ;;  %v7547_v30 = vor.u32 %v8526_v60, %v7546_v57  ;;  %v10730_v45 = vsel %vm280_vm13, %v2268_v61, %v10637_v25 }
 0x355   :  { %4804 = vmatpush.bf16.msra.mxu2 %v7179_v2  ;;  %4823 = vmatpush.bf16.msra.mxu3 %v7307_v48  ;;  %v8170_v28 = vld [vmem:[%s13494_s3 + $0xbe0] sm:$0xf]  ;;  %v8682_v14 = vld [vmem:[%s13494_s3 + $0xbec] sm:$0xf0]  ;;  %v2303_v2 = vrot.slane %v2301_v58, 1  ;;  %v2308_v48 = vrot.slane %v2306_v52, 1  ;;  %v8043_v35 = vor.u32 %v8650_v12, %v8042_v7 }
 0x356   :  { %v10697_v26 = vld [vmem:[#allocation3 + $0x40] sm:$0x11]  ;;  %v8582_v32 = vld [vmem:[%s13494_s3 + $0x8cc] sm:$0xf0]  ;;  %v8171_v36 = vor.u32 %v8682_v14, %v8170_v28 }
 0x357   :  { %4842 = vmatpush.bf16.msrb.mxu0 %v7435_v50  ;;  %4861 = vmatpush.bf16.msrb.mxu1 %v7563_v62  ;;  %v7770_v34 = vld [vmem:[%s13494_s3 + $0x8c0] sm:$0xf]  ;;  %v8614_v38 = vld [vmem:[%s13494_s3 + $0x9cc] sm:$0xf0]  ;;  %v2280_v50 = vor.u32 %v2279_v63, %v2275_v53  ;;  %v2292_v62 = vor.u32 %v2291_v46, %v2287_v15  ;;  %v2252_v55 = vunpack.c.l.b16 %v10697_v26  ;;  %v2304_v57 = vor.u32 %v2303_v2, %v2299_v49 }
 0x358   :  { %v7898_v56 = vld [vmem:[%s13494_s3 + $0x9c0] sm:$0xf]  ;;  %v8646_v18 = vld [vmem:[%s13494_s3 + $0xacc] sm:$0xf0]  ;;  %v7771_v58 = vor.u32 %v8582_v32, %v7770_v34  ;;  %v2253_v24 = vunpack.c.h.b16 %v10697_v26  ;;  %v10772_v15 = vpack.c.b16 %v2251_v33, %v2251_v33  ;;  %v2318_v49 = vshll.u32 %v10725_v3, 16 }
 0x359   :  { %4805 = vmatpush.bf16.msra.mxu2 %v7163_v23  ;;  %4824 = vmatpush.bf16.msra.mxu3 %v7291_v37  ;;  %v8026_v5 = vld [vmem:[%s13494_s3 + $0xac0] sm:$0xf]  ;;  %v8678_v40 = vld [vmem:[%s13494_s3 + $0xbcc] sm:$0xf0]  ;;  %v7899_v52 = vor.u32 %v8614_v38, %v7898_v56  ;;  %v10746_v37 = vsel %vm280_vm13, %v2280_v50, %v2284_v6  ;;  %v10760_v6 = vsel %vm280_vm13, %v2292_v62, %v2296_v47  ;;  %v2325_v26 = vshll.u32 %v10210_v59, 16 }
 0x35a   :  { %v8154_v31 = vld [vmem:[%s13494_s3 + $0xbc0] sm:$0xf]  ;;  %v8578_v25 = vld [vmem:[%s13494_s3 + $0x8ac] sm:$0xf0]  ;;  %v8027_v60 = vor.u32 %v8646_v18, %v8026_v5  ;;  %v10763_v12 = vsel %vm280_vm13, %v2304_v57, %v2308_v48  ;;  %v2311_v32 = vshrl.u32 %v10206_v43, 16  ;;  %v10793_v61 = vpack.c.b16 %v2253_v24, %v2253_v24 }
 0x35b   :  { %4843 = vmatpush.bf16.msrb.mxu0 %v7419_v19  ;;  %4862 = vmatpush.bf16.msrb.mxu1 %v7547_v30  ;;  %v7754_v23 = vld [vmem:[%s13494_s3 + $0x8a0] sm:$0xf]  ;;  %v8155_v63 = vor.u32 %v8678_v40, %v8154_v31  ;;  %v8610_v7 = vld [vmem:[%s13494_s3 + $0x9ac] sm:$0xf0]  ;;  %v10784_v19 = vpack.c.b16 %v2252_v55, %v2252_v55  ;;  %v2315_v31 = vrot.slane %v2313_v17, 1  ;;  %v2323_v40 = vshrl.u32 %v10210_v59, 16 }
 0x35c   :  { %v7882_v53 = vld [vmem:[%s13494_s3 + $0x9a0] sm:$0xf]  ;;  %4806 = vmatmul.bf16.vlgmr.msra.gmra.mxu2 %v10730_v45  ;;  %4825 = vmatmul.bf16.vlgmr.msra.gmra.mxu3 %v10746_v37  ;;  %v8674_v14 = vld [vmem:[%s13494_s3 + $0xbac] sm:$0xf0]  ;;  %v7755_v30 = vor.u32 %v8578_v25, %v7754_v23  ;;  %v2330_v33 = vshll.u32 %v10772_v15, 16  ;;  %v2335_v50 = vshrl.u32 %v10216_v16, 16 }
 0x35d   :  { %4874 = vmatpush.bf16.msrb.mxu2 %v7787_v8  ;;  %4893 = vmatpush.bf16.msrb.mxu3 %v7915_v10  ;;  %v8010_v8 = vld [vmem:[%s13494_s3 + $0xaa0] sm:$0xf]  ;;  %v8642_v10 = vld [vmem:[%s13494_s3 + $0xaac] sm:$0xf0]  ;;  %v7883_v2 = vor.u32 %v8610_v7, %v7882_v53  ;;  %v2320_v62 = vrot.slane %v2318_v49, 1  ;;  %v2327_v55 = vrot.slane %v2325_v26, 1 }
 0x35e   :  { %v8138_v28 = vld [vmem:[%s13494_s3 + $0xba0] sm:$0xf]  ;;  %4844 = vmatmul.bf16.vlgmr.msrb.gmra.mxu0 %v10760_v6  ;;  %4863 = vmatmul.bf16.vlgmr.msrb.gmra.mxu1 %v10763_v12  ;;  %v8574_v47 = vld [vmem:[%s13494_s3 + $0x88c] sm:$0xf0]  ;;  %v2337_v57 = vshll.u32 %v10216_v16, 16  ;;  %v2349_v25 = vshll.u32 %v10238_v21, 16 }
 0x35f   :  { %4912 = vmatpush.bf16.msra.mxu0 %v8043_v35  ;;  %4931 = vmatpush.bf16.msra.mxu1 %v8171_v36  ;;  %v7738_v46 = vld [vmem:[%s13494_s3 + $0x880] sm:$0xf]  ;;  %v8606_v34 = vld [vmem:[%s13494_s3 + $0x98c] sm:$0xf0]  ;;  %v8011_v35 = vor.u32 %v8642_v10, %v8010_v8  ;;  %v8139_v36 = vor.u32 %v8674_v14, %v8138_v28  ;;  %v2354_v53 = vshll.u32 %v10793_v61, 16 }
 0x360   :  { %v7866_v48 = vld [vmem:[%s13494_s3 + $0x980] sm:$0xf]  ;;  %v8638_v38 = vld [vmem:[%s13494_s3 + $0xa8c] sm:$0xf0]  ;;  %v2339_v49 = vrot.slane %v2337_v57, 1 }
 0x361   :  { %4875 = vmatpush.bf16.msrb.mxu2 %v7771_v58  ;;  %4894 = vmatpush.bf16.msrb.mxu3 %v7899_v52  ;;  %v7994_v56 = vld [vmem:[%s13494_s3 + $0xa80] sm:$0xf]  ;;  %v8670_v18 = vld [vmem:[%s13494_s3 + $0xb8c] sm:$0xf0]  ;;  %v2342_v58 = vshll.u32 %v10784_v19, 16  ;;  %v7739_v52 = vor.u32 %v8574_v47, %v7738_v46  ;;  %v7867_v23 = vor.u32 %v8606_v34, %v7866_v48  ;;  %v2332_v47 = vrot.slane %v2330_v33, 1 }
 0x362   :  { %v8122_v5 = vld [vmem:[%s13494_s3 + $0xb80] sm:$0xf]  ;;  %v8602_v10 = vld [vmem:[%s13494_s3 + $0x96c] sm:$0xf0]  ;;  %v2356_v48 = vrot.slane %v2354_v53, 1  ;;  %v2340_v53 = vor.u32 %v2339_v49, %v2335_v50 }
 0x363   :  { %4913 = vmatpush.bf16.msra.mxu0 %v8027_v60  ;;  %4932 = vmatpush.bf16.msra.mxu1 %v8155_v63  ;;  %v7722_v24 = vld [vmem:[%s13494_s3 + $0x860] sm:$0xf]  ;;  %v8570_v60 = vld [vmem:[%s13494_s3 + $0x86c] sm:$0xf0]  ;;  %v7995_v63 = vor.u32 %v8638_v38, %v7994_v56  ;;  %v8123_v7 = vor.u32 %v8670_v18, %v8122_v5  ;;  %v2344_v26 = vrot.slane %v2342_v58, 1  ;;  %v2316_v38 = vor.u32 %v2315_v31, %v2311_v32 }
 0x364   :  { %v7850_v8 = vld [vmem:[%s13494_s3 + $0x960] sm:$0xf]  ;;  %v8634_v14 = vld [vmem:[%s13494_s3 + $0xa6c] sm:$0xf0]  ;;  %v7723_v34 = vor.u32 %v8570_v60, %v7722_v24 }
 0x365   :  { %4876 = vmatpush.bf16.msrb.mxu2 %v7755_v30  ;;  %4895 = vmatpush.bf16.msrb.mxu3 %v7883_v2  ;;  %v7978_v28 = vld [vmem:[%s13494_s3 + $0xa60] sm:$0xf]  ;;  %v8666_v46 = vld [vmem:[%s13494_s3 + $0xb6c] sm:$0xf0]  ;;  %v2347_v30 = vshrl.u32 %v10238_v21, 16  ;;  %v2351_v2 = vrot.slane %v2349_v25, 1  ;;  %v2328_v25 = vor.u32 %v2327_v55, %v2323_v40 }
 0x366   :  { %v8106_v17 = vld [vmem:[%s13494_s3 + $0xb60] sm:$0xf]  ;;  %v8566_v56 = vld [vmem:[%s13494_s3 + $0x84c] sm:$0xf0]  ;;  %v7979_v5 = vor.u32 %v8634_v14, %v7978_v28 }
 0x367   :  { %4914 = vmatpush.bf16.msra.mxu0 %v8011_v35  ;;  %4933 = vmatpush.bf16.msra.mxu1 %v8139_v36  ;;  %v7851_v35 = vor.u32 %v8602_v10, %v7850_v8  ;;  %v7706_v36 = vld [vmem:[%s13494_s3 + $0x840] sm:$0xf]  ;;  %v8107_v18 = vor.u32 %v8666_v46, %v8106_v17  ;;  %v8598_v57 = vld [vmem:[%s13494_s3 + $0x94c] sm:$0xf0]  ;;  %v2352_v60 = vor.u32 %v2351_v2, %v2347_v30 }
 0x368   :  { %v7834_v33 = vld [vmem:[%s13494_s3 + $0x940] sm:$0xf]  ;;  %v8662_v31 = vld [vmem:[%s13494_s3 + $0xb4c] sm:$0xf0]  ;;  %v10887_v46 = vsel %vm280_vm13, %v2340_v53, %v2344_v26  ;;  %v8328_v53 = vld [vmem:[%s13494_s3 + $0xe4] sm:$0xf] }
 0x369   :  { %4877 = vmatpush.bf16.msrb.mxu2 %v7739_v52  ;;  %4896 = vmatpush.bf16.msrb.mxu3 %v7867_v23  ;;  %v7962_v58 = vld [vmem:[%s13494_s3 + $0xa40] sm:$0xf]  ;;  %v8630_v52 = vld [vmem:[%s13494_s3 + $0xa4c] sm:$0xf0]  ;;  %v10864_v23 = vsel %vm280_vm13, %v2316_v38, %v2320_v62  ;;  %v10873_v62 = vsel %vm280_vm13, %v2328_v25, %v2332_v47  ;;  %v10890_v47 = vsel %vm280_vm13, %v2352_v60, %v2356_v48 }
 0x36a   :  { %v8090_v32 = vld [vmem:[%s13494_s3 + $0xb40] sm:$0xf]  ;;  %v2198_v24 = vld [vmem:[#allocation3 + $0x30] sm:$0xee]  ;;  %v7963_v40 = vor.u32 %v8630_v52, %v7962_v58 }
 0x36b   :  { %4915 = vmatpush.bf16.msra.mxu0 %v7995_v63  ;;  %4934 = vmatpush.bf16.msra.mxu1 %v8123_v7  ;;  %v7707_v63 = vor.u32 %v8566_v56, %v7706_v36  ;;  %v7835_v7 = vor.u32 %v8598_v57, %v7834_v33  ;;  %v7690_v8 = vld [vmem:[%s13494_s3 + $0x820] sm:$0xf]  ;;  %v8562_v10 = vld [vmem:[%s13494_s3 + $0x82c] sm:$0xf0]  ;;  %v8091_v50 = vor.u32 %v8662_v31, %v8090_v32  ;;  %v2370_v48 = vunpack.c.l.b16 %v2198_v24 }
 0x36c   :  { %v2199_v28 = vld [vmem:[#allocation3] sm:$0xee]  ;;  %v8594_v14 = vld [vmem:[%s13494_s3 + $0x92c] sm:$0xf0]  ;;  %4811 = vmatmul.bf16.gmra.mxu2 %v10864_v23  ;;  %4830 = vmatmul.bf16.gmra.mxu3 %v10873_v62  ;;  %v7691_v36 = vor.u32 %v8562_v10, %v7690_v8  ;;  %v6892_v10 = vld [vmem:[%s13494_s3 + $0x1f0] sm:$0xf0] }
 0x36d   :  { %4878 = vmatpush.bf16.msrb.mxu2 %v7723_v34  ;;  %4897 = vmatpush.bf16.msrb.mxu3 %v7851_v35  ;;  %v7818_v55 = vld [vmem:[%s13494_s3 + $0x920] sm:$0xf]  ;;  %v8626_v49 = vld [vmem:[%s13494_s3 + $0xa2c] sm:$0xf0]  ;;  %v2371_v34 = vunpack.c.h.b16 %v2198_v24  ;;  %v2372_v35 = vunpack.c.l.b16 %v2199_v28  ;;  %v2373_v33 = vunpack.c.h.b16 %v2199_v28  ;;  %v6764_v24 = vld [vmem:[%s13494_s3 + $0xf0] sm:$0xf0]  ;;  %v8807_v60 = vpack.c.b16 %v2130_v41, %v2370_v48 }
 0x36e   :  { %v7946_v17 = vld [vmem:[%s13494_s3 + $0xa20] sm:$0xf]  ;;  %v8658_v2 = vld [vmem:[%s13494_s3 + $0xb2c] sm:$0xf0]  ;;  %4849 = vmatmul.bf16.gmra.mxu0 %v10887_v46  ;;  %4868 = vmatmul.bf16.gmra.mxu1 %v10890_v47  ;;  %v7819_v56 = vor.u32 %v8594_v14, %v7818_v55  ;;  %v8360_v8 = vld [vmem:[%s13494_s3 + $0x1e4] sm:$0xf] }
 0x36f   :  { %4916 = vmatpush.bf16.msra.mxu0 %v7979_v5  ;;  %4935 = vmatpush.bf16.msra.mxu1 %v8107_v18  ;;  %v8074_v30 = vld [vmem:[%s13494_s3 + $0xb20] sm:$0xf]  ;;  %v8558_v38 = vld [vmem:[%s13494_s3 + $0x80c] sm:$0xf0]  ;;  %v7947_v57 = vor.u32 %v8626_v49, %v7946_v17  ;;  %v8392_v28 = vld [vmem:[%s13494_s3 + $0x2e4] sm:$0xf]  ;;  %v6767_v49 = vor.u32 %v8328_v53, %v6764_v24 }
 0x370   :  { %v7674_v26 = vld [vmem:[%s13494_s3 + $0x800] sm:$0xf]  ;;  %v8590_v18 = vld [vmem:[%s13494_s3 + $0x90c] sm:$0xf0]  ;;  %v8075_v58 = vor.u32 %v8658_v2, %v8074_v30  ;;  %v7148_v55 = vld [vmem:[%s13494_s3 + $0x3f0] sm:$0xf0]  ;;  %v6895_v30 = vor.u32 %v8360_v8, %v6892_v10 }
 0x371   :  { %4879 = vmatpush.bf16.msrb.mxu2 %v7707_v63  ;;  %4898 = vmatpush.bf16.msrb.mxu3 %v7835_v7  ;;  %v7802_v5 = vld [vmem:[%s13494_s3 + $0x900] sm:$0xf]  ;;  %v8622_v32 = vld [vmem:[%s13494_s3 + $0xa0c] sm:$0xf0]  ;;  %v8808_v63 = vpack.c.b16 %v2131_v44, %v2371_v34  ;;  %v8809_v7 = vpack.c.b16 %v2132_v4, %v2372_v35  ;;  %v7675_v41 = vor.u32 %v8558_v38, %v7674_v26  ;;  %v7020_v4 = vld [vmem:[%s13494_s3 + $0x2f0] sm:$0xf0] }
 0x372   :  { %v7930_v52 = vld [vmem:[%s13494_s3 + $0xa00] sm:$0xf]  ;;  %v8654_v25 = vld [vmem:[%s13494_s3 + $0xb0c] sm:$0xf0]  ;;  %v8810_v44 = vpack.c.b16 %v2133_v1, %v2373_v33  ;;  %v2386_v2 = vrot.slane %v8807_v60, 1  ;;  %v7023_v26 = vor.u32 %v8392_v28, %v7020_v4  ;;  %v2393_v53 = vrot.slane %v10618_v39, 1 }
 0x373   :  { %4917 = vmatpush.bf16.msra.mxu0 %v7963_v40  ;;  %4936 = vmatpush.bf16.msra.mxu1 %v8091_v50  ;;  %v8058_v31 = vld [vmem:[%s13494_s3 + $0xb00] sm:$0xf]  ;;  %v7803_v40 = vor.u32 %v8590_v18, %v7802_v5  ;;  %v8424_v50 = vld [vmem:[%s13494_s3 + $0x3e4] sm:$0xf]  ;;  %v7931_v14 = vor.u32 %v8622_v32, %v7930_v52  ;;  %v2389_v1 = vrot.slane %v8808_v63, 1  ;;  %v2392_v34 = vrot.slane %v8809_v7, 1 }
 0x374   :  { %v8059_v17 = vor.u32 %v8654_v25, %v8058_v31  ;;  %v7151_v48 = vor.u32 %v8424_v50, %v7148_v55  ;;  %v2395_v35 = vrot.slane %v8810_v44, 1  ;;  %v8356_v38 = vld [vmem:[%s13494_s3 + $0x1c4] sm:$0xf]  ;;  %v6876_v5 = vld [vmem:[%s13494_s3 + $0x1d0] sm:$0xf0]  ;;  %v2387_v52 = vrot.slane %v10572_v54, 1 }
 0x375   :  { %4880 = vmatpush.bf16.msrb.mxu2 %v7691_v36  ;;  %4899 = vmatpush.bf16.msrb.mxu3 %v7819_v56  ;;  %v8324_v36 = vld [vmem:[%s13494_s3 + $0xc4] sm:$0xf]  ;;  %v6748_v56 = vld [vmem:[%s13494_s3 + $0xd0] sm:$0xf0]  ;;  %v2390_v32 = vrot.slane %v10606_v13, 1  ;;  %v2396_v24 = vrot.slane %v10639_v9, 1  ;;  %v6879_v63 = vor.u32 %v8356_v38, %v6876_v5 }
 0x376   :  { %v8388_v18 = vld [vmem:[%s13494_s3 + $0x2c4] sm:$0xf]  ;;  %v7004_v33 = vld [vmem:[%s13494_s3 + $0x2d0] sm:$0xf0]  ;;  %v2200_v31 = vld [vmem:[#allocation3 + $0x8] sm:$0xee]  ;;  %v6751_v60 = vor.u32 %v8324_v36, %v6748_v56  ;;  %v10994_v13 = vsel %vm315_vm3, %v2386_v2, %v2387_v52 }
 0x377   :  { %4918 = vmatpush.bf16.msra.mxu0 %v7947_v57  ;;  %4937 = vmatpush.bf16.msra.mxu1 %v8075_v58  ;;  %v8420_v57 = vld [vmem:[%s13494_s3 + $0x3c4] sm:$0xf]  ;;  %v7132_v58 = vld [vmem:[%s13494_s3 + $0x3d0] sm:$0xf0]  ;;  %v2201_v25 = vld [vmem:[#allocation3 + $0x38] sm:$0xee]  ;;  %v10997_v8 = vsel %vm315_vm3, %v2389_v1, %v2390_v32  ;;  %v7007_v10 = vor.u32 %v8388_v18, %v7004_v33  ;;  %v11014_v44 = vsel %vm315_vm3, %v2395_v35, %v2396_v24 }
 0x378   :  { %v8320_v7 = vld [vmem:[%s13494_s3 + $0xa4] sm:$0xf]  ;;  %v6732_v54 = vld [vmem:[%s13494_s3 + $0xb0] sm:$0xf0]  ;;  %v7135_v39 = vor.u32 %v8420_v57, %v7132_v58 }
 0x379   :  { %4881 = vmatpush.bf16.msrb.mxu2 %v7675_v41  ;;  %4900 = vmatpush.bf16.msrb.mxu3 %v7803_v40  ;;  %v8352_v9 = vld [vmem:[%s13494_s3 + $0x1a4] sm:$0xf]  ;;  %v6860_v28 = vld [vmem:[%s13494_s3 + $0x1b0] sm:$0xf0]  ;;  %v11011_v40 = vsel %vm315_vm3, %v2392_v34, %v2393_v53 }
 0x37a   :  { %v8384_v41 = vld [vmem:[%s13494_s3 + $0x2a4] sm:$0xf]  ;;  %v6988_v4 = vld [vmem:[%s13494_s3 + $0x2b0] sm:$0xf0]  ;;  %v6863_v2 = vor.u32 %v8352_v9, %v6860_v28 }
 0x37b   :  { %4919 = vmatpush.bf16.msra.mxu0 %v7931_v14  ;;  %4938 = vmatpush.bf16.msra.mxu1 %v8059_v17  ;;  %v8416_v50 = vld [vmem:[%s13494_s3 + $0x3a4] sm:$0xf]  ;;  %v7116_v55 = vld [vmem:[%s13494_s3 + $0x3b0] sm:$0xf0]  ;;  %v2374_v14 = vunpack.c.l.b16 %v2200_v31  ;;  %v2375_v17 = vunpack.c.h.b16 %v2200_v31  ;;  %v6991_v34 = vor.u32 %v8384_v41, %v6988_v4 }
 0x37c   :  { %4882 = vmatmul.bf16.vlgmr.msrb.gmra.mxu2 %v10994_v13  ;;  %4901 = vmatmul.bf16.vlgmr.msrb.gmra.mxu3 %v10997_v8  ;;  %v8316_v1 = vld [vmem:[%s13494_s3 + $0x84] sm:$0xf]  ;;  %v7119_v35 = vor.u32 %v8416_v50, %v7116_v55  ;;  %v6844_v56 = vld [vmem:[%s13494_s3 + $0x190] sm:$0xf0] }
 0x37d   :  { %4950 = vmatpush.bf16.msra.mxu2 %v6767_v49  ;;  %4969 = vmatpush.bf16.msra.mxu3 %v6895_v30  ;;  %v2376_v49 = vunpack.c.l.b16 %v2201_v25  ;;  %v6735_v30 = vor.u32 %v8320_v7, %v6732_v54  ;;  %v8348_v36 = vld [vmem:[%s13494_s3 + $0x184] sm:$0xf]  ;;  %v6972_v5 = vld [vmem:[%s13494_s3 + $0x290] sm:$0xf0]  ;;  %v8811_v57 = vpack.c.b16 %v2142_v20, %v2374_v14  ;;  %v8812_v58 = vpack.c.b16 %v2143_v22, %v2375_v17 }
 0x37e   :  { %4920 = vmatmul.bf16.vlgmr.msra.gmra.mxu0 %v11011_v40  ;;  %4939 = vmatmul.bf16.vlgmr.msra.gmra.mxu1 %v11014_v44  ;;  %v8380_v38 = vld [vmem:[%s13494_s3 + $0x284] sm:$0xf]  ;;  %v7100_v33 = vld [vmem:[%s13494_s3 + $0x390] sm:$0xf0]  ;;  %v6847_v31 = vor.u32 %v8348_v36, %v6844_v56  ;;  %v2405_v36 = vrot.slane %v10784_v19, 1  ;;  %v2408_v56 = vrot.slane %v10793_v61, 1 }
 0x37f   :  { %4988 = vmatpush.bf16.msrb.mxu0 %v7023_v26  ;;  %5007 = vmatpush.bf16.msrb.mxu1 %v7151_v48  ;;  %v6716_v26 = vld [vmem:[%s13494_s3 + $0x90] sm:$0xf0]  ;;  %v2377_v48 = vunpack.c.h.b16 %v2201_v25  ;;  %v8412_v18 = vld [vmem:[%s13494_s3 + $0x384] sm:$0xf]  ;;  %v8813_v52 = vpack.c.b16 %v2144_v51, %v2376_v49  ;;  %v6975_v22 = vor.u32 %v8380_v38, %v6972_v5  ;;  %v2401_v9 = vrot.slane %v8812_v58, 1 }
 0x380   :  { %v6719_v32 = vor.u32 %v8316_v1, %v6716_v26  ;;  %v8312_v53 = vld [vmem:[%s13494_s3 + $0x64] sm:$0xf]  ;;  %v6700_v20 = vld [vmem:[%s13494_s3 + $0x70] sm:$0xf0]  ;;  %v7103_v24 = vor.u32 %v8412_v18, %v7100_v33 }
 0x381   :  { %4951 = vmatpush.bf16.msra.mxu2 %v6751_v60  ;;  %4970 = vmatpush.bf16.msra.mxu3 %v6879_v63  ;;  %v8814_v25 = vpack.c.b16 %v2145_v11, %v2377_v48  ;;  %v8344_v51 = vld [vmem:[%s13494_s3 + $0x164] sm:$0xf]  ;;  %v6828_v11 = vld [vmem:[%s13494_s3 + $0x170] sm:$0xf0]  ;;  %v2404_v28 = vrot.slane %v8813_v52, 1  ;;  %v6703_v4 = vor.u32 %v8312_v53, %v6700_v20 }
 0x382   :  { %v8376_v60 = vld [vmem:[%s13494_s3 + $0x264] sm:$0xf]  ;;  %v6956_v63 = vld [vmem:[%s13494_s3 + $0x270] sm:$0xf0]  ;;  %v6831_v50 = vor.u32 %v8344_v51, %v6828_v11 }
 0x383   :  { %4989 = vmatpush.bf16.msrb.mxu0 %v7007_v10  ;;  %5008 = vmatpush.bf16.msrb.mxu1 %v7135_v39  ;;  %v8408_v7 = vld [vmem:[%s13494_s3 + $0x364] sm:$0xf]  ;;  %v7084_v54 = vld [vmem:[%s13494_s3 + $0x370] sm:$0xf0]  ;;  %v2398_v10 = vrot.slane %v8811_v57, 1  ;;  %v2399_v39 = vrot.slane %v10725_v3, 1  ;;  %v6959_v17 = vor.u32 %v8376_v60, %v6956_v63 }
 0x384   :  { %v2407_v41 = vrot.slane %v8814_v25, 1  ;;  %v8308_v55 = vld [vmem:[%s13494_s3 + $0x44] sm:$0xf]  ;;  %v6684_v14 = vld [vmem:[%s13494_s3 + $0x50] sm:$0xf0]  ;;  %v7087_v49 = vor.u32 %v8408_v7, %v7084_v54 }
 0x385   :  { %4952 = vmatpush.bf16.msra.mxu2 %v6735_v30  ;;  %4971 = vmatpush.bf16.msra.mxu3 %v6863_v2  ;;  %v8340_v3 = vld [vmem:[%s13494_s3 + $0x144] sm:$0xf]  ;;  %v6812_v30 = vld [vmem:[%s13494_s3 + $0x150] sm:$0xf0]  ;;  %v6687_v38 = vor.u32 %v8308_v55, %v6684_v14 }
 0x386   :  { %v8372_v2 = vld [vmem:[%s13494_s3 + $0x244] sm:$0xf]  ;;  %v6940_v1 = vld [vmem:[%s13494_s3 + $0x250] sm:$0xf0]  ;;  %v6815_v5 = vor.u32 %v8340_v3, %v6812_v30 }
 0x387   :  { %4990 = vmatpush.bf16.msrb.mxu0 %v6991_v34  ;;  %5009 = vmatpush.bf16.msrb.mxu1 %v7119_v35  ;;  %v8404_v26 = vld [vmem:[%s13494_s3 + $0x344] sm:$0xf]  ;;  %v7068_v48 = vld [vmem:[%s13494_s3 + $0x350] sm:$0xf0]  ;;  %v11109_v34 = vsel %vm315_vm3, %v2398_v10, %v2399_v39  ;;  %v2402_v35 = vrot.slane %v10772_v15, 1  ;;  %v6943_v15 = vor.u32 %v8372_v2, %v6940_v1 }
 0x388   :  { %v8304_v18 = vld [vmem:[%s13494_s3 + $0x24] sm:$0xf]  ;;  %v6668_v33 = vld [vmem:[%s13494_s3 + $0x30] sm:$0xf0]  ;;  %v7071_v19 = vor.u32 %v8404_v26, %v7068_v48 }
 0x389   :  { %4953 = vmatpush.bf16.msra.mxu2 %v6719_v32  ;;  %4972 = vmatpush.bf16.msra.mxu3 %v6847_v31  ;;  %v11121_v57 = vsel %vm315_vm3, %v2401_v9, %v2402_v35  ;;  %v8336_v61 = vld [vmem:[%s13494_s3 + $0x124] sm:$0xf]  ;;  %v6796_v58 = vld [vmem:[%s13494_s3 + $0x130] sm:$0xf0]  ;;  %v11135_v32 = vsel %vm315_vm3, %v2404_v28, %v2405_v36  ;;  %v11138_v31 = vsel %vm315_vm3, %v2407_v41, %v2408_v56 }
 0x38a   :  { %v8368_v52 = vld [vmem:[%s13494_s3 + $0x224] sm:$0xf]  ;;  %v6924_v25 = vld [vmem:[%s13494_s3 + $0x230] sm:$0xf0]  ;;  %v6799_v51 = vor.u32 %v8336_v61, %v6796_v58 }
 0x38b   :  { %4991 = vmatpush.bf16.msrb.mxu0 %v6975_v22  ;;  %5010 = vmatpush.bf16.msrb.mxu1 %v7103_v24  ;;  %v8400_v53 = vld [vmem:[%s13494_s3 + $0x324] sm:$0xf]  ;;  %v7052_v20 = vld [vmem:[%s13494_s3 + $0x330] sm:$0xf0]  ;;  %v6671_v24 = vor.u32 %v8304_v18, %v6668_v33  ;;  %v6927_v7 = vor.u32 %v8368_v52, %v6924_v25 }
 0x38c   :  { %4887 = vmatmul.bf16.gmra.mxu2 %v11109_v34  ;;  %4906 = vmatmul.bf16.gmra.mxu3 %v11121_v57  ;;  %v8300_v22 = vld [vmem:[%s13494_s3 + $0x4] sm:$0xf]  ;;  %v6652_v11 = vld [vmem:[%s13494_s3 + $0x10] sm:$0xf0]  ;;  %v7055_v54 = vor.u32 %v8400_v53, %v7052_v20 }
 0x38d   :  { %4954 = vmatpush.bf16.msra.mxu2 %v6703_v4  ;;  %4973 = vmatpush.bf16.msra.mxu3 %v6831_v50  ;;  %v8332_v60 = vld [vmem:[%s13494_s3 + $0x104] sm:$0xf]  ;;  %v6780_v63 = vld [vmem:[%s13494_s3 + $0x110] sm:$0xf0] }
 0x38e   :  { %4925 = vmatmul.bf16.gmra.mxu0 %v11135_v32  ;;  %4944 = vmatmul.bf16.gmra.mxu1 %v11138_v31  ;;  %v8364_v10 = vld [vmem:[%s13494_s3 + $0x204] sm:$0xf]  ;;  %v6908_v39 = vld [vmem:[%s13494_s3 + $0x210] sm:$0xf0] }
 0x38f   :  { %4992 = vmatpush.bf16.msrb.mxu0 %v6959_v17  ;;  %5011 = vmatpush.bf16.msrb.mxu1 %v7087_v49  ;;  %v8396_v9 = vld [vmem:[%s13494_s3 + $0x304] sm:$0xf]  ;;  %v7036_v28 = vld [vmem:[%s13494_s3 + $0x310] sm:$0xf0]  ;;  %v6655_v17 = vor.u32 %v8300_v22, %v6652_v11  ;;  %v6783_v49 = vor.u32 %v8332_v60, %v6780_v63  ;;  %v6911_v1 = vor.u32 %v8364_v10, %v6908_v39 }
 0x390   :  { %v8456_v41 = vld [vmem:[%s13494_s3 + $0x4e4] sm:$0xf]  ;;  %v7276_v4 = vld [vmem:[%s13494_s3 + $0x4f0] sm:$0xf0]  ;;  %v7039_v26 = vor.u32 %v8396_v9, %v7036_v28 }
 0x391   :  { %4955 = vmatpush.bf16.msra.mxu2 %v6687_v38  ;;  %4974 = vmatpush.bf16.msra.mxu3 %v6815_v5  ;;  %v8488_v50 = vld [vmem:[%s13494_s3 + $0x5e4] sm:$0xf]  ;;  %v7404_v55 = vld [vmem:[%s13494_s3 + $0x5f0] sm:$0xf0]  ;;  %v7279_v48 = vor.u32 %v8456_v41, %v7276_v4 }
 0x392   :  { %v8520_v14 = vld [vmem:[%s13494_s3 + $0x6e4] sm:$0xf]  ;;  %v7532_v3 = vld [vmem:[%s13494_s3 + $0x6f0] sm:$0xf0]  ;;  %v7407_v35 = vor.u32 %v8488_v50, %v7404_v55 }
 0x393   :  { %4993 = vmatpush.bf16.msrb.mxu0 %v6943_v15  ;;  %5012 = vmatpush.bf16.msrb.mxu1 %v7071_v19  ;;  %v8552_v30 = vld [vmem:[%s13494_s3 + $0x7e4] sm:$0xf]  ;;  %v7660_v2 = vld [vmem:[%s13494_s3 + $0x7f0] sm:$0xf0]  ;;  %v7535_v36 = vor.u32 %v8520_v14, %v7532_v3 }
 0x394   :  { %v7663_v56 = vor.u32 %v8552_v30, %v7660_v2  ;;  %v8452_v38 = vld [vmem:[%s13494_s3 + $0x4c4] sm:$0xf]  ;;  %v7260_v5 = vld [vmem:[%s13494_s3 + $0x4d0] sm:$0xf0] }
 0x395   :  { %4956 = vmatpush.bf16.msra.mxu2 %v6671_v24  ;;  %4975 = vmatpush.bf16.msra.mxu3 %v6799_v51  ;;  %v8484_v18 = vld [vmem:[%s13494_s3 + $0x5c4] sm:$0xf]  ;;  %v7388_v33 = vld [vmem:[%s13494_s3 + $0x5d0] sm:$0xf0]  ;;  %v7263_v52 = vor.u32 %v8452_v38, %v7260_v5 }
 0x396   :  { %v8516_v15 = vld [vmem:[%s13494_s3 + $0x6c4] sm:$0xf]  ;;  %v7516_v19 = vld [vmem:[%s13494_s3 + $0x6d0] sm:$0xf0]  ;;  %v7391_v25 = vor.u32 %v8484_v18, %v7388_v33 }
 0x397   :  { %4994 = vmatpush.bf16.msrb.mxu0 %v6927_v7  ;;  %5013 = vmatpush.bf16.msrb.mxu1 %v7055_v54  ;;  %v8548_v61 = vld [vmem:[%s13494_s3 + $0x7c4] sm:$0xf]  ;;  %v7644_v58 = vld [vmem:[%s13494_s3 + $0x7d0] sm:$0xf0]  ;;  %v7519_v22 = vor.u32 %v8516_v15, %v7516_v19 }
 0x398   :  { %v8448_v53 = vld [vmem:[%s13494_s3 + $0x4a4] sm:$0xf]  ;;  %v7244_v20 = vld [vmem:[%s13494_s3 + $0x4b0] sm:$0xf0]  ;;  %v7647_v24 = vor.u32 %v8548_v61, %v7644_v58 }
 0x399   :  { %4957 = vmatpush.bf16.msra.mxu2 %v6655_v17  ;;  %4976 = vmatpush.bf16.msra.mxu3 %v6783_v49  ;;  %v8480_v51 = vld [vmem:[%s13494_s3 + $0x5a4] sm:$0xf]  ;;  %v7372_v11 = vld [vmem:[%s13494_s3 + $0x5b0] sm:$0xf0]  ;;  %v7247_v10 = vor.u32 %v8448_v53, %v7244_v20 }
 0x39a   :  { %v8512_v60 = vld [vmem:[%s13494_s3 + $0x6a4] sm:$0xf]  ;;  %v7500_v63 = vld [vmem:[%s13494_s3 + $0x6b0] sm:$0xf0]  ;;  %v7375_v39 = vor.u32 %v8480_v51, %v7372_v11 }
 0x39b   :  { %4995 = vmatpush.bf16.msrb.mxu0 %v6911_v1  ;;  %5014 = vmatpush.bf16.msrb.mxu1 %v7039_v26  ;;  %v8544_v7 = vld [vmem:[%s13494_s3 + $0x7a4] sm:$0xf]  ;;  %v7628_v54 = vld [vmem:[%s13494_s3 + $0x7b0] sm:$0xf0]  ;;  %v7503_v41 = vor.u32 %v8512_v60, %v7500_v63 }
 0x39c   :  { %4958 = vmatmul.bf16.vlgmr.msra.gmra.mxu2 %v10189_v29  ;;  %4977 = vmatmul.bf16.vlgmr.msra.gmra.mxu3 %v10193_v0  ;;  %v8444_v9 = vld [vmem:[%s13494_s3 + $0x484] sm:$0xf]  ;;  %v7228_v28 = vld [vmem:[%s13494_s3 + $0x490] sm:$0xf0]  ;;  %v7631_v4 = vor.u32 %v8544_v7, %v7628_v54 }
 0x39d   :  { %5026 = vmatpush.bf16.msrb.mxu2 %v7279_v48  ;;  %5045 = vmatpush.bf16.msrb.mxu3 %v7407_v35  ;;  %v8476_v50 = vld [vmem:[%s13494_s3 + $0x584] sm:$0xf]  ;;  %v7356_v55 = vld [vmem:[%s13494_s3 + $0x590] sm:$0xf0]  ;;  %v7231_v30 = vor.u32 %v8444_v9, %v7228_v28 }
 0x39e   :  { %4996 = vmatmul.bf16.vlgmr.msrb.gmra.mxu0 %v10197_v42  ;;  %5015 = vmatmul.bf16.vlgmr.msrb.gmra.mxu1 %v10201_v27  ;;  %v8508_v14 = vld [vmem:[%s13494_s3 + $0x684] sm:$0xf]  ;;  %v7484_v17 = vld [vmem:[%s13494_s3 + $0x690] sm:$0xf0]  ;;  %v7359_v2 = vor.u32 %v8476_v50, %v7356_v55 }
 0x39f   :  { %5064 = vmatpush.bf16.msra.mxu0 %v7535_v36  ;;  %5083 = vmatpush.bf16.msra.mxu1 %v7663_v56  ;;  %v8540_v49 = vld [vmem:[%s13494_s3 + $0x784] sm:$0xf]  ;;  %v7612_v3 = vld [vmem:[%s13494_s3 + $0x790] sm:$0xf0]  ;;  %v7487_v48 = vor.u32 %v8508_v14, %v7484_v17 }
 0x3a0   :  { %v8440_v1 = vld [vmem:[%s13494_s3 + $0x464] sm:$0xf]  ;;  %v7212_v26 = vld [vmem:[%s13494_s3 + $0x470] sm:$0xf0]  ;;  %v7615_v35 = vor.u32 %v8540_v49, %v7612_v3 }
 0x3a1   :  { %5027 = vmatpush.bf16.msrb.mxu2 %v7263_v52  ;;  %5046 = vmatpush.bf16.msrb.mxu3 %v7391_v25  ;;  %v8472_v36 = vld [vmem:[%s13494_s3 + $0x564] sm:$0xf]  ;;  %v7340_v56 = vld [vmem:[%s13494_s3 + $0x570] sm:$0xf0]  ;;  %v7215_v15 = vor.u32 %v8440_v1, %v7212_v26 }
 0x3a2   :  { %v8504_v38 = vld [vmem:[%s13494_s3 + $0x664] sm:$0xf]  ;;  %v7468_v5 = vld [vmem:[%s13494_s3 + $0x670] sm:$0xf0]  ;;  %v7343_v19 = vor.u32 %v8472_v36, %v7340_v56 }
 0x3a3   :  { %5065 = vmatpush.bf16.msra.mxu0 %v7519_v22  ;;  %5084 = vmatpush.bf16.msra.mxu1 %v7647_v24  ;;  %v8536_v18 = vld [vmem:[%s13494_s3 + $0x764] sm:$0xf]  ;;  %v7596_v33 = vld [vmem:[%s13494_s3 + $0x770] sm:$0xf0]  ;;  %v7471_v52 = vor.u32 %v8504_v38, %v7468_v5 }
 0x3a4   :  { %v8436_v61 = vld [vmem:[%s13494_s3 + $0x444] sm:$0xf]  ;;  %v7196_v58 = vld [vmem:[%s13494_s3 + $0x450] sm:$0xf0]  ;;  %v7599_v25 = vor.u32 %v8536_v18, %v7596_v33 }
 0x3a5   :  { %5028 = vmatpush.bf16.msrb.mxu2 %v7247_v10  ;;  %5047 = vmatpush.bf16.msrb.mxu3 %v7375_v39  ;;  %v8468_v53 = vld [vmem:[%s13494_s3 + $0x544] sm:$0xf]  ;;  %v7324_v20 = vld [vmem:[%s13494_s3 + $0x550] sm:$0xf0]  ;;  %v7199_v60 = vor.u32 %v8436_v61, %v7196_v58 }
 0x3a6   :  { %v8500_v22 = vld [vmem:[%s13494_s3 + $0x644] sm:$0xf]  ;;  %v7452_v24 = vld [vmem:[%s13494_s3 + $0x650] sm:$0xf0]  ;;  %v7327_v63 = vor.u32 %v8468_v53, %v7324_v20 }
 0x3a7   :  { %5066 = vmatpush.bf16.msra.mxu0 %v7503_v41  ;;  %5085 = vmatpush.bf16.msra.mxu1 %v7631_v4  ;;  %v8532_v51 = vld [vmem:[%s13494_s3 + $0x744] sm:$0xf]  ;;  %v7580_v11 = vld [vmem:[%s13494_s3 + $0x750] sm:$0xf0]  ;;  %v7455_v10 = vor.u32 %v8500_v22, %v7452_v24 }
 0x3a8   :  { %v8432_v7 = vld [vmem:[%s13494_s3 + $0x424] sm:$0xf]  ;;  %v7180_v54 = vld [vmem:[%s13494_s3 + $0x430] sm:$0xf0]  ;;  %v7583_v39 = vor.u32 %v8532_v51, %v7580_v11 }
 0x3a9   :  { %5029 = vmatpush.bf16.msrb.mxu2 %v7231_v30  ;;  %5048 = vmatpush.bf16.msrb.mxu3 %v7359_v2  ;;  %v8464_v9 = vld [vmem:[%s13494_s3 + $0x524] sm:$0xf]  ;;  %v7308_v28 = vld [vmem:[%s13494_s3 + $0x530] sm:$0xf0]  ;;  %v7183_v17 = vor.u32 %v8432_v7, %v7180_v54 }
 0x3aa   :  { %v8496_v41 = vld [vmem:[%s13494_s3 + $0x624] sm:$0xf]  ;;  %v7436_v4 = vld [vmem:[%s13494_s3 + $0x630] sm:$0xf0]  ;;  %v7311_v49 = vor.u32 %v8464_v9, %v7308_v28 }
 0x3ab   :  { %5067 = vmatpush.bf16.msra.mxu0 %v7487_v48  ;;  %5086 = vmatpush.bf16.msra.mxu1 %v7615_v35  ;;  %v8528_v50 = vld [vmem:[%s13494_s3 + $0x724] sm:$0xf]  ;;  %v7564_v55 = vld [vmem:[%s13494_s3 + $0x730] sm:$0xf0]  ;;  %v7439_v1 = vor.u32 %v8496_v41, %v7436_v4 }
 0x3ac   :  { %4963 = vmatmul.bf16.gmra.mxu2 %v10206_v43  ;;  %4982 = vmatmul.bf16.gmra.mxu3 %v10210_v59  ;;  %v8428_v14 = vld [vmem:[%s13494_s3 + $0x404] sm:$0xf]  ;;  %v7164_v3 = vld [vmem:[%s13494_s3 + $0x410] sm:$0xf0]  ;;  %v7567_v26 = vor.u32 %v8528_v50, %v7564_v55 }
 0x3ad   :  { %5030 = vmatpush.bf16.msrb.mxu2 %v7215_v15  ;;  %5049 = vmatpush.bf16.msrb.mxu3 %v7343_v19  ;;  %v8460_v30 = vld [vmem:[%s13494_s3 + $0x504] sm:$0xf]  ;;  %v7292_v2 = vld [vmem:[%s13494_s3 + $0x510] sm:$0xf0]  ;;  %v7167_v19 = vor.u32 %v8428_v14, %v7164_v3 }
 0x3ae   :  { %5001 = vmatmul.bf16.gmra.mxu0 %v10216_v16  ;;  %5020 = vmatmul.bf16.gmra.mxu1 %v10238_v21  ;;  %v8492_v48 = vld [vmem:[%s13494_s3 + $0x604] sm:$0xf]  ;;  %v7420_v35 = vld [vmem:[%s13494_s3 + $0x610] sm:$0xf0]  ;;  %v7295_v61 = vor.u32 %v8460_v30, %v7292_v2 }
 0x3af   :  { %5068 = vmatpush.bf16.msra.mxu0 %v7471_v52  ;;  %5087 = vmatpush.bf16.msra.mxu1 %v7599_v25  ;;  %v8524_v36 = vld [vmem:[%s13494_s3 + $0x704] sm:$0xf]  ;;  %v7548_v56 = vld [vmem:[%s13494_s3 + $0x710] sm:$0xf0]  ;;  %v7423_v53 = vor.u32 %v8492_v48, %v7420_v35 }
 0x3b0   :  { %v8584_v38 = vld [vmem:[%s13494_s3 + $0x8e4] sm:$0xf]  ;;  %v7788_v5 = vld [vmem:[%s13494_s3 + $0x8f0] sm:$0xf0]  ;;  %v7551_v20 = vor.u32 %v8524_v36, %v7548_v56 }
 0x3b1   :  { %5031 = vmatpush.bf16.msrb.mxu2 %v7199_v60  ;;  %5050 = vmatpush.bf16.msrb.mxu3 %v7327_v63  ;;  %v8616_v18 = vld [vmem:[%s13494_s3 + $0x9e4] sm:$0xf]  ;;  %v7916_v33 = vld [vmem:[%s13494_s3 + $0x9f0] sm:$0xf0]  ;;  %v7791_v22 = vor.u32 %v8584_v38, %v7788_v5 }
 0x3b2   :  { %v8648_v15 = vld [vmem:[%s13494_s3 + $0xae4] sm:$0xf]  ;;  %v8044_v58 = vld [vmem:[%s13494_s3 + $0xaf0] sm:$0xf0]  ;;  %v7919_v24 = vor.u32 %v8616_v18, %v7916_v33 }
 0x3b3   :  { %5069 = vmatpush.bf16.msra.mxu0 %v7455_v10  ;;  %5088 = vmatpush.bf16.msra.mxu1 %v7583_v39  ;;  %v8680_v52 = vld [vmem:[%s13494_s3 + $0xbe4] sm:$0xf]  ;;  %v8172_v25 = vld [vmem:[%s13494_s3 + $0xbf0] sm:$0xf0]  ;;  %v8047_v51 = vor.u32 %v8648_v15, %v8044_v58 }
 0x3b4   :  { %v8175_v11 = vor.u32 %v8680_v52, %v8172_v25  ;;  %v8580_v60 = vld [vmem:[%s13494_s3 + $0x8c4] sm:$0xf]  ;;  %v7772_v63 = vld [vmem:[%s13494_s3 + $0x8d0] sm:$0xf0] }
 0x3b5   :  { %5032 = vmatpush.bf16.msrb.mxu2 %v7183_v17  ;;  %5051 = vmatpush.bf16.msrb.mxu3 %v7311_v49  ;;  %v8612_v7 = vld [vmem:[%s13494_s3 + $0x9c4] sm:$0xf]  ;;  %v7900_v54 = vld [vmem:[%s13494_s3 + $0x9d0] sm:$0xf0]  ;;  %v7775_v50 = vor.u32 %v8580_v60, %v7772_v63 }
 0x3b6   :  { %v8644_v10 = vld [vmem:[%s13494_s3 + $0xac4] sm:$0xf]  ;;  %v8028_v39 = vld [vmem:[%s13494_s3 + $0xad0] sm:$0xf0]  ;;  %v7903_v55 = vor.u32 %v8612_v7, %v7900_v54 }
 0x3b7   :  { %5070 = vmatpush.bf16.msra.mxu0 %v7439_v1  ;;  %5089 = vmatpush.bf16.msra.mxu1 %v7567_v26  ;;  %v8676_v9 = vld [vmem:[%s13494_s3 + $0xbc4] sm:$0xf]  ;;  %v8156_v28 = vld [vmem:[%s13494_s3 + $0xbd0] sm:$0xf0]  ;;  %v8031_v49 = vor.u32 %v8644_v10, %v8028_v39 }
 0x3b8   :  { %v8576_v14 = vld [vmem:[%s13494_s3 + $0x8a4] sm:$0xf]  ;;  %v7756_v17 = vld [vmem:[%s13494_s3 + $0x8b0] sm:$0xf0]  ;;  %v8159_v3 = vor.u32 %v8676_v9, %v8156_v28 }
 0x3b9   :  { %5033 = vmatpush.bf16.msrb.mxu2 %v7167_v19  ;;  %5052 = vmatpush.bf16.msrb.mxu3 %v7295_v61  ;;  %v8608_v30 = vld [vmem:[%s13494_s3 + $0x9a4] sm:$0xf]  ;;  %v7884_v2 = vld [vmem:[%s13494_s3 + $0x9b0] sm:$0xf0]  ;;  %v7759_v36 = vor.u32 %v8576_v14, %v7756_v17 }
 0x3ba   :  { %v8640_v1 = vld [vmem:[%s13494_s3 + $0xaa4] sm:$0xf]  ;;  %v8012_v26 = vld [vmem:[%s13494_s3 + $0xab0] sm:$0xf0]  ;;  %v7887_v56 = vor.u32 %v8608_v30, %v7884_v2 }
 0x3bb   :  { %5071 = vmatpush.bf16.msra.mxu0 %v7423_v53  ;;  %5090 = vmatpush.bf16.msra.mxu1 %v7551_v20  ;;  %v4769_v41 = vpop.f32.mrf.mxu0  ;;  %v4788_v4 = vpop.f32.mrf.mxu1  ;;  %v8672_v48 = vld [vmem:[%s13494_s3 + $0xba4] sm:$0xf]  ;;  %v8140_v35 = vld [vmem:[%s13494_s3 + $0xbb0] sm:$0xf0]  ;;  %v8015_v15 = vor.u32 %v8640_v1, %v8012_v26 }
 0x3bc   :  { %5034 = vmatmul.bf16.vlgmr.msrb.gmra.mxu2 %v10730_v45  ;;  %5053 = vmatmul.bf16.vlgmr.msrb.gmra.mxu3 %v10746_v37  ;;  %v8572_v38 = vld [vmem:[%s13494_s3 + $0x884] sm:$0xf]  ;;  %v7740_v5 = vld [vmem:[%s13494_s3 + $0x890] sm:$0xf0]  ;;  %v8143_v19 = vor.u32 %v8672_v48, %v8140_v35 }
 0x3bd   :  { %5102 = vmatpush.bf16.msra.mxu2 %v7791_v22  ;;  %5121 = vmatpush.bf16.msra.mxu3 %v7919_v24  ;;  %v8604_v61 = vld [vmem:[%s13494_s3 + $0x984] sm:$0xf]  ;;  %v7868_v58 = vld [vmem:[%s13494_s3 + $0x990] sm:$0xf0]  ;;  %v7743_v60 = vor.u32 %v8572_v38, %v7740_v5 }
 0x3be   :  { %5072 = vmatmul.bf16.vlgmr.msra.gmra.mxu0 %v10760_v6  ;;  %5091 = vmatmul.bf16.vlgmr.msra.gmra.mxu1 %v10763_v12  ;;  %v8636_v52 = vld [vmem:[%s13494_s3 + $0xa84] sm:$0xf]  ;;  %v7996_v53 = vld [vmem:[%s13494_s3 + $0xa90] sm:$0xf0]  ;;  %v7871_v63 = vor.u32 %v8604_v61, %v7868_v58 }
 0x3bf   :  { %5140 = vmatpush.bf16.msrb.mxu0 %v8047_v51  ;;  %5159 = vmatpush.bf16.msrb.mxu1 %v8175_v11  ;;  %v4731_v18 = vpop.f32.mrf.mxu2  ;;  %v4750_v33 = vpop.f32.mrf.mxu3  ;;  %v8668_v20 = vld [vmem:[%s13494_s3 + $0xb84] sm:$0xf]  ;;  %v8124_v22 = vld [vmem:[%s13494_s3 + $0xb90] sm:$0xf0]  ;;  %v7999_v10 = vor.u32 %v8636_v52, %v7996_v53 }
 0x3c0   :  { %v4751_v25 = vadd.f32 %v4750_v33, %v4731_v18  ;;  %v8568_v7 = vld [vmem:[%s13494_s3 + $0x864] sm:$0xf]  ;;  %v7724_v54 = vld [vmem:[%s13494_s3 + $0x870] sm:$0xf0]  ;;  %v8127_v39 = vor.u32 %v8668_v20, %v8124_v22 }
 0x3c1   :  { %5103 = vmatpush.bf16.msra.mxu2 %v7775_v50  ;;  %5122 = vmatpush.bf16.msra.mxu3 %v7903_v55  ;;  %v8600_v9 = vld [vmem:[%s13494_s3 + $0x964] sm:$0xf]  ;;  %v7852_v28 = vld [vmem:[%s13494_s3 + $0x970] sm:$0xf0] }
 0x3c2   :  { %v4770_v24 = vadd.f32 %v4769_v41, %v4751_v25  ;;  %v8632_v41 = vld [vmem:[%s13494_s3 + $0xa64] sm:$0xf]  ;;  %v7980_v50 = vld [vmem:[%s13494_s3 + $0xa70] sm:$0xf0] }
 0x3c3   :  { %5141 = vmatpush.bf16.msrb.mxu0 %v8031_v49  ;;  %5160 = vmatpush.bf16.msrb.mxu1 %v8159_v3  ;;  %v4771_v51 = vpop.f32.mrf.mxu0  ;;  %v4790_v11 = vpop.f32.mrf.mxu1  ;;  %v8664_v55 = vld [vmem:[%s13494_s3 + $0xb64] sm:$0xf]  ;;  %v8108_v14 = vld [vmem:[%s13494_s3 + $0xb70] sm:$0xf0]  ;;  %v7727_v49 = vor.u32 %v8568_v7, %v7724_v54  ;;  %v7855_v3 = vor.u32 %v8600_v9, %v7852_v28  ;;  %v7983_v48 = vor.u32 %v8632_v41, %v7980_v50 }
 0x3c4   :  { %v11499_v17 = vadd.f32 %v4788_v4, %v4770_v24  ;;  %v8564_v30 = vld [vmem:[%s13494_s3 + $0x844] sm:$0xf]  ;;  %v7708_v2 = vld [vmem:[%s13494_s3 + $0x850] sm:$0xf0]  ;;  %v8111_v35 = vor.u32 %v8664_v55, %v8108_v14 }
 0x3c5   :  { %5104 = vmatpush.bf16.msra.mxu2 %v7759_v36  ;;  %5123 = vmatpush.bf16.msra.mxu3 %v7887_v56  ;;  %v8596_v4 = vld [vmem:[%s13494_s3 + $0x944] sm:$0xf]  ;;  %v7836_v36 = vld [vmem:[%s13494_s3 + $0x950] sm:$0xf0]  ;;  %v7711_v58 = vor.u32 %v8564_v30, %v7708_v2 }
 0x3c6   :  { %v8628_v56 = vld [vmem:[%s13494_s3 + $0xa44] sm:$0xf]  ;;  %v7964_v5 = vld [vmem:[%s13494_s3 + $0xa50] sm:$0xf0]  ;;  %v7839_v52 = vor.u32 %v8596_v4, %v7836_v36  ;;  %v8331_v4 = vld [vmem:[%s13494_s3 + $0xf4] sm:$0xf0] }
 0x3c7   :  { %5142 = vmatpush.bf16.msrb.mxu0 %v8015_v15  ;;  %5161 = vmatpush.bf16.msrb.mxu1 %v8143_v19  ;;  %v4733_v1 = vpop.f32.mrf.mxu2  ;;  %v4752_v26 = vpop.f32.mrf.mxu3  ;;  %v8660_v18 = vld [vmem:[%s13494_s3 + $0xb44] sm:$0xf]  ;;  %v8092_v33 = vld [vmem:[%s13494_s3 + $0xb50] sm:$0xf0]  ;;  %v7967_v20 = vor.u32 %v8628_v56, %v7964_v5  ;;  %v6898_v36 = vld [vmem:[%s13494_s3 + $0x1e8] sm:$0xf] }
 0x3c8   :  { %v4753_v38 = vadd.f32 %v4752_v26, %v4733_v1  ;;  %v8560_v25 = vld [vmem:[%s13494_s3 + $0x824] sm:$0xf]  ;;  %v7692_v53 = vld [vmem:[%s13494_s3 + $0x830] sm:$0xf0]  ;;  %v8095_v22 = vor.u32 %v8660_v18, %v8092_v33  ;;  %v8363_v56 = vld [vmem:[%s13494_s3 + $0x1f4] sm:$0xf0] }
 0x3c9   :  { %5105 = vmatpush.bf16.msra.mxu2 %v7743_v60  ;;  %5124 = vmatpush.bf16.msra.mxu3 %v7871_v63  ;;  %v8592_v24 = vld [vmem:[%s13494_s3 + $0x924] sm:$0xf]  ;;  %v7948_v63 = vld [vmem:[%s13494_s3 + $0xa30] sm:$0xf0]  ;;  %v7695_v9 = vor.u32 %v8560_v25, %v7692_v53  ;;  %v7154_v25 = vld [vmem:[%s13494_s3 + $0x3e8] sm:$0xf] }
 0x3ca   :  { %v4772_v15 = vadd.f32 %v4771_v51, %v4753_v38  ;;  %v7820_v51 = vld [vmem:[%s13494_s3 + $0x930] sm:$0xf0]  ;;  %v8624_v60 = vld [vmem:[%s13494_s3 + $0xa24] sm:$0xf]  ;;  %v7026_v38 = vld [vmem:[%s13494_s3 + $0x2e8] sm:$0xf] }
 0x3cb   :  { %5143 = vmatpush.bf16.msrb.mxu0 %v7999_v10  ;;  %5162 = vmatpush.bf16.msrb.mxu1 %v8127_v39  ;;  %v4774_v19 = vpop.f32.mrf.mxu0  ;;  %v4793_v61 = vpop.f32.mrf.mxu1  ;;  %v8656_v7 = vld [vmem:[%s13494_s3 + $0xb24] sm:$0xf]  ;;  %v8076_v54 = vld [vmem:[%s13494_s3 + $0xb30] sm:$0xf0]  ;;  %v7823_v28 = vor.u32 %v8592_v24, %v7820_v51  ;;  %v8427_v53 = vld [vmem:[%s13494_s3 + $0x3f4] sm:$0xf0]  ;;  %v6899_v24 = vor.u32 %v8363_v56, %v6898_v36 }
 0x3cc   :  { %5039 = vmatmul.bf16.gmra.mxu2 %v10864_v23  ;;  %5058 = vmatmul.bf16.gmra.mxu3 %v10873_v62  ;;  %v11551_v10 = vadd.f32 %v4790_v11, %v4772_v15  ;;  %v8556_v39 = vld [vmem:[%s13494_s3 + $0x804] sm:$0xf]  ;;  %v7676_v41 = vld [vmem:[%s13494_s3 + $0x810] sm:$0xf0]  ;;  %v6866_v36 = vld [vmem:[%s13494_s3 + $0x1a8] sm:$0xf] }
 0x3cd   :  { %5106 = vmatpush.bf16.msra.mxu2 %v7727_v49  ;;  %5125 = vmatpush.bf16.msra.mxu3 %v7855_v3  ;;  %v8588_v11 = vld [vmem:[%s13494_s3 + $0x904] sm:$0xf]  ;;  %v7804_v50 = vld [vmem:[%s13494_s3 + $0x910] sm:$0xf0]  ;;  %v7951_v49 = vor.u32 %v8624_v60, %v7948_v63  ;;  %v8079_v3 = vor.u32 %v8656_v7, %v8076_v54  ;;  %v7679_v15 = vor.u32 %v8556_v39, %v7676_v41  ;;  %v6754_v7 = vld [vmem:[%s13494_s3 + $0xc8] sm:$0xf] }
 0x3ce   :  { %5077 = vmatmul.bf16.gmra.mxu0 %v10887_v46  ;;  %5096 = vmatmul.bf16.gmra.mxu1 %v10890_v47  ;;  %v8620_v30 = vld [vmem:[%s13494_s3 + $0xa04] sm:$0xf]  ;;  %v7932_v2 = vld [vmem:[%s13494_s3 + $0xa10] sm:$0xf0]  ;;  %v7155_v63 = vor.u32 %v8427_v53, %v7154_v25  ;;  %v8327_v54 = vld [vmem:[%s13494_s3 + $0xd4] sm:$0xf0] }
 0x3cf   :  { %5144 = vmatpush.bf16.msrb.mxu0 %v7983_v48  ;;  %5163 = vmatpush.bf16.msrb.mxu1 %v8111_v35  ;;  %v4736_v55 = vpop.f32.mrf.mxu2  ;;  %v4755_v14 = vpop.f32.mrf.mxu3  ;;  %v8652_v1 = vld [vmem:[%s13494_s3 + $0xb04] sm:$0xf]  ;;  %v8060_v48 = vld [vmem:[%s13494_s3 + $0xb10] sm:$0xf0]  ;;  %v6770_v35 = vld [vmem:[%s13494_s3 + $0xe8] sm:$0xf] }
 0x3d0   :  { %v4756_v26 = vadd.f32 %v4755_v14, %v4736_v55  ;;  %v7010_v41 = vld [vmem:[%s13494_s3 + $0x2c8] sm:$0xf]  ;;  %v8423_v14 = vld [vmem:[%s13494_s3 + $0x3d4] sm:$0xf0] }
 0x3d1   :  { %5107 = vmatpush.bf16.msra.mxu2 %v7711_v58  ;;  %5126 = vmatpush.bf16.msra.mxu3 %v7839_v52  ;;  %v7807_v58 = vor.u32 %v8588_v11, %v7804_v50  ;;  %v8395_v52 = vld [vmem:[%s13494_s3 + $0x2f4] sm:$0xf0]  ;;  %v7138_v55 = vld [vmem:[%s13494_s3 + $0x3c8] sm:$0xf] }
 0x3d2   :  { %v4775_v5 = vadd.f32 %v4774_v19, %v4756_v26  ;;  %v7935_v19 = vor.u32 %v8620_v30, %v7932_v2  ;;  %v7027_v60 = vor.u32 %v8395_v52, %v7026_v38  ;;  %v8391_v50 = vld [vmem:[%s13494_s3 + $0x2d4] sm:$0xf0]  ;;  %v6755_v2 = vor.u32 %v8327_v54, %v6754_v7  ;;  %v6738_v26 = vld [vmem:[%s13494_s3 + $0xa8] sm:$0xf] }
 0x3d3   :  { %5145 = vmatpush.bf16.msrb.mxu0 %v7967_v20  ;;  %5164 = vmatpush.bf16.msrb.mxu1 %v8095_v22  ;;  %v4776_v18 = vpop.f32.mrf.mxu0  ;;  %v4795_v33 = vpop.f32.mrf.mxu1  ;;  %v8063_v20 = vor.u32 %v8652_v1, %v8060_v48  ;;  %v6771_v22 = vor.u32 %v8331_v4, %v6770_v35  ;;  %v8323_v48 = vld [vmem:[%s13494_s3 + $0xb4] sm:$0xf0]  ;;  %v7011_v35 = vor.u32 %v8391_v50, %v7010_v41  ;;  %v6994_v38 = vld [vmem:[%s13494_s3 + $0x2a8] sm:$0xf] }
 0x3d4   :  { %v11603_v51 = vadd.f32 %v4793_v61, %v4775_v5  ;;  %v6882_v61 = vld [vmem:[%s13494_s3 + $0x1c8] sm:$0xf]  ;;  %v7139_v4 = vor.u32 %v8423_v14, %v7138_v55  ;;  %v8355_v56 = vld [vmem:[%s13494_s3 + $0x1b4] sm:$0xf0]  ;;  %v6739_v52 = vor.u32 %v8323_v48, %v6738_v26 }
 0x3d5   :  { %5108 = vmatpush.bf16.msra.mxu2 %v7695_v9  ;;  %5127 = vmatpush.bf16.msra.mxu3 %v7823_v28  ;;  %v8359_v28 = vld [vmem:[%s13494_s3 + $0x1d4] sm:$0xf0]  ;;  %v6867_v25 = vor.u32 %v8355_v56, %v6866_v36  ;;  %v6722_v53 = vld [vmem:[%s13494_s3 + $0x88] sm:$0xf] }
 0x3d6   :  { %v6883_v1 = vor.u32 %v8359_v28, %v6882_v61  ;;  %v8387_v5 = vld [vmem:[%s13494_s3 + $0x2b4] sm:$0xf0]  ;;  %v6978_v7 = vld [vmem:[%s13494_s3 + $0x288] sm:$0xf] }
 0x3d7   :  { %5146 = vmatpush.bf16.msrb.mxu0 %v7951_v49  ;;  %5165 = vmatpush.bf16.msrb.mxu1 %v8079_v3  ;;  %v4738_v39 = vpop.f32.mrf.mxu2  ;;  %v4757_v9 = vpop.f32.mrf.mxu3  ;;  %v8415_v61 = vld [vmem:[%s13494_s3 + $0x394] sm:$0xf0]  ;;  %v6706_v55 = vld [vmem:[%s13494_s3 + $0x68] sm:$0xf] }
 0x3d8   :  { %v4758_v11 = vadd.f32 %v4757_v9, %v4738_v39  ;;  %v8383_v39 = vld [vmem:[%s13494_s3 + $0x294] sm:$0xf0]  ;;  %v7106_v9 = vld [vmem:[%s13494_s3 + $0x388] sm:$0xf] }
 0x3d9   :  { %5109 = vmatpush.bf16.msra.mxu2 %v7679_v15  ;;  %5128 = vmatpush.bf16.msra.mxu3 %v7807_v58  ;;  %v8419_v15 = vld [vmem:[%s13494_s3 + $0x3b4] sm:$0xf0]  ;;  %v6962_v48 = vld [vmem:[%s13494_s3 + $0x268] sm:$0xf] }
 0x3da   :  { %v4777_v49 = vadd.f32 %v4776_v18, %v4758_v11  ;;  %v7122_v18 = vld [vmem:[%s13494_s3 + $0x3a8] sm:$0xf]  ;;  %v8315_v14 = vld [vmem:[%s13494_s3 + $0x74] sm:$0xf0] }
 0x3db   :  { %5147 = vmatpush.bf16.msrb.mxu0 %v7935_v19  ;;  %5166 = vmatpush.bf16.msrb.mxu1 %v8063_v20  ;;  %v4845_v3 = vpop.f32.mrf.mxu0  ;;  %v11629_v30 = vpop.f32.mrf.mxu1  ;;  %v8319_v19 = vld [vmem:[%s13494_s3 + $0x94] sm:$0xf0]  ;;  %v7090_v36 = vld [vmem:[%s13494_s3 + $0x368] sm:$0xf] }
 0x3dc   :  { %5110 = vmatmul.bf16.vlgmr.msra.gmra.mxu2 %v10994_v13  ;;  %5129 = vmatmul.bf16.vlgmr.msra.gmra.mxu3 %v10997_v8  ;;  %v11657_v58 = vadd.f32 %v4795_v33, %v4777_v49  ;;  %v6995_v33 = vor.u32 %v8387_v5, %v6994_v38  ;;  %v6723_v50 = vor.u32 %v8319_v19, %v6722_v53  ;;  %v8347_v26 = vld [vmem:[%s13494_s3 + $0x174] sm:$0xf0] }
 0x3dd   :  { %5178 = vmatpush.bf16.msrb.mxu2 %v6771_v22  ;;  %5197 = vmatpush.bf16.msrb.mxu3 %v6899_v24  ;;  %v7123_v24 = vor.u32 %v8419_v15, %v7122_v18  ;;  %v6979_v49 = vor.u32 %v8383_v39, %v6978_v7  ;;  %v8411_v56 = vld [vmem:[%s13494_s3 + $0x374] sm:$0xf0]  ;;  %v6707_v38 = vor.u32 %v8315_v14, %v6706_v55  ;;  %v6802_v55 = vld [vmem:[%s13494_s3 + $0x128] sm:$0xf] }
 0x3de   :  { %5148 = vmatmul.bf16.vlgmr.msrb.gmra.mxu0 %v11011_v40  ;;  %5167 = vmatmul.bf16.vlgmr.msrb.gmra.mxu1 %v11014_v44  ;;  %v8311_v18 = vld [vmem:[%s13494_s3 + $0x54] sm:$0xf0]  ;;  %v7091_v19 = vor.u32 %v8411_v56, %v7090_v36  ;;  %v6786_v56 = vld [vmem:[%s13494_s3 + $0x108] sm:$0xf] }
 0x3df   :  { %5216 = vmatpush.bf16.msra.mxu0 %v7027_v60  ;;  %5235 = vmatpush.bf16.msra.mxu1 %v7155_v63  ;;  %v4807_v20 = vpop.f32.mrf.mxu2  ;;  %v4826_v22 = vpop.f32.mrf.mxu3  ;;  %v6850_v60 = vld [vmem:[%s13494_s3 + $0x188] sm:$0xf]  ;;  %v8351_v63 = vld [vmem:[%s13494_s3 + $0x194] sm:$0xf0] }
 0x3e0   :  { %v4808_v54 = vadd.f32 %v4807_v20, %v11499_v17  ;;  %v6851_v17 = vor.u32 %v8351_v63, %v6850_v60  ;;  %v6818_v20 = vld [vmem:[%s13494_s3 + $0x148] sm:$0xf]  ;;  %v8407_v63 = vld [vmem:[%s13494_s3 + $0x354] sm:$0xf0] }
 0x3e1   :  { %5179 = vmatpush.bf16.msrb.mxu2 %v6755_v2  ;;  %5198 = vmatpush.bf16.msrb.mxu3 %v6883_v1  ;;  %v7107_v2 = vor.u32 %v8415_v61, %v7106_v9  ;;  %v6834_v1 = vld [vmem:[%s13494_s3 + $0x168] sm:$0xf]  ;;  %v8339_v14 = vld [vmem:[%s13494_s3 + $0x134] sm:$0xf0] }
 0x3e2   :  { %v4827_v28 = vadd.f32 %v4826_v22, %v4808_v54  ;;  %v6835_v5 = vor.u32 %v8347_v26, %v6834_v1  ;;  %v8343_v22 = vld [vmem:[%s13494_s3 + $0x154] sm:$0xf0]  ;;  %v7074_v60 = vld [vmem:[%s13494_s3 + $0x348] sm:$0xf] }
 0x3e3   :  { %5217 = vmatpush.bf16.msra.mxu0 %v7011_v35  ;;  %5236 = vmatpush.bf16.msra.mxu1 %v7139_v4  ;;  %v4847_v41 = vpop.f32.mrf.mxu0  ;;  %v11686_v11 = vpop.f32.mrf.mxu1  ;;  %v8379_v4 = vld [vmem:[%s13494_s3 + $0x274] sm:$0xf0]  ;;  %v6674_v61 = vld [vmem:[%s13494_s3 + $0x28] sm:$0xf] }
 0x3e4   :  { %v4846_v35 = vadd.f32 %v4845_v3, %v4827_v28  ;;  %v6690_v3 = vld [vmem:[%s13494_s3 + $0x48] sm:$0xf]  ;;  %v6963_v53 = vor.u32 %v8379_v4, %v6962_v48  ;;  %v8307_v28 = vld [vmem:[%s13494_s3 + $0x34] sm:$0xf0]  ;;  %v6803_v4 = vor.u32 %v8339_v14, %v6802_v55 }
 0x3e5   :  { %5180 = vmatpush.bf16.msrb.mxu2 %v6739_v52  ;;  %5199 = vmatpush.bf16.msrb.mxu3 %v6867_v25  ;;  %v6691_v9 = vor.u32 %v8311_v18, %v6690_v3  ;;  %v8371_v1 = vld [vmem:[%s13494_s3 + $0x234] sm:$0xf0]  ;;  %v7058_v26 = vld [vmem:[%s13494_s3 + $0x328] sm:$0xf] }
 0x3e6   :  { %v11719_v15 = vadd.f32 %v11629_v30, %v4846_v35  ;;  %v8403_v48 = vld [vmem:[%s13494_s3 + $0x334] sm:$0xf0]  ;;  %v6675_v35 = vor.u32 %v8307_v28, %v6674_v61 }
 0x3e7   :  { %5218 = vmatpush.bf16.msra.mxu0 %v6995_v33  ;;  %5237 = vmatpush.bf16.msra.mxu1 %v7123_v24  ;;  %v4809_v52 = vpop.f32.mrf.mxu2  ;;  %v4828_v25 = vpop.f32.mrf.mxu3  ;;  %v6946_v33 = vld [vmem:[%s13494_s3 + $0x248] sm:$0xf]  ;;  %v8375_v24 = vld [vmem:[%s13494_s3 + $0x254] sm:$0xf0] }
 0x3e8   :  { %v4810_v30 = vadd.f32 %v4809_v52, %v11551_v10  ;;  %v6819_v10 = vor.u32 %v8343_v22, %v6818_v20  ;;  %v8303_v36 = vld [vmem:[%s13494_s3 + $0x14] sm:$0xf0]  ;;  %v7042_v20 = vld [vmem:[%s13494_s3 + $0x308] sm:$0xf] }
 0x3e9   :  { %5181 = vmatpush.bf16.msrb.mxu2 %v6723_v50  ;;  %5200 = vmatpush.bf16.msrb.mxu3 %v6851_v17  ;;  %v6947_v50 = vor.u32 %v8375_v24, %v6946_v33  ;;  %v7075_v17 = vor.u32 %v8407_v63, %v7074_v60  ;;  %v8399_v22 = vld [vmem:[%s13494_s3 + $0x314] sm:$0xf0]  ;;  %v7282_v33 = vld [vmem:[%s13494_s3 + $0x4e8] sm:$0xf] }
 0x3ea   :  { %v4829_v7 = vadd.f32 %v4828_v25, %v4810_v30  ;;  %v7059_v25 = vor.u32 %v8403_v48, %v7058_v26  ;;  %v8459_v30 = vld [vmem:[%s13494_s3 + $0x4f4] sm:$0xf0]  ;;  %v7410_v24 = vld [vmem:[%s13494_s3 + $0x5e8] sm:$0xf]  ;;  %v7043_v14 = vor.u32 %v8399_v22, %v7042_v20 }
 0x3eb   :  { %5219 = vmatpush.bf16.msra.mxu0 %v6979_v49  ;;  %5238 = vmatpush.bf16.msra.mxu1 %v7107_v2  ;;  %v4850_v54 = vpop.f32.mrf.mxu0  ;;  %v11740_v39 = vpop.f32.mrf.mxu1  ;;  %v6930_v49 = vld [vmem:[%s13494_s3 + $0x228] sm:$0xf]  ;;  %v8523_v28 = vld [vmem:[%s13494_s3 + $0x6f4] sm:$0xf0] }
 0x3ec   :  { %v4848_v2 = vadd.f32 %v4847_v41, %v4829_v7  ;;  %5115 = vmatmul.bf16.gmra.mxu2 %v11109_v34  ;;  %5134 = vmatmul.bf16.gmra.mxu3 %v11121_v57  ;;  %v6658_v41 = vld [vmem:[%s13494_s3 + $0x8] sm:$0xf]  ;;  %v6931_v52 = vor.u32 %v8371_v1, %v6930_v49 }
 0x3ed   :  { %5182 = vmatpush.bf16.msrb.mxu2 %v6707_v38  ;;  %5201 = vmatpush.bf16.msrb.mxu3 %v6835_v5  ;;  %v8335_v38 = vld [vmem:[%s13494_s3 + $0x114] sm:$0xf0]  ;;  %v7538_v60 = vld [vmem:[%s13494_s3 + $0x6e8] sm:$0xf] }
 0x3ee   :  { %5153 = vmatmul.bf16.gmra.mxu0 %v11135_v32  ;;  %5172 = vmatmul.bf16.gmra.mxu1 %v11138_v31  ;;  %v11783_v5 = vadd.f32 %v11686_v11, %v4848_v2  ;;  %v6787_v61 = vor.u32 %v8335_v38, %v6786_v56  ;;  %v7283_v2 = vor.u32 %v8459_v30, %v7282_v33  ;;  %v8487_v38 = vld [vmem:[%s13494_s3 + $0x5d4] sm:$0xf0]  ;;  %v7250_v22 = vld [vmem:[%s13494_s3 + $0x4a8] sm:$0xf] }
 0x3ef   :  { %5220 = vmatpush.bf16.msra.mxu0 %v6963_v53  ;;  %5239 = vmatpush.bf16.msra.mxu1 %v7091_v19  ;;  %v4812_v3 = vpop.f32.mrf.mxu2  ;;  %v4831_v18 = vpop.f32.mrf.mxu3  ;;  %v6914_v53 = vld [vmem:[%s13494_s3 + $0x208] sm:$0xf]  ;;  %v8367_v19 = vld [vmem:[%s13494_s3 + $0x214] sm:$0xf0]  ;;  %v7539_v26 = vor.u32 %v8523_v28, %v7538_v60 }
 0x3f0   :  { %v4813_v11 = vadd.f32 %v4812_v3, %v11603_v51  ;;  %v8491_v51 = vld [vmem:[%s13494_s3 + $0x5f4] sm:$0xf0]  ;;  %v6915_v55 = vor.u32 %v8367_v19, %v6914_v53  ;;  %v7522_v3 = vld [vmem:[%s13494_s3 + $0x6c8] sm:$0xf] }
 0x3f1   :  { %5183 = vmatpush.bf16.msrb.mxu2 %v6691_v9  ;;  %5202 = vmatpush.bf16.msrb.mxu3 %v6819_v10  ;;  %v6659_v10 = vor.u32 %v8303_v36, %v6658_v41  ;;  %v7411_v1 = vor.u32 %v8491_v51, %v7410_v24  ;;  %v7266_v41 = vld [vmem:[%s13494_s3 + $0x4c8] sm:$0xf]  ;;  %v8451_v33 = vld [vmem:[%s13494_s3 + $0x4b4] sm:$0xf0] }
 0x3f2   :  { %v4832_v63 = vadd.f32 %v4831_v18, %v4813_v11  ;;  %v7378_v51 = vld [vmem:[%s13494_s3 + $0x5a8] sm:$0xf]  ;;  %v8483_v60 = vld [vmem:[%s13494_s3 + $0x5b4] sm:$0xf0] }
 0x3f3   :  { %5221 = vmatpush.bf16.msra.mxu0 %v6947_v50  ;;  %5240 = vmatpush.bf16.msra.mxu1 %v7075_v17  ;;  %v4852_v7 = vpop.f32.mrf.mxu0  ;;  %v11813_v9 = vpop.f32.mrf.mxu1  ;;  %v7666_v50 = vld [vmem:[%s13494_s3 + $0x7e8] sm:$0xf]  ;;  %v8555_v17 = vld [vmem:[%s13494_s3 + $0x7f4] sm:$0xf0] }
 0x3f4   :  { %v4851_v49 = vadd.f32 %v4850_v54, %v4832_v63  ;;  %v7667_v48 = vor.u32 %v8555_v17, %v7666_v50  ;;  %v7394_v54 = vld [vmem:[%s13494_s3 + $0x5c8] sm:$0xf]  ;;  %v8547_v50 = vld [vmem:[%s13494_s3 + $0x7b4] sm:$0xf0]  ;;  %v7379_v17 = vor.u32 %v8483_v60, %v7378_v51 }
 0x3f5   :  { %5184 = vmatpush.bf16.msrb.mxu2 %v6675_v35  ;;  %5203 = vmatpush.bf16.msrb.mxu3 %v6803_v4  ;;  %v8455_v35 = vld [vmem:[%s13494_s3 + $0x4d4] sm:$0xf0]  ;;  %v7395_v11 = vor.u32 %v8487_v38, %v7394_v54  ;;  %v7506_v63 = vld [vmem:[%s13494_s3 + $0x6a8] sm:$0xf] }
 0x3f6   :  { %v11831_v4 = vadd.f32 %v11740_v39, %v4851_v49  ;;  %v8519_v39 = vld [vmem:[%s13494_s3 + $0x6d4] sm:$0xf0]  ;;  %v7634_v28 = vld [vmem:[%s13494_s3 + $0x7a8] sm:$0xf] }
 0x3f7   :  { %5222 = vmatpush.bf16.msra.mxu0 %v6931_v52  ;;  %5241 = vmatpush.bf16.msra.mxu1 %v7059_v25  ;;  %v4814_v36 = vpop.f32.mrf.mxu2  ;;  %v4833_v56 = vpop.f32.mrf.mxu3  ;;  %v7650_v52 = vld [vmem:[%s13494_s3 + $0x7c8] sm:$0xf]  ;;  %v8551_v25 = vld [vmem:[%s13494_s3 + $0x7d4] sm:$0xf0]  ;;  %v7523_v30 = vor.u32 %v8519_v39, %v7522_v3 }
 0x3f8   :  { %v4815_v18 = vadd.f32 %v4814_v36, %v11657_v58  ;;  %v7267_v58 = vor.u32 %v8455_v35, %v7266_v41  ;;  %v7651_v24 = vor.u32 %v8551_v25, %v7650_v52  ;;  %v7362_v41 = vld [vmem:[%s13494_s3 + $0x588] sm:$0xf]  ;;  %v8479_v35 = vld [vmem:[%s13494_s3 + $0x594] sm:$0xf0] }
 0x3f9   :  { %5185 = vmatpush.bf16.msrb.mxu2 %v6659_v10  ;;  %5204 = vmatpush.bf16.msrb.mxu3 %v6787_v61  ;;  %v8515_v61 = vld [vmem:[%s13494_s3 + $0x6b4] sm:$0xf0]  ;;  %v7490_v36 = vld [vmem:[%s13494_s3 + $0x688] sm:$0xf] }
 0x3fa   :  { %v4834_v53 = vadd.f32 %v4833_v56, %v4815_v18  ;;  %v8511_v56 = vld [vmem:[%s13494_s3 + $0x694] sm:$0xf0]  ;;  %v7618_v54 = vld [vmem:[%s13494_s3 + $0x788] sm:$0xf] }
 0x3fb   :  { %5223 = vmatpush.bf16.msra.mxu0 %v6915_v55  ;;  %5242 = vmatpush.bf16.msra.mxu1 %v7043_v14  ;;  %v4921_v19 = vpop.f32.mrf.mxu0  ;;  %v4940_v20 = vpop.f32.mrf.mxu1  ;;  %v7234_v55 = vld [vmem:[%s13494_s3 + $0x488] sm:$0xf]  ;;  %v8447_v14 = vld [vmem:[%s13494_s3 + $0x494] sm:$0xf0] }
 0x3fc   :  { %v4853_v10 = vadd.f32 %v4852_v7, %v4834_v53  ;;  %5186 = vmatmul.bf16.vlgmr.msrb.gmra.mxu2 %v10189_v29  ;;  %5205 = vmatmul.bf16.vlgmr.msrb.gmra.mxu3 %v10193_v0  ;;  %v7251_v7 = vor.u32 %v8451_v33, %v7250_v22  ;;  %v8543_v38 = vld [vmem:[%s13494_s3 + $0x794] sm:$0xf0]  ;;  %v7235_v52 = vor.u32 %v8447_v14, %v7234_v55  ;;  %v7218_v25 = vld [vmem:[%s13494_s3 + $0x468] sm:$0xf] }
 0x3fd   :  { %5254 = vmatpush.bf16.msra.mxu2 %v7283_v2  ;;  %5273 = vmatpush.bf16.msra.mxu3 %v7411_v1  ;;  %v8443_v53 = vld [vmem:[%s13494_s3 + $0x474] sm:$0xf0]  ;;  %v7346_v22 = vld [vmem:[%s13494_s3 + $0x568] sm:$0xf] }
 0x3fe   :  { %5224 = vmatmul.bf16.vlgmr.msra.gmra.mxu0 %v10197_v42  ;;  %5243 = vmatmul.bf16.vlgmr.msra.gmra.mxu1 %v10201_v27  ;;  %v11887_v49 = vadd.f32 %v11813_v9, %v4853_v10  ;;  %v8475_v33 = vld [vmem:[%s13494_s3 + $0x574] sm:$0xf0]  ;;  %v7602_v60 = vld [vmem:[%s13494_s3 + $0x768] sm:$0xf] }
 0x3ff   :  { %5292 = vmatpush.bf16.msrb.mxu0 %v7539_v26  ;;  %5311 = vmatpush.bf16.msrb.mxu1 %v7667_v48  ;;  %v4883_v2 = vpop.f32.mrf.mxu2  ;;  %v4902_v1 = vpop.f32.mrf.mxu3  ;;  %v7507_v26 = vor.u32 %v8515_v61, %v7506_v63  ;;  %v7635_v48 = vor.u32 %v8547_v50, %v7634_v28  ;;  %v8507_v51 = vld [vmem:[%s13494_s3 + $0x674] sm:$0xf0]  ;;  %v7219_v61 = vor.u32 %v8443_v53, %v7218_v25  ;;  %v7314_v25 = vld [vmem:[%s13494_s3 + $0x528] sm:$0xf] }
 0x400   :  { %v4884_v9 = vadd.f32 %v4883_v2, %v11719_v15  ;;  %v7363_v15 = vor.u32 %v8479_v35, %v7362_v41  ;;  %v8539_v63 = vld [vmem:[%s13494_s3 + $0x774] sm:$0xf0]  ;;  %v7347_v28 = vor.u32 %v8475_v33, %v7346_v22  ;;  %v7586_v41 = vld [vmem:[%s13494_s3 + $0x748] sm:$0xf] }
 0x401   :  { %5255 = vmatpush.bf16.msra.mxu2 %v7267_v58  ;;  %5274 = vmatpush.bf16.msra.mxu3 %v7395_v11  ;;  %v7491_v58 = vor.u32 %v8511_v56, %v7490_v36  ;;  %v7619_v11 = vor.u32 %v8543_v38, %v7618_v54  ;;  %v8439_v50 = vld [vmem:[%s13494_s3 + $0x454] sm:$0xf0]  ;;  %v7603_v14 = vor.u32 %v8539_v63, %v7602_v60  ;;  %v7186_v38 = vld [vmem:[%s13494_s3 + $0x428] sm:$0xf] }
 0x402   :  { %v4903_v3 = vadd.f32 %v4902_v1, %v4884_v9  ;;  %v8471_v2 = vld [vmem:[%s13494_s3 + $0x554] sm:$0xf0]  ;;  %v7458_v1 = vld [vmem:[%s13494_s3 + $0x648] sm:$0xf] }
 0x403   :  { %5293 = vmatpush.bf16.msrb.mxu0 %v7523_v30  ;;  %5312 = vmatpush.bf16.msrb.mxu1 %v7651_v24  ;;  %v4923_v18 = vpop.f32.mrf.mxu0  ;;  %v11908_v39 = vpop.f32.mrf.mxu1  ;;  %v7474_v30 = vld [vmem:[%s13494_s3 + $0x668] sm:$0xf]  ;;  %v8535_v35 = vld [vmem:[%s13494_s3 + $0x754] sm:$0xf0] }
 0x404   :  { %v4922_v24 = vadd.f32 %v4921_v19, %v4903_v3  ;;  %v7202_v19 = vld [vmem:[%s13494_s3 + $0x448] sm:$0xf]  ;;  %v7475_v55 = vor.u32 %v8507_v51, %v7474_v30  ;;  %v8435_v3 = vld [vmem:[%s13494_s3 + $0x434] sm:$0xf0] }
 0x405   :  { %5256 = vmatpush.bf16.msra.mxu2 %v7251_v7  ;;  %5275 = vmatpush.bf16.msra.mxu3 %v7379_v17  ;;  %v7203_v54 = vor.u32 %v8439_v50, %v7202_v19  ;;  %v8467_v53 = vld [vmem:[%s13494_s3 + $0x534] sm:$0xf0]  ;;  %v7570_v33 = vld [vmem:[%s13494_s3 + $0x728] sm:$0xf]  ;;  %v7187_v51 = vor.u32 %v8435_v3, %v7186_v38 }
 0x406   :  { %v11934_v10 = vadd.f32 %v4940_v20, %v4922_v24  ;;  %v7330_v20 = vld [vmem:[%s13494_s3 + $0x548] sm:$0xf]  ;;  %v8499_v22 = vld [vmem:[%s13494_s3 + $0x634] sm:$0xf0]  ;;  %v7315_v60 = vor.u32 %v8467_v53, %v7314_v25 }
 0x407   :  { %5294 = vmatpush.bf16.msrb.mxu0 %v7507_v26  ;;  %5313 = vmatpush.bf16.msrb.mxu1 %v7635_v48  ;;  %v4885_v7 = vpop.f32.mrf.mxu2  ;;  %v4904_v17 = vpop.f32.mrf.mxu3  ;;  %v8503_v48 = vld [vmem:[%s13494_s3 + $0x654] sm:$0xf0] }
 0x408   :  { %v4886_v26 = vadd.f32 %v4885_v7, %v11783_v5  ;;  %v7331_v5 = vor.u32 %v8471_v2, %v7330_v20  ;;  %v8531_v30 = vld [vmem:[%s13494_s3 + $0x734] sm:$0xf0] }
 0x409   :  { %5257 = vmatpush.bf16.msra.mxu2 %v7235_v52  ;;  %5276 = vmatpush.bf16.msra.mxu3 %v7363_v15  ;;  %v7459_v52 = vor.u32 %v8503_v48, %v7458_v1  ;;  %v7587_v15 = vor.u32 %v8535_v35, %v7586_v41  ;;  %v8431_v63 = vld [vmem:[%s13494_s3 + $0x414] sm:$0xf0]  ;;  %v7571_v7 = vor.u32 %v8531_v30, %v7570_v33  ;;  %v7794_v1 = vld [vmem:[%s13494_s3 + $0x8e8] sm:$0xf] }
 0x40a   :  { %v4905_v36 = vadd.f32 %v4904_v17, %v4886_v26  ;;  %v7426_v17 = vld [vmem:[%s13494_s3 + $0x608] sm:$0xf]  ;;  %v8527_v2 = vld [vmem:[%s13494_s3 + $0x714] sm:$0xf0] }
 0x40b   :  { %5295 = vmatpush.bf16.msrb.mxu0 %v7491_v58  ;;  %5314 = vmatpush.bf16.msrb.mxu1 %v7619_v11  ;;  %v4926_v9 = vpop.f32.mrf.mxu0  ;;  %v11961_v56 = vpop.f32.mrf.mxu1  ;;  %v7442_v58 = vld [vmem:[%s13494_s3 + $0x628] sm:$0xf]  ;;  %v8587_v26 = vld [vmem:[%s13494_s3 + $0x8f4] sm:$0xf0] }
 0x40c   :  { %v4924_v11 = vadd.f32 %v4923_v18, %v4905_v36  ;;  %5191 = vmatmul.bf16.gmra.mxu2 %v10206_v43  ;;  %5210 = vmatmul.bf16.gmra.mxu3 %v10210_v59  ;;  %v7170_v18 = vld [vmem:[%s13494_s3 + $0x408] sm:$0xf]  ;;  %v8651_v3 = vld [vmem:[%s13494_s3 + $0xaf4] sm:$0xf0] }
 0x40d   :  { %5258 = vmatpush.bf16.msra.mxu2 %v7219_v61  ;;  %5277 = vmatpush.bf16.msra.mxu3 %v7347_v28  ;;  %v7298_v61 = vld [vmem:[%s13494_s3 + $0x508] sm:$0xf]  ;;  %v8463_v28 = vld [vmem:[%s13494_s3 + $0x514] sm:$0xf0] }
 0x40e   :  { %5229 = vmatmul.bf16.gmra.mxu0 %v10216_v16  ;;  %5248 = vmatmul.bf16.gmra.mxu1 %v10238_v21  ;;  %v11995_v24 = vadd.f32 %v11908_v39, %v4924_v11  ;;  %v7443_v39 = vor.u32 %v8499_v22, %v7442_v58  ;;  %v7922_v48 = vld [vmem:[%s13494_s3 + $0x9e8] sm:$0xf]  ;;  %v7299_v38 = vor.u32 %v8463_v28, %v7298_v61 }
 0x40f   :  { %5296 = vmatpush.bf16.msrb.mxu0 %v7475_v55  ;;  %5315 = vmatpush.bf16.msrb.mxu1 %v7603_v14  ;;  %v4888_v19 = vpop.f32.mrf.mxu2  ;;  %v4907_v50 = vpop.f32.mrf.mxu3  ;;  %v8495_v55 = vld [vmem:[%s13494_s3 + $0x614] sm:$0xf0]  ;;  %v7554_v14 = vld [vmem:[%s13494_s3 + $0x708] sm:$0xf]  ;;  %v7795_v11 = vor.u32 %v8587_v26, %v7794_v1 }
 0x410   :  { %v4889_v20 = vadd.f32 %v4888_v19, %v11831_v4  ;;  %v8619_v4 = vld [vmem:[%s13494_s3 + $0x9f4] sm:$0xf0]  ;;  %v8050_v41 = vld [vmem:[%s13494_s3 + $0xae8] sm:$0xf]  ;;  %v7427_v25 = vor.u32 %v8495_v55, %v7426_v17  ;;  %v7555_v53 = vor.u32 %v8527_v2, %v7554_v14 }
 0x411   :  { %5259 = vmatpush.bf16.msra.mxu2 %v7203_v54  ;;  %5278 = vmatpush.bf16.msra.mxu3 %v7331_v5  ;;  %v7171_v5 = vor.u32 %v8431_v63, %v7170_v18  ;;  %v7923_v22 = vor.u32 %v8619_v4, %v7922_v48  ;;  %v8051_v33 = vor.u32 %v8651_v3, %v8050_v41  ;;  %v8034_v28 = vld [vmem:[%s13494_s3 + $0xac8] sm:$0xf]  ;;  %v8579_v1 = vld [vmem:[%s13494_s3 + $0x8b4] sm:$0xf0] }
 0x412   :  { %v4908_v35 = vadd.f32 %v4907_v50, %v4889_v20  ;;  %v8647_v50 = vld [vmem:[%s13494_s3 + $0xad4] sm:$0xf0]  ;;  %v7762_v2 = vld [vmem:[%s13494_s3 + $0x8a8] sm:$0xf] }
 0x413   :  { %5297 = vmatpush.bf16.msrb.mxu0 %v7459_v52  ;;  %5316 = vmatpush.bf16.msrb.mxu1 %v7587_v15  ;;  %v4928_v36 = vpop.f32.mrf.mxu0  ;;  %v4947_v54 = vpop.f32.mrf.mxu1  ;;  %v8178_v52 = vld [vmem:[%s13494_s3 + $0xbe8] sm:$0xf]  ;;  %v8683_v15 = vld [vmem:[%s13494_s3 + $0xbf4] sm:$0xf0]  ;;  %v8035_v26 = vor.u32 %v8647_v50, %v8034_v28 }
 0x414   :  { %v4927_v58 = vadd.f32 %v4926_v9, %v4908_v35  ;;  %v8179_v30 = vor.u32 %v8683_v15, %v8178_v52  ;;  %v7906_v9 = vld [vmem:[%s13494_s3 + $0x9c8] sm:$0xf]  ;;  %v8611_v41 = vld [vmem:[%s13494_s3 + $0x9b4] sm:$0xf0]  ;;  %v7763_v15 = vor.u32 %v8579_v1, %v7762_v2 }
 0x415   :  { %5260 = vmatpush.bf16.msra.mxu2 %v7187_v51  ;;  %5279 = vmatpush.bf16.msra.mxu3 %v7315_v60  ;;  %v7778_v51 = vld [vmem:[%s13494_s3 + $0x8c8] sm:$0xf]  ;;  %v8583_v60 = vld [vmem:[%s13494_s3 + $0x8d4] sm:$0xf0] }
 0x416   :  { %v12044_v18 = vadd.f32 %v11961_v56, %v4927_v58  ;;  %v8615_v56 = vld [vmem:[%s13494_s3 + $0x9d4] sm:$0xf0]  ;;  %v7890_v4 = vld [vmem:[%s13494_s3 + $0x9a8] sm:$0xf] }
 0x417   :  { %5298 = vmatpush.bf16.msrb.mxu0 %v7443_v39  ;;  %5317 = vmatpush.bf16.msrb.mxu1 %v7571_v7  ;;  %v4890_v63 = vpop.f32.mrf.mxu2  ;;  %v4909_v61 = vpop.f32.mrf.mxu3  ;;  %v8162_v39 = vld [vmem:[%s13494_s3 + $0xbc8] sm:$0xf]  ;;  %v8679_v7 = vld [vmem:[%s13494_s3 + $0xbd4] sm:$0xf0]  ;;  %v7907_v20 = vor.u32 %v8615_v56, %v7906_v9 }
 0x418   :  { %v4891_v19 = vadd.f32 %v4890_v63, %v11887_v49  ;;  %v7779_v49 = vor.u32 %v8583_v60, %v7778_v51  ;;  %v8163_v48 = vor.u32 %v8679_v7, %v8162_v39  ;;  %v8018_v35 = vld [vmem:[%s13494_s3 + $0xaa8] sm:$0xf]  ;;  %v8675_v52 = vld [vmem:[%s13494_s3 + $0xbb4] sm:$0xf0] }
 0x419   :  { %5261 = vmatpush.bf16.msra.mxu2 %v7171_v5  ;;  %5280 = vmatpush.bf16.msra.mxu3 %v7299_v38  ;;  %v8643_v38 = vld [vmem:[%s13494_s3 + $0xab4] sm:$0xf0]  ;;  %v8146_v3 = vld [vmem:[%s13494_s3 + $0xba8] sm:$0xf] }
 0x41a   :  { %v4910_v17 = vadd.f32 %v4909_v61, %v4891_v19  ;;  %v8575_v58 = vld [vmem:[%s13494_s3 + $0x894] sm:$0xf0]  ;;  %v8002_v60 = vld [vmem:[%s13494_s3 + $0xa88] sm:$0xf] }
 0x41b   :  { %5299 = vmatpush.bf16.msrb.mxu0 %v7427_v25  ;;  %5318 = vmatpush.bf16.msrb.mxu1 %v7555_v53  ;;  %v4997_v55 = vpop.f32.mrf.mxu0  ;;  %v5016_v14 = vpop.f32.mrf.mxu1  ;;  %v7891_v25 = vor.u32 %v8611_v41, %v7890_v4  ;;  %v7746_v53 = vld [vmem:[%s13494_s3 + $0x888] sm:$0xf]  ;;  %v8607_v51 = vld [vmem:[%s13494_s3 + $0x994] sm:$0xf0] }
 0x41c   :  { %v4929_v5 = vadd.f32 %v4928_v36, %v4910_v17  ;;  %5262 = vmatmul.bf16.vlgmr.msra.gmra.mxu2 %v10730_v45  ;;  %5281 = vmatmul.bf16.vlgmr.msra.gmra.mxu3 %v10746_v37  ;;  %v8639_v61 = vld [vmem:[%s13494_s3 + $0xa94] sm:$0xf0]  ;;  %v8130_v9 = vld [vmem:[%s13494_s3 + $0xb88] sm:$0xf]  ;;  %v7747_v39 = vor.u32 %v8575_v58, %v7746_v53 }
 0x41d   :  { %5330 = vmatpush.bf16.msrb.mxu2 %v7795_v11  ;;  %5349 = vmatpush.bf16.msrb.mxu3 %v7923_v22  ;;  %v8671_v56 = vld [vmem:[%s13494_s3 + $0xb94] sm:$0xf0]  ;;  %v7730_v17 = vld [vmem:[%s13494_s3 + $0x868] sm:$0xf] }
 0x41e   :  { %5300 = vmatmul.bf16.vlgmr.msrb.gmra.mxu0 %v10760_v6  ;;  %5319 = vmatmul.bf16.vlgmr.msrb.gmra.mxu1 %v10763_v12  ;;  %v12099_v36 = vadd.f32 %v4947_v54, %v4929_v5  ;;  %v7874_v54 = vld [vmem:[%s13494_s3 + $0x988] sm:$0xf]  ;;  %v8131_v2 = vor.u32 %v8671_v56, %v8130_v9  ;;  %v8603_v1 = vld [vmem:[%s13494_s3 + $0x974] sm:$0xf0] }
 0x41f   :  { %5368 = vmatpush.bf16.msra.mxu0 %v8051_v33  ;;  %5387 = vmatpush.bf16.msra.mxu1 %v8179_v30  ;;  %v4959_v11 = vpop.f32.mrf.mxu2  ;;  %v4978_v22 = vpop.f32.mrf.mxu3  ;;  %v8019_v33 = vor.u32 %v8643_v38, %v8018_v35  ;;  %v8147_v30 = vor.u32 %v8675_v52, %v8146_v3  ;;  %v7875_v7 = vor.u32 %v8607_v51, %v7874_v54  ;;  %v8114_v4 = vld [vmem:[%s13494_s3 + $0xb68] sm:$0xf]  ;;  %v8667_v41 = vld [vmem:[%s13494_s3 + $0xb74] sm:$0xf0] }
 0x420   :  { %v4979_v63 = vadd.f32 %v4978_v22, %v4959_v11  ;;  %v7714_v3 = vld [vmem:[%s13494_s3 + $0x848] sm:$0xf]  ;;  %v8567_v52 = vld [vmem:[%s13494_s3 + $0x854] sm:$0xf0]  ;;  %v8115_v58 = vor.u32 %v8667_v41, %v8114_v4 }
 0x421   :  { %5331 = vmatpush.bf16.msrb.mxu2 %v7779_v49  ;;  %5350 = vmatpush.bf16.msrb.mxu3 %v7907_v20  ;;  %v8571_v49 = vld [vmem:[%s13494_s3 + $0x874] sm:$0xf0]  ;;  %v8003_v20 = vor.u32 %v8639_v61, %v8002_v60  ;;  %v7970_v22 = vld [vmem:[%s13494_s3 + $0xa48] sm:$0xf]  ;;  %v7715_v9 = vor.u32 %v8567_v52, %v7714_v3 }
 0x422   :  { %v4998_v28 = vadd.f32 %v4997_v55, %v4979_v63  ;;  %v7858_v55 = vld [vmem:[%s13494_s3 + $0x968] sm:$0xf]  ;;  %v7731_v5 = vor.u32 %v8571_v49, %v7730_v17  ;;  %v8599_v11 = vld [vmem:[%s13494_s3 + $0x954] sm:$0xf0] }
 0x423   :  { %5369 = vmatpush.bf16.msra.mxu0 %v8035_v26  ;;  %5388 = vmatpush.bf16.msra.mxu1 %v8163_v48  ;;  %v4999_v19 = vpop.f32.mrf.mxu0  ;;  %v5018_v50 = vpop.f32.mrf.mxu1  ;;  %v7986_v26 = vld [vmem:[%s13494_s3 + $0xa68] sm:$0xf]  ;;  %v8635_v48 = vld [vmem:[%s13494_s3 + $0xa74] sm:$0xf0]  ;;  %v7859_v38 = vor.u32 %v8603_v1, %v7858_v55 }
 0x424   :  { %v12149_v35 = vadd.f32 %v5016_v14, %v4998_v28  ;;  %v7987_v53 = vor.u32 %v8635_v48, %v7986_v26  ;;  %v7842_v14 = vld [vmem:[%s13494_s3 + $0x948] sm:$0xf]  ;;  %v8663_v51 = vld [vmem:[%s13494_s3 + $0xb54] sm:$0xf0] }
 0x425   :  { %5332 = vmatpush.bf16.msrb.mxu2 %v7763_v15  ;;  %5351 = vmatpush.bf16.msrb.mxu3 %v7891_v25  ;;  %v8098_v54 = vld [vmem:[%s13494_s3 + $0xb48] sm:$0xf]  ;;  %v7843_v56 = vor.u32 %v8599_v11, %v7842_v14  ;;  %v8595_v49 = vld [vmem:[%s13494_s3 + $0x934] sm:$0xf0] }
 0x426   :  { %v7698_v28 = vld [vmem:[%s13494_s3 + $0x828] sm:$0xf]  ;;  %v8099_v17 = vor.u32 %v8663_v51, %v8098_v54  ;;  %v8659_v1 = vld [vmem:[%s13494_s3 + $0xb34] sm:$0xf0]  ;;  %v8361_v54 = vld [vmem:[%s13494_s3 + $0x1ec] sm:$0xf] }
 0x427   :  { %5370 = vmatpush.bf16.msra.mxu0 %v8019_v33  ;;  %5389 = vmatpush.bf16.msra.mxu1 %v8147_v30  ;;  %v4961_v15 = vpop.f32.mrf.mxu2  ;;  %v4980_v25 = vpop.f32.mrf.mxu3  ;;  %v8631_v30 = vld [vmem:[%s13494_s3 + $0xa54] sm:$0xf0]  ;;  %v8082_v55 = vld [vmem:[%s13494_s3 + $0xb28] sm:$0xf]  ;;  %v6900_v51 = vld [vmem:[%s13494_s3 + $0x1f8] sm:$0xf0] }
 0x428   :  { %v4981_v33 = vadd.f32 %v4980_v25, %v4961_v15  ;;  %v7682_v48 = vld [vmem:[%s13494_s3 + $0x808] sm:$0xf]  ;;  %v8083_v25 = vor.u32 %v8659_v1, %v8082_v55  ;;  %v6903_v55 = vor.u32 %v8361_v54, %v6900_v51  ;;  %v8321_v54 = vld [vmem:[%s13494_s3 + $0xac] sm:$0xf]  ;;  %v6740_v51 = vld [vmem:[%s13494_s3 + $0xb8] sm:$0xf0] }
 0x429   :  { %5333 = vmatpush.bf16.msrb.mxu2 %v7747_v39  ;;  %5352 = vmatpush.bf16.msrb.mxu3 %v7875_v7  ;;  %v8563_v39 = vld [vmem:[%s13494_s3 + $0x834] sm:$0xf0]  ;;  %v7971_v7 = vor.u32 %v8631_v30, %v7970_v22  ;;  %v8066_v14 = vld [vmem:[%s13494_s3 + $0xb08] sm:$0xf]  ;;  %v6772_v30 = vld [vmem:[%s13494_s3 + $0xf8] sm:$0xf0] }
 0x42a   :  { %v5000_v60 = vadd.f32 %v4999_v19, %v4981_v33  ;;  %v7826_v19 = vld [vmem:[%s13494_s3 + $0x928] sm:$0xf]  ;;  %v7699_v4 = vor.u32 %v8563_v39, %v7698_v28  ;;  %v8655_v22 = vld [vmem:[%s13494_s3 + $0xb14] sm:$0xf0]  ;;  %v8329_v33 = vld [vmem:[%s13494_s3 + $0xec] sm:$0xf] }
 0x42b   :  { %5371 = vmatpush.bf16.msra.mxu0 %v8003_v20  ;;  %5390 = vmatpush.bf16.msra.mxu1 %v8131_v2  ;;  %v5002_v63 = vpop.f32.mrf.mxu0  ;;  %v5021_v61 = vpop.f32.mrf.mxu1  ;;  %v7954_v20 = vld [vmem:[%s13494_s3 + $0xa28] sm:$0xf]  ;;  %v8627_v2 = vld [vmem:[%s13494_s3 + $0xa34] sm:$0xf0]  ;;  %v7827_v41 = vor.u32 %v8595_v49, %v7826_v19  ;;  %v8425_v19 = vld [vmem:[%s13494_s3 + $0x3ec] sm:$0xf] }
 0x42c   :  { %5267 = vmatmul.bf16.gmra.mxu2 %v10864_v23  ;;  %5286 = vmatmul.bf16.gmra.mxu3 %v10873_v62  ;;  %v12201_v26 = vadd.f32 %v5018_v50, %v5000_v60  ;;  %v7810_v50 = vld [vmem:[%s13494_s3 + $0x908] sm:$0xf]  ;;  %v7955_v15 = vor.u32 %v8627_v2, %v7954_v20  ;;  %v8393_v60 = vld [vmem:[%s13494_s3 + $0x2ec] sm:$0xf]  ;;  %v7156_v49 = vld [vmem:[%s13494_s3 + $0x3f8] sm:$0xf0]  ;;  %v8067_v20 = vor.u32 %v8655_v22, %v8066_v14 }
 0x42d   :  { %5334 = vmatpush.bf16.msrb.mxu2 %v7731_v5  ;;  %5353 = vmatpush.bf16.msrb.mxu3 %v7859_v38  ;;  %v8559_v5 = vld [vmem:[%s13494_s3 + $0x814] sm:$0xf0]  ;;  %v6775_v2 = vor.u32 %v8329_v33, %v6772_v30 }
 0x42e   :  { %5305 = vmatmul.bf16.gmra.mxu0 %v10887_v46  ;;  %5324 = vmatmul.bf16.gmra.mxu1 %v10890_v47  ;;  %v8591_v38 = vld [vmem:[%s13494_s3 + $0x914] sm:$0xf0]  ;;  %v7683_v39 = vor.u32 %v8559_v5, %v7682_v48  ;;  %v6756_v5 = vld [vmem:[%s13494_s3 + $0xd8] sm:$0xf0] }
 0x42f   :  { %5372 = vmatpush.bf16.msra.mxu0 %v7987_v53  ;;  %5391 = vmatpush.bf16.msra.mxu1 %v8115_v58  ;;  %v4964_v3 = vpop.f32.mrf.mxu2  ;;  %v4983_v52 = vpop.f32.mrf.mxu3  ;;  %v7938_v53 = vld [vmem:[%s13494_s3 + $0xa08] sm:$0xf]  ;;  %v8623_v58 = vld [vmem:[%s13494_s3 + $0xa14] sm:$0xf0] }
 0x430   :  { %v4984_v11 = vadd.f32 %v4983_v52, %v4964_v3  ;;  %v6884_v3 = vld [vmem:[%s13494_s3 + $0x1d8] sm:$0xf0]  ;;  %v8389_v52 = vld [vmem:[%s13494_s3 + $0x2cc] sm:$0xf] }
 0x431   :  { %5335 = vmatpush.bf16.msrb.mxu2 %v7715_v9  ;;  %5354 = vmatpush.bf16.msrb.mxu3 %v7843_v56 }
 0x432   :  { %v5003_v9 = vadd.f32 %v5002_v63, %v4984_v11  ;;  %v7939_v63 = vor.u32 %v8623_v58, %v7938_v53  ;;  %v8421_v53 = vld [vmem:[%s13494_s3 + $0x3cc] sm:$0xf]  ;;  %v7140_v58 = vld [vmem:[%s13494_s3 + $0x3d8] sm:$0xf0] }
 0x433   :  { %5373 = vmatpush.bf16.msra.mxu0 %v7971_v7  ;;  %5392 = vmatpush.bf16.msra.mxu1 %v8099_v17  ;;  %v5004_v56 = vpop.f32.mrf.mxu0  ;;  %v5023_v28 = vpop.f32.mrf.mxu1  ;;  %v7811_v7 = vor.u32 %v8591_v38, %v7810_v50  ;;  %v7028_v17 = vld [vmem:[%s13494_s3 + $0x2f8] sm:$0xf0] }
 0x434   :  { %v12253_v1 = vadd.f32 %v5021_v61, %v5003_v9  ;;  %v7031_v48 = vor.u32 %v8393_v60, %v7028_v17  ;;  %v8357_v61 = vld [vmem:[%s13494_s3 + $0x1cc] sm:$0xf]  ;;  %v7143_v9 = vor.u32 %v8421_v53, %v7140_v58  ;;  %v6996_v17 = vld [vmem:[%s13494_s3 + $0x2b8] sm:$0xf0] }
 0x435   :  { %5336 = vmatpush.bf16.msrb.mxu2 %v7699_v4  ;;  %5355 = vmatpush.bf16.msrb.mxu3 %v7827_v41  ;;  %v7159_v4 = vor.u32 %v8425_v19, %v7156_v49  ;;  %v8325_v41 = vld [vmem:[%s13494_s3 + $0xcc] sm:$0xf]  ;;  %v6887_v30 = vor.u32 %v8357_v61, %v6884_v3  ;;  %v7124_v49 = vld [vmem:[%s13494_s3 + $0x3b8] sm:$0xf0] }
 0x436   :  { %v6759_v33 = vor.u32 %v8325_v41, %v6756_v5  ;;  %v8417_v19 = vld [vmem:[%s13494_s3 + $0x3ac] sm:$0xf] }
 0x437   :  { %5374 = vmatpush.bf16.msra.mxu0 %v7955_v15  ;;  %5393 = vmatpush.bf16.msra.mxu1 %v8083_v25  ;;  %v4966_v50 = vpop.f32.mrf.mxu2  ;;  %v4985_v38 = vpop.f32.mrf.mxu3  ;;  %v7012_v25 = vld [vmem:[%s13494_s3 + $0x2d8] sm:$0xf0]  ;;  %v7127_v5 = vor.u32 %v8417_v19, %v7124_v49  ;;  %v8381_v61 = vld [vmem:[%s13494_s3 + $0x28c] sm:$0xf] }
 0x438   :  { %v4986_v15 = vadd.f32 %v4985_v38, %v4966_v50  ;;  %v7015_v60 = vor.u32 %v8389_v52, %v7012_v25  ;;  %v8349_v50 = vld [vmem:[%s13494_s3 + $0x18c] sm:$0xf]  ;;  %v6852_v38 = vld [vmem:[%s13494_s3 + $0x198] sm:$0xf0] }
 0x439   :  { %5337 = vmatpush.bf16.msrb.mxu2 %v7683_v39  ;;  %5356 = vmatpush.bf16.msrb.mxu3 %v7811_v7  ;;  %v8353_v39 = vld [vmem:[%s13494_s3 + $0x1ac] sm:$0xf]  ;;  %v6980_v52 = vld [vmem:[%s13494_s3 + $0x298] sm:$0xf0] }
 0x43a   :  { %v5005_v14 = vadd.f32 %v5004_v56, %v4986_v15  ;;  %v6868_v56 = vld [vmem:[%s13494_s3 + $0x1b8] sm:$0xf0]  ;;  %v8385_v7 = vld [vmem:[%s13494_s3 + $0x2ac] sm:$0xf] }
 0x43b   :  { %5375 = vmatpush.bf16.msra.mxu0 %v7939_v63  ;;  %5394 = vmatpush.bf16.msra.mxu1 %v8067_v20  ;;  %v5073_v11 = vpop.f32.mrf.mxu0  ;;  %v12279_v22 = vpop.f32.mrf.mxu1  ;;  %v6743_v20 = vor.u32 %v8321_v54, %v6740_v51  ;;  %v8413_v15 = vld [vmem:[%s13494_s3 + $0x38c] sm:$0xf]  ;;  %v7108_v25 = vld [vmem:[%s13494_s3 + $0x398] sm:$0xf0]  ;;  %v6983_v51 = vor.u32 %v8381_v61, %v6980_v52 }
 0x43c   :  { %5338 = vmatmul.bf16.vlgmr.msrb.gmra.mxu2 %v10994_v13  ;;  %5357 = vmatmul.bf16.vlgmr.msrb.gmra.mxu3 %v10997_v8  ;;  %v12307_v63 = vadd.f32 %v5023_v28, %v5005_v14  ;;  %v6999_v28 = vor.u32 %v8385_v7, %v6996_v17  ;;  %v6708_v54 = vld [vmem:[%s13494_s3 + $0x78] sm:$0xf0]  ;;  %v8409_v19 = vld [vmem:[%s13494_s3 + $0x36c] sm:$0xf] }
 0x43d   :  { %5406 = vmatpush.bf16.msra.mxu2 %v6775_v2  ;;  %5425 = vmatpush.bf16.msra.mxu3 %v6903_v55  ;;  %v6871_v2 = vor.u32 %v8353_v39, %v6868_v56  ;;  %v8317_v55 = vld [vmem:[%s13494_s3 + $0x8c] sm:$0xf]  ;;  %v6836_v39 = vld [vmem:[%s13494_s3 + $0x178] sm:$0xf0] }
 0x43e   :  { %5376 = vmatmul.bf16.vlgmr.msra.gmra.mxu0 %v11011_v40  ;;  %5395 = vmatmul.bf16.vlgmr.msra.gmra.mxu1 %v11014_v44  ;;  %v8377_v56 = vld [vmem:[%s13494_s3 + $0x26c] sm:$0xf]  ;;  %v6964_v17 = vld [vmem:[%s13494_s3 + $0x278] sm:$0xf0] }
 0x43f   :  { %5444 = vmatpush.bf16.msrb.mxu0 %v7031_v48  ;;  %5463 = vmatpush.bf16.msrb.mxu1 %v7159_v4  ;;  %v6724_v48 = vld [vmem:[%s13494_s3 + $0x98] sm:$0xf0]  ;;  %v5035_v4 = vpop.f32.mrf.mxu2  ;;  %v5054_v41 = vpop.f32.mrf.mxu3  ;;  %v8373_v61 = vld [vmem:[%s13494_s3 + $0x24c] sm:$0xf] }
 0x440   :  { %v5036_v3 = vadd.f32 %v5035_v4, %v12149_v35  ;;  %v6855_v35 = vor.u32 %v8349_v50, %v6852_v38  ;;  %v7092_v49 = vld [vmem:[%s13494_s3 + $0x378] sm:$0xf0]  ;;  %v8341_v50 = vld [vmem:[%s13494_s3 + $0x14c] sm:$0xf] }
 0x441   :  { %5407 = vmatpush.bf16.msra.mxu2 %v6759_v33  ;;  %5426 = vmatpush.bf16.msra.mxu3 %v6887_v30  ;;  %v6727_v33 = vor.u32 %v8317_v55, %v6724_v48  ;;  %v8313_v30 = vld [vmem:[%s13494_s3 + $0x6c] sm:$0xf]  ;;  %v6692_v55 = vld [vmem:[%s13494_s3 + $0x58] sm:$0xf0] }
 0x442   :  { %v5055_v53 = vadd.f32 %v5054_v41, %v5036_v3  ;;  %v6820_v38 = vld [vmem:[%s13494_s3 + $0x158] sm:$0xf0]  ;;  %v8405_v52 = vld [vmem:[%s13494_s3 + $0x34c] sm:$0xf] }
 0x443   :  { %5445 = vmatpush.bf16.msrb.mxu0 %v7015_v60  ;;  %5464 = vmatpush.bf16.msrb.mxu1 %v7143_v9  ;;  %v5075_v58 = vpop.f32.mrf.mxu0  ;;  %v12336_v14 = vpop.f32.mrf.mxu1  ;;  %v7111_v60 = vor.u32 %v8413_v15, %v7108_v25  ;;  %v8345_v9 = vld [vmem:[%s13494_s3 + $0x16c] sm:$0xf]  ;;  %v6948_v3 = vld [vmem:[%s13494_s3 + $0x258] sm:$0xf0] }
 0x444   :  { %v5074_v7 = vadd.f32 %v5073_v11, %v5055_v53  ;;  %v8309_v11 = vld [vmem:[%s13494_s3 + $0x4c] sm:$0xf]  ;;  %v7076_v15 = vld [vmem:[%s13494_s3 + $0x358] sm:$0xf0] }
 0x445   :  { %5408 = vmatpush.bf16.msra.mxu2 %v6743_v20  ;;  %5427 = vmatpush.bf16.msra.mxu3 %v6871_v2  ;;  %v6711_v20 = vor.u32 %v8313_v30, %v6708_v54  ;;  %v6839_v2 = vor.u32 %v8345_v9, %v6836_v39  ;;  %v8305_v30 = vld [vmem:[%s13494_s3 + $0x2c] sm:$0xf]  ;;  %v6676_v54 = vld [vmem:[%s13494_s3 + $0x38] sm:$0xf0] }
 0x446   :  { %v12369_v48 = vadd.f32 %v12279_v22, %v5074_v7  ;;  %v8337_v9 = vld [vmem:[%s13494_s3 + $0x12c] sm:$0xf]  ;;  %v6804_v39 = vld [vmem:[%s13494_s3 + $0x138] sm:$0xf0] }
 0x447   :  { %5446 = vmatpush.bf16.msrb.mxu0 %v6999_v28  ;;  %5465 = vmatpush.bf16.msrb.mxu1 %v7127_v5  ;;  %v5037_v4 = vpop.f32.mrf.mxu2  ;;  %v5056_v41 = vpop.f32.mrf.mxu3  ;;  %v6967_v28 = vor.u32 %v8377_v56, %v6964_v17  ;;  %v7095_v5 = vor.u32 %v8409_v19, %v7092_v49  ;;  %v8369_v56 = vld [vmem:[%s13494_s3 + $0x22c] sm:$0xf]  ;;  %v6932_v17 = vld [vmem:[%s13494_s3 + $0x238] sm:$0xf0] }
 0x448   :  { %v5038_v22 = vadd.f32 %v5037_v4, %v12201_v26  ;;  %v6823_v26 = vor.u32 %v8341_v50, %v6820_v38  ;;  %v8401_v19 = vld [vmem:[%s13494_s3 + $0x32c] sm:$0xf]  ;;  %v7060_v49 = vld [vmem:[%s13494_s3 + $0x338] sm:$0xf0]  ;;  %v6935_v50 = vor.u32 %v8369_v56, %v6932_v17 }
 0x449   :  { %5409 = vmatpush.bf16.msra.mxu2 %v6727_v33  ;;  %5428 = vmatpush.bf16.msra.mxu3 %v6855_v35  ;;  %v6695_v35 = vor.u32 %v8309_v11, %v6692_v55  ;;  %v6660_v11 = vld [vmem:[%s13494_s3 + $0x18] sm:$0xf0]  ;;  %v8333_v55 = vld [vmem:[%s13494_s3 + $0x10c] sm:$0xf]  ;;  %v7063_v38 = vor.u32 %v8401_v19, %v7060_v49 }
 0x44a   :  { %v5057_v25 = vadd.f32 %v5056_v41, %v5038_v22  ;;  %v6788_v4 = vld [vmem:[%s13494_s3 + $0x118] sm:$0xf0]  ;;  %v8553_v56 = vld [vmem:[%s13494_s3 + $0x7ec] sm:$0xf] }
 0x44b   :  { %5447 = vmatpush.bf16.msrb.mxu0 %v6983_v51  ;;  %5466 = vmatpush.bf16.msrb.mxu1 %v7111_v60  ;;  %v5078_v53 = vpop.f32.mrf.mxu0  ;;  %v12390_v33 = vpop.f32.mrf.mxu1  ;;  %v6951_v51 = vor.u32 %v8373_v61, %v6948_v3  ;;  %v7079_v60 = vor.u32 %v8405_v52, %v7076_v15  ;;  %v8365_v61 = vld [vmem:[%s13494_s3 + $0x20c] sm:$0xf]  ;;  %v6916_v22 = vld [vmem:[%s13494_s3 + $0x218] sm:$0xf0] }
 0x44c   :  { %v5076_v7 = vadd.f32 %v5075_v58, %v5057_v25  ;;  %5343 = vmatmul.bf16.gmra.mxu2 %v11109_v34  ;;  %5362 = vmatmul.bf16.gmra.mxu3 %v11121_v57  ;;  %v8301_v58 = vld [vmem:[%s13494_s3 + $0xc] sm:$0xf]  ;;  %v7044_v52 = vld [vmem:[%s13494_s3 + $0x318] sm:$0xf0]  ;;  %v6919_v17 = vor.u32 %v8365_v61, %v6916_v22 }
 0x44d   :  { %5410 = vmatpush.bf16.msra.mxu2 %v6711_v20  ;;  %5429 = vmatpush.bf16.msra.mxu3 %v6839_v2  ;;  %v6679_v20 = vor.u32 %v8305_v30, %v6676_v54  ;;  %v6807_v2 = vor.u32 %v8337_v9, %v6804_v39  ;;  %v8397_v3 = vld [vmem:[%s13494_s3 + $0x30c] sm:$0xf]  ;;  %v7284_v25 = vld [vmem:[%s13494_s3 + $0x4f8] sm:$0xf0]  ;;  %v6791_v9 = vor.u32 %v8333_v55, %v6788_v4 }
 0x44e   :  { %5381 = vmatmul.bf16.gmra.mxu0 %v11135_v32  ;;  %5400 = vmatmul.bf16.gmra.mxu1 %v11138_v31  ;;  %v12433_v41 = vadd.f32 %v12336_v14, %v5076_v7  ;;  %v8457_v15 = vld [vmem:[%s13494_s3 + $0x4ec] sm:$0xf]  ;;  %v7540_v39 = vld [vmem:[%s13494_s3 + $0x6f8] sm:$0xf0]  ;;  %v7047_v19 = vor.u32 %v8397_v3, %v7044_v52 }
 0x44f   :  { %5448 = vmatpush.bf16.msrb.mxu0 %v6967_v28  ;;  %5467 = vmatpush.bf16.msrb.mxu1 %v7095_v5  ;;  %v5040_v28 = vpop.f32.mrf.mxu2  ;;  %v5059_v5 = vpop.f32.mrf.mxu3  ;;  %v7668_v7 = vld [vmem:[%s13494_s3 + $0x7f8] sm:$0xf0]  ;;  %v8453_v55 = vld [vmem:[%s13494_s3 + $0x4cc] sm:$0xf] }
 0x450   :  { %v5041_v14 = vadd.f32 %v5040_v28, %v12253_v1  ;;  %v7412_v1 = vld [vmem:[%s13494_s3 + $0x5f8] sm:$0xf0]  ;;  %v8517_v61 = vld [vmem:[%s13494_s3 + $0x6cc] sm:$0xf] }
 0x451   :  { %5411 = vmatpush.bf16.msra.mxu2 %v6695_v35  ;;  %5430 = vmatpush.bf16.msra.mxu3 %v6823_v26  ;;  %v8489_v35 = vld [vmem:[%s13494_s3 + $0x5ec] sm:$0xf]  ;;  %v7268_v4 = vld [vmem:[%s13494_s3 + $0x4d8] sm:$0xf0] }
 0x452   :  { %v8521_v26 = vld [vmem:[%s13494_s3 + $0x6ec] sm:$0xf]  ;;  %v5060_v30 = vadd.f32 %v5059_v5, %v5041_v14  ;;  %v7652_v14 = vld [vmem:[%s13494_s3 + $0x7d8] sm:$0xf0] }
 0x453   :  { %5449 = vmatpush.bf16.msrb.mxu0 %v6951_v51  ;;  %5468 = vmatpush.bf16.msrb.mxu1 %v7079_v60  ;;  %v5080_v54 = vpop.f32.mrf.mxu0  ;;  %v12463_v51 = vpop.f32.mrf.mxu1  ;;  %v6663_v60 = vor.u32 %v8301_v58, %v6660_v11  ;;  %v7415_v58 = vor.u32 %v8489_v35, %v7412_v1  ;;  %v7671_v11 = vor.u32 %v8553_v56, %v7668_v7  ;;  %v8549_v3 = vld [vmem:[%s13494_s3 + $0x7cc] sm:$0xf] }
 0x454   :  { %v5079_v49 = vadd.f32 %v5078_v53, %v5060_v30  ;;  %v8485_v53 = vld [vmem:[%s13494_s3 + $0x5cc] sm:$0xf] }
 0x455   :  { %5412 = vmatpush.bf16.msra.mxu2 %v6679_v20  ;;  %5431 = vmatpush.bf16.msra.mxu3 %v6807_v2  ;;  %v7287_v20 = vor.u32 %v8457_v15, %v7284_v25  ;;  %v7543_v2 = vor.u32 %v8521_v26, %v7540_v39  ;;  %v8449_v1 = vld [vmem:[%s13494_s3 + $0x4ac] sm:$0xf]  ;;  %v7252_v26 = vld [vmem:[%s13494_s3 + $0x4b8] sm:$0xf0] }
 0x456   :  { %v12481_v28 = vadd.f32 %v12390_v33, %v5079_v49  ;;  %v7524_v33 = vld [vmem:[%s13494_s3 + $0x6d8] sm:$0xf0]  ;;  %v8513_v56 = vld [vmem:[%s13494_s3 + $0x6ac] sm:$0xf] }
 0x457   :  { %5450 = vmatpush.bf16.msrb.mxu0 %v6935_v50  ;;  %5469 = vmatpush.bf16.msrb.mxu1 %v7063_v38  ;;  %v5042_v5 = vpop.f32.mrf.mxu2  ;;  %v5061_v50 = vpop.f32.mrf.mxu3  ;;  %v7396_v38 = vld [vmem:[%s13494_s3 + $0x5d8] sm:$0xf0]  ;;  %v7527_v30 = vor.u32 %v8517_v61, %v7524_v33 }
 0x458   :  { %v5043_v22 = vadd.f32 %v5042_v5, %v12307_v63  ;;  %v7271_v63 = vor.u32 %v8453_v55, %v7268_v4  ;;  %v7399_v35 = vor.u32 %v8485_v53, %v7396_v38  ;;  %v7380_v39 = vld [vmem:[%s13494_s3 + $0x5b8] sm:$0xf0]  ;;  %v8477_v55 = vld [vmem:[%s13494_s3 + $0x58c] sm:$0xf] }
 0x459   :  { %5413 = vmatpush.bf16.msra.mxu2 %v6663_v60  ;;  %5432 = vmatpush.bf16.msra.mxu3 %v6791_v9  ;;  %v7655_v60 = vor.u32 %v8549_v3, %v7652_v14  ;;  %v8481_v9 = vld [vmem:[%s13494_s3 + $0x5ac] sm:$0xf]  ;;  %v7636_v49 = vld [vmem:[%s13494_s3 + $0x7b8] sm:$0xf0] }
 0x45a   :  { %v5062_v52 = vadd.f32 %v5061_v50, %v5043_v22  ;;  %v7364_v4 = vld [vmem:[%s13494_s3 + $0x598] sm:$0xf0]  ;;  %v8509_v5 = vld [vmem:[%s13494_s3 + $0x68c] sm:$0xf] }
 0x45b   :  { %5451 = vmatpush.bf16.msrb.mxu0 %v6919_v17  ;;  %5470 = vmatpush.bf16.msrb.mxu1 %v7047_v19  ;;  %v5149_v15 = vpop.f32.mrf.mxu0  ;;  %v5168_v25 = vpop.f32.mrf.mxu1  ;;  %v7508_v17 = vld [vmem:[%s13494_s3 + $0x6b8] sm:$0xf0]  ;;  %v8545_v19 = vld [vmem:[%s13494_s3 + $0x7ac] sm:$0xf]  ;;  %v7367_v3 = vor.u32 %v8477_v55, %v7364_v4 }
 0x45c   :  { %v5081_v7 = vadd.f32 %v5080_v54, %v5062_v52  ;;  %5414 = vmatmul.bf16.vlgmr.msra.gmra.mxu2 %v10189_v29  ;;  %5433 = vmatmul.bf16.vlgmr.msra.gmra.mxu3 %v10193_v0  ;;  %v7255_v29 = vor.u32 %v8449_v1, %v7252_v26  ;;  %v7383_v0 = vor.u32 %v8481_v9, %v7380_v39  ;;  %v8445_v54 = vld [vmem:[%s13494_s3 + $0x48c] sm:$0xf]  ;;  %v7492_v50 = vld [vmem:[%s13494_s3 + $0x698] sm:$0xf0] }
 0x45d   :  { %5482 = vmatpush.bf16.msrb.mxu2 %v7287_v20  ;;  %5501 = vmatpush.bf16.msrb.mxu3 %v7415_v58  ;;  %v7236_v20 = vld [vmem:[%s13494_s3 + $0x498] sm:$0xf0]  ;;  %v8541_v53 = vld [vmem:[%s13494_s3 + $0x78c] sm:$0xf] }
 0x45e   :  { %5452 = vmatmul.bf16.vlgmr.msrb.gmra.mxu0 %v10197_v42  ;;  %5471 = vmatmul.bf16.vlgmr.msrb.gmra.mxu1 %v10201_v27  ;;  %v12537_v58 = vadd.f32 %v12463_v51, %v5081_v7  ;;  %v7511_v42 = vor.u32 %v8513_v56, %v7508_v17  ;;  %v7639_v27 = vor.u32 %v8545_v19, %v7636_v49  ;;  %v7620_v38 = vld [vmem:[%s13494_s3 + $0x798] sm:$0xf0]  ;;  %v8441_v14 = vld [vmem:[%s13494_s3 + $0x46c] sm:$0xf] }
 0x45f   :  { %5520 = vmatpush.bf16.msra.mxu0 %v7543_v2  ;;  %5539 = vmatpush.bf16.msra.mxu1 %v7671_v11  ;;  %v5111_v2 = vpop.f32.mrf.mxu2  ;;  %v5130_v11 = vpop.f32.mrf.mxu3  ;;  %v7220_v52 = vld [vmem:[%s13494_s3 + $0x478] sm:$0xf0]  ;;  %v8473_v1 = vld [vmem:[%s13494_s3 + $0x56c] sm:$0xf] }
 0x460   :  { %v5112_v51 = vadd.f32 %v5111_v2, %v12369_v48  ;;  %v7239_v48 = vor.u32 %v8445_v54, %v7236_v20  ;;  %v7348_v26 = vld [vmem:[%s13494_s3 + $0x578] sm:$0xf0]  ;;  %v8537_v39 = vld [vmem:[%s13494_s3 + $0x76c] sm:$0xf]  ;;  %v7223_v17 = vor.u32 %v8441_v14, %v7220_v52 }
 0x461   :  { %5483 = vmatpush.bf16.msrb.mxu2 %v7271_v63  ;;  %5502 = vmatpush.bf16.msrb.mxu3 %v7399_v35  ;;  %v7495_v63 = vor.u32 %v8509_v5, %v7492_v50  ;;  %v7623_v35 = vor.u32 %v8541_v53, %v7620_v38  ;;  %v7476_v9 = vld [vmem:[%s13494_s3 + $0x678] sm:$0xf0]  ;;  %v7351_v19 = vor.u32 %v8473_v1, %v7348_v26  ;;  %v8469_v20 = vld [vmem:[%s13494_s3 + $0x54c] sm:$0xf] }
 0x462   :  { %v5131_v61 = vadd.f32 %v5130_v11, %v5112_v51  ;;  %v7604_v56 = vld [vmem:[%s13494_s3 + $0x778] sm:$0xf0]  ;;  %v8501_v11 = vld [vmem:[%s13494_s3 + $0x64c] sm:$0xf] }
 0x463   :  { %5521 = vmatpush.bf16.msra.mxu0 %v7527_v30  ;;  %5540 = vmatpush.bf16.msra.mxu1 %v7655_v60  ;;  %v12558_v22 = vpop.f32.mrf.mxu0  ;;  %v12560_v33 = vpop.f32.mrf.mxu1  ;;  %v8505_v30 = vld [vmem:[%s13494_s3 + $0x66c] sm:$0xf]  ;;  %v7204_v49 = vld [vmem:[%s13494_s3 + $0x458] sm:$0xf0]  ;;  %v7607_v54 = vor.u32 %v8537_v39, %v7604_v56 }
 0x464   :  { %v5150_v60 = vadd.f32 %v5149_v15, %v5131_v61  ;;  %v8437_v15 = vld [vmem:[%s13494_s3 + $0x44c] sm:$0xf]  ;;  %v7332_v2 = vld [vmem:[%s13494_s3 + $0x558] sm:$0xf0] }
 0x465   :  { %5484 = vmatpush.bf16.msrb.mxu2 %v7255_v29  ;;  %5503 = vmatpush.bf16.msrb.mxu3 %v7383_v0  ;;  %v7588_v55 = vld [vmem:[%s13494_s3 + $0x758] sm:$0xf0]  ;;  %v7207_v51 = vor.u32 %v8437_v15, %v7204_v49  ;;  %v7335_v50 = vor.u32 %v8469_v20, %v7332_v2  ;;  %v8433_v53 = vld [vmem:[%s13494_s3 + $0x42c] sm:$0xf] }
 0x466   :  { %v12586_v7 = vadd.f32 %v5168_v25, %v5150_v60  ;;  %v7479_v25 = vor.u32 %v8505_v30, %v7476_v9  ;;  %v7188_v38 = vld [vmem:[%s13494_s3 + $0x438] sm:$0xf0]  ;;  %v8497_v52 = vld [vmem:[%s13494_s3 + $0x62c] sm:$0xf] }
 0x467   :  { %5522 = vmatpush.bf16.msra.mxu0 %v7511_v42  ;;  %5541 = vmatpush.bf16.msra.mxu1 %v7639_v27  ;;  %v12594_v29 = vpop.f32.mrf.mxu2  ;;  %v12596_v0 = vpop.f32.mrf.mxu3  ;;  %v7460_v42 = vld [vmem:[%s13494_s3 + $0x658] sm:$0xf0]  ;;  %v8533_v27 = vld [vmem:[%s13494_s3 + $0x74c] sm:$0xf] }
 0x468   :  { %v7463_v61 = vor.u32 %v8501_v11, %v7460_v42  ;;  %v7316_v14 = vld [vmem:[%s13494_s3 + $0x538] sm:$0xf0]  ;;  %v8461_v60 = vld [vmem:[%s13494_s3 + $0x50c] sm:$0xf] }
 0x469   :  { %5485 = vmatpush.bf16.msrb.mxu2 %v7239_v48  ;;  %5504 = vmatpush.bf16.msrb.mxu3 %v7367_v3  ;;  %v7591_v48 = vor.u32 %v8533_v27, %v7588_v55  ;;  %v8465_v3 = vld [vmem:[%s13494_s3 + $0x52c] sm:$0xf]  ;;  %v7572_v1 = vld [vmem:[%s13494_s3 + $0x738] sm:$0xf0] }
 0x46a   :  { %v7319_v26 = vor.u32 %v8465_v3, %v7316_v14  ;;  %v7172_v30 = vld [vmem:[%s13494_s3 + $0x418] sm:$0xf0]  ;;  %v8525_v15 = vld [vmem:[%s13494_s3 + $0x70c] sm:$0xf] }
 0x46b   :  { %5523 = vmatpush.bf16.msra.mxu0 %v7495_v63  ;;  %5542 = vmatpush.bf16.msra.mxu1 %v7623_v35  ;;  %v12616_v4 = vpop.f32.mrf.mxu0  ;;  %v12618_v5 = vpop.f32.mrf.mxu1  ;;  %v7444_v63 = vld [vmem:[%s13494_s3 + $0x638] sm:$0xf0]  ;;  %v8529_v35 = vld [vmem:[%s13494_s3 + $0x72c] sm:$0xf] }
 0x46c   :  { %5419 = vmatmul.bf16.gmra.mxu2 %v10206_v43  ;;  %5438 = vmatmul.bf16.gmra.mxu3 %v10210_v59  ;;  %v8429_v43 = vld [vmem:[%s13494_s3 + $0x40c] sm:$0xf]  ;;  %v7191_v59 = vor.u32 %v8433_v53, %v7188_v38  ;;  %v7447_v39 = vor.u32 %v8497_v52, %v7444_v63  ;;  %v7575_v56 = vor.u32 %v8529_v35, %v7572_v1  ;;  %v7556_v49 = vld [vmem:[%s13494_s3 + $0x718] sm:$0xf0] }
 0x46d   :  { %5486 = vmatpush.bf16.msrb.mxu2 %v7223_v17  ;;  %5505 = vmatpush.bf16.msrb.mxu3 %v7351_v19  ;;  %v8493_v17 = vld [vmem:[%s13494_s3 + $0x60c] sm:$0xf]  ;;  %v7428_v19 = vld [vmem:[%s13494_s3 + $0x618] sm:$0xf0]  ;;  %v7175_v55 = vor.u32 %v8429_v43, %v7172_v30 }
 0x46e   :  { %5457 = vmatmul.bf16.gmra.mxu0 %v10216_v16  ;;  %5476 = vmatmul.bf16.gmra.mxu1 %v10238_v21  ;;  %v7300_v16 = vld [vmem:[%s13494_s3 + $0x518] sm:$0xf0]  ;;  %v8617_v20 = vld [vmem:[%s13494_s3 + $0x9ec] sm:$0xf] }
 0x46f   :  { %5524 = vmatpush.bf16.msra.mxu0 %v7479_v25  ;;  %5543 = vmatpush.bf16.msra.mxu1 %v7607_v54  ;;  %v12660_v21 = vpop.f32.mrf.mxu2  ;;  %v12662_v9 = vpop.f32.mrf.mxu3  ;;  %v8585_v25 = vld [vmem:[%s13494_s3 + $0x8ec] sm:$0xf]  ;;  %v7796_v54 = vld [vmem:[%s13494_s3 + $0x8f8] sm:$0xf0] }
 0x470   :  { %v7924_v2 = vld [vmem:[%s13494_s3 + $0x9f8] sm:$0xf0]  ;;  %v8649_v11 = vld [vmem:[%s13494_s3 + $0xaec] sm:$0xf]  ;;  %v7799_v3 = vor.u32 %v8585_v25, %v7796_v54 }
 0x471   :  { %5487 = vmatpush.bf16.msrb.mxu2 %v7207_v51  ;;  %5506 = vmatpush.bf16.msrb.mxu3 %v7335_v50  ;;  %v7303_v51 = vor.u32 %v8461_v60, %v7300_v16  ;;  %v8052_v50 = vld [vmem:[%s13494_s3 + $0xaf8] sm:$0xf0]  ;;  %v8681_v53 = vld [vmem:[%s13494_s3 + $0xbec] sm:$0xf]  ;;  %v7927_v14 = vor.u32 %v8617_v20, %v7924_v2 }
 0x472   :  { %v8180_v38 = vld [vmem:[%s13494_s3 + $0xbf8] sm:$0xf0]  ;;  %v8055_v52 = vor.u32 %v8649_v11, %v8052_v50  ;;  %v8581_v35 = vld [vmem:[%s13494_s3 + $0x8cc] sm:$0xf] }
 0x473   :  { %5525 = vmatpush.bf16.msra.mxu0 %v7463_v61  ;;  %5544 = vmatpush.bf16.msra.mxu1 %v7591_v48  ;;  %v12691_v42 = vpop.f32.mrf.mxu0  ;;  %v12693_v27 = vpop.f32.mrf.mxu1  ;;  %v7431_v61 = vor.u32 %v8493_v17, %v7428_v19  ;;  %v7559_v48 = vor.u32 %v8525_v15, %v7556_v49  ;;  %v8183_v63 = vor.u32 %v8681_v53, %v8180_v38  ;;  %v7780_v1 = vld [vmem:[%s13494_s3 + $0x8d8] sm:$0xf0]  ;;  %v8645_v60 = vld [vmem:[%s13494_s3 + $0xacc] sm:$0xf] }
 0x474   :  { %v7908_v30 = vld [vmem:[%s13494_s3 + $0x9d8] sm:$0xf0]  ;;  %v7783_v15 = vor.u32 %v8581_v35, %v7780_v1  ;;  %v8577_v25 = vld [vmem:[%s13494_s3 + $0x8ac] sm:$0xf] }
 0x475   :  { %5488 = vmatpush.bf16.msrb.mxu2 %v7191_v59  ;;  %5507 = vmatpush.bf16.msrb.mxu3 %v7319_v26  ;;  %v8613_v26 = vld [vmem:[%s13494_s3 + $0x9cc] sm:$0xf]  ;;  %v8036_v16 = vld [vmem:[%s13494_s3 + $0xad8] sm:$0xf0] }
 0x476   :  { %v7911_v49 = vor.u32 %v8613_v26, %v7908_v30  ;;  %v7764_v54 = vld [vmem:[%s13494_s3 + $0x8b8] sm:$0xf0]  ;;  %v8039_v20 = vor.u32 %v8645_v60, %v8036_v16  ;;  %v8609_v11 = vld [vmem:[%s13494_s3 + $0x9ac] sm:$0xf] }
 0x477   :  { %5526 = vmatpush.bf16.msra.mxu0 %v7447_v39  ;;  %5545 = vmatpush.bf16.msra.mxu1 %v7575_v56  ;;  %v12710_v43 = vpop.f32.mrf.mxu2  ;;  %v12712_v59 = vpop.f32.mrf.mxu3  ;;  %v8677_v39 = vld [vmem:[%s13494_s3 + $0xbcc] sm:$0xf]  ;;  %v8164_v56 = vld [vmem:[%s13494_s3 + $0xbd8] sm:$0xf0] }
 0x478   :  { %v8167_v2 = vor.u32 %v8677_v39, %v8164_v56  ;;  %v8020_v50 = vld [vmem:[%s13494_s3 + $0xab8] sm:$0xf0]  ;;  %v8673_v53 = vld [vmem:[%s13494_s3 + $0xbac] sm:$0xf] }
 0x479   :  { %5489 = vmatpush.bf16.msrb.mxu2 %v7175_v55  ;;  %5508 = vmatpush.bf16.msrb.mxu3 %v7303_v51  ;;  %v7892_v55 = vld [vmem:[%s13494_s3 + $0x9b8] sm:$0xf0]  ;;  %v8641_v51 = vld [vmem:[%s13494_s3 + $0xaac] sm:$0xf] }
 0x47a   :  { %v8148_v38 = vld [vmem:[%s13494_s3 + $0xbb8] sm:$0xf0]  ;;  %v8637_v35 = vld [vmem:[%s13494_s3 + $0xa8c] sm:$0xf] }
 0x47b   :  { %5527 = vmatpush.bf16.msra.mxu0 %v7431_v61  ;;  %5546 = vmatpush.bf16.msra.mxu1 %v7559_v48  ;;  %v12732_v17 = vpop.f32.mrf.mxu0  ;;  %v12734_v19 = vpop.f32.mrf.mxu1  ;;  %v8573_v61 = vld [vmem:[%s13494_s3 + $0x88c] sm:$0xf]  ;;  %v7748_v48 = vld [vmem:[%s13494_s3 + $0x898] sm:$0xf0] }
 0x47c   :  { %5490 = vmatmul.bf16.vlgmr.msrb.gmra.mxu2 %v10730_v45  ;;  %5509 = vmatmul.bf16.vlgmr.msrb.gmra.mxu3 %v10746_v37  ;;  %v7767_v45 = vor.u32 %v8577_v25, %v7764_v54  ;;  %v7895_v37 = vor.u32 %v8609_v11, %v7892_v55  ;;  %v8004_v26 = vld [vmem:[%s13494_s3 + $0xa98] sm:$0xf0]  ;;  %v8669_v30 = vld [vmem:[%s13494_s3 + $0xb8c] sm:$0xf]  ;;  %v7751_v56 = vor.u32 %v8573_v61, %v7748_v48 }
 0x47d   :  { %5558 = vmatpush.bf16.msra.mxu2 %v7799_v3  ;;  %5577 = vmatpush.bf16.msra.mxu3 %v7927_v14  ;;  %v8132_v60 = vld [vmem:[%s13494_s3 + $0xb98] sm:$0xf0]  ;;  %v8007_v54 = vor.u32 %v8637_v35, %v8004_v26  ;;  %v8633_v55 = vld [vmem:[%s13494_s3 + $0xa6c] sm:$0xf] }
 0x47e   :  { %5528 = vmatmul.bf16.vlgmr.msra.gmra.mxu0 %v10760_v6  ;;  %5547 = vmatmul.bf16.vlgmr.msra.gmra.mxu1 %v10763_v12  ;;  %v8151_v6 = vor.u32 %v8673_v53, %v8148_v38  ;;  %v8605_v12 = vld [vmem:[%s13494_s3 + $0x98c] sm:$0xf]  ;;  %v7732_v25 = vld [vmem:[%s13494_s3 + $0x878] sm:$0xf0] }
 0x47f   :  { %5596 = vmatpush.bf16.msrb.mxu0 %v8055_v52  ;;  %5615 = vmatpush.bf16.msrb.mxu1 %v8183_v63  ;;  %v5187_v3 = vpop.f32.mrf.mxu2  ;;  %v5206_v14 = vpop.f32.mrf.mxu3  ;;  %v8023_v52 = vor.u32 %v8641_v51, %v8020_v50  ;;  %v7876_v63 = vld [vmem:[%s13494_s3 + $0x998] sm:$0xf0]  ;;  %v5119_v51 = vadd.f32 %v12710_v43, %v12537_v58  ;;  %v8665_v53 = vld [vmem:[%s13494_s3 + $0xb6c] sm:$0xf] }
 0x480   :  { %v12779_v1 = vadd.f32 %v5206_v14, %v5187_v3  ;;  %v7860_v11 = vld [vmem:[%s13494_s3 + $0x978] sm:$0xf0]  ;;  %v8565_v61 = vld [vmem:[%s13494_s3 + $0x84c] sm:$0xf] }
 0x481   :  { %5559 = vmatpush.bf16.msra.mxu2 %v7783_v15  ;;  %5578 = vmatpush.bf16.msra.mxu3 %v7911_v49  ;;  %v7879_v15 = vor.u32 %v8605_v12, %v7876_v63  ;;  %v8569_v49 = vld [vmem:[%s13494_s3 + $0x86c] sm:$0xf]  ;;  %v7988_v50 = vld [vmem:[%s13494_s3 + $0xa78] sm:$0xf0] }
 0x482   :  { %v8116_v38 = vld [vmem:[%s13494_s3 + $0xb78] sm:$0xf0]  ;;  %v7735_v58 = vor.u32 %v8569_v49, %v7732_v25  ;;  %v8661_v63 = vld [vmem:[%s13494_s3 + $0xb4c] sm:$0xf] }
 0x483   :  { %5597 = vmatpush.bf16.msrb.mxu0 %v8039_v20  ;;  %5616 = vmatpush.bf16.msrb.mxu1 %v8167_v2  ;;  %v12790_v16 = vpop.f32.mrf.mxu0  ;;  %v12792_v39 = vpop.f32.mrf.mxu1  ;;  %v8135_v20 = vor.u32 %v8669_v30, %v8132_v60  ;;  %v8601_v2 = vld [vmem:[%s13494_s3 + $0x96c] sm:$0xf]  ;;  %v7716_v48 = vld [vmem:[%s13494_s3 + $0x858] sm:$0xf0]  ;;  %v109_v30 = vld [vmem:[%s13495_s4] sm:$0x77] }
 0x484   :  { %v7863_v43 = vor.u32 %v8601_v2, %v7860_v11  ;;  %v7972_v12 = vld [vmem:[%s13494_s3 + $0xa58] sm:$0xf0]  ;;  %v8561_v25 = vld [vmem:[%s13494_s3 + $0x82c] sm:$0xf] }
 0x485   :  { %5560 = vmatpush.bf16.msra.mxu2 %v7767_v45  ;;  %5579 = vmatpush.bf16.msra.mxu3 %v7895_v37  ;;  %v5114_v45 = vadd.f32 %v12594_v29, %v12433_v41  ;;  %v5117_v37 = vadd.f32 %v12660_v21, %v12481_v28  ;;  %v7991_v41 = vor.u32 %v8633_v55, %v7988_v50  ;;  %v8597_v29 = vld [vmem:[%s13494_s3 + $0x94c] sm:$0xf]  ;;  %v7844_v21 = vld [vmem:[%s13494_s3 + $0x958] sm:$0xf0] }
 0x486   :  { %v8119_v28 = vor.u32 %v8665_v53, %v8116_v38  ;;  %v8100_v35 = vld [vmem:[%s13494_s3 + $0xb58] sm:$0xf0]  ;;  %v7847_v49 = vor.u32 %v8597_v29, %v7844_v21  ;;  %v8625_v11 = vld [vmem:[%s13494_s3 + $0xa2c] sm:$0xf]  ;;  %v5636_v38 = vperm.slane %v109_v30, 0 }
 0x487   :  { %5598 = vmatpush.bf16.msrb.mxu0 %v8023_v52  ;;  %5617 = vmatpush.bf16.msrb.mxu1 %v8151_v6  ;;  %v12830_v3 = vpop.f32.mrf.mxu2  ;;  %v12832_v14 = vpop.f32.mrf.mxu3  ;;  %v8629_v52 = vld [vmem:[%s13494_s3 + $0xa4c] sm:$0xf]  ;;  %v5138_v6 = vadd.f32 %v12712_v59, %v5119_v51  ;;  %v5133_v26 = vadd.f32 %v12596_v0, %v5114_v45  ;;  %v5136_v59 = vadd.f32 %v12662_v9, %v5117_v37  ;;  %v7700_v0 = vld [vmem:[%s13494_s3 + $0x838] sm:$0xf0] }
 0x488   :  { %v8103_v9 = vor.u32 %v8661_v63, %v8100_v35  ;;  %v7828_v2 = vld [vmem:[%s13494_s3 + $0x938] sm:$0xf0]  ;;  %v8657_v50 = vld [vmem:[%s13494_s3 + $0xb2c] sm:$0xf] }
 0x489   :  { %5561 = vmatpush.bf16.msra.mxu2 %v7751_v56  ;;  %5580 = vmatpush.bf16.msra.mxu3 %v7879_v15  ;;  %v7719_v15 = vor.u32 %v8565_v61, %v7716_v48  ;;  %v5157_v55 = vadd.f32 %v12691_v42, %v5138_v6  ;;  %v7956_v51 = vld [vmem:[%s13494_s3 + $0xa38] sm:$0xf0]  ;;  %v5152_v45 = vadd.f32 %v12558_v22, %v5133_v26  ;;  %v8589_v61 = vld [vmem:[%s13494_s3 + $0x90c] sm:$0xf]  ;;  %v5644_v6 = vperm.slane %v5636_v38, 0 }
 0x48a   :  { %v8084_v53 = vld [vmem:[%s13494_s3 + $0xb38] sm:$0xf0]  ;;  %v7703_v42 = vor.u32 %v8561_v25, %v7700_v0  ;;  %v8653_v21 = vld [vmem:[%s13494_s3 + $0xb0c] sm:$0xf] }
 0x48b   :  { %5599 = vmatpush.bf16.msrb.mxu0 %v8007_v54  ;;  %5618 = vmatpush.bf16.msrb.mxu1 %v8135_v20  ;;  %v12858_v60 = vpop.f32.mrf.mxu0  ;;  %v12860_v56 = vpop.f32.mrf.mxu1  ;;  %v7975_v54 = vor.u32 %v8629_v52, %v7972_v12  ;;  %v8593_v20 = vld [vmem:[%s13494_s3 + $0x92c] sm:$0xf]  ;;  %v7812_v48 = vld [vmem:[%s13494_s3 + $0x918] sm:$0xf0]  ;;  %v5171_v12 = vadd.f32 %v12560_v33, %v5152_v45  ;;  %v12934_v33 = vadd.f32 %v5644_v6, %v11995_v24 }
 0x48c   :  { %5495 = vmatmul.bf16.gmra.mxu2 %v10864_v23  ;;  %5514 = vmatmul.bf16.gmra.mxu3 %v10873_v62  ;;  %v5637_v23 = vperm.slane %v109_v30, 4  ;;  %v5155_v62 = vadd.f32 %v12616_v4, %v5136_v59  ;;  %v7831_v37 = vor.u32 %v8593_v20, %v7828_v2  ;;  %v8087_v4 = vor.u32 %v8657_v50, %v8084_v53  ;;  %v7940_v29 = vld [vmem:[%s13494_s3 + $0xa18] sm:$0xf0] }
 0x48d   :  { %5562 = vmatpush.bf16.msra.mxu2 %v7735_v58  ;;  %5581 = vmatpush.bf16.msra.mxu3 %v7863_v43  ;;  %v8557_v58 = vld [vmem:[%s13494_s3 + $0x80c] sm:$0xf]  ;;  %v7684_v43 = vld [vmem:[%s13494_s3 + $0x818] sm:$0xf0]  ;;  %v7815_v59 = vor.u32 %v8589_v61, %v7812_v48 }
 0x48e   :  { %5533 = vmatmul.bf16.gmra.mxu0 %v10887_v46  ;;  %5552 = vmatmul.bf16.gmra.mxu1 %v10890_v47  ;;  %v7959_v47 = vor.u32 %v8625_v11, %v7956_v51  ;;  %v8068_v52 = vld [vmem:[%s13494_s3 + $0xb18] sm:$0xf0]  ;;  %v5645_v63 = vperm.slane %v5637_v23, 0  ;;  %v5174_v35 = vadd.f32 %v12618_v5, %v5155_v62  ;;  %v7687_v30 = vor.u32 %v8557_v58, %v7684_v43 }
 0x48f   :  { %5600 = vmatpush.bf16.msrb.mxu0 %v7991_v41  ;;  %5619 = vmatpush.bf16.msrb.mxu1 %v8119_v28  ;;  %v12899_v22 = vpop.f32.mrf.mxu2  ;;  %v12901_v46 = vpop.f32.mrf.mxu3  ;;  %v8621_v41 = vld [vmem:[%s13494_s3 + $0xa0c] sm:$0xf]  ;;  %v5176_v28 = vadd.f32 %v12693_v27, %v5157_v55  ;;  %v8071_v25 = vor.u32 %v8653_v21, %v8068_v52  ;;  %v12937_v5 = vadd.f32 %v5644_v6, %v12044_v18  ;;  %v8703_v55 = vld [vmem:[%s13491_s5 + $0xf8] sm:$0xff] }
 0x490   :  { %v12953_v24 = vadd.f32 %v5645_v63, %v12586_v7  ;;  %v5724_v51 = vmul.f32 %v12934_v33, %v12934_v33  ;;  %v8704_v50 = vld [vmem:[%s13491_s5 + $0x178] sm:$0xff] }
 0x491   :  { %5563 = vmatpush.bf16.msra.mxu2 %v7719_v15  ;;  %5582 = vmatpush.bf16.msra.mxu3 %v7847_v49  ;;  %v12929_v15 = vadd.f32 %v5644_v6, %v12099_v36  ;;  %v7943_v49 = vor.u32 %v8621_v41, %v7940_v29  ;;  %v12931_v0 = vadd.f32 %v5645_v63, %v5176_v28  ;;  %v8705_v53 = vld [vmem:[%s13491_s5 + $0x1f8] sm:$0xff] }
 0x492   :  { %v12944_v36 = vadd.f32 %v5644_v6, %v11934_v10  ;;  %v8702_v10 = vld [vmem:[%s13491_s5 + $0x78] sm:$0xff]  ;;  %v5728_v7 = vmul.f32 %v12937_v5, %v12937_v5  ;;  %v5721_v61 = vmul.f32 %v12953_v24, %v12953_v24 }
 0x493   :  { %5601 = vmatpush.bf16.msrb.mxu0 %v7975_v54  ;;  %5620 = vmatpush.bf16.msrb.mxu1 %v8103_v9  ;;  %v12924_v26 = vpop.f32.mrf.mxu0  ;;  %v12926_v27 = vpop.f32.mrf.mxu1  ;;  %v12939_v54 = vadd.f32 %v5645_v63, %v5171_v12  ;;  %v12941_v9 = vadd.f32 %v5645_v63, %v5174_v35  ;;  %v5732_v20 = vmul.f32 %v12929_v15, %v12929_v15  ;;  %v8712_v63 = vld [vmem:[%s13491_s5 + $0x168] sm:$0xff] }
 0x494   :  { %v5733_v18 = vmul.f32 %v12931_v0, %v12931_v0  ;;  %v5720_v58 = vmul.f32 %v12944_v36, %v12944_v36  ;;  %v5664_v41 = vadd.f32 %v12934_v33, %v12944_v36  ;;  %v5692_v29 = vadd.f32 %v12929_v15, %v12937_v5  ;;  %v8713_v35 = vld [vmem:[%s13491_s5 + $0x1e8] sm:$0xff] }
 0x495   :  { %5564 = vmatpush.bf16.msra.mxu2 %v7703_v42  ;;  %5583 = vmatpush.bf16.msra.mxu3 %v7831_v37  ;;  %v5725_v38 = vmul.f32 %v12939_v54, %v12939_v54  ;;  %v5729_v45 = vmul.f32 %v12941_v9, %v12941_v9  ;;  %v8706_v42 = vld [vmem:[%s13491_s5 + $0x70] sm:$0xff]  ;;  %v5764_v43 = vadd.f32 %v5732_v20, %v5728_v7 }
 0x496   :  { %v8707_v37 = vld [vmem:[%s13491_s5 + $0xf0] sm:$0xff]  ;;  %v5736_v28 = vadd.f32 %v5724_v51, %v5720_v58  ;;  %v5699_v52 = vadd.f32 %v12931_v0, %v12941_v9  ;;  %v8720_v58 = vld [vmem:[%s13491_s5 + $0x158] sm:$0xff] }
 0x497   :  { %5602 = vmatpush.bf16.msrb.mxu0 %v7959_v47  ;;  %5621 = vmatpush.bf16.msrb.mxu1 %v8087_v4  ;;  %v12948_v2 = vpop.f32.mrf.mxu2  ;;  %v12950_v11 = vpop.f32.mrf.mxu3  ;;  %v8708_v47 = vld [vmem:[%s13491_s5 + $0x170] sm:$0xff]  ;;  %v5771_v48 = vadd.f32 %v5733_v18, %v5729_v45  ;;  %v5743_v21 = vadd.f32 %v5725_v38, %v5721_v61  ;;  %v5765_v6 = vrot.slane %v5764_v43, 4  ;;  %v5693_v18 = vrot.slane %v5692_v29, 4  ;;  %v8718_v38 = vld [vmem:[%s13491_s5 + $0x58] sm:$0xff] }
 0x498   :  { %v8709_v4 = vld [vmem:[%s13491_s5 + $0x1f0] sm:$0xff]  ;;  %v5737_v20 = vrot.slane %v5736_v28, 4  ;;  %v5700_v7 = vrot.slane %v5699_v52, 4  ;;  %v8719_v45 = vld [vmem:[%s13491_s5 + $0xd8] sm:$0xff] }
 0x499   :  { %5565 = vmatpush.bf16.msra.mxu2 %v7687_v30  ;;  %5584 = vmatpush.bf16.msra.mxu3 %v7815_v59  ;;  %v5772_v30 = vrot.slane %v5771_v48, 4  ;;  %v8714_v59 = vld [vmem:[%s13491_s5 + $0x60] sm:$0xff]  ;;  %v5744_v51 = vrot.slane %v5743_v21, 4  ;;  %v8722_v61 = vld [vmem:[%s13491_s5 + $0x50] sm:$0xff] }
 0x49b   :  { %5603 = vmatpush.bf16.msrb.mxu0 %v7943_v49  ;;  %5622 = vmatpush.bf16.msrb.mxu1 %v8071_v25  ;;  %v12977_v23 = vpop.f32.mrf.mxu0  ;;  %v12979_v62 = vpop.f32.mrf.mxu1  ;;  %v8715_v49 = vld [vmem:[%s13491_s5 + $0xe0] sm:$0xff]  ;;  %v5665_v25 = vrot.slane %v5664_v41, 4 }
 0x49c   :  { %5566 = vmatmul.bf16.vlgmr.msra.gmra.mxu2 %v10994_v13  ;;  %5585 = vmatmul.bf16.vlgmr.msra.gmra.mxu3 %v10997_v8  ;;  %v8710_v13 = vld [vmem:[%s13491_s5 + $0x68] sm:$0xff] }
 0x49d   :  { %5828 = vmatpush.msrb.mxu2 %v8702_v10  ;;  %5848 = vmatpush.msrb.mxu3 %v8703_v55  ;;  %v8711_v8 = vld [vmem:[%s13491_s5 + $0xe8] sm:$0xff]  ;;  %v8716_v10 = vld [vmem:[%s13491_s5 + $0x160] sm:$0xff] }
 0x49e   :  { %5604 = vmatmul.bf16.vlgmr.msrb.gmra.mxu0 %v11011_v40  ;;  %5623 = vmatmul.bf16.vlgmr.msrb.gmra.mxu1 %v11014_v44  ;;  %v5671_v40 = vadd.f32 %v12939_v54, %v12953_v24  ;;  %v8717_v55 = vld [vmem:[%s13491_s5 + $0x1e0] sm:$0xff] }
 0x49f   :  { %5868 = vmatpush.msra.mxu0 %v8704_v50  ;;  %5888 = vmatpush.msra.mxu1 %v8705_v53  ;;  %v13015_v12 = vpop.f32.mrf.mxu2  ;;  %v13017_v44 = vpop.f32.mrf.mxu3 }
 0x4a0   :  { %5829 = vmatpush.msrb.mxu2 %v8706_v42  ;;  %5849 = vmatpush.msrb.mxu3 %v8707_v37  ;;  %v5766_v42 = vadd.f32 %v5765_v6, %v5764_v43  ;;  %v5672_v37 = vrot.slane %v5671_v40, 4  ;;  %v8723_v43 = vld [vmem:[%s13491_s5 + $0xd0] sm:$0xff]  ;;  %v5694_v6 = vadd.f32 %v5693_v18, %v5692_v29 }
 0x4a1   :  { %5869 = vmatpush.msra.mxu0 %v8708_v47  ;;  %5889 = vmatpush.msra.mxu1 %v8709_v4  ;;  %v8721_v47 = vld [vmem:[%s13491_s5 + $0x1d8] sm:$0xff]  ;;  %v5773_v4 = vadd.f32 %v5772_v30, %v5771_v48  ;;  %v8725_v48 = vld [vmem:[%s13491_s5 + $0x1d0] sm:$0xff]  ;;  %v5701_v30 = vadd.f32 %v5700_v7, %v5699_v52  ;;  %v8729_v52 = vld [vmem:[%s13491_s5 + $0x1c8] sm:$0xff] }
 0x4a2   :  { %5830 = vmatpush.msrb.mxu2 %v8710_v13  ;;  %5850 = vmatpush.msrb.mxu3 %v8711_v8  ;;  %v5666_v13 = vadd.f32 %v5665_v25, %v5664_v41  ;;  %v5738_v8 = vadd.f32 %v5737_v20, %v5736_v28  ;;  %v8727_v41 = vld [vmem:[%s13491_s5 + $0xc8] sm:$0xff]  ;;  %v5673_v28 = vadd.f32 %v5672_v37, %v5671_v40  ;;  %v5767_v25 = vrot.slane %v5766_v42, 2  ;;  %v8730_v20 = vld [vmem:[%s13491_s5 + $0x40] sm:$0xff] }
 0x4a3   :  { %5870 = vmatpush.msra.mxu0 %v8712_v63  ;;  %5890 = vmatpush.msra.mxu1 %v8713_v35  ;;  %v13037_v50 = vpop.f32.mrf.mxu0  ;;  %v13039_v53 = vpop.f32.mrf.mxu1  ;;  %v8724_v63 = vld [vmem:[%s13491_s5 + $0x150] sm:$0xff]  ;;  %v5745_v35 = vadd.f32 %v5744_v51, %v5743_v21  ;;  %v8728_v21 = vld [vmem:[%s13491_s5 + $0x148] sm:$0xff]  ;;  %v8731_v40 = vld [vmem:[%s13491_s5 + $0xc0] sm:$0xff]  ;;  %v5774_v18 = vrot.slane %v5773_v4, 2 }
 0x4a4   :  { %5831 = vmatpush.msrb.mxu2 %v8714_v59  ;;  %5851 = vmatpush.msrb.mxu3 %v8715_v49  ;;  %v8726_v59 = vld [vmem:[%s13491_s5 + $0x48] sm:$0xff]  ;;  %v5739_v51 = vrot.slane %v5738_v8, 2  ;;  %v8732_v7 = vld [vmem:[%s13491_s5 + $0x140] sm:$0xff] }
 0x4a5   :  { %5871 = vmatpush.msra.mxu0 %v8716_v10  ;;  %5891 = vmatpush.msra.mxu1 %v8717_v55  ;;  %v5667_v10 = vrot.slane %v5666_v13, 2  ;;  %v5695_v55 = vrot.slane %v5694_v6, 2 }
 0x4a6   :  { %5832 = vmatpush.msrb.mxu2 %v8718_v38  ;;  %5852 = vmatpush.msrb.mxu3 %v8719_v45  ;;  %v8733_v38 = vld [vmem:[%s13491_s5 + $0x1c0] sm:$0xff]  ;;  %v5702_v45 = vrot.slane %v5701_v30, 2 }
 0x4a7   :  { %5872 = vmatpush.msra.mxu0 %v8720_v58  ;;  %5892 = vmatpush.msra.mxu1 %v8721_v47  ;;  %v13071_v29 = vpop.f32.mrf.mxu2  ;;  %v13073_v49 = vpop.f32.mrf.mxu3  ;;  %v8734_v47 = vld [vmem:[%s13491_s5 + $0x38] sm:$0xff] }
 0x4a8   :  { %5833 = vmatpush.msrb.mxu2 %v8722_v61  ;;  %5853 = vmatpush.msrb.mxu3 %v8723_v43  ;;  %v8735_v61 = vld [vmem:[%s13491_s5 + $0xb8] sm:$0xff]  ;;  %v5746_v43 = vrot.slane %v5745_v35, 2 }
 0x4a9   :  { %5873 = vmatpush.msra.mxu0 %v8724_v63  ;;  %5893 = vmatpush.msra.mxu1 %v8725_v48  ;;  %v5674_v63 = vrot.slane %v5673_v28, 2  ;;  %v5768_v48 = vadd.f32 %v5767_v25, %v5766_v42  ;;  %v5668_v42 = vadd.f32 %v5667_v10, %v5666_v13  ;;  %v5696_v25 = vadd.f32 %v5695_v55, %v5694_v6  ;;  %v8741_v6 = vld [vmem:[%s13491_s5 + $0x1b0] sm:$0xff]  ;;  %v8745_v10 = vld [vmem:[%s13491_s5 + $0x1a8] sm:$0xff] }
 0x4aa   :  { %5834 = vmatpush.msrb.mxu2 %v8726_v59  ;;  %5854 = vmatpush.msrb.mxu3 %v8727_v41  ;;  %v8736_v59 = vld [vmem:[%s13491_s5 + $0x138] sm:$0xff] }
 0x4ab   :  { %5874 = vmatpush.msra.mxu0 %v8728_v21  ;;  %5894 = vmatpush.msra.mxu1 %v8729_v52  ;;  %v13093_v37 = vpop.f32.mrf.mxu0  ;;  %v13095_v58 = vpop.f32.mrf.mxu1  ;;  %v8737_v41 = vld [vmem:[%s13491_s5 + $0x1b8] sm:$0xff]  ;;  %v5775_v21 = vadd.f32 %v5774_v18, %v5773_v4  ;;  %v5740_v52 = vadd.f32 %v5739_v51, %v5738_v8  ;;  %v8740_v8 = vld [vmem:[%s13491_s5 + $0x130] sm:$0xff]  ;;  %v8744_v18 = vld [vmem:[%s13491_s5 + $0x128] sm:$0xff] }
 0x4ac   :  { %5835 = vmatpush.msrb.mxu2 %v8730_v20  ;;  %5855 = vmatpush.msrb.mxu3 %v8731_v40  ;;  %v5226_v20 = vadd.f32 %v12732_v17, %v12779_v1  ;;  %v8738_v40 = vld [vmem:[%s13491_s5 + $0x30] sm:$0xff]  ;;  %v5769_v17 = vrot.slane %v5768_v48, 1  ;;  %v5675_v1 = vadd.f32 %v5674_v63, %v5673_v28 }
 0x4ad   :  { %5875 = vmatpush.msra.mxu0 %v8732_v7  ;;  %5895 = vmatpush.msra.mxu1 %v8733_v38  ;;  %v5741_v28 = vrot.slane %v5740_v52, 1  ;;  %v8746_v38 = vld [vmem:[%s13491_s5 + $0x20] sm:$0xff] }
 0x4ae   :  { %5836 = vmatpush.msrb.mxu2 %v8734_v47  ;;  %5856 = vmatpush.msrb.mxu3 %v8735_v61  ;;  %v5245_v55 = vadd.f32 %v12734_v19, %v5226_v20  ;;  %v5697_v47 = vrot.slane %v5696_v25, 1  ;;  %v5770_v19 = vadd.f32 %v5769_v17, %v5768_v48  ;;  %v8749_v20 = vld [vmem:[%s13491_s5 + $0x1a0] sm:$0xff] }
 0x4af   :  { %5876 = vmatpush.msra.mxu0 %v8736_v59  ;;  %5896 = vmatpush.msra.mxu1 %v8737_v41  ;;  %v13123_v4 = vpop.f32.mrf.mxu2  ;;  %v13125_v13 = vpop.f32.mrf.mxu3  ;;  %v5676_v59 = vrot.slane %v5675_v1, 1  ;;  %v8748_v41 = vld [vmem:[%s13491_s5 + $0x120] sm:$0xff]  ;;  %v5742_v17 = vadd.f32 %v5741_v28, %v5740_v52 }
 0x4b0   :  { %5571 = vmatmul.bf16.gmra.mxu2 %v11109_v34  ;;  %5590 = vmatmul.bf16.gmra.mxu3 %v11121_v57  ;;  %v8739_v34 = vld [vmem:[%s13491_s5 + $0xb0] sm:$0xff]  ;;  %v5703_v57 = vadd.f32 %v5702_v45, %v5701_v30  ;;  %v5669_v30 = vrot.slane %v5668_v42, 1  ;;  %v8747_v45 = vld [vmem:[%s13491_s5 + $0xa0] sm:$0xff] }
 0x4b1   :  { %5609 = vmatmul.bf16.gmra.mxu0 %v11135_v32  ;;  %5628 = vmatmul.bf16.gmra.mxu1 %v11138_v31  ;;  %v5747_v32 = vadd.f32 %v5746_v43, %v5745_v35  ;;  %v5209_v31 = vadd.f32 %v12832_v14, %v12830_v3  ;;  %v8742_v3 = vld [vmem:[%s13491_s5 + $0x28] sm:$0xff]  ;;  %v5776_v35 = vrot.slane %v5775_v21, 1  ;;  %v5816_v28 = vsel %vm1626_vm5, %v5770_v19, %v5742_v17 }
 0x4b2   :  { %5837 = vmatpush.msrb.mxu2 %v8738_v40  ;;  %5857 = vmatpush.msrb.mxu3 %v8739_v34  ;;  %v8743_v14 = vld [vmem:[%s13491_s5 + $0xa8] sm:$0xff]  ;;  %v5704_v61 = vrot.slane %v5703_v57, 1  ;;  %v5264_v40 = vadd.f32 %v13015_v12, %v5245_v55  ;;  %v8750_v34 = vld [vmem:[%s13491_s5 + $0x18] sm:$0xff] }
 0x4b3   :  { %5877 = vmatpush.msra.mxu0 %v8740_v8  ;;  %5897 = vmatpush.msra.mxu1 %v8741_v6  ;;  %v13146_v51 = vpop.f32.mrf.mxu0  ;;  %v13148_v7 = vpop.f32.mrf.mxu1  ;;  %v5748_v43 = vrot.slane %v5747_v32, 1  ;;  %v5228_v63 = vadd.f32 %v12790_v16, %v5209_v31  ;;  %v8751_v16 = vld [vmem:[%s13491_s5 + $0x98] sm:$0xff]  ;;  %v5777_v48 = vadd.f32 %v5776_v35, %v5775_v21  ;;  %v5670_v31 = vadd.f32 %v5669_v30, %v5668_v42  ;;  %v8754_v6 = vld [vmem:[%s13491_s5 + $0x10] sm:$0xff] }
 0x4b4   :  { %5838 = vmatpush.msrb.mxu2 %v8742_v3  ;;  %5858 = vmatpush.msrb.mxu3 %v8743_v14  ;;  %v8752_v8 = vld [vmem:[%s13491_s5 + $0x118] sm:$0xff]  ;;  %v8755_v21 = vld [vmem:[%s13491_s5 + $0x90] sm:$0xff]  ;;  %v5698_v42 = vadd.f32 %v5697_v47, %v5696_v25  ;;  %v5705_v52 = vadd.f32 %v5704_v61, %v5703_v57  ;;  %v5283_v57 = vadd.f32 %v13017_v44, %v5264_v40  ;;  %v8762_v47 = vld [vmem:[%s13491_s5] sm:$0xff] }
 0x4b5   :  { %5878 = vmatpush.msra.mxu0 %v8744_v18  ;;  %5898 = vmatpush.msra.mxu1 %v8745_v10  ;;  %v8753_v12 = vld [vmem:[%s13491_s5 + $0x198] sm:$0xff]  ;;  %v5749_v3 = vadd.f32 %v5748_v43, %v5747_v32  ;;  %v5247_v14 = vadd.f32 %v12792_v39, %v5228_v63  ;;  %v5677_v18 = vadd.f32 %v5676_v59, %v5675_v1  ;;  %v8756_v10 = vld [vmem:[%s13491_s5 + $0x110] sm:$0xff]  ;;  %v8758_v32 = vld [vmem:[%s13491_s5 + $0x8] sm:$0xff] }
 0x4b6   :  { %5839 = vmatpush.msrb.mxu2 %v8746_v38  ;;  %5859 = vmatpush.msrb.mxu3 %v8747_v45  ;;  %v8757_v25 = vld [vmem:[%s13491_s5 + $0x190] sm:$0xff]  ;;  %v5212_v39 = vadd.f32 %v12901_v46, %v12899_v22  ;;  %v8759_v1 = vld [vmem:[%s13491_s5 + $0x88] sm:$0xff]  ;;  %v8763_v61 = vld [vmem:[%s13491_s5 + $0x80] sm:$0xff]  ;;  %v5800_v43 = vsel %vm1609_vm4, %v5698_v42, %v5670_v31  ;;  %v5302_v40 = vadd.f32 %v12977_v23, %v5283_v57 }
 0x4b7   :  { %5879 = vmatpush.msra.mxu0 %v8748_v41  ;;  %5899 = vmatpush.msra.mxu1 %v8749_v20  ;;  %v13183_v35 = vpop.f32.mrf.mxu2  ;;  %v13185_v30 = vpop.f32.mrf.mxu3  ;;  %v5817_v55 = vsel %vm1626_vm5, %v5777_v48, %v5749_v3  ;;  %v8760_v38 = vld [vmem:[%s13491_s5 + $0x108] sm:$0xff]  ;;  %v5266_v46 = vadd.f32 %v13071_v29, %v5247_v14  ;;  %v5801_v63 = vsel %vm1609_vm4, %v5705_v52, %v5677_v18  ;;  %v8764_v59 = vld [vmem:[%s13491_s5 + $0x100] sm:$0xff]  ;;  %v8769_v23 = vld [vmem:[%s13493_s6 + $0x78] sm:$0xff] }
 0x4b8   :  { %5840 = vmatpush.msrb.mxu2 %v8750_v34  ;;  %5860 = vmatpush.msrb.mxu3 %v8751_v16  ;;  %v8761_v22 = vld [vmem:[%s13491_s5 + $0x188] sm:$0xff]  ;;  %v5824_v29 = vsel %vm197_vm2, %v5800_v43, %v5816_v28  ;;  %v5825_v19 = vsel %vm197_vm2, %v5801_v63, %v5817_v55  ;;  %v8765_v41 = vld [vmem:[%s13491_s5 + $0x180] sm:$0xff]  ;;  %v5231_v20 = vadd.f32 %v12858_v60, %v5212_v39  ;;  %v8768_v60 = vld [vmem:[%s13493_s6 + $0x70] sm:$0xff] }
 0x4b9   :  { %5880 = vmatpush.msra.mxu0 %v8752_v8  ;;  %5900 = vmatpush.msra.mxu1 %v8753_v12  ;;  %v8766_v34 = vld [vmem:[%s13493_s6 + $0x60] sm:$0xff]  ;;  %v8767_v16 = vld [vmem:[%s13493_s6 + $0x68] sm:$0xff]  ;;  %v5285_v48 = vadd.f32 %v13073_v49, %v5266_v46  ;;  %v5214_v12 = vadd.f32 %v12950_v11, %v12948_v2  ;;  %v8772_v42 = vld [vmem:[%s13493_s6 + $0x50] sm:$0xff] }
 0x4ba   :  { %5841 = vmatpush.msrb.mxu2 %v8754_v6  ;;  %5861 = vmatpush.msrb.mxu3 %v8755_v21  ;;  %v8770_v8 = vld [vmem:[%s13493_s6 + $0x40] sm:$0xff]  ;;  %v8771_v49 = vld [vmem:[%s13493_s6 + $0x48] sm:$0xff]  ;;  %v5250_v6 = vadd.f32 %v12860_v56, %v5231_v20  ;;  %v5321_v21 = vadd.f32 %v12979_v62, %v5302_v40  ;;  %v8773_v52 = vld [vmem:[%s13493_s6 + $0x58] sm:$0xff] }
 0x4bb   :  { %5881 = vmatpush.msra.mxu0 %v8756_v10  ;;  %5901 = vmatpush.msra.mxu1 %v8757_v25  ;;  %v13211_v44 = vpop.f32.mrf.mxu0  ;;  %v13213_v45 = vpop.f32.mrf.mxu1  ;;  %v8774_v3 = vld [vmem:[%s13493_s6 + $0x20] sm:$0xff]  ;;  %v8775_v56 = vld [vmem:[%s13493_s6 + $0x28] sm:$0xff]  ;;  %v5304_v2 = vadd.f32 %v13037_v50, %v5285_v48  ;;  %v8776_v18 = vld [vmem:[%s13493_s6 + $0x30] sm:$0xff] }
 0x4bc   :  { %5842 = vmatpush.msrb.mxu2 %v8758_v32  ;;  %5862 = vmatpush.msrb.mxu3 %v8759_v1  ;;  %v5269_v11 = vadd.f32 %v13123_v4, %v5250_v6  ;;  %v8777_v10 = vld [vmem:[%s13493_s6 + $0x38] sm:$0xff]  ;;  %v8778_v25 = vld [vmem:[%s13493_s6] sm:$0xff]  ;;  %v8779_v50 = vld [vmem:[%s13493_s6 + $0x8] sm:$0xff]  ;;  %v5233_v4 = vadd.f32 %v12924_v26, %v5214_v12 }
 0x4bd   :  { %5882 = vmatpush.msra.mxu0 %v8760_v38  ;;  %5902 = vmatpush.msra.mxu1 %v8761_v22  ;;  %v8780_v39 = vld [vmem:[%s13493_s6 + $0x10] sm:$0xff]  ;;  %v8781_v57 = vld [vmem:[%s13493_s6 + $0x18] sm:$0xff]  ;;  %v13293_v1 = vld [vmem:[%s13495_s4 + $0x8] sm:$0x77]  ;;  %v5323_v26 = vadd.f32 %v13039_v53, %v5304_v2 }
 0x4be   :  { %5843 = vmatpush.msrb.mxu2 %v8762_v47  ;;  %5863 = vmatpush.msrb.mxu3 %v8763_v61  ;;  %v5288_v32 = vadd.f32 %v13125_v13, %v5269_v11  ;;  %v5252_v46 = vadd.f32 %v12926_v27, %v5233_v4  ;;  %v5638_v61 = vperm.slane %v13293_v1, 0 }
 0x4bf   :  { %5883 = vmatpush.msra.mxu0 %v8764_v59  ;;  %5903 = vmatpush.msra.mxu1 %v8765_v41  ;;  %v5339_v31 = vpop.f32.mrf.mxu2  ;;  %v5358_v17 = vpop.f32.mrf.mxu3 }
 0x4c0   :  { %5844 = vmatmul.f32.vlgmr.msrb.gmra.mxu2 %v5824_v29  ;;  %5864 = vmatmul.f32.vlgmr.msrb.gmra.mxu3 %v5825_v19  ;;  %v5340_v62 = vadd.f32 %v5339_v31, %v5321_v21  ;;  %v5307_v43 = vadd.f32 %v13093_v37, %v5288_v32  ;;  %v5271_v63 = vadd.f32 %v13183_v35, %v5252_v46  ;;  %v5646_v20 = vperm.slane %v5638_v61, 0 }
 0x4c1   :  { %5942 = vmatpush.msra.mxu2 %v8766_v34  ;;  %5962 = vmatpush.msra.mxu3 %v8767_v16 }
 0x4c2   :  { %5982 = vmatpush.msrb.mxu0 %v8768_v60  ;;  %6002 = vmatpush.msrb.mxu1 %v8769_v23  ;;  %v5359_v55 = vadd.f32 %v5358_v17, %v5340_v62  ;;  %v5290_v53 = vadd.f32 %v13185_v30, %v5271_v63  ;;  %v5326_v27 = vadd.f32 %v13095_v58, %v5307_v43 }
 0x4c3   :  { %5943 = vmatpush.msra.mxu2 %v8770_v8  ;;  %5963 = vmatpush.msra.mxu3 %v8771_v49  ;;  %v5379_v14 = vpop.f32.mrf.mxu0  ;;  %v5398_v28 = vpop.f32.mrf.mxu1 }
 0x4c4   :  { %5983 = vmatpush.msrb.mxu0 %v8772_v42  ;;  %6003 = vmatpush.msrb.mxu1 %v8773_v52  ;;  %v5378_v13 = vadd.f32 %v13211_v44, %v5359_v55  ;;  %v5309_v35 = vadd.f32 %v13146_v51, %v5290_v53 }
 0x4c5   :  { %5944 = vmatpush.msra.mxu2 %v8774_v3  ;;  %5964 = vmatpush.msra.mxu3 %v8775_v56 }
 0x4c6   :  { %5984 = vmatpush.msrb.mxu0 %v8776_v18  ;;  %6004 = vmatpush.msrb.mxu1 %v8777_v10  ;;  %v5397_v40 = vadd.f32 %v13213_v45, %v5378_v13  ;;  %v5328_v58 = vadd.f32 %v13148_v7, %v5309_v35 }
 0x4c7   :  { %5945 = vmatpush.msra.mxu2 %v8778_v25  ;;  %5965 = vmatpush.msra.mxu3 %v8779_v50  ;;  %v5341_v38 = vpop.f32.mrf.mxu2  ;;  %v5360_v22 = vpop.f32.mrf.mxu3 }
 0x4c8   :  { %5985 = vmatpush.msrb.mxu0 %v8780_v39  ;;  %6005 = vmatpush.msrb.mxu1 %v8781_v57  ;;  %v5342_v47 = vadd.f32 %v5341_v38, %v5323_v26  ;;  %v13307_v44 = vadd.f32 %v5646_v20, %v5397_v40 }
 0x4ca   :  { %v5361_v29 = vadd.f32 %v5360_v22, %v5342_v47  ;;  %v5722_v45 = vmul.f32 %v13307_v44, %v13307_v44 }
 0x4cb   :  { %v5382_v19 = vpop.f32.mrf.mxu0  ;;  %v5401_v59 = vpop.f32.mrf.mxu1 }
 0x4cc   :  { %v5380_v41 = vadd.f32 %v5379_v14, %v5361_v29 }
 0x4ce   :  { %v5399_v34 = vadd.f32 %v5398_v28, %v5380_v41 }
 0x4cf   :  { %v5344_v16 = vpop.f32.mrf.mxu2  ;;  %v5363_v48 = vpop.f32.mrf.mxu3 }
 0x4d0   :  { %v13304_v60 = vadd.f32 %v5646_v20, %v5399_v34  ;;  %v5345_v37 = vadd.f32 %v5344_v16, %v5326_v27 }
 0x4d2   :  { %v5364_v23 = vadd.f32 %v5363_v48, %v5345_v37  ;;  %v5726_v30 = vmul.f32 %v13304_v60, %v13304_v60  ;;  %v5678_v49 = vadd.f32 %v13304_v60, %v13307_v44 }
 0x4d3   :  { %v5384_v31 = vpop.f32.mrf.mxu0  ;;  %v5403_v17 = vpop.f32.mrf.mxu1 }
 0x4d4   :  { %v5383_v8 = vadd.f32 %v5382_v19, %v5364_v23  ;;  %v5750_v51 = vadd.f32 %v5726_v30, %v5722_v45  ;;  %v5679_v2 = vrot.slane %v5678_v49, 4 }
 0x4d6   :  { %v5402_v42 = vadd.f32 %v5401_v59, %v5383_v8  ;;  %v5751_v11 = vrot.slane %v5750_v51, 4  ;;  %v5680_v18 = vadd.f32 %v5679_v2, %v5678_v49 }
 0x4d7   :  { %v5346_v12 = vpop.f32.mrf.mxu2  ;;  %v5365_v6 = vpop.f32.mrf.mxu3 }
 0x4d8   :  { %v5347_v21 = vadd.f32 %v5346_v12, %v5328_v58  ;;  %v13316_v14 = vadd.f32 %v5646_v20, %v5402_v42  ;;  %v5752_v25 = vadd.f32 %v5751_v11, %v5750_v51  ;;  %v5681_v22 = vrot.slane %v5680_v18, 2 }
 0x4da   :  { %v5366_v52 = vadd.f32 %v5365_v6, %v5347_v21  ;;  %v5730_v39 = vmul.f32 %v13316_v14, %v13316_v14  ;;  %v5753_v61 = vrot.slane %v5752_v25, 2  ;;  %v5682_v59 = vadd.f32 %v5681_v22, %v5680_v18 }
 0x4db   :  { %v5453_v3 = vpop.f32.mrf.mxu0  ;;  %v5472_v56 = vpop.f32.mrf.mxu1 }
 0x4dc   :  { %v5385_v62 = vadd.f32 %v5384_v31, %v5366_v52  ;;  %v5754_v40 = vadd.f32 %v5753_v61, %v5752_v25  ;;  %v5683_v35 = vrot.slane %v5682_v59, 1 }
 0x4de   :  { %v5404_v28 = vadd.f32 %v5403_v17, %v5385_v62  ;;  %v5755_v31 = vrot.slane %v5754_v40, 1  ;;  %v5684_v12 = vadd.f32 %v5683_v35, %v5682_v59 }
 0x4df   :  { %v5415_v10 = vpop.f32.mrf.mxu2  ;;  %v5434_v7 = vpop.f32.mrf.mxu3 }
 0x4e0   :  { %v13318_v50 = vadd.f32 %v5646_v20, %v5404_v28  ;;  %v5435_v4 = vadd.f32 %v5434_v7, %v5415_v10  ;;  %v5756_v6 = vadd.f32 %v5755_v31, %v5754_v40 }
 0x4e2   :  { %v5706_v57 = vadd.f32 %v13318_v50, %v13316_v14  ;;  %v5734_v32 = vmul.f32 %v13318_v50, %v13318_v50  ;;  %v5454_v55 = vadd.f32 %v5453_v3, %v5435_v4 }
 0x4e3   :  { %v5455_v26 = vpop.f32.mrf.mxu0  ;;  %v5474_v38 = vpop.f32.mrf.mxu1 }
 0x4e4   :  { %v5707_v46 = vrot.slane %v5706_v57, 4  ;;  %v5778_v47 = vadd.f32 %v5734_v32, %v5730_v39  ;;  %v5473_v43 = vadd.f32 %v5472_v56, %v5454_v55 }
 0x4e6   :  { %v5708_v63 = vadd.f32 %v5707_v46, %v5706_v57  ;;  %v5779_v13 = vrot.slane %v5778_v47, 4 }
 0x4e7   :  { %v5417_v29 = vpop.f32.mrf.mxu2  ;;  %v5436_v19 = vpop.f32.mrf.mxu3 }
 0x4e8   :  { %v5709_v41 = vrot.slane %v5708_v63, 2  ;;  %v5780_v20 = vadd.f32 %v5779_v13, %v5778_v47  ;;  %v5437_v53 = vadd.f32 %v5436_v19, %v5417_v29 }
 0x4ea   :  { %v5456_v34 = vadd.f32 %v5455_v26, %v5437_v53  ;;  %v5710_v48 = vadd.f32 %v5709_v41, %v5708_v63  ;;  %v5781_v37 = vrot.slane %v5780_v20, 2 }
 0x4eb   :  { %v5458_v27 = vpop.f32.mrf.mxu0  ;;  %v5477_v16 = vpop.f32.mrf.mxu1 }
 0x4ec   :  { %v5711_v23 = vrot.slane %v5710_v48, 1  ;;  %v5782_v17 = vadd.f32 %v5781_v37, %v5780_v20  ;;  %v5475_v30 = vadd.f32 %v5474_v38, %v5456_v34 }
 0x4ee   :  { %v5712_v45 = vadd.f32 %v5711_v23, %v5710_v48  ;;  %v5783_v8 = vrot.slane %v5782_v17, 1 }
 0x4ef   :  { %v5420_v58 = vpop.f32.mrf.mxu2  ;;  %v5439_v49 = vpop.f32.mrf.mxu3 }
 0x4f0   :  { %v5784_v51 = vadd.f32 %v5783_v8, %v5782_v17  ;;  %v5802_v52 = vsel %vm1609_vm4, %v5712_v45, %v5684_v12  ;;  %v5440_v63 = vadd.f32 %v5439_v49, %v5420_v58 }
 0x4f2   :  { %v5818_v3 = vsel %vm1626_vm5, %v5784_v51, %v5756_v6  ;;  %v5459_v19 = vadd.f32 %v5458_v27, %v5440_v63  ;;  %v5639_v51 = vperm.slane %v13293_v1, 4 }
 0x4f3   :  { %v5460_v21 = vpop.f32.mrf.mxu0  ;;  %v5479_v42 = vpop.f32.mrf.mxu1  ;;  %v5826_v56 = vsel %vm197_vm2, %v5802_v52, %v5818_v3 }
 0x4f4   :  { %5884 = vmatmul.f32.vlgmr.msra.gmra.mxu0 %v5826_v56  ;;  %v5478_v37 = vadd.f32 %v5477_v16, %v5459_v19 }
 0x4f7   :  { %v5422_v2 = vpop.f32.mrf.mxu2  ;;  %v5441_v11 = vpop.f32.mrf.mxu3 }
 0x4f8   :  { %v5442_v48 = vadd.f32 %v5441_v11, %v5422_v2 }
 0x4fb   :  { %v5529_v62 = vpop.f32.mrf.mxu0  ;;  %v5548_v28 = vpop.f32.mrf.mxu1 }
 0x4ff   :  { %v5491_v18 = vpop.f32.mrf.mxu2  ;;  %v5510_v10 = vpop.f32.mrf.mxu3 }
 0x500   :  { %v5492_v22 = vadd.f32 %v5491_v18, %v5473_v43  ;;  %v5461_v43 = vadd.f32 %v5460_v21, %v5442_v48 }
 0x502   :  { %v5511_v13 = vadd.f32 %v5510_v10, %v5492_v22  ;;  %v5480_v27 = vadd.f32 %v5479_v42, %v5461_v43 }
 0x503   :  { %v5531_v7 = vpop.f32.mrf.mxu0  ;;  %v5550_v25 = vpop.f32.mrf.mxu1 }
 0x504   :  { %v5530_v59 = vadd.f32 %v5529_v62, %v5511_v13  ;;  %v5647_v62 = vperm.slane %v5639_v51, 0 }
 0x506   :  { %v5549_v35 = vadd.f32 %v5548_v28, %v5530_v59 }
 0x507   :  { %v5493_v4 = vpop.f32.mrf.mxu2  ;;  %v5512_v39 = vpop.f32.mrf.mxu3 }
 0x508   :  { %v5494_v29 = vadd.f32 %v5493_v4, %v5475_v30 }
 0x50a   :  { %v5513_v20 = vadd.f32 %v5512_v39, %v5494_v29 }
 0x50b   :  { %v5534_v57 = vpop.f32.mrf.mxu0  ;;  %v5553_v32 = vpop.f32.mrf.mxu1 }
 0x50c   :  { %v5532_v23 = vadd.f32 %v5531_v7, %v5513_v20 }
 0x50e   :  { %v5551_v58 = vadd.f32 %v5550_v25, %v5532_v23 }
 0x50f   :  { %v5496_v55 = vpop.f32.mrf.mxu2  ;;  %v5515_v26 = vpop.f32.mrf.mxu3 }
 0x510   :  { %v5497_v31 = vadd.f32 %v5496_v55, %v5478_v37 }
 0x512   :  { %v5516_v45 = vadd.f32 %v5515_v26, %v5497_v31 }
 0x513   :  { %v5536_v38 = vpop.f32.mrf.mxu0  ;;  %v5555_v46 = vpop.f32.mrf.mxu1 }
 0x514   :  { %v5535_v3 = vadd.f32 %v5534_v57, %v5516_v45 }
 0x516   :  { %v5554_v10 = vadd.f32 %v5553_v32, %v5535_v3 }
 0x517   :  { %v5498_v47 = vpop.f32.mrf.mxu2  ;;  %v5517_v61 = vpop.f32.mrf.mxu3 }
 0x518   :  { %v5499_v56 = vadd.f32 %v5498_v47, %v5480_v27 }
 0x51a   :  { %v5518_v28 = vadd.f32 %v5517_v61, %v5499_v56 }
 0x51b   :  { %v5605_v41 = vpop.f32.mrf.mxu0  ;;  %v5624_v53 = vpop.f32.mrf.mxu1 }
 0x51c   :  { %v5537_v55 = vadd.f32 %v5536_v38, %v5518_v28 }
 0x51e   :  { %v5556_v13 = vadd.f32 %v5555_v46, %v5537_v55 }
 0x51f   :  { %v5567_v40 = vpop.f32.mrf.mxu2  ;;  %v5586_v34 = vpop.f32.mrf.mxu3 }
 0x520   :  { %v5568_v17 = vadd.f32 %v5567_v40, %v5549_v35 }
 0x522   :  { %v5587_v8 = vadd.f32 %v5586_v34, %v5568_v17 }
 0x523   :  { %v5607_v12 = vpop.f32.mrf.mxu0  ;;  %v5626_v52 = vpop.f32.mrf.mxu1 }
 0x524   :  { %v5606_v2 = vadd.f32 %v5605_v41, %v5587_v8 }
 0x526   :  { %v5625_v18 = vadd.f32 %v5624_v53, %v5606_v2 }
 0x527   :  { %v5569_v49 = vpop.f32.mrf.mxu2  ;;  %v5588_v30 = vpop.f32.mrf.mxu3 }
 0x528   :  { %v5570_v6 = vadd.f32 %v5569_v49, %v5551_v58  ;;  %v13332_v26 = vadd.f32 %v5647_v62, %v5625_v18 }
 0x52a   :  { %v5589_v16 = vadd.f32 %v5588_v30, %v5570_v6  ;;  %v5723_v61 = vmul.f32 %v13332_v26, %v13332_v26 }
 0x52c   :  { %v5608_v11 = vadd.f32 %v5607_v12, %v5589_v16 }
 0x52e   :  { %v5627_v21 = vadd.f32 %v5626_v52, %v5608_v11  ;;  %v5610_v42 = vpop.f32.mrf.mxu0  ;;  %v5629_v57 = vpop.f32.mrf.mxu1 }
 0x530   :  { %v13330_v25 = vadd.f32 %v5647_v62, %v5627_v21 }
 0x532   :  { %v5727_v47 = vmul.f32 %v13330_v25, %v13330_v25  ;;  %v5685_v29 = vadd.f32 %v13330_v25, %v13332_v26 }
 0x533   :  { %v5572_v7 = vpop.f32.mrf.mxu2  ;;  %v5591_v4 = vpop.f32.mrf.mxu3 }
 0x534   :  { %v5573_v39 = vadd.f32 %v5572_v7, %v5554_v10  ;;  %v5757_v19 = vadd.f32 %v5727_v47, %v5723_v61  ;;  %v5686_v40 = vrot.slane %v5685_v29, 4 }
 0x536   :  { %v5592_v22 = vadd.f32 %v5591_v4, %v5573_v39  ;;  %v5612_v53 = vpop.f32.mrf.mxu0  ;;  %v5758_v34 = vrot.slane %v5757_v19, 4  ;;  %v5631_v37 = vpop.f32.mrf.mxu1  ;;  %v5687_v31 = vadd.f32 %v5686_v40, %v5685_v29 }
 0x538   :  { %v5611_v63 = vadd.f32 %v5610_v42, %v5592_v22  ;;  %v5759_v17 = vadd.f32 %v5758_v34, %v5757_v19  ;;  %v5688_v12 = vrot.slane %v5687_v31, 2 }
 0x53a   :  { %v5630_v38 = vadd.f32 %v5629_v57, %v5611_v63  ;;  %v5760_v30 = vrot.slane %v5759_v17, 2  ;;  %v5689_v3 = vadd.f32 %v5688_v12, %v5687_v31 }
 0x53b   :  { %v5574_v32 = vpop.f32.mrf.mxu2  ;;  %v5593_v41 = vpop.f32.mrf.mxu3 }
 0x53c   :  { %v5575_v59 = vadd.f32 %v5574_v32, %v5556_v13  ;;  %v13340_v35 = vadd.f32 %v5647_v62, %v5630_v38  ;;  %v5761_v56 = vadd.f32 %v5760_v30, %v5759_v17  ;;  %v5690_v11 = vrot.slane %v5689_v3, 1 }
 0x53e   :  { %v5594_v20 = vadd.f32 %v5593_v41, %v5575_v59  ;;  %v5731_v43 = vmul.f32 %v13340_v35, %v13340_v35  ;;  %v5762_v28 = vrot.slane %v5761_v56, 1  ;;  %v5691_v7 = vadd.f32 %v5690_v11, %v5689_v3 }
 0x540   :  { %v5613_v48 = vadd.f32 %v5612_v53, %v5594_v20  ;;  %v5763_v4 = vadd.f32 %v5762_v28, %v5761_v56  ;;  %v6098_v28 = vperm.slane %v13293_v1, 1 }
 0x542   :  { %v5632_v23 = vadd.f32 %v5631_v37, %v5613_v48 }
 0x543   :  { %v5845_v57 = vpop.f32.mrf.mxu2  ;;  %v5865_v47 = vpop.f32.mrf.mxu3 }
 0x544   :  { %v13342_v46 = vadd.f32 %v5647_v62, %v5632_v23  ;;  %v5866_v63 = vadd.f32 %v5865_v47, %v5845_v57 }
 0x546   :  { %v5713_v45 = vadd.f32 %v13342_v46, %v13340_v35  ;;  %v5735_v8 = vmul.f32 %v13342_v46, %v13342_v46 }
 0x548   :  { %v5714_v58 = vrot.slane %v5713_v45, 4  ;;  %v5785_v49 = vadd.f32 %v5735_v8, %v5731_v43 }
 0x54a   :  { %v5715_v27 = vadd.f32 %v5714_v58, %v5713_v45  ;;  %v5786_v6 = vrot.slane %v5785_v49, 4 }
 0x54c   :  { %v5716_v51 = vrot.slane %v5715_v27, 2  ;;  %v5787_v52 = vadd.f32 %v5786_v6, %v5785_v49 }
 0x54e   :  { %v5717_v2 = vadd.f32 %v5716_v51, %v5715_v27  ;;  %v5788_v16 = vrot.slane %v5787_v52, 2 }
 0x550   :  { %v5718_v62 = vrot.slane %v5717_v2, 1  ;;  %v5789_v18 = vadd.f32 %v5788_v16, %v5787_v52  ;;  %v8782_v16 = vld [vmem:[%s13495_s4] sm:$0x77] }
 0x551   :  { %v6096_v11 = vperm.slane %v8782_v16, 1 }
 0x552   :  { %v5719_v21 = vadd.f32 %v5718_v62, %v5717_v2  ;;  %v5790_v10 = vrot.slane %v5789_v18, 1  ;;  %v6097_v62 = vperm.slane %v8782_v16, 5 }
 0x554   :  { %v5791_v39 = vadd.f32 %v5790_v10, %v5789_v18  ;;  %v5803_v42 = vsel %vm1609_vm4, %v5719_v21, %v5691_v7  ;;  %v6099_v18 = vperm.slane %v13293_v1, 5  ;;  %v6124_v10 = vperm.slane %v8782_v16, 2 }
 0x555   :  { %v6125_v7 = vperm.slane %v8782_v16, 6  ;;  %v13374_v57 = vperm.slane %v6097_v62, 1 }
 0x556   :  { %v5819_v55 = vsel %vm1626_vm5, %v5791_v39, %v5763_v4  ;;  %v6126_v4 = vperm.slane %v13293_v1, 2 }
 0x557   :  { %v5827_v22 = vsel %vm197_vm2, %v5803_v42, %v5819_v55 }
 0x558   :  { %5904 = vmatmul.f32.vlgmr.msra.gmra.mxu1 %v5827_v22  ;;  %v13372_v22 = vperm.slane %v6096_v11, 1 }
 0x571   :  { %v5885_v61 = vpop.f32.mrf.mxu0 }
 0x572   :  { %v5886_v13 = vadd.f32 %v5885_v61, %v5866_v63  ;;  %v13376_v63 = vperm.slane %v6098_v28, 1 }
 0x5d5   :  { %v5905_v32 = vpop.f32.mrf.mxu1 }
 0x5d6   :  { %v5906_v29 = vadd.f32 %v5905_v32, %v5886_v13  ;;  %v13378_v13 = vperm.slane %v6099_v18, 1  ;;  %v6127_v32 = vperm.slane %v13293_v1, 6 }
 0x5d8   :  { %v5908_v19 = vmul.f32 0.00390625, %v5906_v29 }
 0x5da   :  { %v5909_v59 = vmul.f32 %v5908_v19, %v5908_v19 }
 0x5dc   :  { %v5911_v41 = vrot.slane %v5909_v59, 6  ;;  %v13384_v59 = vperm.slane %v6125_v7, 2 }
 0x5de   :  { %v5913_v38 = vsub.f32 %v5908_v19, %v5911_v41  ;;  %v13386_v41 = vperm.slane %v6126_v4, 2 }
 0x5e0   :  { %v5914_v20 = vmax.f32 %v5913_v38, 0.0 }
 0x5e2   :  { %v5915_v53 = vadd.f32 1e-05, %v5914_v20 }
 0x5e4   :  { %8700 = vrsqrt.f32 %v5915_v53  ;;  %vm5922_vm13 = vweird.f32 %v5915_v53 }
 0x5ea   :  { %v8701_v40 = vpop.eup %8700 }
 0x5eb   :  { %v5917_v34 = vmul.f32 %v8701_v40, %v5915_v53  ;;  %vm5923_vm6 = vweird.f32 %v8701_v40 }
 0x5ec   :  { %vm5924_vm14 = vmor %vm5922_vm13, %vm5923_vm6 }
 0x5ed   :  { %v5918_v48 = vmul.f32 %v8701_v40, %v5917_v34 }
 0x5ef   :  { %v5919_v37 = vmul.f32 0.5, %v5918_v48 }
 0x5f1   :  { %v5920_v23 = vsub.f32 1.5, %v5919_v37 }
 0x5f3   :  { %v5921_v31 = vmul.f32 %v8701_v40, %v5920_v23 }
 0x5f5   :  { %v5925_v17 = vsel %vm5924_vm14, %v8701_v40, %v5921_v31 }
 0x5f6   :  { %v5926_v43 = vsel %vm197_vm2, %v5908_v19, %v5925_v17  ;;  %v13382_v19 = vperm.slane %v6124_v10, 2 }
 0x5f7   :  { %8184 = vmatmul.msk.f32.vlgmr.msra.gmra.mxu2 %vm1738_vm10, %v5926_v43  ;;  %8185 = vmatmul.msk.f32.vlgmr.msra.gmra.mxu3 %vm1738_vm10, %v5926_v43 }
 0x5f8   :  { %8186 = vmatmul.msk.f32.vlgmr.msrb.gmra.mxu0 %vm1738_vm10, %v5926_v43  ;;  %8187 = vmatmul.msk.f32.vlgmr.msrb.gmra.mxu1 %vm1738_vm10, %v5926_v43 }
 0x675   :  { %v5987_v45 = vpop.f32.mrf.mxu0  ;;  %v6007_v8 = vpop.f32.mrf.mxu1 }
 0x676   :  { %6026 = vst [vmem:[#allocation1 + $0x12] sm:$0xff] %v5987_v45  ;;  %v6015_v12 = vrot.slane %v5987_v45, 6  ;;  %v6016_v58 = vrot.slane %v6007_v8, 5  ;;  %v13395_v45 = vperm.slane %v6127_v32, 2 }
 0x677   :  { %6027 = vst [vmem:[#allocation1 + $0x1b] sm:$0xff] %v6007_v8 }
 0x678   :  { %v6018_v6 = vsel %vm1830_vm11, %v6015_v12, %v6016_v58  ;;  %v6021_v51 = vsel %vm1626_vm5, %v6015_v12, %v6016_v58 }
 0x67a   :  { %v5947_v49 = vpop.f32.mrf.mxu2  ;;  %v5967_v30 = vpop.f32.mrf.mxu3 }
 0x67b   :  { %6024 = vst [vmem:[#allocation1] sm:$0xff] %v5947_v49  ;;  %v6014_v27 = vrot.slane %v5967_v30, 7 }
 0x67c   :  { %6025 = vst [vmem:[#allocation1 + $0x9] sm:$0xff] %v5967_v30 }
 0x67d   :  { %v6017_v52 = vsel %vm183_vm0, %v5947_v49, %v6014_v27  ;;  %v6020_v3 = vsel %vm1609_vm4, %v5947_v49, %v6014_v27 }
 0x67e   :  { %v6019_v56 = vsel %vm197_vm2, %v6017_v52, %v6018_v6  ;;  %v6022_v2 = vsel %vm1835_vm12, %v6020_v3, %v6021_v51 }
 0x67f   :  { %v13369_v21 = vrot.slane %v6022_v2, 1  ;;  %v6032_v39 = vperm.slane %v6019_v56, 0  ;;  %v6033_v42 = vperm.slane %v6019_v56, 1  ;;  %v6034_v55 = vperm.slane %v6019_v56, 2 }
 0x680   :  { %v6035_v61 = vperm.slane %v6019_v56, 3 }
 0x681   :  { %v6036_v29 = vperm.slane %v13369_v21, 0  ;;  %v6037_v38 = vperm.slane %v13369_v21, 1  ;;  %v6048_v20 = vsub.f32 %v12944_v36, %v6032_v39  ;;  %v6049_v53 = vsub.f32 %v12953_v24, %v6033_v42 }
 0x682   :  { %v6050_v40 = vsub.f32 %v13307_v44, %v6034_v55  ;;  %v6038_v31 = vperm.slane %v13369_v21, 2  ;;  %v6039_v17 = vperm.slane %v13369_v21, 3  ;;  %v6051_v43 = vsub.f32 %v13332_v26, %v6035_v61 }
 0x683   :  { %v6029_v47 = vld [vmem:[#allocation1 + $0x2] ss:$9 sm:$0xff]  ;;  %v6052_v8 = vsub.f32 %v12934_v33, %v6032_v39  ;;  %v6053_v44 = vsub.f32 %v12939_v54, %v6033_v42  ;;  %v6054_v58 = vsub.f32 %v13304_v60, %v6034_v55  ;;  %v6055_v49 = vsub.f32 %v13330_v25, %v6035_v61 }
 0x684   :  { %v6064_v34 = vperm.slane %v6029_v47, 0  ;;  %v6065_v48 = vperm.slane %v6029_v47, 1  ;;  %v6066_v37 = vperm.slane %v6029_v47, 2  ;;  %v6067_v1 = vperm.slane %v6029_v47, 3  ;;  %v6031_v23 = vld [vmem:[#allocation1 + $0x3] ss:$9 sm:$0xff] }
 0x685   :  { %v6056_v27 = vsub.f32 %v12937_v5, %v6036_v29  ;;  %v6057_v6 = vsub.f32 %v12941_v9, %v6037_v38  ;;  %v6068_v51 = vperm.slane %v6031_v23, 0  ;;  %v6058_v52 = vsub.f32 %v13316_v14, %v6038_v31 }
 0x686   :  { %v6080_v36 = vmul.f32 %v6064_v34, %v6048_v20  ;;  %v6081_v12 = vmul.f32 %v6065_v48, %v6049_v53  ;;  %v6082_v24 = vmul.f32 %v6066_v37, %v6050_v40  ;;  %v6083_v30 = vmul.f32 %v6067_v1, %v6051_v43 }
 0x687   :  { %v6084_v26 = vmul.f32 %v6064_v34, %v6052_v8  ;;  %v6069_v3 = vperm.slane %v6031_v23, 1  ;;  %v6070_v33 = vperm.slane %v6031_v23, 2  ;;  %v6085_v56 = vmul.f32 %v6065_v48, %v6053_v44 }
 0x688   :  { %v6086_v2 = vmul.f32 %v6066_v37, %v6054_v58  ;;  %v6108_v16 = vmul.f32 %v13372_v22, %v6080_v36  ;;  %v6109_v54 = vmul.f32 %v13374_v57, %v6081_v12  ;;  %v6110_v60 = vmul.f32 %v13376_v63, %v6082_v24 }
 0x689   :  { %v6059_v25 = vsub.f32 %v13340_v35, %v6039_v17  ;;  %v6071_v11 = vperm.slane %v6031_v23, 3  ;;  %v6087_v5 = vmul.f32 %v6067_v1, %v6055_v49  ;;  %v6111_v9 = vmul.f32 %v13378_v13, %v6083_v30 }
 0x68a   :  { %v6060_v62 = vsub.f32 %v12929_v15, %v6036_v29  ;;  %v6061_v14 = vsub.f32 %v12931_v0, %v6037_v38  ;;  %v6088_v28 = vmul.f32 %v6068_v51, %v6056_v27  ;;  %v6112_v18 = vmul.f32 %v13372_v22, %v6084_v26 }
 0x68b   :  { %v6062_v21 = vsub.f32 %v13318_v50, %v6038_v31  ;;  %v6089_v10 = vmul.f32 %v6069_v3, %v6057_v6  ;;  %v6090_v7 = vmul.f32 %v6070_v33, %v6058_v52  ;;  %v6113_v4 = vmul.f32 %v13374_v57, %v6085_v56 }
 0x68c   :  { %v6114_v39 = vmul.f32 %v13376_v63, %v6086_v2  ;;  %v6136_v35 = vadd.f32 %v13382_v19, %v6108_v16  ;;  %v6137_v42 = vadd.f32 %v13384_v59, %v6109_v54  ;;  %v6138_v55 = vadd.f32 %v13386_v41, %v6110_v60 }
 0x68d   :  { %v6063_v15 = vsub.f32 %v13342_v46, %v6039_v17  ;;  %v6091_v0 = vmul.f32 %v6071_v11, %v6059_v25  ;;  %v6115_v47 = vmul.f32 %v13378_v13, %v6087_v5  ;;  %v6139_v61 = vadd.f32 %v13395_v45, %v6111_v9 }
 0x68e   :  { %v6092_v50 = vmul.f32 %v6068_v51, %v6060_v62  ;;  %v6093_v32 = vmul.f32 %v6069_v3, %v6061_v14  ;;  %v6116_v29 = vmul.f32 %v13372_v22, %v6088_v28  ;;  %v6140_v38 = vadd.f32 %v13382_v19, %v6112_v18 }
 0x68f   :  { %v6094_v20 = vmul.f32 %v6070_v33, %v6062_v21  ;;  %v6117_v53 = vmul.f32 %v13374_v57, %v6089_v10  ;;  %v6118_v40 = vmul.f32 %v13376_v63, %v6090_v7  ;;  %v6141_v34 = vadd.f32 %v13384_v59, %v6113_v4 }
 0x690   :  { %v6142_v46 = vadd.f32 %v13386_v41, %v6114_v39  ;;  %v6152_v48 = vmax.f32 %v6136_v35, 0.0  ;;  %v6153_v37 = vmax.f32 %v6137_v42, 0.0  ;;  %v6154_v1 = vmax.f32 %v6138_v55, 0.0 }
 0x691   :  { %v6095_v23 = vmul.f32 %v6071_v11, %v6063_v15  ;;  %v6119_v31 = vmul.f32 %v13378_v13, %v6091_v0  ;;  %v6143_v17 = vadd.f32 %v13395_v45, %v6115_v47  ;;  %v6155_v43 = vmax.f32 %v6139_v61, 0.0 }
 0x692   :  { %v6120_v8 = vmul.f32 %v13372_v22, %v6092_v50  ;;  %v6144_v36 = vadd.f32 %v13382_v19, %v6116_v29  ;;  %v6156_v12 = vmax.f32 %v6140_v38, 0.0  ;;  %6168 = vst [vmem:[%s13496_s7] sm:$0xff] %v6152_v48  ;;  %v6121_v24 = vmul.f32 %v13374_v57, %v6093_v32 }
 0x693   :  { %v6145_v44 = vadd.f32 %v13384_v59, %v6117_v53  ;;  %v6157_v58 = vmax.f32 %v6141_v34, 0.0  ;;  %6169 = vst [vmem:[%s13496_s7 + $0x8] sm:$0xff] %v6153_v37  ;;  %v6122_v49 = vmul.f32 %v13376_v63, %v6094_v20  ;;  %v6146_v22 = vadd.f32 %v13386_v41, %v6118_v40 }
 0x694   :  { %v6158_v30 = vmax.f32 %v6142_v46, 0.0  ;;  %6170 = vst [vmem:[%s13496_s7 + $0x10] sm:$0xff] %v6154_v1  ;;  %v6123_v27 = vmul.f32 %v13378_v13, %v6095_v23  ;;  %v6147_v57 = vadd.f32 %v13395_v45, %v6119_v31  ;;  %v6159_v6 = vmax.f32 %v6143_v17, 0.0 }
 0x695   :  { %6171 = vst [vmem:[%s13496_s7 + $0x18] sm:$0xff] %v6155_v43  ;;  %v6148_v51 = vadd.f32 %v13382_v19, %v6120_v8  ;;  %v6160_v26 = vmax.f32 %v6144_v36, 0.0  ;;  %v6149_v63 = vadd.f32 %v13384_v59, %v6121_v24  ;;  %v6161_v52 = vmax.f32 %v6145_v44, 0.0 }
 0x696   :  { %6172 = vst [vmem:[%s13496_s7 + $0x20] sm:$0xff] %v6156_v12  ;;  %v6150_v13 = vadd.f32 %v13386_v41, %v6122_v49  ;;  %v6162_v3 = vmax.f32 %v6146_v22, 0.0  ;;  %v6151_v19 = vadd.f32 %v13395_v45, %v6123_v27  ;;  %v6163_v33 = vmax.f32 %v6147_v57, 0.0 }
 0x697   :  { %6173 = vst [vmem:[%s13496_s7 + $0x28] sm:$0xff] %v6157_v58  ;;  %v6164_v59 = vmax.f32 %v6148_v51, 0.0  ;;  %v6165_v56 = vmax.f32 %v6149_v63, 0.0 }
 0x698   :  { %6174 = vst [vmem:[%s13496_s7 + $0x30] sm:$0xff] %v6158_v30  ;;  %v6166_v41 = vmax.f32 %v6150_v13, 0.0  ;;  %v6167_v45 = vmax.f32 %v6151_v19, 0.0 }
 0x699   :  { %6175 = vst [vmem:[%s13496_s7 + $0x38] sm:$0xff] %v6159_v6 }
 0x69a   :  { %6176 = vst [vmem:[%s13496_s7 + $0x40] sm:$0xff] %v6160_v26 }
 0x69b   :  { %6177 = vst [vmem:[%s13496_s7 + $0x48] sm:$0xff] %v6161_v52 }
 0x69c   :  { %6178 = vst [vmem:[%s13496_s7 + $0x50] sm:$0xff] %v6162_v3 }
 0x69d   :  { %6179 = vst [vmem:[%s13496_s7 + $0x58] sm:$0xff] %v6163_v33 }
 0x69e   :  { %6180 = vst [vmem:[%s13496_s7 + $0x60] sm:$0xff] %v6164_v59 }
 0x69f   :  { %6181 = vst [vmem:[%s13496_s7 + $0x68] sm:$0xff] %v6165_v56 }
 0x6a0   :  { %6182 = vst [vmem:[%s13496_s7 + $0x70] sm:$0xff] %v6166_v41 }
 0x6a1   :  { %6183 = vst [vmem:[%s13496_s7 + $0x78] sm:$0xff] %v6167_v45 }

</bundles_post_ra>
